<compile_context>
chip_gen: v5e
topology: v5e:2x2
jax: 0.10.0
libtpu: 0.0.40
codegen_flags: <defaults>
</compile_context>

<pallas_src>
import jax
import jax.numpy as jnp
from jax.experimental import pallas as pl
from jax.experimental.pallas import tpu as pltpu


_LN_EPS = 1e-5
_SQRT_2_OVER_PI = 0.7978845608028654


def _gelu_tanh(v):
    # TODO(synk): torch nn.GELU() defaults to the exact erf formulation; the
    # tanh approximation (max abs deviation ~1e-3) is used because erf lowering
    # is not guaranteed in Mosaic.
    return 0.5 * v * (1.0 + jnp.tanh(_SQRT_2_OVER_PI * (v + 0.044715 * v * v * v)))


def _layer_norm(v, gamma, beta):
    mu = jnp.mean(v, axis=-1, keepdims=True)
    c = v - mu
    var = jnp.mean(c * c, axis=-1, keepdims=True)
    return c * jax.lax.rsqrt(var + _LN_EPS) * gamma + beta


def _fusion_kernel(x_ref, w_a1_ref, b_a1_ref, w_a2_ref,
                   w_f1_ref, b_f1_ref, w_f2_ref, vecs_ref,
                   out_ref, yh_ref):
    x = x_ref[...]                       # (T, D) f32
    vecs = vecs_ref[...]                 # (6, D) f32 packed row vectors
    g_pre, b_pre = vecs[0:1, :], vecs[1:2, :]
    g_post, b_post = vecs[2:3, :], vecs[3:4, :]
    b_a2, b_f2 = vecs[4:5, :], vecs[5:6, :]

    # --- intra_norm_pre ---
    xn = _layer_norm(x, g_pre, b_pre)

    # --- attn_mlp: Linear -> GELU -> Linear, then softmax gate ---
    a1 = jnp.dot(xn.astype(jnp.bfloat16), w_a1_ref[...],
                 preferred_element_type=jnp.float32) + b_a1_ref[...]
    a1 = _gelu_tanh(a1)
    logits = jnp.dot(a1.astype(jnp.bfloat16), w_a2_ref[...],
                     preferred_element_type=jnp.float32) + b_a2
    m = jnp.max(logits, axis=-1, keepdims=True)
    e = jnp.exp(logits - m)
    y_h = e / jnp.sum(e, axis=-1, keepdims=True)

    # --- gated residual + input skip ---
    y = y_h * xn + xn
    skip_y = y + x

    # --- intra_norm_post ---
    on = _layer_norm(skip_y, g_post, b_post)

    # --- fusion_mlp: Linear -> GELU -> Linear ---
    f1 = jnp.dot(on.astype(jnp.bfloat16), w_f1_ref[...],
                 preferred_element_type=jnp.float32) + b_f1_ref[...]
    f1 = _gelu_tanh(f1)
    out_h = jnp.dot(f1.astype(jnp.bfloat16), w_f2_ref[...],
                    preferred_element_type=jnp.float32) + b_f2

    out_ref[...] = (out_h * on + on + skip_y).astype(out_ref.dtype)
    yh_ref[...] = y_h.astype(yh_ref.dtype)


def feat_weighted_fusion(feature_tuple, params, *, batch_tile=256):
    """feature_tuple: list of (B, d_i) f32 arrays.
       params: dict with weights stored (in_features, out_features):
         w_a1 (D, D//2), b_a1 (D//2,), w_a2 (D//2, D), b_a2 (D,),
         w_f1 (D, 512),  b_f1 (512,),  w_f2 (512, D),  b_f2 (D,),
         gamma_pre/beta_pre/gamma_post/beta_post (D,)
       Returns (out, y_h), matching the torch module."""
    x = jnp.concatenate(feature_tuple, axis=-1).astype(jnp.float32)
    B, D = x.shape
    Dh = params["w_a1"].shape[1]
    Hf = params["w_f1"].shape[1]

    tile = min(batch_tile, B)
    assert B % tile == 0, "batch must be divisible by batch_tile"
    assert tile == B or tile % 8 == 0, "tile must respect the (8,128) sublane rule"

    # bf16 weights: MXU-native everywhere, halves weight DMA bytes; biases and
    # LayerNorm params stay f32 (applied after the f32 accumulation, on the VPU).
    w_a1 = params["w_a1"].astype(jnp.bfloat16)
    w_a2 = params["w_a2"].astype(jnp.bfloat16)
    w_f1 = params["w_f1"].astype(jnp.bfloat16)
    w_f2 = params["w_f2"].astype(jnp.bfloat16)
    b_a1 = params["b_a1"].reshape(1, Dh).astype(jnp.float32)
    b_f1 = params["b_f1"].reshape(1, Hf).astype(jnp.float32)
    # Pack all D-wide vectors (LN params + the two D-wide biases) into one
    # (6, D) operand: one DMA / VMEM slab instead of six tiny padded ones.
    vecs = jnp.stack([params["gamma_pre"], params["beta_pre"],
                      params["gamma_post"], params["beta_post"],
                      params["b_a2"], params["b_f2"]], axis=0).astype(jnp.float32)

    def const(shape):
        return pl.BlockSpec(shape, lambda i: (0, 0))
    # NOTE: constant-index weight blocks could be single-buffered via
    # pipeline_mode=pl.Buffered(1); skipped because total live VMEM here is
    # ~1.5 MiB, far below even v7x's 64 MiB.

    in_specs = [
        pl.BlockSpec((tile, D), lambda i: (i, 0)),     # x
        const((D, Dh)), const((1, Dh)), const((Dh, D)),
        const((D, Hf)), const((1, Hf)), const((Hf, D)),
        const((6, D)),
    ]
    out_specs = (pl.BlockSpec((tile, D), lambda i: (i, 0)),
                 pl.BlockSpec((tile, D), lambda i: (i, 0)))
    out_shape = (jax.ShapeDtypeStruct((B, D), jnp.float32),   # out
                 jax.ShapeDtypeStruct((B, D), jnp.float32))   # y_h

    weight_bytes = sum(int(a.size) * a.dtype.itemsize
                       for a in (w_a1, w_a2, w_f1, w_f2, b_a1, b_f1, vecs))
    cost = pl.CostEstimate(
        flops=int(2 * B * (D * Dh + Dh * D + D * Hf + Hf * D)),
        transcendentals=int(B * (Dh + Hf + D)),
        bytes_accessed=int(x.size) * 4 + 2 * B * D * 4 + weight_bytes,
    )

    out, y_h = pl.pallas_call(
        _fusion_kernel,
        out_shape=out_shape,
        grid=(B // tile,),
        in_specs=in_specs,
        out_specs=out_specs,
        compiler_params=pltpu.CompilerParams(
            dimension_semantics=("parallel",)),
        cost_estimate=cost,
    )(x, w_a1, b_a1, w_a2, w_f1, b_f1, w_f2, vecs)
    return out, y_h


def _init_params(key, input_dims, fusion_hidden=512):
    D = sum(input_dims)
    Dh = D // 2
    ks = jax.random.split(key, 12)

    def w(k, fi, fo):
        b = float(fi) ** -0.5
        return jax.random.uniform(k, (fi, fo), jnp.float32, -b, b)

    def bias(k, fi, fo):
        b = float(fi) ** -0.5
        return jax.random.uniform(k, (fo,), jnp.float32, -b, b)

    return {
        "w_a1": w(ks[0], D, Dh), "b_a1": bias(ks[1], D, Dh),
        "w_a2": w(ks[2], Dh, D), "b_a2": bias(ks[3], Dh, D),
        "w_f1": w(ks[4], D, fusion_hidden), "b_f1": bias(ks[5], D, fusion_hidden),
        "w_f2": w(ks[6], fusion_hidden, D), "b_f2": bias(ks[7], fusion_hidden, D),
        "gamma_pre": 1.0 + 0.05 * jax.random.normal(ks[8], (D,), jnp.float32),
        "beta_pre": 0.05 * jax.random.normal(ks[9], (D,), jnp.float32),
        "gamma_post": 1.0 + 0.05 * jax.random.normal(ks[10], (D,), jnp.float32),
        "beta_post": 0.05 * jax.random.normal(ks[11], (D,), jnp.float32),
    }


def _reference(feature_tuple, params):
    x = jnp.concatenate(feature_tuple, axis=-1).astype(jnp.float32)
    xn = _layer_norm(x, params["gamma_pre"][None, :], params["beta_pre"][None, :])
    a1 = _gelu_tanh(xn @ params["w_a1"] + params["b_a1"])
    y_h = jax.nn.softmax(a1 @ params["w_a2"] + params["b_a2"], axis=-1)
    y = y_h * xn + xn
    skip_y = y + x
    on = _layer_norm(skip_y, params["gamma_post"][None, :], params["beta_post"][None, :])
    f1 = _gelu_tanh(on @ params["w_f1"] + params["b_f1"])
    out_h = f1 @ params["w_f2"] + params["b_f2"]
    return out_h * on + on + skip_y, y_h


if __name__ == "__main__":
    key = jax.random.PRNGKey(0)
    k_p, k_x0, k_x1 = jax.random.split(key, 3)

    input_dims = (48, 80)   # two modalities; sum -> D = 128 (lane-dense)
    batch = 512             # 2 parallel grid steps of 256 rows

    params = _init_params(k_p, input_dims)
    x0 = jax.random.normal(k_x0, (batch, input_dims[0]), jnp.float32)
    x1 = jax.random.normal(k_x1, (batch, input_dims[1]), jnp.float32)
    feats = [x0, x1]

    out, y_h = feat_weighted_fusion(feats, params, batch_tile=256)
    out, y_h = jax.block_until_ready((out, y_h))

    ref_out, ref_yh = _reference(feats, params)
    D = sum(input_dims)
    assert out.shape == (batch, D) and y_h.shape == (batch, D)
    # bf16 matmul operands (f32 accumulation) -> ~1e-2 deviation vs f32 reference.
    assert jnp.allclose(y_h, ref_yh, atol=2e-3, rtol=2e-2), "y_h mismatch vs JAX reference"
    assert jnp.allclose(out, ref_out, atol=3e-2, rtol=3e-2), "out mismatch vs JAX reference"

    print("KERNEL_OK")
</pallas_src>

<mosaic_0001>
module attributes {stable_mosaic.version = 11 : i64} {
  func.func @_fusion_kernel(%arg0: i32, %arg1: memref<256x128xf32, #tpu.memory_space<vmem>>, %arg2: memref<128x64xbf16, #tpu.memory_space<vmem>>, %arg3: memref<1x64xf32, #tpu.memory_space<vmem>>, %arg4: memref<64x128xbf16, #tpu.memory_space<vmem>>, %arg5: memref<128x512xbf16, #tpu.memory_space<vmem>>, %arg6: memref<1x512xf32, #tpu.memory_space<vmem>>, %arg7: memref<512x128xbf16, #tpu.memory_space<vmem>>, %arg8: memref<6x128xf32, #tpu.memory_space<vmem>>, %arg9: memref<256x128xf32, #tpu.memory_space<vmem>>, %arg10: memref<256x128xf32, #tpu.memory_space<vmem>>) attributes {dimension_semantics = [#tpu.dimension_semantics<parallel>], iteration_bounds = array<i64: 2>, scalar_prefetch = 0 : i64, scratch_operands = 0 : i64, tpu.core_type = #tpu.core_type<tc>, window_params = [{transform_indices = @transform_0, window_bounds = array<i64: 256, 128>}, {pipeline_mode = #tpu.pipeline_mode<synchronous>, transform_indices = @transform_1, window_bounds = array<i64: 128, 64>}, {pipeline_mode = #tpu.pipeline_mode<synchronous>, transform_indices = @transform_2, window_bounds = array<i64: 1, 64>}, {pipeline_mode = #tpu.pipeline_mode<synchronous>, transform_indices = @transform_3, window_bounds = array<i64: 64, 128>}, {pipeline_mode = #tpu.pipeline_mode<synchronous>, transform_indices = @transform_4, window_bounds = array<i64: 128, 512>}, {pipeline_mode = #tpu.pipeline_mode<synchronous>, transform_indices = @transform_5, window_bounds = array<i64: 1, 512>}, {pipeline_mode = #tpu.pipeline_mode<synchronous>, transform_indices = @transform_6, window_bounds = array<i64: 512, 128>}, {pipeline_mode = #tpu.pipeline_mode<synchronous>, transform_indices = @transform_7, window_bounds = array<i64: 6, 128>}, {transform_indices = @transform_8, window_bounds = array<i64: 256, 128>}, {transform_indices = @transform_9, window_bounds = array<i64: 256, 128>}]} {
    %c0 = arith.constant 0 : index
    %c0_0 = arith.constant 0 : index
    %0 = vector.load %arg1[%c0, %c0_0] : memref<256x128xf32, #tpu.memory_space<vmem>>, vector<256x128xf32>
    %c0_1 = arith.constant 0 : index
    %c0_2 = arith.constant 0 : index
    %1 = vector.load %arg8[%c0_1, %c0_2] : memref<6x128xf32, #tpu.memory_space<vmem>>, vector<6x128xf32>
    %2 = vector.extract_strided_slice %1 {offsets = [0, 0], sizes = [1, 128], strides = [1, 1]} : vector<6x128xf32> to vector<1x128xf32>
    %3 = vector.extract_strided_slice %1 {offsets = [1, 0], sizes = [1, 128], strides = [1, 1]} : vector<6x128xf32> to vector<1x128xf32>
    %4 = vector.extract_strided_slice %1 {offsets = [2, 0], sizes = [1, 128], strides = [1, 1]} : vector<6x128xf32> to vector<1x128xf32>
    %5 = vector.extract_strided_slice %1 {offsets = [3, 0], sizes = [1, 128], strides = [1, 1]} : vector<6x128xf32> to vector<1x128xf32>
    %6 = vector.extract_strided_slice %1 {offsets = [4, 0], sizes = [1, 128], strides = [1, 1]} : vector<6x128xf32> to vector<1x128xf32>
    %7 = vector.extract_strided_slice %1 {offsets = [5, 0], sizes = [1, 128], strides = [1, 1]} : vector<6x128xf32> to vector<1x128xf32>
    %cst = arith.constant dense<0.000000e+00> : vector<256xf32>
    %8 = vector.multi_reduction <add>, %0, %cst [1] : vector<256x128xf32> to vector<256xf32>
    %9 = vector.shape_cast %8 : vector<256xf32> to vector<256x1xf32>
    %cst_3 = arith.constant 1.280000e+02 : f32
    %10 = vector.broadcast %cst_3 : f32 to vector<256x1xf32>
    %11 = arith.divf %9, %10 : vector<256x1xf32>
    %12 = vector.broadcast %11 : vector<256x1xf32> to vector<256x128xf32>
    %13 = arith.subf %0, %12 : vector<256x128xf32>
    %14 = arith.mulf %13, %13 : vector<256x128xf32>
    %cst_4 = arith.constant dense<0.000000e+00> : vector<256xf32>
    %15 = vector.multi_reduction <add>, %14, %cst_4 [1] : vector<256x128xf32> to vector<256xf32>
    %16 = vector.shape_cast %15 : vector<256xf32> to vector<256x1xf32>
    %cst_5 = arith.constant 1.280000e+02 : f32
    %17 = vector.broadcast %cst_5 : f32 to vector<256x1xf32>
    %18 = arith.divf %16, %17 : vector<256x1xf32>
    %cst_6 = arith.constant 9.99999974E-6 : f32
    %19 = vector.broadcast %cst_6 : f32 to vector<256x1xf32>
    %20 = arith.addf %18, %19 : vector<256x1xf32>
    %21 = math.rsqrt %20 : vector<256x1xf32>
    %22 = vector.broadcast %21 : vector<256x1xf32> to vector<256x128xf32>
    %23 = arith.mulf %13, %22 : vector<256x128xf32>
    %24 = vector.broadcast %2 : vector<1x128xf32> to vector<256x128xf32>
    %25 = arith.mulf %23, %24 : vector<256x128xf32>
    %26 = vector.broadcast %3 : vector<1x128xf32> to vector<256x128xf32>
    %27 = arith.addf %25, %26 : vector<256x128xf32>
    %28 = arith.truncf %27 : vector<256x128xf32> to vector<256x128xbf16>
    %c0_7 = arith.constant 0 : index
    %c0_8 = arith.constant 0 : index
    %29 = vector.load %arg2[%c0_7, %c0_8] : memref<128x64xbf16, #tpu.memory_space<vmem>>, vector<128x64xbf16>
    %cst_9 = arith.constant dense<0.000000e+00> : vector<256x64xf32>
    %30 = tpu.matmul %28, %29, %cst_9 {dimension_numbers = #tpu.dot_dimension_numbers<[1], [0], [0], [1], [0, 0, 1, 1], [], []>} : vector<256x128xbf16>, vector<128x64xbf16>, vector<256x64xf32> -> vector<256x64xf32>
    %c0_10 = arith.constant 0 : index
    %c0_11 = arith.constant 0 : index
    %31 = vector.load %arg3[%c0_10, %c0_11] : memref<1x64xf32, #tpu.memory_space<vmem>>, vector<1x64xf32>
    %32 = vector.broadcast %31 : vector<1x64xf32> to vector<256x64xf32>
    %33 = arith.addf %30, %32 : vector<256x64xf32>
    %cst_12 = arith.constant 5.000000e-01 : f32
    %34 = vector.broadcast %cst_12 : f32 to vector<256x64xf32>
    %35 = arith.mulf %34, %33 : vector<256x64xf32>
    %cst_13 = arith.constant 4.471500e-02 : f32
    %36 = vector.broadcast %cst_13 : f32 to vector<256x64xf32>
    %37 = arith.mulf %36, %33 : vector<256x64xf32>
    %38 = arith.mulf %37, %33 : vector<256x64xf32>
    %39 = arith.mulf %38, %33 : vector<256x64xf32>
    %40 = arith.addf %33, %39 : vector<256x64xf32>
    %cst_14 = arith.constant 0.797884583 : f32
    %41 = vector.broadcast %cst_14 : f32 to vector<256x64xf32>
    %42 = arith.mulf %41, %40 : vector<256x64xf32>
    %43 = math.tanh %42 : vector<256x64xf32>
    %cst_15 = arith.constant 1.000000e+00 : f32
    %44 = vector.broadcast %cst_15 : f32 to vector<256x64xf32>
    %45 = arith.addf %44, %43 : vector<256x64xf32>
    %46 = arith.mulf %35, %45 : vector<256x64xf32>
    %47 = arith.truncf %46 : vector<256x64xf32> to vector<256x64xbf16>
    %c0_16 = arith.constant 0 : index
    %c0_17 = arith.constant 0 : index
    %48 = vector.load %arg4[%c0_16, %c0_17] : memref<64x128xbf16, #tpu.memory_space<vmem>>, vector<64x128xbf16>
    %cst_18 = arith.constant dense<0.000000e+00> : vector<256x128xf32>
    %49 = tpu.matmul %47, %48, %cst_18 {dimension_numbers = #tpu.dot_dimension_numbers<[1], [0], [0], [1], [0, 0, 1, 1], [], []>} : vector<256x64xbf16>, vector<64x128xbf16>, vector<256x128xf32> -> vector<256x128xf32>
    %50 = vector.broadcast %6 : vector<1x128xf32> to vector<256x128xf32>
    %51 = arith.addf %49, %50 : vector<256x128xf32>
    %cst_19 = arith.constant dense<0xFF800000> : vector<256xf32>
    %52 = vector.multi_reduction <maximumf>, %51, %cst_19 [1] : vector<256x128xf32> to vector<256xf32>
    %53 = vector.shape_cast %52 : vector<256xf32> to vector<256x1xf32>
    %54 = vector.broadcast %53 : vector<256x1xf32> to vector<256x128xf32>
    %55 = arith.subf %51, %54 : vector<256x128xf32>
    %56 = math.exp %55 : vector<256x128xf32>
    %cst_20 = arith.constant dense<0.000000e+00> : vector<256xf32>
    %57 = vector.multi_reduction <add>, %56, %cst_20 [1] : vector<256x128xf32> to vector<256xf32>
    %58 = vector.shape_cast %57 : vector<256xf32> to vector<256x1xf32>
    %59 = vector.broadcast %58 : vector<256x1xf32> to vector<256x128xf32>
    %60 = arith.divf %56, %59 : vector<256x128xf32>
    %61 = arith.mulf %60, %27 : vector<256x128xf32>
    %62 = arith.addf %61, %27 : vector<256x128xf32>
    %63 = arith.addf %62, %0 : vector<256x128xf32>
    %cst_21 = arith.constant dense<0.000000e+00> : vector<256xf32>
    %64 = vector.multi_reduction <add>, %63, %cst_21 [1] : vector<256x128xf32> to vector<256xf32>
    %65 = vector.shape_cast %64 : vector<256xf32> to vector<256x1xf32>
    %cst_22 = arith.constant 1.280000e+02 : f32
    %66 = vector.broadcast %cst_22 : f32 to vector<256x1xf32>
    %67 = arith.divf %65, %66 : vector<256x1xf32>
    %68 = vector.broadcast %67 : vector<256x1xf32> to vector<256x128xf32>
    %69 = arith.subf %63, %68 : vector<256x128xf32>
    %70 = arith.mulf %69, %69 : vector<256x128xf32>
    %cst_23 = arith.constant dense<0.000000e+00> : vector<256xf32>
    %71 = vector.multi_reduction <add>, %70, %cst_23 [1] : vector<256x128xf32> to vector<256xf32>
    %72 = vector.shape_cast %71 : vector<256xf32> to vector<256x1xf32>
    %cst_24 = arith.constant 1.280000e+02 : f32
    %73 = vector.broadcast %cst_24 : f32 to vector<256x1xf32>
    %74 = arith.divf %72, %73 : vector<256x1xf32>
    %cst_25 = arith.constant 9.99999974E-6 : f32
    %75 = vector.broadcast %cst_25 : f32 to vector<256x1xf32>
    %76 = arith.addf %74, %75 : vector<256x1xf32>
    %77 = math.rsqrt %76 : vector<256x1xf32>
    %78 = vector.broadcast %77 : vector<256x1xf32> to vector<256x128xf32>
    %79 = arith.mulf %69, %78 : vector<256x128xf32>
    %80 = vector.broadcast %4 : vector<1x128xf32> to vector<256x128xf32>
    %81 = arith.mulf %79, %80 : vector<256x128xf32>
    %82 = vector.broadcast %5 : vector<1x128xf32> to vector<256x128xf32>
    %83 = arith.addf %81, %82 : vector<256x128xf32>
    %84 = arith.truncf %83 : vector<256x128xf32> to vector<256x128xbf16>
    %c0_26 = arith.constant 0 : index
    %c0_27 = arith.constant 0 : index
    %85 = vector.load %arg5[%c0_26, %c0_27] : memref<128x512xbf16, #tpu.memory_space<vmem>>, vector<128x512xbf16>
    %cst_28 = arith.constant dense<0.000000e+00> : vector<256x512xf32>
    %86 = tpu.matmul %84, %85, %cst_28 {dimension_numbers = #tpu.dot_dimension_numbers<[1], [0], [0], [1], [0, 0, 1, 1], [], []>} : vector<256x128xbf16>, vector<128x512xbf16>, vector<256x512xf32> -> vector<256x512xf32>
    %c0_29 = arith.constant 0 : index
    %c0_30 = arith.constant 0 : index
    %87 = vector.load %arg6[%c0_29, %c0_30] : memref<1x512xf32, #tpu.memory_space<vmem>>, vector<1x512xf32>
    %88 = vector.broadcast %87 : vector<1x512xf32> to vector<256x512xf32>
    %89 = arith.addf %86, %88 : vector<256x512xf32>
    %cst_31 = arith.constant 5.000000e-01 : f32
    %90 = vector.broadcast %cst_31 : f32 to vector<256x512xf32>
    %91 = arith.mulf %90, %89 : vector<256x512xf32>
    %cst_32 = arith.constant 4.471500e-02 : f32
    %92 = vector.broadcast %cst_32 : f32 to vector<256x512xf32>
    %93 = arith.mulf %92, %89 : vector<256x512xf32>
    %94 = arith.mulf %93, %89 : vector<256x512xf32>
    %95 = arith.mulf %94, %89 : vector<256x512xf32>
    %96 = arith.addf %89, %95 : vector<256x512xf32>
    %cst_33 = arith.constant 0.797884583 : f32
    %97 = vector.broadcast %cst_33 : f32 to vector<256x512xf32>
    %98 = arith.mulf %97, %96 : vector<256x512xf32>
    %99 = math.tanh %98 : vector<256x512xf32>
    %cst_34 = arith.constant 1.000000e+00 : f32
    %100 = vector.broadcast %cst_34 : f32 to vector<256x512xf32>
    %101 = arith.addf %100, %99 : vector<256x512xf32>
    %102 = arith.mulf %91, %101 : vector<256x512xf32>
    %103 = arith.truncf %102 : vector<256x512xf32> to vector<256x512xbf16>
    %c0_35 = arith.constant 0 : index
    %c0_36 = arith.constant 0 : index
    %104 = vector.load %arg7[%c0_35, %c0_36] : memref<512x128xbf16, #tpu.memory_space<vmem>>, vector<512x128xbf16>
    %cst_37 = arith.constant dense<0.000000e+00> : vector<256x128xf32>
    %105 = tpu.matmul %103, %104, %cst_37 {dimension_numbers = #tpu.dot_dimension_numbers<[1], [0], [0], [1], [0, 0, 1, 1], [], []>} : vector<256x512xbf16>, vector<512x128xbf16>, vector<256x128xf32> -> vector<256x128xf32>
    %106 = vector.broadcast %7 : vector<1x128xf32> to vector<256x128xf32>
    %107 = arith.addf %105, %106 : vector<256x128xf32>
    %108 = arith.mulf %107, %83 : vector<256x128xf32>
    %109 = arith.addf %108, %83 : vector<256x128xf32>
    %110 = arith.addf %109, %63 : vector<256x128xf32>
    %c0_38 = arith.constant 0 : index
    %c0_39 = arith.constant 0 : index
    %111 = vector.load %arg9[%c0_38, %c0_39] : memref<256x128xf32, #tpu.memory_space<vmem>>, vector<256x128xf32>
    tpu.vector_store %arg9[%c0_38, %c0_39], %110 {strides = array<i32>} : memref<256x128xf32, #tpu.memory_space<vmem>>, vector<256x128xf32>,
    %c0_40 = arith.constant 0 : index
    %c0_41 = arith.constant 0 : index
    %112 = vector.load %arg10[%c0_40, %c0_41] : memref<256x128xf32, #tpu.memory_space<vmem>>, vector<256x128xf32>
    tpu.vector_store %arg10[%c0_40, %c0_41], %60 {strides = array<i32>} : memref<256x128xf32, #tpu.memory_space<vmem>>, vector<256x128xf32>,
    return
  }
  func.func @transform_0(%arg0: i32) -> (i32, i32) {
    %c0_i32 = arith.constant 0 : i32
    %c0_i32_0 = arith.constant 0 : i32
    return %arg0, %c0_i32 : i32, i32
  }
  func.func @transform_1(%arg0: i32) -> (i32, i32) {
    %c0_i32 = arith.constant 0 : i32
    %c0_i32_0 = arith.constant 0 : i32
    %c0_i32_1 = arith.constant 0 : i32
    return %c0_i32, %c0_i32_0 : i32, i32
  }
  func.func @transform_2(%arg0: i32) -> (i32, i32) {
    %c0_i32 = arith.constant 0 : i32
    %c0_i32_0 = arith.constant 0 : i32
    %c0_i32_1 = arith.constant 0 : i32
    return %c0_i32, %c0_i32_0 : i32, i32
  }
  func.func @transform_3(%arg0: i32) -> (i32, i32) {
    %c0_i32 = arith.constant 0 : i32
    %c0_i32_0 = arith.constant 0 : i32
    %c0_i32_1 = arith.constant 0 : i32
    return %c0_i32, %c0_i32_0 : i32, i32
  }
  func.func @transform_4(%arg0: i32) -> (i32, i32) {
    %c0_i32 = arith.constant 0 : i32
    %c0_i32_0 = arith.constant 0 : i32
    %c0_i32_1 = arith.constant 0 : i32
    return %c0_i32, %c0_i32_0 : i32, i32
  }
  func.func @transform_5(%arg0: i32) -> (i32, i32) {
    %c0_i32 = arith.constant 0 : i32
    %c0_i32_0 = arith.constant 0 : i32
    %c0_i32_1 = arith.constant 0 : i32
    return %c0_i32, %c0_i32_0 : i32, i32
  }
  func.func @transform_6(%arg0: i32) -> (i32, i32) {
    %c0_i32 = arith.constant 0 : i32
    %c0_i32_0 = arith.constant 0 : i32
    %c0_i32_1 = arith.constant 0 : i32
    return %c0_i32, %c0_i32_0 : i32, i32
  }
  func.func @transform_7(%arg0: i32) -> (i32, i32) {
    %c0_i32 = arith.constant 0 : i32
    %c0_i32_0 = arith.constant 0 : i32
    %c0_i32_1 = arith.constant 0 : i32
    return %c0_i32, %c0_i32_0 : i32, i32
  }
  func.func @transform_8(%arg0: i32) -> (i32, i32) {
    %c0_i32 = arith.constant 0 : i32
    %c0_i32_0 = arith.constant 0 : i32
    return %arg0, %c0_i32 : i32, i32
  }
  func.func @transform_9(%arg0: i32) -> (i32, i32) {
    %c0_i32 = arith.constant 0 : i32
    %c0_i32_0 = arith.constant 0 : i32
    return %arg0, %c0_i32 : i32, i32
  }
}

</mosaic_0001>

<bundles_post_ra>
// kernel: tpu_custom_call.1
= control target key start
LH: loop header
LB: loop body
LE: loop exit
PB: predicated region body
PF: predicated region fallthrough
CT: control target
= control target key end

     0   :  { %s12621_s0 = inlined_call_operand.hbm [shape: f32[512,128], index: 0, kind: input, shape index: {}]   ;;  %s12622_s1 = inlined_call_operand.vmem [shape: bf16[128,64], index: 1, kind: input, shape index: {}]   ;;  %s12623_s2 = inlined_call_operand.vmem [shape: f32[1,64], index: 2, kind: input, shape index: {}]   ;;  %s12624_s3 = inlined_call_operand.vmem [shape: bf16[64,128], index: 3, kind: input, shape index: {}]   ;;  %s12625_s4 = inlined_call_operand.hbm [shape: bf16[128,512], index: 4, kind: input, shape index: {}]   ;;  %s12626_s5 = inlined_call_operand.vmem [shape: f32[1,512], index: 5, kind: input, shape index: {}]   ;;  %s12627_s6 = inlined_call_operand.hbm [shape: bf16[512,128], index: 6, kind: input, shape index: {}]   ;;  %s12628_s7 = inlined_call_operand.vmem [shape: f32[6,128], index: 7, kind: input, shape index: {}]   ;;  %s12629_s8 = inlined_call_operand.hbm [shape: f32[512,128], index: 8, kind: output, shape index: {0}]   ;;  %s12630_s9 = inlined_call_operand.hbm [shape: f32[512,128], index: 9, kind: output, shape index: {1}]  }
   0x1   :  { %12882 = sst [smem:[#allocation132_spill]] %s12625_s4 }
   0x2   :  { %12883 = sst [smem:[#allocation133_spill]] %s12627_s6 }
   0x3   :  { %15 = vsyncpa [#allocation3], 0 }
   0x4   :  { %17 = vsyncpa [#allocation3 + $0x1], 0 }
   0x5   :  { %18 = vsyncpa [#allocation6], 0 }
   0x6   :  { %19 = vsyncpa [#allocation4], 0 }
   0x7   :  { %21 = vsyncpa [#allocation4 + $0x1], 0 }
   0x8   :  { %22 = vsyncpa [#allocation10], 0 }
   0x9   :  { %24 = vsyncpa [#allocation10 + $0x1], 0  ;;  %s7411_s30 = smov 0   ;;  %s7413_s10 = smov 0  }
   0xa   :  { %s7415_s11 = smov 0   ;;  %s7417_s12 = smov 0  }
   0xb LB: > { %s7432_s13 = sadd.s32 4294967295, %s7348_s12   ;;  %s6027_s14 = sadd.s32 4294967294, %s7348_s12   ;;  %s7348_s12 = sphi %s7417_s12, %s13467_s12   ;;  %s7344_s11 = sphi %s7415_s11, %s13466_s11   ;;  %s7340_s10 = sphi %s7413_s10, %s13465_s10   ;;  %s7336_s30 = sphi %s7411_s30, %s13464_s30  }
   0xc   : > { %p50_p0 = scmp.ne.s32.totalorder %s7340_s10, %s7336_s30  ;;  %p51_p1 = scmp.eq.s32.totalorder %s7432_s13, 0 }
   0xd   : > { %p221_p2 = scmp.eq.s32.totalorder %s7432_s13, 1  ;;  %p227_p3 = scmp.eq.s32.totalorder %s6027_s14, 1 }
   0xe   : > { %p7441_p4 = por %p51_p1, %p50_p0  ;;  %p6028_p5 = scmp.ge.s32.totalorder %s7348_s12, 1 }
   0xf   : > { %p7446_p6 = por %p227_p3, %p50_p0  ;;  %p260_p7 = scmp.lt.s32.totalorder %s7348_s12, 3 }
  0x10   : > { %s12886_s4 = sld [smem:[#allocation132_spill]]  ;;  %s7350_s21 = smov [#allocation5]  }
  0x11   : > { %p7454_p8 = pnand %p6028_p5, %p260_p7  ;;  %s282_s22 = sshll.u32 %s7350_s21, 4  ;;  %s283_s22 = int_to_ptr.vmem [resolvable:$true] %s282_s22 }
  0x12   : > { %s12888_s6 = sld [smem:[#allocation133_spill]]  ;;  %s7351_s26 = smov 256  }
  0x13   : > { %p6474_p9 = pneg %p7454_p8  ;;  %s7352_s27 = smov 16  }
  0x14   : > { %s7353_s28 = smov [#allocation7]   ;;  %s7354_s14 = smov 64  }
  0x15   : > { %p6475_p10 = pnand %p6474_p9, %p51_p1  ;;  %s299_s29 = sshll.u32 %s7353_s28, 4  ;;  %s300_s29 = int_to_ptr.vmem [resolvable:$true] %s299_s29 }
  0x16   : > { %s280_s19 = sshll.u32 %s12886_s4, 4  ;;  %s7355_s17 = smov 4   ;;  %s281_s19 = int_to_ptr.hbm [resolvable:$true] %s280_s19 }
  0x17   : > { %6477 = dma.hbm_to_vmem [thread:$0]  (!%p6475_p10), %s281_s19, 4096, %s283_s22, [#allocation6], %s7351_s26, %s7351_s26, %s7352_s27  }
  0x18   : > { %s297_s25 = sshll.u32 %s12888_s6, 4  ;;  %s7467_s18 = sadd.s32 1, %s7348_s12   ;;  %s298_s25 = int_to_ptr.hbm [resolvable:$true] %s297_s25 }
  0x19   : > { %6480 = dma.hbm_to_vmem [thread:$0]  (!%p6475_p10), %s298_s25, 4096, %s300_s29, [#allocation6], %s7354_s14, %s7354_s14, %s7355_s17  }
  0x1a   : > { %s34_s21 = ssub.s32 %s7348_s12, %s7467_s18  ;;  %s37_s23 = sadd.s32 1, %s7344_s11 }
  0x1b   : > { %p35_p12 = scmp.eq.s32.totalorder %s34_s21, 0  ;;  %p44_p13 = scmp.ne.s32.totalorder %s7344_s11, %s7340_s10 }
  0x1c   : > { %p45_p0 = scmp.eq.s32.totalorder %s7348_s12, 0  ;;  %p6494_p7 = scmp.lt.s32.totalorder %s7348_s12, 2 }
  0x1d   : > { %s7476_s24 = scalar_select %p35_p12, %s7344_s11, %s37_s23  }
  0x1e   : > { %p46_p3 = por %p45_p0, %p44_p13  ;;  %p7480_p5 = por %p221_p2, %p44_p13 }
  0x1f   : > { %12889 = sst [smem:[#allocation15_spill]] %s7476_s24  ;;  %s316_s22 = sand.u32 1, %s7344_s11  }
  0x20   : > { %s6032_s26 = sshll.u32 %s316_s22, 8  ;;  %s6369_s25 = sshll.u32 %s7348_s12, 8 }
  0x21   : > { %s325_s29 = scalar_lea.hbm %s12621_s0, %s6369_s25  ;;  %s320_s14 = scalar_lea.vmem [#allocation2], %s6032_s26 }
  0x22   : > { %s328_s17 = sshll.u32 %s320_s14, 4  ;;  %s326_s21 = sshll.u32 %s325_s29, 4  ;;  %s329_s17 = int_to_ptr.vmem [resolvable:$true] %s328_s17  ;;  %s327_s21 = int_to_ptr.hbm [resolvable:$true] %s326_s21 }
  0x23   : > { %p7490_p9 = pnand %p6494_p7, %p46_p3  ;;  %s317_s4 = scalar_lea.sflag [#allocation3], %s316_s22 }
  0x24   : > { %s7216_s6 = sshra.s32 %s327_s21, 4  ;;  %s7223_s27 = scalar_lea.hbm %s12621_s0, 512  ;;  %s7217_s6 = int_to_ptr.hbm [resolvable:$true] %s7216_s6 }
  0x25   : > { %s7218_s24 = scalar_lea.hbm %s7217_s6, 256  ;;  %p7220_p10 = pneg %p7490_p9 }
  0x26   : > { %p7219_p2 = scmp.ne.s32.totalorder %s7217_s6, %s7218_s24  ;;  %p7224_p0 = scmp.lt.s32.totalorder %s7217_s6, %s12621_s0 }
  0x27   : > { %p7225_p3 = scmp.lt.s32.totalorder %s7223_s27, %s7218_s24 }
  0x28   : > { %p7221_p12 = pnand %p7220_p10, %p7219_p2 }
  0x29   : > { %p7226_p7 = por %p7225_p3, %p7224_p0 }
  0x2a   : > { %p7222_p13 = pneg %p7221_p12 }
  0x2c   : > { %p7227_p11 = pnand %p7226_p7, %p7222_p13 }
  0x2e   : > { %7230 = shalt.err (!%p7227_p11)
}
  0x2f   : > { %s7356_s22 = smov 128   ;;  %s7357_s14 = smov 8  }
  0x30   : > { %6484 = dma.hbm_to_vmem [thread:$0]  (!%p7490_p9), %s327_s21, 4096, %s329_s17, %s317_s4, %s7356_s22, %s7356_s22, %s7357_s14  }
  0x31   : > { %340 = sbr.rel (%p7454_p8) target bundleno = 2326 (0x916), region = 52 }
  0x36   : > { %s7507_s25 = sand.u32 1, %s7340_s10  }
  0x37   : > { %s7510_s26 = sshll.u32 %s7507_s25, 8  ;;  %s343_s6 = scalar_lea.sflag [#allocation3], %s7507_s25 }
  0x38   : > { %s7514_s24 = scalar_lea.vmem [#allocation2], %s7510_s26 }
  0x39   : > { %7319 = dma.done.wait (%p7441_p4), %s343_s6, 4096  }
  0x3a   : > { %7321 = vsyncadd (%p7441_p4), %s343_s6, 4294963200 }
  0x3b   : > { %7323 = dma.done.wait (%p51_p1), [#allocation6], 8192  }
  0x3c   : > { %7325 = vsyncadd (%p51_p1), [#allocation6], 4294959104  ;;  %v403_v0 = vld [vmem:[%s7514_s24 + $0x10] sm:$0xff]  ;;  %v401_v1 = vld [vmem:[%s7514_s24] sm:$0xff]  ;;  %v7358_v7 = vmov 128.0   ;;  %s8649_s29 = scalar_lea.vmem [#allocation9], %s7510_s26 }
  0x3d   : > { %438 = vadd.xlane.f32.xlu1 %v403_v0  ;;  %434 = vadd.xlane.f32.xlu0 %v401_v1  ;;  %v405_v2 = vld [vmem:[%s7514_s24 + $0x20] sm:$0xff]  ;;  %v404_v3 = vld [vmem:[%s7514_s24 + $0x18] sm:$0xff]  ;;  %v402_v4 = vld [vmem:[%s7514_s24 + $0x8] sm:$0xff]  ;;  %6542 = vrcp.f32 %v7358_v7  ;;  %s12203_s20 = scalar_lea.vmem [#allocation8], %s7510_s26  ;;  %s6446_s26 = sshll.u32 %s7432_s13, 8 }
  0x3e   : > { %442 = vadd.xlane.f32.xlu2 %v405_v2  ;;  %v406_v5 = vld [vmem:[%s7514_s24 + $0x28] sm:$0xff]  ;;  %v407_v6 = vld [vmem:[%s7514_s24 + $0x30] sm:$0xff]  ;;  %v7547_v28 = vld [vmem:[%s7514_s24 + $0x38] sm:$0xff]  ;;  %s5898_s23 = scalar_lea.hbm %s12630_s9, %s6446_s26  ;;  %s5899_s27 = sshll.u32 %s8649_s29, 4  ;;  %s5900_s27 = int_to_ptr.vmem [resolvable:$true] %s5899_s27 }
  0x3f   : > { %v7562_v36 = vld [vmem:[%s7514_s24 + $0x40] sm:$0xff]  ;;  %v7573_v42 = vld [vmem:[%s7514_s24 + $0x58] sm:$0xff]  ;;  %v7576_v43 = vld [vmem:[%s7514_s24 + $0x48] sm:$0xff]  ;;  %s5901_s28 = sshll.u32 %s5898_s23, 4  ;;  %s5870_s22 = scalar_lea.sflag [#allocation10], %s7507_s25  ;;  %s5902_s28 = int_to_ptr.hbm [resolvable:$true] %s5901_s28 }
  0x40   : > { %v7585_v46 = vld [vmem:[%s7514_s24 + $0x60] sm:$0xff]  ;;  %v7588_v47 = vld [vmem:[%s7514_s24 + $0x50] sm:$0xff]  ;;  %v7593_v48 = vld [vmem:[%s7514_s24 + $0x68] sm:$0xff]  ;;  %s7260_s14 = sshra.s32 %s5902_s28, 4  ;;  %s7266_s4 = scalar_lea.hbm %s12630_s9, 512  ;;  %s7261_s14 = int_to_ptr.hbm [resolvable:$true] %s7260_s14 }
  0x41   : > { %v7597_v49 = vld [vmem:[%s7514_s24 + $0x70] sm:$0xff]  ;;  %v7601_v50 = vld [vmem:[%s7514_s24 + $0x88] sm:$0xff]  ;;  %v6377_v52 = vld [vmem:[%s12622_s1 + $0x38] sm:$0xff]  ;;  %p7267_p11 = scmp.lt.s32.totalorder %s7261_s14, %s12630_s9 }
  0x42   : > { %v7605_v51 = vld [vmem:[%s7514_s24 + $0x90] sm:$0xff]  ;;  %1231 = vmatpush.bf16.msra.mxu0 %v6377_v52  ;;  %6448 = vmatpush.bf16.msra.mxu2 %v6377_v52  ;;  %v6375_v54 = vld [vmem:[%s12622_s1 + $0x28] sm:$0xff]  ;;  %v6374_v55 = vld [vmem:[%s12622_s1 + $0x20] sm:$0xff] }
  0x43   : > { %v6543_v8 = vpop.eup %6542  ;;  %v6376_v53 = vld [vmem:[%s12622_s1 + $0x30] sm:$0xff]  ;;  %v6373_v56 = vld [vmem:[%s12622_s1 + $0x18] sm:$0xff]  ;;  %v6371_v59 = vld [vmem:[%s12622_s1 + $0x8] sm:$0xff] }
  0x44   : > { %v499_v9 = vmul.f32 128.0, %v6543_v8  ;;  %vm503_vm0 = vweird.f32 %v6543_v8  ;;  %v6372_v57 = vld [vmem:[%s12622_s1 + $0x10] sm:$0xff]  ;;  %v6370_v62 = vld [vmem:[%s12622_s1] sm:$0xff] }
  0x45   : > { %440 = vadd.xlane.f32.xlu1 %v404_v3  ;;  %436 = vadd.xlane.f32.xlu0 %v402_v4 }
  0x46   : > { %444 = vadd.xlane.f32.xlu2 %v406_v5  ;;  %v500_v10 = vsub.f32 1.0, %v499_v9  ;;  %1232 = vmatpush.bf16.msra.mxu0 %v6376_v53 }
  0x47   : > { %6449 = vmatpush.bf16.msra.mxu2 %v6376_v53 }
  0x48   : > { %v501_v11 = vmul.f32 %v6543_v8, %v500_v10 }
  0x4a   : > { %v502_v12 = vadd.f32 %v6543_v8, %v501_v11  ;;  %1233 = vmatpush.bf16.msra.mxu0 %v6375_v54 }
  0x4b   : > { %6450 = vmatpush.bf16.msra.mxu2 %v6375_v54 }
  0x4c   : > { %v7531_v13 = vsel %vm503_vm0, %v6543_v8, %v502_v12 }
  0x4d   : > { %12892 = vst [vmem:[#allocation16_spill] sm:$0xff] %v7531_v13 }
  0x4e   : > { %446 = vadd.xlane.f32.xlu2 %v407_v6  ;;  %1234 = vmatpush.bf16.msra.mxu0 %v6374_v55 }
  0x4f   : > { %6451 = vmatpush.bf16.msra.mxu2 %v6374_v55 }
  0x52   : > { %1235 = vmatpush.bf16.msra.mxu0 %v6373_v56 }
  0x53   : > { %6452 = vmatpush.bf16.msra.mxu2 %v6373_v56 }
  0x56   : > { %1236 = vmatpush.bf16.msra.mxu0 %v6372_v57 }
  0x57   : > { %6453 = vmatpush.bf16.msra.mxu2 %v6372_v57 }
  0x5a   : > { %1237 = vmatpush.bf16.msra.mxu0 %v6371_v59 }
  0x5b   : > { %6454 = vmatpush.bf16.msra.mxu2 %v6371_v59 }
  0x5e   : > { %1238 = vmatpush.bf16.msra.mxu0 %v6370_v62 }
  0x5f   : > { %6455 = vmatpush.bf16.msra.mxu2 %v6370_v62 }
  0xb0   : > { %v439_v14 = vpop.xlane.xlu1 %438  ;;  %v435_v15 = vpop.xlane.xlu0 %434 }
  0xb1   : > { %v505_v16 = vmul.f32 %v7531_v13, %v435_v15  ;;  %v443_v19 = vpop.xlane.xlu2 %442  ;;  %v507_v27 = vmul.f32 %v7531_v13, %v439_v14 }
  0xb2   : > { %v509_v26 = vmul.f32 %v7531_v13, %v443_v19 }
  0xb3   : > { %v7534_v17 = vsub.f32 %v401_v1, %v505_v16  ;;  %v7556_v32 = vsub.f32 %v403_v0, %v507_v27 }
  0xb4   : > { %v7554_v31 = vsub.f32 %v405_v2, %v509_v26 }
  0xb5   : > { %v569_v18 = vmul.f32 %v7534_v17, %v7534_v17  ;;  %v571_v37 = vmul.f32 %v7556_v32, %v7556_v32 }
  0xb6   : > { %v573_v34 = vmul.f32 %v7554_v31, %v7554_v31 }
  0xb7   : > { %601 = vadd.xlane.f32.xlu0 %v569_v18 }
  0xb8   : > { %v441_v20 = vpop.xlane.xlu1 %440  ;;  %v437_v21 = vpop.xlane.xlu0 %436 }
  0xb9   : > { %v508_v22 = vmul.f32 %v7531_v13, %v441_v20  ;;  %v506_v23 = vmul.f32 %v7531_v13, %v437_v21  ;;  %v445_v33 = vpop.xlane.xlu2 %444 }
  0xba   : > { %v510_v35 = vmul.f32 %v7531_v13, %v445_v33 }
  0xbb   : > { %v7540_v24 = vsub.f32 %v404_v3, %v508_v22  ;;  %v7542_v25 = vsub.f32 %v402_v4, %v506_v23 }
  0xbc   : > { %v7567_v38 = vsub.f32 %v406_v5, %v510_v35 }
  0xbd   : > { %v572_v29 = vmul.f32 %v7540_v24, %v7540_v24  ;;  %v570_v30 = vmul.f32 %v7542_v25, %v7542_v25 }
  0xbe   : > { %v574_v40 = vmul.f32 %v7567_v38, %v7567_v38 }
  0xbf   : > { %607 = vadd.xlane.f32.xlu2 %v572_v29  ;;  %448 = vadd.xlane.f32.xlu0 %v7547_v28 }
  0xc0   : > { %603 = vadd.xlane.f32.xlu1 %v570_v30 }
  0xc1   : > { %v447_v39 = vpop.xlane.xlu2 %446 }
  0xc2   : > { %v511_v41 = vmul.f32 %v7531_v13, %v447_v39  ;;  %v433_v39 = vld [vmem:[%s12628_s7] sm:$0x3f] }
  0xc3   : > { %v7675_v57 = vperm.slane %v433_v39, 0 }
  0xc4   : > { %v7578_v44 = vsub.f32 %v407_v6, %v511_v41 }
  0xc6   : > { %v575_v45 = vmul.f32 %v7578_v44, %v7578_v44 }
  0xc7   : > { %609 = vadd.xlane.f32.xlu2 %v573_v34  ;;  %450 = vadd.xlane.f32.xlu0 %v7562_v36 }
  0xc8   : > { %605 = vadd.xlane.f32.xlu1 %v571_v37 }
  0xcf   : > { %611 = vadd.xlane.f32.xlu0 %v574_v40  ;;  %456 = vadd.xlane.f32.xlu2 %v7573_v42 }
  0xd0   : > { %452 = vadd.xlane.f32.xlu1 %v7576_v43 }
  0xd7   : > { %613 = vadd.xlane.f32.xlu0 %v575_v45  ;;  %458 = vadd.xlane.f32.xlu2 %v7585_v46 }
  0xd8   : > { %454 = vadd.xlane.f32.xlu1 %v7588_v47 }
  0xdf   : > { %460 = vadd.xlane.f32.xlu0 %v7593_v48 }
  0xe7   : > { %462 = vadd.xlane.f32.xlu0 %v7597_v49 }
  0xef   : > { %468 = vadd.xlane.f32.xlu0 %v7601_v50 }
  0xf7   : > { %470 = vadd.xlane.f32.xlu0 %v7605_v51 }
 0x12a   : > { %v602_v58 = vpop.xlane.xlu0 %601 }
 0x12b   : > { %v665_v60 = vmul.f32 %v602_v58, %v7531_v13 }
 0x12d   : > { %v697_v61 = vadd.f32 1e-05, %v665_v60 }
 0x12f   : > { %6544 = vrsqrt.f32 %v697_v61  ;;  %vm735_vm2 = vweird.f32 %v697_v61 }
 0x132   : > { %v608_v63 = vpop.xlane.xlu2 %607  ;;  %v449_v0 = vpop.xlane.xlu0 %448 }
 0x133   : > { %v668_v1 = vmul.f32 %v608_v63, %v7531_v13  ;;  %v604_v2 = vpop.xlane.xlu1 %603  ;;  %v512_v3 = vmul.f32 %v7531_v13, %v449_v0 }
 0x134   : > { %v666_v4 = vmul.f32 %v604_v2, %v7531_v13 }
 0x135   : > { %v6545_v5 = vpop.eup %6544  ;;  %v7636_v6 = vadd.f32 1e-05, %v668_v1  ;;  %v7639_v7 = vsub.f32 %v7547_v28, %v512_v3  ;;  %v7687_v1 = vld [vmem:[%s7514_s24 + $0x78] sm:$0xff] }
 0x136   : > { %v730_v8 = vmul.f32 %v6545_v5, %v697_v61  ;;  %v698_v9 = vadd.f32 1e-05, %v666_v4  ;;  %vm736_vm1 = vweird.f32 %v6545_v5 }
 0x137   : > { %6546 = vrsqrt.f32 %v7636_v6  ;;  %v576_v10 = vmul.f32 %v7639_v7, %v7639_v7  ;;  %vm7659_vm3 = vmor %vm735_vm2, %vm736_vm1  ;;  %vm765_vm7 = vweird.f32 %v7636_v6 }
 0x138   : > { %v731_v11 = vmul.f32 %v6545_v5, %v730_v8  ;;  %6548 = vrsqrt.f32 %v698_v9  ;;  %vm745_vm5 = vweird.f32 %v698_v9  ;;  %v7693_v8 = vperm.slane %v433_v39, 1 }
 0x139   : > { %615 = vadd.xlane.f32.xlu1 %v576_v10 }
 0x13a   : > { %v732_v12 = vmul.f32 0.5, %v731_v11  ;;  %v451_v14 = vpop.xlane.xlu0 %450  ;;  %v610_v15 = vpop.xlane.xlu2 %609 }
 0x13b   : > { %v606_v16 = vpop.xlane.xlu1 %605  ;;  %v513_v18 = vmul.f32 %v7531_v13, %v451_v14  ;;  %v669_v26 = vmul.f32 %v610_v15, %v7531_v13 }
 0x13c   : > { %v733_v19 = vsub.f32 1.5, %v732_v12  ;;  %v667_v20 = vmul.f32 %v606_v16, %v7531_v13 }
 0x13d   : > { %v7646_v21 = vpop.eup %6546  ;;  %v7649_v22 = vsub.f32 %v7562_v36, %v513_v18  ;;  %v7663_v36 = vadd.f32 1e-05, %v669_v26 }
 0x13e   : > { %v6549_v23 = vpop.eup %6548  ;;  %v7652_v27 = vadd.f32 1e-05, %v667_v20  ;;  %v734_v28 = vmul.f32 %v6545_v5, %v733_v19  ;;  %v760_v29 = vmul.f32 %v7646_v21, %v7636_v6  ;;  %vm766_vm8 = vweird.f32 %v7646_v21 }
 0x13f   : > { %v740_v30 = vmul.f32 %v6549_v23, %v698_v9  ;;  %v577_v34 = vmul.f32 %v7649_v22, %v7649_v22  ;;  %vm746_vm4 = vweird.f32 %v6549_v23  ;;  %vm7715_vm11 = vmor %vm765_vm7, %vm766_vm8  ;;  %vm775_vm15 = vweird.f32 %v7663_v36 }
 0x140   : > { %6550 = vrsqrt.f32 %v7652_v27  ;;  %v738_v40 = vsel %vm7659_vm3, %v6545_v5, %v734_v28  ;;  %v761_v41 = vmul.f32 %v7646_v21, %v760_v29  ;;  %vm747_vm6 = vmor %vm745_vm5, %vm746_vm4  ;;  %vm755_vm9 = vweird.f32 %v7652_v27  ;;  %v7722_v29 = vld [vmem:[%s7514_s24 + $0x80] sm:$0xff] }
 0x141   : > { %v741_v33 = vmul.f32 %v6549_v23, %v740_v30  ;;  %617 = vadd.xlane.f32.xlu1 %v577_v34  ;;  %6552 = vrsqrt.f32 %v7663_v36  ;;  %v1049_v60 = vmul.f32 %v738_v40, %v7534_v17 }
 0x142   : > { %v612_v37 = vpop.xlane.xlu0 %611  ;;  %v762_v61 = vmul.f32 0.5, %v761_v41  ;;  %v457_v4 = vpop.xlane.xlu2 %456 }
 0x143   : > { %v742_v45 = vmul.f32 0.5, %v741_v33  ;;  %v453_v52 = vpop.xlane.xlu1 %452  ;;  %v670_v53 = vmul.f32 %v612_v37, %v7531_v13  ;;  %v1082_v5 = vmul.f32 %v7675_v57, %v1049_v60  ;;  %v516_v20 = vmul.f32 %v7531_v13, %v457_v4 }
 0x144   : > { %v514_v54 = vmul.f32 %v7531_v13, %v453_v52  ;;  %v763_v9 = vsub.f32 1.5, %v762_v61 }
 0x145   : > { %v743_v55 = vsub.f32 1.5, %v742_v45  ;;  %v7673_v56 = vadd.f32 1e-05, %v670_v53  ;;  %v7708_v19 = vadd.f32 %v7693_v8, %v1082_v5  ;;  %v7734_v40 = vsub.f32 %v7573_v42, %v516_v20 }
 0x146   : > { %v6551_v58 = vpop.eup %6550  ;;  %v7679_v59 = vsub.f32 %v7576_v43, %v514_v54 }
 0x147   : > { %v744_v62 = vmul.f32 %v6549_v23, %v743_v55  ;;  %v750_v63 = vmul.f32 %v6551_v58, %v7652_v27  ;;  %6554 = vrsqrt.f32 %v7673_v56  ;;  %v7696_v12 = vpop.eup %6552  ;;  %vm756_vm10 = vweird.f32 %v6551_v58 }
 0x148   : > { %v578_v0 = vmul.f32 %v7679_v59, %v7679_v59  ;;  %v770_v27 = vmul.f32 %v7696_v12, %v7663_v36  ;;  %vm757_vm12 = vmor %vm755_vm9, %vm756_vm10  ;;  %v580_v42 = vmul.f32 %v7734_v40, %v7734_v40  ;;  %vm785_vm13 = vweird.f32 %v7673_v56 }
 0x149   : > { %v748_v2 = vsel %vm747_vm6, %v6549_v23, %v744_v62  ;;  %v751_v3 = vmul.f32 %v6551_v58, %v750_v63  ;;  %464 = vadd.xlane.f32.xlu1 %v7687_v1  ;;  %v764_v23 = vmul.f32 %v7646_v21, %v763_v9  ;;  %v7752_v62 = vld [vmem:[%s7514_s24 + $0x98] sm:$0xff]  ;;  %vm776_vm0 = vweird.f32 %v7696_v12 }
 0x14a   : > { %619 = vadd.xlane.f32.xlu2 %v578_v0  ;;  %v7689_v43 = vpop.xlane.xlu0 %613  ;;  %v1050_v17 = vmul.f32 %v748_v2, %v7542_v25  ;;  %v771_v41 = vmul.f32 %v7696_v12, %v770_v27  ;;  %v459_v52 = vpop.xlane.xlu2 %458  ;;  %vm777_vm2 = vmor %vm775_vm15, %vm776_vm0  ;;  %v7801_v27 = vld [vmem:[%s7514_s24 + $0xa8] sm:$0xff] }
 0x14b   : > { %v752_v10 = vmul.f32 0.5, %v751_v3  ;;  %v455_v11 = vpop.xlane.xlu1 %454 }
 0x14c   : > { %v515_v14 = vmul.f32 %v7531_v13, %v455_v11  ;;  %v1083_v25 = vmul.f32 %v7675_v57, %v1050_v17  ;;  %v7787_v11 = vld [vmem:[%s7514_s24 + $0xa0] sm:$0xff] }
 0x14d   : > { %v7702_v15 = vpop.eup %6554  ;;  %v753_v16 = vsub.f32 1.5, %v752_v10 }
 0x14e   : > { %v780_v18 = vmul.f32 %v7702_v15, %v7673_v56  ;;  %v7711_v6 = vadd.f32 %v7693_v8, %v1083_v25  ;;  %v7725_v30 = vsub.f32 %v7588_v47, %v515_v14  ;;  %v768_v47 = vsel %vm7715_vm11, %v7646_v21, %v764_v23 }
 0x14f   : > { %v754_v28 = vmul.f32 %v6551_v58, %v753_v16  ;;  %v1052_v60 = vmul.f32 %v768_v47, %v7540_v24  ;;  %v772_v21 = vmul.f32 0.5, %v771_v41  ;;  %vm786_vm14 = vweird.f32 %v7702_v15 }
 0x150   : > { %v1147_v33 = vpack.c.bf16 %v7711_v6, %v7708_v19  ;;  %v781_v35 = vmul.f32 %v7702_v15, %v780_v18  ;;  %v579_v37 = vmul.f32 %v7725_v30, %v7725_v30  ;;  %vm7772_vm1 = vmor %vm785_vm13, %vm786_vm14  ;;  %v671_v47 = vmul.f32 %v7689_v43, %v7531_v13 }
 0x151   : > { %v758_v34 = vsel %vm757_vm12, %v6551_v58, %v754_v28  ;;  %v517_v58 = vmul.f32 %v7531_v13, %v459_v52  ;;  %v1085_v0 = vmul.f32 %v7675_v57, %v1052_v60  ;;  %v773_v3 = vsub.f32 1.5, %v772_v21 }
 0x152   : > { %466 = vadd.xlane.f32.xlu2 %v7722_v29  ;;  %1239 = vmatmul.bf16.vlgmr.msra.gmra.mxu0 %v1147_v33  ;;  %v461_v39 = vpop.xlane.xlu0 %460  ;;  %v1051_v53 = vmul.f32 %v758_v34, %v7556_v32  ;;  %v782_v54 = vmul.f32 0.5, %v781_v35  ;;  %v703_v41 = vadd.f32 1e-05, %v671_v47 }
 0x153   : > { %621 = vadd.xlane.f32.xlu1 %v579_v37  ;;  %v518_v45 = vmul.f32 %v7531_v13, %v461_v39  ;;  %v7779_v9 = vadd.f32 %v7693_v8, %v1085_v0  ;;  %v774_v10 = vmul.f32 %v7696_v12, %v773_v3  ;;  %v7823_v39 = vld [vmem:[%s7514_s24 + $0xc8] sm:$0xff] }
 0x154   : > { %v1084_v63 = vmul.f32 %v7675_v57, %v1051_v53  ;;  %v783_v32 = vsub.f32 1.5, %v782_v54  ;;  %6556 = vrsqrt.f32 %v703_v41  ;;  %vm795_vm3 = vweird.f32 %v703_v41 }
 0x155   : > { %v7743_v55 = vsub.f32 %v7593_v48, %v518_v45  ;;  %v7756_v48 = vsub.f32 %v7585_v46, %v517_v58  ;;  %v778_v16 = vsel %vm777_vm2, %v7696_v12, %v774_v10 }
 0x156   : > { %v7764_v4 = vadd.f32 %v7693_v8, %v1084_v63  ;;  %v784_v46 = vmul.f32 %v7702_v15, %v783_v32  ;;  %v1053_v26 = vmul.f32 %v778_v16, %v7554_v31 }
 0x157   : > { %v582_v61 = vmul.f32 %v7743_v55, %v7743_v55  ;;  %v581_v5 = vmul.f32 %v7756_v48, %v7756_v48 }
 0x158   : > { %v788_v14 = vsel %vm7772_vm1, %v7702_v15, %v784_v46  ;;  %v1086_v12 = vmul.f32 %v7675_v57, %v1053_v26 }
 0x159   : > { %627 = vadd.xlane.f32.xlu0 %v582_v61  ;;  %v1054_v20 = vmul.f32 %v788_v14, %v7567_v38 }
 0x15a   : > { %623 = vadd.xlane.f32.xlu2 %v580_v42  ;;  %v463_v2 = vpop.xlane.xlu0 %462  ;;  %v7816_v34 = vadd.f32 %v7693_v8, %v1086_v12  ;;  %v6557_v45 = vpop.eup %6556 }
 0x15b   : > { %472 = vadd.xlane.f32.xlu1 %v7752_v62  ;;  %v519_v24 = vmul.f32 %v7531_v13, %v463_v2  ;;  %v1087_v28 = vmul.f32 %v7675_v57, %v1054_v20  ;;  %v790_v52 = vmul.f32 %v6557_v45, %v703_v41  ;;  %vm796_vm4 = vweird.f32 %v6557_v45 }
 0x15c   : > { %vm797_vm5 = vmor %vm795_vm3, %vm796_vm4 }
 0x15d   : > { %v7770_v17 = vsub.f32 %v7597_v49, %v519_v24  ;;  %v1148_v49 = vpack.c.bf16 %v7779_v9, %v7764_v4  ;;  %v7810_v33 = vadd.f32 %v7693_v8, %v1087_v28  ;;  %v791_v53 = vmul.f32 %v6557_v45, %v790_v52 }
 0x15f   : > { %v583_v36 = vmul.f32 %v7770_v17, %v7770_v17  ;;  %v1149_v37 = vpack.c.bf16 %v7810_v33, %v7816_v34  ;;  %v792_v60 = vmul.f32 0.5, %v791_v53  ;;  %v6380_v53 = vld [vmem:[%s12624_s3 + $0x10] sm:$0xff] }
 0x161   : > { %629 = vadd.xlane.f32.xlu0 %v583_v36  ;;  %v793_v21 = vsub.f32 1.5, %v792_v60 }
 0x162   : > { %625 = vadd.xlane.f32.xlu2 %v581_v5  ;;  %1244 = vmatmul.bf16.gmra.mxu0 %v1148_v49  ;;  %v469_v25 = vpop.xlane.xlu0 %468 }
 0x163   : > { %474 = vadd.xlane.f32.xlu1 %v7787_v11  ;;  %v522_v18 = vmul.f32 %v7531_v13, %v469_v25  ;;  %v794_v32 = vmul.f32 %v6557_v45, %v793_v21 }
 0x165   : > { %v7797_v23 = vsub.f32 %v7601_v50, %v522_v18  ;;  %v798_v24 = vsel %vm797_vm5, %v6557_v45, %v794_v32  ;;  %v7879_v32 = vld [vmem:[%s7514_s24 + $0xb0] sm:$0xff] }
 0x166   : > { %v1055_v14 = vmul.f32 %v798_v24, %v7578_v44 }
 0x167   : > { %v586_v15 = vmul.f32 %v7797_v23, %v7797_v23 }
 0x168   : > { %v1088_v44 = vmul.f32 %v7675_v57, %v1055_v14 }
 0x169   : > { %635 = vadd.xlane.f32.xlu0 %v586_v15 }
 0x16a   : > { %476 = vadd.xlane.f32.xlu2 %v7801_v27  ;;  %v471_v38 = vpop.xlane.xlu0 %470  ;;  %v7858_v45 = vadd.f32 %v7693_v8, %v1088_v44 }
 0x16b   : > { %v523_v50 = vmul.f32 %v7531_v13, %v471_v38  ;;  %v6381_v38 = vld [vmem:[%s12624_s3 + $0x18] sm:$0xff] }
 0x16c   : > { %1710 = vmatpush.bf16.msra.mxu1 %v6381_v38  ;;  %6456 = vmatpush.bf16.msra.mxu3 %v6381_v38 }
 0x16d   : > { %v7813_v31 = vsub.f32 %v7605_v51, %v523_v50  ;;  %v7829_v51 = vld [vmem:[%s7514_s24 + $0xd0] sm:$0xff] }
 0x16f   : > { %v587_v35 = vmul.f32 %v7813_v31, %v7813_v31 }
 0x170   : > { %1711 = vmatpush.bf16.msra.mxu1 %v6380_v53  ;;  %6457 = vmatpush.bf16.msra.mxu3 %v6380_v53 }
 0x171   : > { %637 = vadd.xlane.f32.xlu0 %v587_v35 }
 0x172   : > { %1249 = vmatmul.bf16.gmra.mxu0 %v1149_v37 }
 0x179   : > { %484 = vadd.xlane.f32.xlu0 %v7823_v39 }
 0x181   : > { %486 = vadd.xlane.f32.xlu0 %v7829_v51 }
 0x1ac   : > { %v616_v54 = vpop.xlane.xlu1 %615 }
 0x1ad   : > { %v672_v42 = vmul.f32 %v616_v54, %v7531_v13 }
 0x1af   : > { %v704_v58 = vadd.f32 1e-05, %v672_v42 }
 0x1b1   : > { %6558 = vrsqrt.f32 %v704_v58  ;;  %vm805_vm6 = vweird.f32 %v704_v58 }
 0x1b4   : > { %v618_v61 = vpop.xlane.xlu1 %617 }
 0x1b5   : > { %v673_v63 = vmul.f32 %v618_v61, %v7531_v13 }
 0x1b7   : > { %v6559_v43 = vpop.eup %6558  ;;  %v705_v2 = vadd.f32 1e-05, %v673_v63 }
 0x1b8   : > { %v800_v0 = vmul.f32 %v6559_v43, %v704_v58  ;;  %vm806_vm7 = vweird.f32 %v6559_v43 }
 0x1b9   : > { %6560 = vrsqrt.f32 %v705_v2  ;;  %vm807_vm8 = vmor %vm805_vm6, %vm806_vm7  ;;  %vm815_vm9 = vweird.f32 %v705_v2 }
 0x1ba   : > { %v801_v3 = vmul.f32 %v6559_v43, %v800_v0  ;;  %v6379_v0 = vld [vmem:[%s12624_s3 + $0x8] sm:$0xff] }
 0x1bb   : > { %1712 = vmatpush.bf16.msra.mxu1 %v6379_v0  ;;  %6458 = vmatpush.bf16.msra.mxu3 %v6379_v0 }
 0x1bc   : > { %v802_v46 = vmul.f32 0.5, %v801_v3  ;;  %v465_v36 = vpop.xlane.xlu1 %464 }
 0x1bd   : > { %v620_v56 = vpop.xlane.xlu2 %619  ;;  %v520_v49 = vmul.f32 %v7531_v13, %v465_v36 }
 0x1be   : > { %v803_v5 = vsub.f32 1.5, %v802_v46  ;;  %v674_v10 = vmul.f32 %v620_v56, %v7531_v13 }
 0x1bf   : > { %v7839_v18 = vpop.eup %6560  ;;  %v7842_v20 = vsub.f32 %v7687_v1, %v520_v49 }
 0x1c0   : > { %v804_v25 = vmul.f32 %v6559_v43, %v803_v5  ;;  %v7837_v16 = vadd.f32 1e-05, %v674_v10  ;;  %v810_v15 = vmul.f32 %v7839_v18, %v705_v2  ;;  %vm816_vm10 = vweird.f32 %v7839_v18  ;;  %v7888_v2 = vld [vmem:[%s12623_s2] ss:$0 sm:$0xff] }
 0x1c1   : > { %v584_v28 = vmul.f32 %v7842_v20, %v7842_v20  ;;  %vm7890_vm11 = vmor %vm815_vm9, %vm816_vm10 }
 0x1c2   : > { %v808_v26 = vsel %vm807_vm8, %v6559_v43, %v804_v25  ;;  %6562 = vrsqrt.f32 %v7837_v16  ;;  %v811_v50 = vmul.f32 %v7839_v18, %v810_v15  ;;  %vm825_vm13 = vweird.f32 %v7837_v16 }
 0x1c3   : > { %v1056_v12 = vmul.f32 %v808_v26, %v7639_v7  ;;  %631 = vadd.xlane.f32.xlu1 %v584_v28  ;;  %v6378_v28 = vld [vmem:[%s12624_s3] sm:$0xff] }
 0x1c4   : > { %v812_v37 = vmul.f32 0.5, %v811_v50  ;;  %v7916_v50 = vld [vmem:[%s7514_s24 + $0xb8] sm:$0xff]  ;;  %1713 = vmatpush.bf16.msra.mxu1 %v6378_v28  ;;  %6459 = vmatpush.bf16.msra.mxu3 %v6378_v28 }
 0x1c5   : > { %v467_v1 = vpop.xlane.xlu2 %466  ;;  %v1089_v35 = vmul.f32 %v7675_v57, %v1056_v12 }
 0x1c6   : > { %v521_v47 = vmul.f32 %v7531_v13, %v467_v1  ;;  %v622_v41 = vpop.xlane.xlu1 %621  ;;  %v813_v42 = vsub.f32 1.5, %v812_v37 }
 0x1c7   : > { %v675_v7 = vmul.f32 %v622_v41, %v7531_v13  ;;  %v7861_v52 = vadd.f32 %v7693_v8, %v1089_v35 }
 0x1c8   : > { %v6563_v54 = vpop.eup %6562  ;;  %v7867_v58 = vsub.f32 %v7722_v29, %v521_v47  ;;  %v814_v43 = vmul.f32 %v7839_v18, %v813_v42 }
 0x1c9   : > { %v820_v60 = vmul.f32 %v6563_v54, %v7837_v16  ;;  %v7870_v21 = vadd.f32 1e-05, %v675_v7  ;;  %v1150_v61 = vpack.c.bf16 %v7861_v52, %v7858_v45  ;;  %vm826_vm12 = vweird.f32 %v6563_v54 }
 0x1ca   : > { %v585_v63 = vmul.f32 %v7867_v58, %v7867_v58  ;;  %v818_v10 = vsel %vm7890_vm11, %v7839_v18, %v814_v43  ;;  %vm827_vm14 = vmor %vm825_vm13, %vm826_vm12  ;;  %vm1657_vm11 = vcmask 523264  }
 0x1cb   : > { %v821_v29 = vmul.f32 %v6563_v54, %v820_v60  ;;  %6564 = vrsqrt.f32 %v7870_v21  ;;  %1254 = vmatmul.bf16.gmra.mxu0 %v1150_v61  ;;  %478 = vadd.xlane.f32.xlu1 %v7879_v32  ;;  %v1057_v35 = vmul.f32 %v818_v10, %v7649_v22  ;;  %vm835_vm15 = vweird.f32 %v7870_v21 }
 0x1cc   : > { %633 = vadd.xlane.f32.xlu2 %v585_v63  ;;  %v628_v3 = vpop.xlane.xlu0 %627 }
 0x1cd   : > { %v822_v46 = vmul.f32 0.5, %v821_v29  ;;  %v624_v56 = vpop.xlane.xlu2 %623  ;;  %v678_v5 = vmul.f32 %v628_v3, %v7531_v13  ;;  %v1090_v53 = vmul.f32 %v7675_v57, %v1057_v35 }
 0x1ce   : > { %v676_v36 = vmul.f32 %v624_v56, %v7531_v13  ;;  %v473_v49 = vpop.xlane.xlu1 %472 }
 0x1cf   : > { %v823_v14 = vsub.f32 1.5, %v822_v46  ;;  %v524_v25 = vmul.f32 %v7531_v13, %v473_v49  ;;  %v1240_v26 = vpop.f32.mrf.mxu0  ;;  %v7901_v15 = vadd.f32 1e-05, %v678_v5  ;;  %v7948_v5 = vld [vmem:[%s7514_s24 + $0xc0] sm:$0xff] }
 0x1d0   : > { %v7907_v12 = vadd.f32 1e-05, %v676_v36  ;;  %v7910_v18 = vadd.f32 %v7888_v2, %v1240_v26  ;;  %v7954_v36 = vadd.f32 %v7693_v8, %v1090_v53 }
 0x1d1   : > { %v7912_v44 = vpop.eup %6564  ;;  %v824_v38 = vmul.f32 %v6563_v54, %v823_v14  ;;  %6566 = vrsqrt.f32 %v7901_v15  ;;  %v7919_v1 = vsub.f32 %v7752_v62, %v524_v25  ;;  %vm865_vm7 = vweird.f32 %v7901_v15 }
 0x1d2   : > { %v830_v16 = vmul.f32 %v7912_v44, %v7870_v21  ;;  %6568 = vrsqrt.f32 %v7907_v12  ;;  %v1352_v47 = vmul.f32 0.044715, %v7910_v18  ;;  %vm836_vm0 = vweird.f32 %v7912_v44 }
 0x1d3   : > { %v828_v37 = vsel %vm827_vm14, %v6563_v54, %v824_v38  ;;  %v588_v41 = vmul.f32 %v7919_v1, %v7919_v1  ;;  %vm7961_vm1 = vmor %vm835_vm15, %vm836_vm0  ;;  %vm845_vm2 = vweird.f32 %v7907_v12 }
 0x1d4   : > { %v831_v62 = vmul.f32 %v7912_v44, %v830_v16  ;;  %480 = vadd.xlane.f32.xlu2 %v7916_v50  ;;  %v1058_v22 = vmul.f32 %v828_v37, %v7679_v59  ;;  %v1384_v60 = vmul.f32 %v1352_v47, %v7910_v18 }
 0x1d5   : > { %639 = vadd.xlane.f32.xlu1 %v588_v41  ;;  %v626_v7 = vpop.xlane.xlu2 %625 }
 0x1d6   : > { %v832_v42 = vmul.f32 0.5, %v831_v62  ;;  %v677_v54 = vmul.f32 %v626_v7, %v7531_v13  ;;  %v475_v61 = vpop.xlane.xlu1 %474  ;;  %v1091_v0 = vmul.f32 %v7675_v57, %v1058_v22  ;;  %v1416_v14 = vmul.f32 %v1384_v60, %v7910_v18 }
 0x1d7   : > { %v7935_v43 = vpop.eup %6566  ;;  %v525_v63 = vmul.f32 %v7531_v13, %v475_v61  ;;  %v1242_v29 = vpop.f32.mrf.mxu0 }
 0x1d8   : > { %v6569_v3 = vpop.eup %6568  ;;  %v833_v59 = vsub.f32 1.5, %v832_v42  ;;  %v7941_v24 = vadd.f32 1e-05, %v677_v54  ;;  %v7945_v56 = vadd.f32 %v7888_v2, %v1242_v29  ;;  %v860_v21 = vmul.f32 %v7935_v43, %v7901_v15 }
 0x1d9   : > { %v840_v46 = vmul.f32 %v6569_v3, %v7907_v12  ;;  %v7951_v10 = vsub.f32 %v7787_v11, %v525_v63  ;;  %v7969_v38 = vadd.f32 %v7693_v8, %v1091_v0  ;;  %vm846_vm3 = vweird.f32 %v6569_v3 }
 0x1da   : > { %v834_v49 = vmul.f32 %v7912_v44, %v833_v59  ;;  %6570 = vrsqrt.f32 %v7941_v24  ;;  %v1353_v11 = vmul.f32 0.044715, %v7945_v56  ;;  %v1448_v22 = vadd.f32 %v1416_v14, %v7910_v18  ;;  %vm7987_vm4 = vmor %vm845_vm2, %vm846_vm3 }
 0x1db   : > { %v841_v26 = vmul.f32 %v6569_v3, %v840_v46  ;;  %v589_v28 = vmul.f32 %v7951_v10, %v7951_v10  ;;  %12903 = vst [vmem:[#allocation17_spill] sm:$0xff] %v7969_v38  ;;  %v1151_v37 = vpack.c.bf16 %v7969_v38, %v7954_v36  ;;  %v861_v53 = vmul.f32 %v7935_v43, %v860_v21  ;;  %v8004_v21 = vld [vmem:[%s7514_s24 + $0xd8] sm:$0xff] }
 0x1dc   : > { %482 = vadd.xlane.f32.xlu2 %v7948_v5  ;;  %v1385_v16 = vmul.f32 %v1353_v11, %v7945_v56  ;;  %v838_v41 = vsel %vm7961_vm1, %v7912_v44, %v834_v49  ;;  %v1480_v29 = vmul.f32 0.7978846, %v1448_v22  ;;  %vm855_vm5 = vweird.f32 %v7941_v24 }
 0x1dd   : > { %v842_v35 = vmul.f32 0.5, %v841_v26  ;;  %641 = vadd.xlane.f32.xlu1 %v589_v28  ;;  %v477_v47 = vpop.xlane.xlu2 %476  ;;  %1259 = vmatmul.bf16.gmra.mxu0 %v1151_v37  ;;  %v1059_v46 = vmul.f32 %v838_v41, %v7725_v30  ;;  %v862_v25 = vmul.f32 0.5, %v861_v53  ;;  %vm866_vm8 = vweird.f32 %v7935_v43 }
 0x1de   : > { %v526_v62 = vmul.f32 %v7531_v13, %v477_v47  ;;  %v1417_v60 = vmul.f32 %v1385_v16, %v7945_v56  ;;  %6572 = vtanh.f32 %v1480_v29  ;;  %vm8036_vm10 = vmor %vm865_vm7, %vm866_vm8 }
 0x1df   : > { %v843_v7 = vsub.f32 1.5, %v842_v35  ;;  %v1245_v42 = vpop.f32.mrf.mxu0  ;;  %v1092_v16 = vmul.f32 %v7675_v57, %v1059_v46  ;;  %v863_v47 = vsub.f32 1.5, %v862_v25 }
 0x1e0   : > { %v7983_v54 = vpop.eup %6570  ;;  %v7992_v44 = vadd.f32 %v7888_v2, %v1245_v42  ;;  %v7995_v63 = vsub.f32 %v7801_v27, %v526_v62  ;;  %v1449_v14 = vadd.f32 %v1417_v60, %v7945_v56 }
 0x1e1   : > { %v844_v0 = vmul.f32 %v6569_v3, %v843_v7  ;;  %v850_v59 = vmul.f32 %v7983_v54, %v7941_v24  ;;  %vm856_vm6 = vweird.f32 %v7983_v54  ;;  %v8024_v53 = vadd.f32 %v7693_v8, %v1092_v16 }
 0x1e2   : > { %v1354_v49 = vmul.f32 0.044715, %v7992_v44  ;;  %v590_v12 = vmul.f32 %v7995_v63, %v7995_v63  ;;  %v1481_v28 = vmul.f32 0.7978846, %v1449_v14  ;;  %vm8029_vm9 = vmor %vm855_vm5, %vm856_vm6  ;;  %v864_v46 = vmul.f32 %v7935_v43, %v863_v47 }
 0x1e3   : > { %v848_v27 = vsel %vm7987_vm4, %v6569_v3, %v844_v0  ;;  %v851_v26 = vmul.f32 %v7983_v54, %v850_v59  ;;  %v1320_v14 = vmul.f32 0.5, %v7910_v18 }
 0x1e4   : > { %v1386_v11 = vmul.f32 %v1354_v49, %v7992_v44  ;;  %643 = vadd.xlane.f32.xlu2 %v590_v12  ;;  %v1060_v30 = vmul.f32 %v848_v27, %v7734_v40  ;;  %6574 = vtanh.f32 %v1481_v28  ;;  %v6573_v42 = vpop.eup %6572  ;;  %v1321_v27 = vmul.f32 0.5, %v7945_v56 }
 0x1e5   : > { %v852_v35 = vmul.f32 0.5, %v851_v26  ;;  %488 = vadd.xlane.f32.xlu1 %v8004_v21  ;;  %v1544_v0 = vadd.f32 1.0, %v6573_v42  ;;  %v868_v18 = vsel %vm8036_vm10, %v7935_v43, %v864_v46 }
 0x1e6   : > { %v1093_v37 = vmul.f32 %v7675_v57, %v1060_v30  ;;  %v1418_v3 = vmul.f32 %v1386_v11, %v7992_v44  ;;  %v8045_v11 = vpop.xlane.xlu0 %629 }
 0x1e7   : > { %v853_v41 = vsub.f32 1.5, %v852_v35  ;;  %v1247_v62 = vpop.f32.mrf.mxu0  ;;  %v1576_v35 = vmul.f32 %v1544_v0, %v1320_v14  ;;  %v1322_v14 = vmul.f32 0.5, %v7992_v44 }
 0x1e8   : > { %v1248_v40 = vadd.f32 %v7888_v2, %v1247_v62  ;;  %v8020_v22 = vadd.f32 %v7693_v8, %v1093_v37  ;;  %v1450_v7 = vadd.f32 %v1418_v3, %v7992_v44  ;;  %v1062_v62 = vmul.f32 %v868_v18, %v7743_v55 }
 0x1e9   : > { %v854_v24 = vmul.f32 %v7983_v54, %v853_v41 }
 0x1ea   : > { %12906 = vst [vmem:[#allocation18_spill] sm:$0xff] %v8020_v22  ;;  %v1355_v60 = vmul.f32 0.044715, %v1248_v40  ;;  %v1152_v29 = vpack.c.bf16 %v8020_v22, %v8024_v53  ;;  %v6575_v59 = vpop.eup %6574  ;;  %v1482_v12 = vmul.f32 0.7978846, %v1450_v7  ;;  %v8055_v7 = vld [vmem:[%s7514_s24 + $0xe0] sm:$0xff] }
 0x1eb   : > { %v1545_v25 = vadd.f32 1.0, %v6575_v59  ;;  %v858_v26 = vsel %vm8029_vm9, %v7983_v54, %v854_v24 }
 0x1ec   : > { %v1387_v49 = vmul.f32 %v1355_v60, %v1248_v40  ;;  %6576 = vtanh.f32 %v1482_v12  ;;  %v1061_v54 = vmul.f32 %v858_v26, %v7756_v48  ;;  %v1095_v48 = vmul.f32 %v7675_v57, %v1062_v62 }
 0x1ed   : > { %1264 = vmatmul.bf16.gmra.mxu0 %v1152_v29  ;;  %v1577_v16 = vmul.f32 %v1545_v25, %v1321_v27  ;;  %490 = vadd.xlane.f32.xlu1 %v8055_v7  ;;  %v1323_v27 = vmul.f32 0.5, %v1248_v40 }
 0x1ee   : > { %v1419_v30 = vmul.f32 %v1387_v49, %v1248_v40  ;;  %v1094_v43 = vmul.f32 %v7675_v57, %v1061_v54  ;;  %v636_v60 = vpop.xlane.xlu0 %635  ;;  %v8065_v15 = vadd.f32 %v7693_v8, %v1095_v48 }
 0x1ef   : > { %v1250_v28 = vpop.f32.mrf.mxu0  ;;  %v1608_v3 = vpack.c.bf16 %v1577_v16, %v1576_v35 }
 0x1f0   : > { %v1251_v56 = vadd.f32 %v7888_v2, %v1250_v28  ;;  %v1451_v37 = vadd.f32 %v1419_v30, %v1248_v40  ;;  %v8062_v46 = vadd.f32 %v7693_v8, %v1094_v43  ;;  %12912 = vst [vmem:[#allocation20_spill] sm:$0xff] %v8065_v15 }
 0x1f1   : > { %6089 = vmatmul.msk.bf16.vlgmr.msra.gmra.mxu1 %vm1657_vm11, %v1608_v3 }
 0x1f2   : > { %v1356_v47 = vmul.f32 0.044715, %v1251_v56  ;;  %v1483_v41 = vmul.f32 0.7978846, %v1451_v37  ;;  %v6577_v24 = vpop.eup %6576  ;;  %12911 = vst [vmem:[#allocation19_spill] sm:$0xff] %v8062_v46  ;;  %v1153_v28 = vpack.c.bf16 %v8065_v15, %v8062_v46 }
 0x1f3   : > { %v1546_v55 = vadd.f32 1.0, %v6577_v24  ;;  %v1324_v24 = vmul.f32 0.5, %v1251_v56 }
 0x1f4   : > { %v1388_v42 = vmul.f32 %v1356_v47, %v1251_v56  ;;  %6578 = vtanh.f32 %v1483_v41 }
 0x1f5   : > { %v1578_v35 = vmul.f32 %v1546_v55, %v1322_v14 }
 0x1f6   : > { %v1420_v61 = vmul.f32 %v1388_v42, %v1251_v56  ;;  %v638_v37 = vpop.xlane.xlu0 %637 }
 0x1f7   : > { %v1252_v29 = vpop.f32.mrf.mxu0 }
 0x1f8   : > { %v1253_v0 = vadd.f32 %v7888_v2, %v1252_v29  ;;  %v1452_v59 = vadd.f32 %v1420_v61, %v1251_v56  ;;  %v679_v56 = vmul.f32 %v8045_v11, %v7531_v13 }
 0x1fa   : > { %v6579_v49 = vpop.eup %6578  ;;  %v1357_v12 = vmul.f32 0.044715, %v1253_v0  ;;  %v1484_v30 = vmul.f32 0.7978846, %v1452_v59  ;;  %v1325_v61 = vmul.f32 0.5, %v1253_v0 }
 0x1fb   : > { %v1547_v25 = vadd.f32 1.0, %v6579_v49 }
 0x1fc   : > { %v1389_v26 = vmul.f32 %v1357_v12, %v1253_v0  ;;  %6580 = vtanh.f32 %v1484_v30 }
 0x1fd   : > { %v1579_v16 = vmul.f32 %v1547_v25, %v1323_v27  ;;  %1269 = vmatmul.bf16.gmra.mxu0 %v1153_v28  ;;  %v682_v25 = vmul.f32 %v636_v60, %v7531_v13 }
 0x1fe   : > { %v1421_v18 = vmul.f32 %v1389_v26, %v1253_v0  ;;  %v485_v40 = vpop.xlane.xlu0 %484 }
 0x1ff   : > { %v1609_v3 = vpack.c.bf16 %v1579_v16, %v1578_v35  ;;  %v530_v41 = vmul.f32 %v7531_v13, %v485_v40  ;;  %v714_v26 = vadd.f32 1e-05, %v682_v25 }
 0x200   : > { %v1453_v54 = vadd.f32 %v1421_v18, %v1253_v0  ;;  %v711_v0 = vadd.f32 1e-05, %v679_v56 }
 0x201   : > { %6090 = vmatmul.msk.bf16.gmra.mxu1 %vm1657_vm11, %v1609_v3  ;;  %v8073_v42 = vsub.f32 %v7823_v39, %v530_v41  ;;  %vm905_vm15 = vweird.f32 %v714_v26 }
 0x202   : > { %v1485_v47 = vmul.f32 0.7978846, %v1453_v54  ;;  %v6581_v44 = vpop.eup %6580  ;;  %vm875_vm12 = vweird.f32 %v711_v0 }
 0x203   : > { %v1548_v62 = vadd.f32 1.0, %v6581_v44  ;;  %v594_v48 = vmul.f32 %v8073_v42, %v8073_v42 }
 0x204   : > { %6582 = vtanh.f32 %v1485_v47 }
 0x205   : > { %v1580_v59 = vmul.f32 %v1548_v62, %v1324_v24  ;;  %651 = vadd.xlane.f32.xlu1 %v594_v48  ;;  %6584 = vrsqrt.f32 %v711_v0 }
 0x206   : > { %v487_v49 = vpop.xlane.xlu0 %486  ;;  %6586 = vrsqrt.f32 %v714_v26 }
 0x207   : > { %v531_v14 = vmul.f32 %v7531_v13, %v487_v49 }
 0x209   : > { %v8079_v27 = vsub.f32 %v7829_v51, %v531_v14  ;;  %v683_v51 = vmul.f32 %v638_v37, %v7531_v13 }
 0x20a   : > { %v6583_v43 = vpop.eup %6582 }
 0x20b   : > { %v1549_v29 = vadd.f32 1.0, %v6583_v43  ;;  %v595_v39 = vmul.f32 %v8079_v27, %v8079_v27  ;;  %v6585_v30 = vpop.eup %6584  ;;  %v8092_v47 = vadd.f32 1e-05, %v683_v51 }
 0x20c   : > { %v870_v28 = vmul.f32 %v6585_v30, %v711_v0  ;;  %v8088_v35 = vpop.eup %6586  ;;  %vm876_vm13 = vweird.f32 %v6585_v30 }
 0x20d   : > { %v1581_v55 = vmul.f32 %v1549_v29, %v1325_v61  ;;  %653 = vadd.xlane.f32.xlu1 %v595_v39  ;;  %v900_v54 = vmul.f32 %v8088_v35, %v714_v26  ;;  %vm8108_vm14 = vmor %vm875_vm12, %vm876_vm13  ;;  %vm906_vm0 = vweird.f32 %v8088_v35  ;;  %vm915_vm10 = vweird.f32 %v8092_v47 }
 0x20e   : > { %v871_v18 = vmul.f32 %v6585_v30, %v870_v28  ;;  %vm8131_vm3 = vmor %vm905_vm15, %vm906_vm0 }
 0x20f   : > { %v1610_v12 = vpack.c.bf16 %v1581_v55, %v1580_v59  ;;  %v901_v60 = vmul.f32 %v8088_v35, %v900_v54 }
 0x210   : > { %v872_v44 = vmul.f32 0.5, %v871_v18 }
 0x211   : > { %6091 = vmatmul.msk.bf16.gmra.mxu1 %vm1657_vm11, %v1610_v12  ;;  %v902_v29 = vmul.f32 0.5, %v901_v60 }
 0x212   : > { %v873_v62 = vsub.f32 1.5, %v872_v44 }
 0x213   : > { %v903_v56 = vsub.f32 1.5, %v902_v29 }
 0x214   : > { %v874_v49 = vmul.f32 %v6585_v30, %v873_v62 }
 0x216   : > { %v878_v18 = vsel %vm8108_vm14, %v6585_v30, %v874_v49 }
 0x217   : > { %v1063_v49 = vmul.f32 %v878_v18, %v7770_v17 }
 0x236   : > { %v632_v16 = vpop.xlane.xlu1 %631 }
 0x237   : > { %v680_v3 = vmul.f32 %v632_v16, %v7531_v13 }
 0x239   : > { %v712_v11 = vadd.f32 1e-05, %v680_v3 }
 0x23b   : > { %6588 = vrsqrt.f32 %v712_v11  ;;  %vm885_vm1 = vweird.f32 %v712_v11 }
 0x23c   : > { %6590 = vrsqrt.f32 %v8092_v47 }
 0x23e   : > { %v479_v41 = vpop.xlane.xlu1 %478 }
 0x23f   : > { %v634_v40 = vpop.xlane.xlu2 %633  ;;  %v527_v43 = vmul.f32 %v7531_v13, %v479_v41 }
 0x240   : > { %v681_v37 = vmul.f32 %v634_v40, %v7531_v13 }
 0x241   : > { %v6589_v61 = vpop.eup %6588  ;;  %v8101_v48 = vsub.f32 %v7879_v32, %v527_v43 }
 0x242   : > { %v8098_v24 = vadd.f32 1e-05, %v681_v37  ;;  %v880_v59 = vmul.f32 %v6589_v61, %v712_v11  ;;  %v8104_v55 = vpop.eup %6590  ;;  %vm886_vm2 = vweird.f32 %v6589_v61  ;;  %v904_v37 = vmul.f32 %v8088_v35, %v903_v56 }
 0x243   : > { %v591_v12 = vmul.f32 %v8101_v48, %v8101_v48  ;;  %v910_v32 = vmul.f32 %v8104_v55, %v8092_v47  ;;  %vm887_vm4 = vmor %vm885_vm1, %vm886_vm2  ;;  %vm916_vm12 = vweird.f32 %v8104_v55 }
 0x244   : > { %6592 = vrsqrt.f32 %v8098_v24  ;;  %v881_v39 = vmul.f32 %v6589_v61, %v880_v59  ;;  %v8137_v59 = vld [vmem:[%s7514_s24 + $0xe8] sm:$0xff]  ;;  %vm895_vm6 = vweird.f32 %v8098_v24  ;;  %vm8224_vm14 = vmor %vm915_vm10, %vm916_vm12 }
 0x245   : > { %645 = vadd.xlane.f32.xlu2 %v591_v12  ;;  %v911_v29 = vmul.f32 %v8104_v55, %v910_v32 }
 0x246   : > { %v882_v25 = vmul.f32 0.5, %v881_v39  ;;  %v908_v39 = vsel %vm8131_vm3, %v8088_v35, %v904_v37 }
 0x247   : > { %v481_v0 = vpop.xlane.xlu2 %480  ;;  %v1066_v37 = vmul.f32 %v908_v39, %v7797_v23 }
 0x248   : > { %v528_v28 = vmul.f32 %v7531_v13, %v481_v0  ;;  %v640_v51 = vpop.xlane.xlu1 %639  ;;  %v1255_v16 = vpop.f32.mrf.mxu0  ;;  %v883_v60 = vsub.f32 1.5, %v882_v25  ;;  %v912_v25 = vmul.f32 0.5, %v911_v29 }
 0x249   : > { %v684_v3 = vmul.f32 %v640_v51, %v7531_v13  ;;  %v8120_v54 = vadd.f32 %v7888_v2, %v1255_v16 }
 0x24a   : > { %v6593_v44 = vpop.eup %6592  ;;  %v8123_v40 = vsub.f32 %v7916_v50, %v528_v28  ;;  %v884_v11 = vmul.f32 %v6589_v61, %v883_v60 }
 0x24b   : > { %v890_v41 = vmul.f32 %v6593_v44, %v8098_v24  ;;  %v8127_v30 = vadd.f32 1e-05, %v684_v3  ;;  %v1358_v62 = vmul.f32 0.044715, %v8120_v54  ;;  %vm896_vm5 = vweird.f32 %v6593_v44  ;;  %v8175_v24 = vld [vmem:[%s7514_s24 + $0xf0] sm:$0xff] }
 0x24c   : > { %v592_v50 = vmul.f32 %v8123_v40, %v8123_v40  ;;  %v888_v14 = vsel %vm887_vm4, %v6589_v61, %v884_v11  ;;  %v1096_v61 = vmul.f32 %v7675_v57, %v1063_v49  ;;  %vm897_vm7 = vmor %vm895_vm6, %vm896_vm5 }
 0x24d   : > { %v891_v12 = vmul.f32 %v6593_v44, %v890_v41  ;;  %6594 = vrsqrt.f32 %v8127_v30  ;;  %v1390_v26 = vmul.f32 %v1358_v62, %v8120_v54  ;;  %492 = vadd.xlane.f32.xlu2 %v8137_v59  ;;  %v1064_v32 = vmul.f32 %v888_v14, %v7842_v20 }
 0x24e   : > { %647 = vadd.xlane.f32.xlu0 %v592_v50  ;;  %v8180_v49 = vadd.f32 %v7693_v8, %v1096_v61  ;;  %vm925_vm8 = vweird.f32 %v8127_v30 }
 0x24f   : > { %v892_v56 = vmul.f32 0.5, %v891_v12  ;;  %v483_v0 = vpop.xlane.xlu2 %482  ;;  %v1422_v17 = vmul.f32 %v1390_v26, %v8120_v54  ;;  %v1097_v60 = vmul.f32 %v7675_v57, %v1064_v32  ;;  %v913_v32 = vsub.f32 1.5, %v912_v25 }
 0x250   : > { %v529_v28 = vmul.f32 %v7531_v13, %v483_v0  ;;  %v642_v51 = vpop.xlane.xlu1 %641  ;;  %v1257_v16 = vpop.f32.mrf.mxu0  ;;  %12918 = vst [vmem:[#allocation22_spill] sm:$0xff] %v8180_v49 }
 0x251   : > { %v893_v18 = vsub.f32 1.5, %v892_v56  ;;  %v685_v35 = vmul.f32 %v642_v51, %v7531_v13  ;;  %v8154_v3 = vadd.f32 %v7888_v2, %v1257_v16  ;;  %v1454_v41 = vadd.f32 %v1422_v17, %v8120_v54 }
 0x252   : > { %v8159_v20 = vsub.f32 %v7948_v5, %v529_v28  ;;  %v8169_v50 = vadd.f32 %v7693_v8, %v1097_v60 }
 0x253   : > { %v8163_v62 = vpop.eup %6594  ;;  %v894_v43 = vmul.f32 %v6593_v44, %v893_v18  ;;  %v8165_v29 = vadd.f32 1e-05, %v685_v35  ;;  %v1359_v11 = vmul.f32 0.044715, %v8154_v3  ;;  %v1486_v0 = vmul.f32 0.7978846, %v1454_v41 }
 0x254   : > { %12917 = vst [vmem:[#allocation21_spill] sm:$0xff] %v8169_v50  ;;  %v920_v5 = vmul.f32 %v8163_v62, %v8127_v30  ;;  %v593_v23 = vmul.f32 %v8159_v20, %v8159_v20  ;;  %v1154_v39 = vpack.c.bf16 %v8169_v50, %v8180_v49  ;;  %vm926_vm9 = vweird.f32 %v8163_v62 }
 0x255   : > { %v898_v12 = vsel %vm897_vm7, %v6593_v44, %v894_v43  ;;  %6596 = vrsqrt.f32 %v8165_v29  ;;  %v1391_v26 = vmul.f32 %v1359_v11, %v8154_v3  ;;  %494 = vadd.xlane.f32.xlu2 %v8175_v24  ;;  %v1099_v44 = vmul.f32 %v7675_v57, %v1066_v37  ;;  %vm8209_vm13 = vmor %vm925_vm8, %vm926_vm9 }
 0x256   : > { %v921_v14 = vmul.f32 %v8163_v62, %v920_v5  ;;  %649 = vadd.xlane.f32.xlu0 %v593_v23  ;;  %v1065_v56 = vmul.f32 %v898_v12, %v7867_v58  ;;  %1274 = vmatmul.bf16.gmra.mxu0 %v1154_v39  ;;  %6598 = vtanh.f32 %v1486_v0  ;;  %v914_v43 = vmul.f32 %v8104_v55, %v913_v32  ;;  %v8217_v23 = vld [vmem:[%s7514_s24 + $0xf8] sm:$0xff] }
 0x257   : > { %v644_v17 = vpop.xlane.xlu2 %643  ;;  %v1423_v28 = vmul.f32 %v1391_v26, %v8154_v3  ;;  %v8220_v12 = vadd.f32 %v7693_v8, %v1099_v44  ;;  %vm935_vm1 = vweird.f32 %v8165_v29 }
 0x258   : > { %v922_v51 = vmul.f32 0.5, %v921_v14  ;;  %v686_v16 = vmul.f32 %v644_v17, %v7531_v13  ;;  %v489_v61 = vpop.xlane.xlu1 %488  ;;  %v1098_v58 = vmul.f32 %v7675_v57, %v1065_v56  ;;  %v918_v17 = vsel %vm8224_vm14, %v8104_v55, %v914_v43 }
 0x259   : > { %v532_v25 = vmul.f32 %v7531_v13, %v489_v61  ;;  %v1455_v18 = vadd.f32 %v1423_v28, %v8154_v3  ;;  %12922 = vst [vmem:[#allocation24_spill] sm:$0xff] %v8220_v12 }
 0x25a   : > { %v923_v35 = vsub.f32 1.5, %v922_v51  ;;  %v718_v60 = vadd.f32 1e-05, %v686_v16  ;;  %v8200_v37 = vadd.f32 %v7693_v8, %v1098_v58 }
 0x25b   : > { %v8202_v41 = vpop.eup %6596  ;;  %v8214_v5 = vsub.f32 %v8004_v21, %v532_v25  ;;  %v1487_v26 = vmul.f32 0.7978846, %v1455_v18  ;;  %v1260_v21 = vpop.f32.mrf.mxu0 }
 0x25c   : > { %12919 = vst [vmem:[#allocation23_spill] sm:$0xff] %v8200_v37  ;;  %v924_v30 = vmul.f32 %v8163_v62, %v923_v35  ;;  %v930_v39 = vmul.f32 %v8202_v41, %v8165_v29  ;;  %6600 = vrsqrt.f32 %v718_v60  ;;  %v8232_v56 = vadd.f32 %v7888_v2, %v1260_v21  ;;  %v6599_v28 = vpop.eup %6598 }
 0x25d   : > { %v596_v0 = vmul.f32 %v8214_v5, %v8214_v5  ;;  %v1155_v47 = vpack.c.bf16 %v8220_v12, %v8200_v37  ;;  %6602 = vtanh.f32 %v1487_v26  ;;  %v1550_v18 = vadd.f32 1.0, %v6599_v28 }
 0x25e   : > { %v928_v32 = vsel %vm8209_vm13, %v8163_v62, %v924_v30  ;;  %496 = vadd.xlane.f32.xlu0 %v8217_v23  ;;  %v1360_v44 = vmul.f32 0.044715, %v8232_v56  ;;  %v931_v51 = vmul.f32 %v8202_v41, %v930_v39  ;;  %v1067_v62 = vmul.f32 %v918_v17, %v7813_v31 }
 0x25f   : > { %655 = vadd.xlane.f32.xlu2 %v596_v0  ;;  %1279 = vmatmul.bf16.vlgmr.msra.gmra.mxu2 %v1155_v47  ;;  %v1068_v16 = vmul.f32 %v928_v32, %v7919_v1  ;;  %v1326_v26 = vmul.f32 0.5, %v8120_v54  ;;  %v1327_v1 = vmul.f32 0.5, %v8154_v3  ;;  %vm945_vm15 = vweird.f32 %v718_v60 }
 0x260   : > { %v1392_v61 = vmul.f32 %v1360_v44, %v8232_v56  ;;  %v932_v55 = vmul.f32 0.5, %v931_v51  ;;  %v1100_v0 = vmul.f32 %v7675_v57, %v1067_v62  ;;  %vm936_vm2 = vweird.f32 %v8202_v41 }
 0x261   : > { %v1101_v14 = vmul.f32 %v7675_v57, %v1068_v16  ;;  %v1582_v17 = vmul.f32 %v1550_v18, %v1326_v26  ;;  %vm937_vm4 = vmor %vm935_vm1, %vm936_vm2 }
 0x262   : > { %v6601_v58 = vpop.eup %6600  ;;  %v1424_v35 = vmul.f32 %v1392_v61, %v8232_v56  ;;  %v933_v28 = vsub.f32 1.5, %v932_v55 }
 0x263   : > { %v940_v25 = vmul.f32 %v6601_v58, %v718_v60  ;;  %v6603_v11 = vpop.eup %6602  ;;  %v1262_v43 = vpop.f32.mrf.mxu0  ;;  %vm946_vm0 = vweird.f32 %v6601_v58  ;;  %v8258_v54 = vadd.f32 %v7693_v8, %v1101_v14  ;;  %v8268_v60 = vadd.f32 %v7693_v8, %v1100_v0 }
 0x264   : > { %v1263_v39 = vadd.f32 %v7888_v2, %v1262_v43  ;;  %v1551_v21 = vadd.f32 1.0, %v6603_v11  ;;  %v1456_v31 = vadd.f32 %v1424_v35, %v8232_v56  ;;  %vm8262_vm3 = vmor %vm945_vm15, %vm946_vm0  ;;  %v934_v35 = vmul.f32 %v8202_v41, %v933_v28 }
 0x265   : > { %v941_v30 = vmul.f32 %v6601_v58, %v940_v25  ;;  %12925 = vst [vmem:[#allocation25_spill] sm:$0xff] %v8258_v54  ;;  %v1156_v29 = vpack.c.bf16 %v8258_v54, %v8268_v60 }
 0x266   : > { %v1361_v32 = vmul.f32 0.044715, %v1263_v39  ;;  %v1583_v44 = vmul.f32 %v1551_v21, %v1327_v1  ;;  %v1488_v25 = vmul.f32 0.7978846, %v1456_v31  ;;  %12928 = vst [vmem:[#allocation26_spill] sm:$0xff] %v8268_v60  ;;  %v938_v1 = vsel %vm937_vm4, %v8202_v41, %v934_v35 }
 0x267   : > { %v942_v47 = vmul.f32 0.5, %v941_v30  ;;  %v1328_v41 = vmul.f32 0.5, %v8232_v56 }
 0x268   : > { %v1393_v16 = vmul.f32 %v1361_v32, %v1263_v39  ;;  %v1611_v61 = vpack.c.bf16 %v1583_v44, %v1582_v17  ;;  %6604 = vtanh.f32 %v1488_v25 }
 0x269   : > { %v943_v51 = vsub.f32 1.5, %v942_v47  ;;  %v1069_v47 = vmul.f32 %v938_v1, %v7951_v10 }
 0x26a   : > { %6092 = vmatmul.msk.bf16.gmra.mxu1 %vm1657_vm11, %v1611_v61  ;;  %v1425_v18 = vmul.f32 %v1393_v16, %v1263_v39 }
 0x26b   : > { %v944_v3 = vmul.f32 %v6601_v58, %v943_v51  ;;  %v1265_v11 = vpop.f32.mrf.mxu0  ;;  %v1102_v25 = vmul.f32 %v7675_v57, %v1069_v47 }
 0x26c   : > { %v1266_v55 = vadd.f32 %v7888_v2, %v1265_v11  ;;  %v1457_v43 = vadd.f32 %v1425_v18, %v1263_v39 }
 0x26d   : > { %v948_v26 = vsel %vm8262_vm3, %v6601_v58, %v944_v3 }
 0x26e   : > { %v1362_v14 = vmul.f32 0.044715, %v1266_v55  ;;  %v1489_v30 = vmul.f32 0.7978846, %v1457_v43  ;;  %v1070_v21 = vmul.f32 %v948_v26, %v7995_v63  ;;  %v6605_v31 = vpop.eup %6604  ;;  %v1329_v63 = vmul.f32 0.5, %v1263_v39 }
 0x26f   : > { %1284 = vmatmul.bf16.gmra.mxu2 %v1156_v29  ;;  %v1552_v58 = vadd.f32 1.0, %v6605_v31  ;;  %v8287_v29 = vadd.f32 %v7693_v8, %v1102_v25 }
 0x270   : > { %v1394_v0 = vmul.f32 %v1362_v14, %v1266_v55  ;;  %6606 = vtanh.f32 %v1489_v30  ;;  %v1103_v28 = vmul.f32 %v7675_v57, %v1070_v21 }
 0x271   : > { %v1584_v35 = vmul.f32 %v1552_v58, %v1328_v41  ;;  %12930 = vst [vmem:[#allocation28_spill] sm:$0xff] %v8287_v29 }
 0x272   : > { %v1426_v32 = vmul.f32 %v1394_v0, %v1266_v55  ;;  %v8284_v18 = vadd.f32 %v7693_v8, %v1103_v28 }
 0x273   : > { %v1267_v17 = vpop.f32.mrf.mxu0 }
 0x274   : > { %v1268_v44 = vadd.f32 %v7888_v2, %v1267_v17  ;;  %v1458_v51 = vadd.f32 %v1426_v32, %v1266_v55  ;;  %12929 = vst [vmem:[#allocation27_spill] sm:$0xff] %v8284_v18  ;;  %v1157_v56 = vpack.c.bf16 %v8284_v18, %v8287_v29 }
 0x276   : > { %v6607_v16 = vpop.eup %6606  ;;  %v1363_v61 = vmul.f32 0.044715, %v1268_v44  ;;  %v1490_v10 = vmul.f32 0.7978846, %v1458_v51  ;;  %v1331_v25 = vmul.f32 0.5, %v1268_v44 }
 0x277   : > { %v1553_v3 = vadd.f32 1.0, %v6607_v16 }
 0x278   : > { %v1395_v62 = vmul.f32 %v1363_v61, %v1268_v44  ;;  %6608 = vtanh.f32 %v1490_v10  ;;  %v1330_v61 = vmul.f32 0.5, %v1266_v55 }
 0x279   : > { %v1585_v11 = vmul.f32 %v1553_v3, %v1329_v63 }
 0x27a   : > { %v1427_v43 = vmul.f32 %v1395_v62, %v1268_v44 }
 0x27b   : > { %v1270_v26 = vpop.f32.mrf.mxu0  ;;  %v1612_v14 = vpack.c.bf16 %v1585_v11, %v1584_v35 }
 0x27c   : > { %v1271_v30 = vadd.f32 %v7888_v2, %v1270_v26  ;;  %v1459_v39 = vadd.f32 %v1427_v43, %v1268_v44 }
 0x27d   : > { %6093 = vmatmul.msk.bf16.gmra.mxu1 %vm1657_vm11, %v1612_v14 }
 0x27e   : > { %v1364_v1 = vmul.f32 0.044715, %v1271_v30  ;;  %v1491_v21 = vmul.f32 0.7978846, %v1459_v39  ;;  %v6609_v31 = vpop.eup %6608  ;;  %v1332_v39 = vmul.f32 0.5, %v1271_v30 }
 0x27f   : > { %1289 = vmatmul.bf16.gmra.mxu2 %v1157_v56  ;;  %v1554_v51 = vadd.f32 1.0, %v6609_v31  ;;  %v491_v31 = vpop.xlane.xlu1 %490 }
 0x280   : > { %v1396_v0 = vmul.f32 %v1364_v1, %v1271_v30  ;;  %6610 = vtanh.f32 %v1491_v21 }
 0x281   : > { %v1586_v62 = vmul.f32 %v1554_v51, %v1330_v61 }
 0x282   : > { %v1428_v47 = vmul.f32 %v1396_v0, %v1271_v30 }
 0x283   : > { %v1272_v32 = vpop.f32.mrf.mxu0 }
 0x284   : > { %v1273_v17 = vadd.f32 %v7888_v2, %v1272_v32  ;;  %v1460_v28 = vadd.f32 %v1428_v47, %v1271_v30  ;;  %v533_v47 = vmul.f32 %v7531_v13, %v491_v31 }
 0x286   : > { %v6611_v58 = vpop.eup %6610  ;;  %v1365_v16 = vmul.f32 0.044715, %v1273_v17  ;;  %v1492_v3 = vmul.f32 0.7978846, %v1460_v28  ;;  %v1333_v1 = vmul.f32 0.5, %v1273_v17  ;;  %v8298_v32 = vsub.f32 %v8055_v7, %v533_v47  ;;  %v1715_v28 = vpop.f32.mrf.mxu1 }
 0x287   : > { %v1555_v41 = vadd.f32 1.0, %v6611_v58  ;;  %v652_v30 = vpop.xlane.xlu1 %651 }
 0x288   : > { %v1397_v63 = vmul.f32 %v1365_v16, %v1273_v17  ;;  %6612 = vtanh.f32 %v1492_v3  ;;  %v597_v51 = vmul.f32 %v8298_v32, %v8298_v32  ;;  %v690_v16 = vmul.f32 %v652_v30, %v7531_v13 }
 0x289   : > { %v1587_v10 = vmul.f32 %v1555_v41, %v1331_v25 }
 0x28a   : > { %v1429_v35 = vmul.f32 %v1397_v63, %v1273_v17  ;;  %657 = vadd.xlane.f32.xlu0 %v597_v51  ;;  %v8306_v41 = vadd.f32 1e-05, %v690_v16 }
 0x28b   : > { %v1613_v11 = vpack.c.bf16 %v1587_v10, %v1586_v62 }
 0x28c   : > { %v1461_v43 = vadd.f32 %v1429_v35, %v1273_v17  ;;  %vm985_vm14 = vweird.f32 %v8306_v41 }
 0x28d   : > { %6094 = vmatmul.msk.bf16.gmra.mxu1 %vm1657_vm11, %v1613_v11 }
 0x28e   : > { %v1493_v26 = vmul.f32 0.7978846, %v1461_v43  ;;  %v6613_v2 = vpop.eup %6612  ;;  %v8302_v58 = vpop.f32.mrf.mxu1 }
 0x28f   : > { %v1556_v14 = vadd.f32 1.0, %v6613_v2 }
 0x290   : > { %6614 = vtanh.f32 %v1493_v26 }
 0x291   : > { %v1588_v44 = vmul.f32 %v1556_v14, %v1332_v39  ;;  %v654_v14 = vpop.xlane.xlu1 %653 }
 0x292   : > { %v691_v31 = vmul.f32 %v654_v14, %v7531_v13 }
 0x296   : > { %v6615_v56 = vpop.eup %6614  ;;  %v8308_v7 = vpop.f32.mrf.mxu1 }
 0x297   : > { %v1557_v55 = vadd.f32 1.0, %v6615_v56 }
 0x299   : > { %v1589_v21 = vmul.f32 %v1557_v55, %v1333_v1 }
 0x29b   : > { %v1614_v0 = vpack.c.bf16 %v1589_v21, %v1588_v44 }
 0x29d   : > { %6095 = vmatmul.msk.bf16.gmra.mxu1 %vm1657_vm11, %v1614_v0 }
 0x29e   : > { %v1722_v30 = vpop.f32.mrf.mxu1 }
 0x2b8   : > { %v646_v17 = vpop.xlane.xlu2 %645 }
 0x2b9   : > { %v687_v61 = vmul.f32 %v646_v17, %v7531_v13 }
 0x2bb   : > { %v719_v25 = vadd.f32 1e-05, %v687_v61 }
 0x2bd   : > { %6616 = vrsqrt.f32 %v719_v25  ;;  %vm955_vm5 = vweird.f32 %v719_v25 }
 0x2be   : > { %6618 = vrsqrt.f32 %v8306_v41 }
 0x2c0   : > { %v493_v3 = vpop.xlane.xlu2 %492 }
 0x2c1   : > { %v648_v63 = vpop.xlane.xlu0 %647  ;;  %v534_v10 = vmul.f32 %v7531_v13, %v493_v3 }
 0x2c2   : > { %v688_v62 = vmul.f32 %v648_v63, %v7531_v13 }
 0x2c3   : > { %v6617_v11 = vpop.eup %6616  ;;  %v8314_v43 = vsub.f32 %v8137_v59, %v534_v10  ;;  %v7120_v59 = vld [vmem:[%s12628_s7] sm:$0x3f] }
 0x2c4   : > { %v720_v35 = vadd.f32 1e-05, %v688_v62  ;;  %v950_v26 = vmul.f32 %v6617_v11, %v719_v25  ;;  %v8318_v39 = vpop.eup %6618  ;;  %v8324_v0 = vperm.slane %v7120_v59, 4  ;;  %vm956_vm6 = vweird.f32 %v6617_v11 }
 0x2c5   : > { %v598_v2 = vmul.f32 %v8314_v43, %v8314_v43  ;;  %v980_v17 = vmul.f32 %v8318_v39, %v8306_v41  ;;  %vm957_vm7 = vmor %vm955_vm5, %vm956_vm6  ;;  %vm986_vm15 = vweird.f32 %v8318_v39 }
 0x2c6   : > { %6620 = vrsqrt.f32 %v720_v35  ;;  %v951_v56 = vmul.f32 %v6617_v11, %v950_v26  ;;  %v8334_v10 = vadd.f32 %v1715_v28, %v8324_v0  ;;  %v8336_v26 = vadd.f32 1e-05, %v691_v31  ;;  %vm8400_vm1 = vmor %vm985_vm14, %vm986_vm15 }
 0x2c7   : > { %659 = vadd.xlane.f32.xlu1 %v598_v2  ;;  %vm965_vm9 = vweird.f32 %v720_v35 }
 0x2c8   : > { %v952_v55 = vmul.f32 0.5, %v951_v56  ;;  %v495_v44 = vpop.xlane.xlu2 %494  ;;  %v981_v56 = vmul.f32 %v8318_v39, %v980_v17  ;;  %vm995_vm2 = vweird.f32 %v8336_v26 }
 0x2c9   : > { %v650_v1 = vpop.xlane.xlu0 %649  ;;  %v535_v47 = vmul.f32 %v7531_v13, %v495_v44 }
 0x2ca   : > { %v689_v21 = vmul.f32 %v650_v1, %v7531_v13  ;;  %v953_v16 = vsub.f32 1.5, %v952_v55  ;;  %v982_v31 = vmul.f32 0.5, %v981_v56 }
 0x2cb   : > { %v8331_v3 = vsub.f32 %v8175_v24, %v535_v47 }
 0x2cc   : > { %v6621_v51 = vpop.eup %6620  ;;  %v721_v61 = vadd.f32 1e-05, %v689_v21  ;;  %v954_v62 = vmul.f32 %v6617_v11, %v953_v16 }
 0x2cd   : > { %v960_v63 = vmul.f32 %v6621_v51, %v720_v35  ;;  %v599_v14 = vmul.f32 %v8331_v3, %v8331_v3  ;;  %vm966_vm8 = vweird.f32 %v6621_v51 }
 0x2ce   : > { %6622 = vrsqrt.f32 %v721_v61  ;;  %v958_v25 = vsel %vm957_vm7, %v6617_v11, %v954_v62  ;;  %vm967_vm10 = vmor %vm965_vm9, %vm966_vm8  ;;  %vm975_vm12 = vweird.f32 %v721_v61 }
 0x2cf   : > { %v961_v2 = vmul.f32 %v6621_v51, %v960_v63  ;;  %661 = vadd.xlane.f32.xlu2 %v599_v14  ;;  %1795 = vmax.xlane.f32.xlu1 %v8334_v10  ;;  %6624 = vrsqrt.f32 %v8336_v26  ;;  %v1071_v47 = vmul.f32 %v958_v25, %v8101_v48  ;;  %v8354_v14 = vld [vmem:[%s12623_s2] ss:$0 sm:$0xff]  ;;  %v8361_v48 = vadd.f32 %v8302_v58, %v8324_v0 }
 0x2d0   : > { %v983_v58 = vsub.f32 1.5, %v982_v31 }
 0x2d1   : > { %v962_v1 = vmul.f32 0.5, %v961_v2  ;;  %v497_v24 = vpop.xlane.xlu0 %496  ;;  %v1725_v2 = vpop.f32.mrf.mxu1 }
 0x2d2   : > { %v656_v55 = vpop.xlane.xlu2 %655  ;;  %v536_v44 = vmul.f32 %v7531_v13, %v497_v24  ;;  %v984_v41 = vmul.f32 %v8318_v39, %v983_v58  ;;  %v8412_v58 = vadd.f32 %v1725_v2, %v8324_v0 }
 0x2d3   : > { %v963_v28 = vsub.f32 1.5, %v962_v1  ;;  %v692_v21 = vmul.f32 %v656_v55, %v7531_v13  ;;  %v1275_v62 = vpop.f32.mrf.mxu0  ;;  %v8367_v1 = vadd.f32 %v1722_v30, %v8324_v0 }
 0x2d4   : > { %v6623_v59 = vpop.eup %6622  ;;  %v8347_v11 = vsub.f32 %v8217_v23, %v536_v44  ;;  %v8357_v56 = vadd.f32 %v8354_v14, %v1275_v62  ;;  %v1104_v44 = vmul.f32 %v7675_v57, %v1071_v47  ;;  %v988_v2 = vsel %vm8400_vm1, %v8318_v39, %v984_v41 }
 0x2d5   : > { %v964_v17 = vmul.f32 %v6621_v51, %v963_v28  ;;  %v970_v16 = vmul.f32 %v6623_v59, %v721_v61  ;;  %v8349_v63 = vadd.f32 1e-05, %v692_v21  ;;  %v8372_v28 = vpop.eup %6624  ;;  %vm976_vm13 = vweird.f32 %v6623_v59 }
 0x2d6   : > { %v600_v23 = vmul.f32 %v8347_v11, %v8347_v11  ;;  %v1366_v55 = vmul.f32 0.044715, %v8357_v56  ;;  %v990_v47 = vmul.f32 %v8372_v28, %v8336_v26  ;;  %vm8382_vm0 = vmor %vm975_vm12, %vm976_vm13  ;;  %v8387_v61 = vadd.f32 %v7693_v8, %v1104_v44 }
 0x2d7   : > { %v968_v35 = vsel %vm967_vm10, %v6621_v51, %v964_v17  ;;  %v971_v25 = vmul.f32 %v6623_v59, %v970_v16  ;;  %6626 = vrsqrt.f32 %v8349_v63  ;;  %1797 = vmax.xlane.f32.xlu2 %v8361_v48  ;;  %1801 = vmax.xlane.f32.xlu1 %v8367_v1  ;;  %vm1005_vm3 = vweird.f32 %v8349_v63 }
 0x2d8   : > { %v1072_v24 = vmul.f32 %v968_v35, %v8123_v40  ;;  %663 = vadd.xlane.f32.xlu0 %v600_v23  ;;  %v1398_v51 = vmul.f32 %v1366_v55, %v8357_v56  ;;  %12933 = vst [vmem:[#allocation29_spill] sm:$0xff] %v8387_v61  ;;  %vm996_vm5 = vweird.f32 %v8372_v28 }
 0x2d9   : > { %v972_v21 = vmul.f32 0.5, %v971_v25  ;;  %v8398_v25 = vadd.f32 %v8308_v7, %v8324_v0  ;;  %vm8465_vm7 = vmor %vm995_vm2, %vm996_vm5 }
 0x2da   : > { %v1105_v30 = vmul.f32 %v7675_v57, %v1072_v24  ;;  %v1430_v16 = vmul.f32 %v1398_v51, %v8357_v56 }
 0x2db   : > { %v973_v40 = vsub.f32 1.5, %v972_v21  ;;  %v1277_v35 = vpop.f32.mrf.mxu0 }
 0x2dc   : > { %v8390_v17 = vadd.f32 %v7693_v8, %v1105_v30  ;;  %v8407_v44 = vadd.f32 %v8354_v14, %v1277_v35  ;;  %v1462_v51 = vadd.f32 %v1430_v16, %v8357_v56  ;;  %v1727_v30 = vpop.f32.mrf.mxu1 }
 0x2dd   : > { %v8393_v62 = vpop.eup %6626  ;;  %v974_v23 = vmul.f32 %v6623_v59, %v973_v40  ;;  %v991_v40 = vmul.f32 %v8372_v28, %v990_v47  ;;  %v8434_v39 = vadd.f32 %v1727_v30, %v8324_v0 }
 0x2de   : > { %12934 = vst [vmem:[#allocation30_spill] sm:$0xff] %v8390_v17  ;;  %v1000_v55 = vmul.f32 %v8393_v62, %v8349_v63  ;;  %v1158_v21 = vpack.c.bf16 %v8390_v17, %v8387_v61  ;;  %v1367_v18 = vmul.f32 0.044715, %v8407_v44  ;;  %vm1006_vm4 = vweird.f32 %v8393_v62 }
 0x2df   : > { %v978_v7 = vsel %vm8382_vm0, %v6623_v59, %v974_v23  ;;  %1803 = vmax.xlane.f32.xlu2 %v8412_v58  ;;  %v1494_v23 = vmul.f32 0.7978846, %v1462_v51  ;;  %vm8456_vm6 = vmor %vm1005_vm3, %vm1006_vm4 }
 0x2e0   : > { %v1001_v29 = vmul.f32 %v8393_v62, %v1000_v55  ;;  %1294 = vmatmul.bf16.gmra.mxu2 %v1158_v21  ;;  %1799 = vmax.xlane.f32.xlu0 %v8398_v25  ;;  %v1073_v59 = vmul.f32 %v978_v7, %v8159_v20  ;;  %v1399_v31 = vmul.f32 %v1367_v18, %v8407_v44  ;;  %v992_v21 = vmul.f32 0.5, %v991_v40 }
 0x2e1   : > { %v1074_v55 = vmul.f32 %v988_v2, %v8073_v42  ;;  %6628 = vtanh.f32 %v1494_v23 }
 0x2e2   : > { %v1280_v16 = vpop.f32.mrf.mxu2  ;;  %v1002_v47 = vmul.f32 0.5, %v1001_v29  ;;  %v1431_v61 = vmul.f32 %v1399_v31, %v8407_v44  ;;  %v1106_v20 = vmul.f32 %v7675_v57, %v1073_v59  ;;  %v993_v7 = vsub.f32 1.5, %v992_v21 }
 0x2e3   : > { %v8428_v35 = vadd.f32 %v8354_v14, %v1280_v16  ;;  %v1107_v42 = vmul.f32 %v7675_v57, %v1074_v55 }
 0x2e4   : > { %v1463_v18 = vadd.f32 %v1431_v61, %v8407_v44  ;;  %v1003_v41 = vsub.f32 1.5, %v1002_v47  ;;  %v8449_v2 = vadd.f32 %v7693_v8, %v1106_v20  ;;  %v994_v23 = vmul.f32 %v8372_v28, %v993_v7 }
 0x2e5   : > { %v1368_v24 = vmul.f32 0.044715, %v8428_v35  ;;  %v8461_v55 = vadd.f32 %v7693_v8, %v1107_v42 }
 0x2e6   : > { %v1495_v40 = vmul.f32 0.7978846, %v1463_v18  ;;  %12937 = vst [vmem:[#allocation31_spill] sm:$0xff] %v8449_v2  ;;  %v1004_v31 = vmul.f32 %v8393_v62, %v1003_v41  ;;  %v998_v26 = vsel %vm8465_vm7, %v8372_v28, %v994_v23 }
 0x2e7   : > { %v1400_v29 = vmul.f32 %v1368_v24, %v8428_v35  ;;  %v1730_v51 = vpop.f32.mrf.mxu1  ;;  %v6629_v63 = vpop.eup %6628  ;;  %12940 = vst [vmem:[#allocation32_spill] sm:$0xff] %v8461_v55  ;;  %v1159_v20 = vpack.c.bf16 %v8461_v55, %v8449_v2 }
 0x2e8   : > { %1805 = vmax.xlane.f32.xlu0 %v8434_v39  ;;  %v8445_v30 = vadd.f32 %v1730_v51, %v8324_v0  ;;  %6630 = vtanh.f32 %v1495_v40  ;;  %v1008_v41 = vsel %vm8456_vm6, %v8393_v62, %v1004_v31  ;;  %v1558_v7 = vadd.f32 1.0, %v6629_v63 }
 0x2e9   : > { %v1432_v59 = vmul.f32 %v1400_v29, %v8428_v35  ;;  %v1334_v40 = vmul.f32 0.5, %v8357_v56  ;;  %v1076_v62 = vmul.f32 %v1008_v41, %v8214_v5  ;;  %v1075_v56 = vmul.f32 %v998_v26, %v8079_v27 }
 0x2ea   : > { %v1282_v61 = vpop.f32.mrf.mxu2  ;;  %1807 = vmax.xlane.f32.xlu1 %v8445_v30 }
 0x2eb   : > { %v1283_v16 = vadd.f32 %v8354_v14, %v1282_v61  ;;  %v1464_v18 = vadd.f32 %v1432_v59, %v8428_v35  ;;  %v1335_v59 = vmul.f32 0.5, %v8407_v44  ;;  %v1590_v28 = vmul.f32 %v1558_v7, %v1334_v40 }
 0x2ec   : > { %v1109_v44 = vmul.f32 %v7675_v57, %v1076_v62  ;;  %v1108_v5 = vmul.f32 %v7675_v57, %v1075_v56 }
 0x2ed   : > { %v1369_v24 = vmul.f32 0.044715, %v1283_v16  ;;  %v1496_v63 = vmul.f32 0.7978846, %v1464_v18 }
 0x2ee   : > { %v6631_v51 = vpop.eup %6630  ;;  %v8491_v7 = vadd.f32 %v7693_v8, %v1109_v44  ;;  %v8498_v40 = vadd.f32 %v7693_v8, %v1108_v5 }
 0x2ef   : > { %v1401_v29 = vmul.f32 %v1369_v24, %v1283_v16  ;;  %v1732_v42 = vpop.f32.mrf.mxu1  ;;  %v1559_v55 = vadd.f32 1.0, %v6631_v51  ;;  %6632 = vtanh.f32 %v1496_v63 }
 0x2f0   : > { %1299 = vmatmul.bf16.gmra.mxu2 %v1159_v20  ;;  %v8480_v61 = vadd.f32 %v1732_v42, %v8324_v0  ;;  %12943 = vst [vmem:[#allocation33_spill] sm:$0xff] %v8491_v7 }
 0x2f1   : > { %v1433_v2 = vmul.f32 %v1401_v29, %v1283_v16  ;;  %v1591_v23 = vmul.f32 %v1559_v55, %v1335_v59  ;;  %12944 = vst [vmem:[#allocation34_spill] sm:$0xff] %v8498_v40 }
 0x2f2   : > { %v1285_v31 = vpop.f32.mrf.mxu2  ;;  %1809 = vmax.xlane.f32.xlu2 %v8480_v61 }
 0x2f3   : > { %v1286_v47 = vadd.f32 %v8354_v14, %v1285_v31  ;;  %v1465_v21 = vadd.f32 %v1433_v2, %v1283_v16  ;;  %v1615_v20 = vpack.c.bf16 %v1591_v23, %v1590_v28  ;;  %v1160_v31 = vpack.c.bf16 %v8491_v7, %v8498_v40 }
 0x2f4   : > { %v1337_v23 = vmul.f32 0.5, %v1283_v16 }
 0x2f5   : > { %v1370_v24 = vmul.f32 0.044715, %v1286_v47  ;;  %v1497_v42 = vmul.f32 0.7978846, %v1465_v21  ;;  %6096 = vmatmul.msk.bf16.gmra.mxu1 %vm1657_vm11, %v1615_v20  ;;  %v6633_v51 = vpop.eup %6632 }
 0x2f6   : > { %v1560_v21 = vadd.f32 1.0, %v6633_v51 }
 0x2f7   : > { %v1402_v29 = vmul.f32 %v1370_v24, %v1286_v47  ;;  %6634 = vtanh.f32 %v1497_v42  ;;  %v1336_v24 = vmul.f32 0.5, %v8428_v35 }
 0x2f9   : > { %v1434_v18 = vmul.f32 %v1402_v29, %v1286_v47 }
 0x2fa   : > { %v1287_v41 = vpop.f32.mrf.mxu2  ;;  %v1735_v2 = vpop.f32.mrf.mxu1 }
 0x2fb   : > { %v1288_v27 = vadd.f32 %v8354_v14, %v1287_v41  ;;  %v1466_v55 = vadd.f32 %v1434_v18, %v1286_v47  ;;  %v8495_v26 = vadd.f32 %v1735_v2, %v8324_v0  ;;  %v1592_v18 = vmul.f32 %v1560_v21, %v1336_v24 }
 0x2fd   : > { %v6635_v59 = vpop.eup %6634  ;;  %v1371_v62 = vmul.f32 0.044715, %v1288_v27  ;;  %1811 = vmax.xlane.f32.xlu2 %v8495_v26  ;;  %v1498_v56 = vmul.f32 0.7978846, %v1466_v55 }
 0x2fe   : > { %v1561_v63 = vadd.f32 1.0, %v6635_v59 }
 0x2ff   : > { %v1403_v28 = vmul.f32 %v1371_v62, %v1288_v27  ;;  %6636 = vtanh.f32 %v1498_v56 }
 0x300   : > { %1304 = vmatmul.bf16.gmra.mxu2 %v1160_v31  ;;  %v1593_v20 = vmul.f32 %v1561_v63, %v1337_v23 }
 0x301   : > { %v1435_v42 = vmul.f32 %v1403_v28, %v1288_v27 }
 0x302   : > { %v1290_v44 = vpop.f32.mrf.mxu2  ;;  %v1737_v29 = vpop.f32.mrf.mxu1  ;;  %v1616_v62 = vpack.c.bf16 %v1593_v20, %v1592_v18  ;;  %v1339_v20 = vmul.f32 0.5, %v1288_v27 }
 0x303   : > { %v1291_v5 = vadd.f32 %v8354_v14, %v1290_v44  ;;  %v1467_v41 = vadd.f32 %v1435_v42, %v1288_v27  ;;  %v8506_v2 = vadd.f32 %v1737_v29, %v8324_v0  ;;  %v1338_v42 = vmul.f32 0.5, %v1286_v47 }
 0x305   : > { %v1372_v59 = vmul.f32 0.044715, %v1291_v5  ;;  %v1499_v16 = vmul.f32 0.7978846, %v1467_v41  ;;  %1813 = vmax.xlane.f32.xlu0 %v8506_v2  ;;  %6097 = vmatmul.msk.bf16.gmra.mxu1 %vm1657_vm11, %v1616_v62  ;;  %v6637_v35 = vpop.eup %6636 }
 0x306   : > { %v1562_v21 = vadd.f32 1.0, %v6637_v35 }
 0x307   : > { %v1404_v55 = vmul.f32 %v1372_v59, %v1291_v5  ;;  %6638 = vtanh.f32 %v1499_v16 }
 0x308   : > { %v1594_v41 = vmul.f32 %v1562_v21, %v1338_v42  ;;  %v1340_v21 = vmul.f32 0.5, %v1291_v5 }
 0x309   : > { %v1436_v51 = vmul.f32 %v1404_v55, %v1291_v5 }
 0x30a   : > { %v1292_v31 = vpop.f32.mrf.mxu2  ;;  %v8510_v63 = vpop.f32.mrf.mxu1 }
 0x30b   : > { %v1293_v28 = vadd.f32 %v8354_v14, %v1292_v31  ;;  %v1468_v23 = vadd.f32 %v1436_v51, %v1291_v5 }
 0x30d   : > { %v6639_v56 = vpop.eup %6638  ;;  %v1373_v24 = vmul.f32 0.044715, %v1293_v28  ;;  %v1500_v18 = vmul.f32 0.7978846, %v1468_v23 }
 0x30e   : > { %v1563_v44 = vadd.f32 1.0, %v6639_v56  ;;  %v1341_v56 = vmul.f32 0.5, %v1293_v28 }
 0x30f   : > { %v1405_v29 = vmul.f32 %v1373_v24, %v1293_v28  ;;  %6640 = vtanh.f32 %v1500_v18  ;;  %v658_v18 = vpop.xlane.xlu0 %657 }
 0x310   : > { %v1595_v59 = vmul.f32 %v1563_v44, %v1339_v20 }
 0x311   : > { %v1437_v62 = vmul.f32 %v1405_v29, %v1293_v28 }
 0x312   : > { %v1617_v16 = vpack.c.bf16 %v1595_v59, %v1594_v41  ;;  %v1742_v7 = vpop.f32.mrf.mxu1  ;;  %v693_v41 = vmul.f32 %v658_v18, %v7531_v13 }
 0x313   : > { %v1469_v55 = vadd.f32 %v1437_v62, %v1293_v28  ;;  %v8515_v31 = vadd.f32 %v1742_v7, %v8324_v0 }
 0x314   : > { %6098 = vmatmul.msk.bf16.vlgmr.msra.gmra.mxu3 %vm1657_vm11, %v1617_v16  ;;  %v725_v59 = vadd.f32 1e-05, %v693_v41 }
 0x315   : > { %v1501_v35 = vmul.f32 0.7978846, %v1469_v55  ;;  %1817 = vmax.xlane.f32.xlu1 %v8515_v31  ;;  %v6641_v47 = vpop.eup %6640 }
 0x316   : > { %v1564_v51 = vadd.f32 1.0, %v6641_v47  ;;  %vm1015_vm8 = vweird.f32 %v725_v59 }
 0x317   : > { %6642 = vtanh.f32 %v1501_v35 }
 0x318   : > { %v1596_v42 = vmul.f32 %v1564_v51, %v1340_v21  ;;  %6644 = vrsqrt.f32 %v725_v59 }
 0x31a   : > { %v8518_v27 = vpop.f32.mrf.mxu1 }
 0x31d   : > { %v6643_v23 = vpop.eup %6642 }
 0x31e   : > { %v1565_v24 = vadd.f32 1.0, %v6643_v23  ;;  %v6645_v62 = vpop.eup %6644 }
 0x31f   : > { %v1010_v5 = vmul.f32 %v6645_v62, %v725_v59  ;;  %vm1016_vm9 = vweird.f32 %v6645_v62 }
 0x320   : > { %v1597_v20 = vmul.f32 %v1565_v24, %v1341_v56  ;;  %vm1017_vm10 = vmor %vm1015_vm8, %vm1016_vm9 }
 0x321   : > { %v1011_v28 = vmul.f32 %v6645_v62, %v1010_v5 }
 0x322   : > { %v1618_v44 = vpack.c.bf16 %v1597_v20, %v1596_v42  ;;  %v1747_v29 = vpop.f32.mrf.mxu1 }
 0x323   : > { %v8521_v7 = vadd.f32 %v1747_v29, %v8324_v0  ;;  %v1012_v35 = vmul.f32 0.5, %v1011_v28 }
 0x324   : > { %6099 = vmatmul.msk.bf16.gmra.mxu3 %vm1657_vm11, %v1618_v44 }
 0x325   : > { %1821 = vmax.xlane.f32.xlu2 %v8521_v7  ;;  %v1013_v51 = vsub.f32 1.5, %v1012_v35 }
 0x327   : > { %v1014_v42 = vmul.f32 %v6645_v62, %v1013_v51 }
 0x329   : > { %v1018_v5 = vsel %vm1017_vm10, %v6645_v62, %v1014_v42 }
 0x32a   : > { %v1077_v35 = vmul.f32 %v1018_v5, %v8298_v32 }
 0x33a   : > { %v660_v16 = vpop.xlane.xlu1 %659 }
 0x33b   : > { %v694_v55 = vmul.f32 %v660_v16, %v7531_v13 }
 0x33d   : > { %v726_v47 = vadd.f32 1e-05, %v694_v55 }
 0x33f   : > { %6646 = vrsqrt.f32 %v726_v47  ;;  %vm1025_vm12 = vweird.f32 %v726_v47 }
 0x342   : > { %v662_v23 = vpop.xlane.xlu2 %661  ;;  %v1796_v21 = vpop.xlane.xlu1 %1795 }
 0x343   : > { %v695_v56 = vmul.f32 %v662_v23, %v7531_v13  ;;  %v1859_v24 = vsub.f32 %v8334_v10, %v1796_v21 }
 0x345   : > { %v6647_v20 = vpop.eup %6646  ;;  %v727_v44 = vadd.f32 1e-05, %v695_v56  ;;  %v1891_v29 = vmul.f32 1.442695, %v1859_v24 }
 0x346   : > { %v1020_v18 = vmul.f32 %v6647_v20, %v726_v47  ;;  %vm1026_vm13 = vweird.f32 %v6647_v20  ;;  %v1110_v47 = vmul.f32 %v7675_v57, %v1077_v35  ;;  %v8545_v35 = vadd.f32 %v8510_v63, %v8324_v0 }
 0x347   : > { %6648 = vrsqrt.f32 %v727_v44  ;;  %vm1027_vm14 = vmor %vm1025_vm12, %vm1026_vm13  ;;  %vm1035_vm15 = vweird.f32 %v727_v44 }
 0x348   : > { %v1021_v41 = vmul.f32 %v6647_v20, %v1020_v18  ;;  %6650 = vpow2.f32 %v1891_v29  ;;  %v8539_v5 = vadd.f32 %v7693_v8, %v1110_v47 }
 0x34a   : > { %v1022_v16 = vmul.f32 0.5, %v1021_v41  ;;  %v1798_v59 = vpop.xlane.xlu2 %1797  ;;  %12945 = vst [vmem:[#allocation35_spill] sm:$0xff] %v8539_v5 }
 0x34b   : > { %v664_v28 = vpop.xlane.xlu0 %663  ;;  %v1860_v10 = vsub.f32 %v8361_v48, %v1798_v59 }
 0x34c   : > { %v696_v55 = vmul.f32 %v664_v28, %v7531_v13  ;;  %v1023_v51 = vsub.f32 1.5, %v1022_v16 }
 0x34d   : > { %v6649_v21 = vpop.eup %6648  ;;  %v1893_v56 = vmul.f32 1.442695, %v1860_v10 }
 0x34e   : > { %v728_v23 = vadd.f32 1e-05, %v696_v55  ;;  %v8532_v24 = vpop.eup %6650  ;;  %v1024_v62 = vmul.f32 %v6647_v20, %v1023_v51  ;;  %v1030_v42 = vmul.f32 %v6649_v21, %v727_v44  ;;  %vm1036_vm0 = vweird.f32 %v6649_v21 }
 0x34f   : > { %1955 = vadd.xlane.f32.xlu0 %v8532_v24  ;;  %vm1037_vm1 = vmor %vm1035_vm15, %vm1036_vm0 }
 0x350   : > { %6652 = vrsqrt.f32 %v728_v23  ;;  %v1028_v29 = vsel %vm1027_vm14, %v6647_v20, %v1024_v62  ;;  %v1031_v18 = vmul.f32 %v6649_v21, %v1030_v42  ;;  %vm1045_vm2 = vweird.f32 %v728_v23 }
 0x351   : > { %6654 = vpow2.f32 %v1893_v56  ;;  %v1078_v32 = vmul.f32 %v1028_v29, %v8314_v43  ;;  %v8557_v29 = vadd.f32 %v8518_v27, %v8324_v0 }
 0x352   : > { %v1032_v48 = vmul.f32 0.5, %v1031_v18 }
 0x353   : > { %v1111_v41 = vmul.f32 %v7675_v57, %v1078_v32  ;;  %v1800_v59 = vpop.xlane.xlu0 %1799 }
 0x354   : > { %v1033_v16 = vsub.f32 1.5, %v1032_v48  ;;  %v1861_v51 = vsub.f32 %v8398_v25, %v1800_v59 }
 0x355   : > { %v8548_v43 = vadd.f32 %v7693_v8, %v1111_v41 }
 0x356   : > { %v6653_v28 = vpop.eup %6652  ;;  %v1034_v44 = vmul.f32 %v6649_v21, %v1033_v16  ;;  %v1895_v47 = vmul.f32 1.442695, %v1861_v51  ;;  %v1802_v51 = vpop.xlane.xlu1 %1801 }
 0x357   : > { %v8541_v55 = vpop.eup %6654  ;;  %v1040_v20 = vmul.f32 %v6653_v28, %v728_v23  ;;  %12946 = vst [vmem:[#allocation36_spill] sm:$0xff] %v8548_v43  ;;  %1815 = vmax.xlane.f32.xlu0 %v8545_v35  ;;  %v1161_v56 = vpack.c.bf16 %v8548_v43, %v8539_v5  ;;  %vm1046_vm3 = vweird.f32 %v6653_v28 }
 0x358   : > { %1957 = vadd.xlane.f32.xlu1 %v8541_v55  ;;  %v1038_v62 = vsel %vm1037_vm1, %v6649_v21, %v1034_v44  ;;  %vm1047_vm4 = vmor %vm1045_vm2, %vm1046_vm3  ;;  %6656 = vpow2.f32 %v1895_v47 }
 0x359   : > { %v1041_v10 = vmul.f32 %v6653_v28, %v1040_v20  ;;  %1309 = vmatmul.bf16.gmra.mxu2 %v1161_v56  ;;  %v1079_v18 = vmul.f32 %v1038_v62, %v8331_v3 }
 0x35b   : > { %v1042_v42 = vmul.f32 0.5, %v1041_v10  ;;  %v1112_v23 = vmul.f32 %v7675_v57, %v1079_v18 }
 0x35d   : > { %v1043_v63 = vsub.f32 1.5, %v1042_v42  ;;  %v8566_v27 = vadd.f32 %v7693_v8, %v1112_v23  ;;  %v1862_v42 = vsub.f32 %v8367_v1, %v1802_v51 }
 0x35e   : > { %v8571_v20 = vpop.eup %6656 }
 0x35f   : > { %v1044_v25 = vmul.f32 %v6653_v28, %v1043_v63  ;;  %12947 = vst [vmem:[#allocation37_spill] sm:$0xff] %v8566_v27  ;;  %v1897_v18 = vmul.f32 1.442695, %v1862_v42 }
 0x360   : > { %1819 = vmax.xlane.f32.xlu1 %v8557_v29 }
 0x361   : > { %v1048_v32 = vsel %vm1047_vm4, %v6653_v28, %v1044_v25 }
 0x362   : > { %v1080_v21 = vmul.f32 %v1048_v32, %v8347_v11 }
 0x363   : > { %v1295_v48 = vpop.f32.mrf.mxu2 }
 0x364   : > { %v1296_v41 = vadd.f32 %v8354_v14, %v1295_v48  ;;  %v1113_v16 = vmul.f32 %v7675_v57, %v1080_v21 }
 0x366   : > { %v1374_v59 = vmul.f32 0.044715, %v1296_v41  ;;  %v8569_v3 = vadd.f32 %v7693_v8, %v1113_v16 }
 0x368   : > { %12948 = vst [vmem:[#allocation38_spill] sm:$0xff] %v8569_v3  ;;  %v1406_v28 = vmul.f32 %v1374_v59, %v1296_v41  ;;  %1959 = vadd.xlane.f32.xlu1 %v8571_v20  ;;  %v1162_v11 = vpack.c.bf16 %v8569_v3, %v8566_v27 }
 0x36a   : > { %v1438_v44 = vmul.f32 %v1406_v28, %v1296_v41  ;;  %1314 = vmatmul.bf16.gmra.mxu2 %v1162_v11 }
 0x36b   : > { %v1297_v10 = vpop.f32.mrf.mxu2 }
 0x36c   : > { %v1298_v57 = vadd.f32 %v8354_v14, %v1297_v10  ;;  %v1470_v56 = vadd.f32 %v1438_v44, %v1296_v41  ;;  %v1804_v10 = vpop.xlane.xlu2 %1803 }
 0x36e   : > { %v1375_v62 = vmul.f32 0.044715, %v1298_v57  ;;  %v1502_v63 = vmul.f32 0.7978846, %v1470_v56 }
 0x370   : > { %v1407_v8 = vmul.f32 %v1375_v62, %v1298_v57  ;;  %6658 = vtanh.f32 %v1502_v63 }
 0x371   : > { %6660 = vpow2.f32 %v1897_v18 }
 0x372   : > { %v1439_v47 = vmul.f32 %v1407_v8, %v1298_v57  ;;  %v1750_v32 = vpop.f32.mrf.mxu1 }
 0x373   : > { %v1300_v25 = vpop.f32.mrf.mxu2  ;;  %v8582_v48 = vadd.f32 %v1750_v32, %v8324_v0  ;;  %v1342_v32 = vmul.f32 0.5, %v1296_v41 }
 0x374   : > { %v8579_v21 = vadd.f32 %v8354_v14, %v1300_v25  ;;  %v1471_v23 = vadd.f32 %v1439_v47, %v1298_v57  ;;  %v1863_v25 = vsub.f32 %v8412_v58, %v1804_v10  ;;  %v1806_v58 = vpop.xlane.xlu0 %1805 }
 0x375   : > { %1823 = vmax.xlane.f32.xlu2 %v8582_v48 }
 0x376   : > { %v1376_v16 = vmul.f32 0.044715, %v8579_v21  ;;  %v1503_v59 = vmul.f32 0.7978846, %v1471_v23  ;;  %v6659_v28 = vpop.eup %6658  ;;  %v1343_v23 = vmul.f32 0.5, %v1298_v57 }
 0x377   : > { %v8590_v42 = vpop.eup %6660  ;;  %v1566_v63 = vadd.f32 1.0, %v6659_v28  ;;  %v1899_v27 = vmul.f32 1.442695, %v1863_v25 }
 0x378   : > { %v1408_v1 = vmul.f32 %v1376_v16, %v8579_v21  ;;  %6662 = vtanh.f32 %v1503_v59 }
 0x37a   : > { %v1440_v11 = vmul.f32 %v1408_v1, %v8579_v21  ;;  %v1752_v51 = vpop.f32.mrf.mxu1 }
 0x37b   : > { %v1302_v44 = vpop.f32.mrf.mxu2  ;;  %v8593_v8 = vadd.f32 %v1752_v51, %v8324_v0 }
 0x37c   : > { %v1303_v56 = vadd.f32 %v8354_v14, %v1302_v44  ;;  %v1472_v62 = vadd.f32 %v1440_v11, %v8579_v21  ;;  %v1598_v11 = vmul.f32 %v1566_v63, %v1342_v32 }
 0x37d   : > { %1961 = vadd.xlane.f32.xlu2 %v8590_v42  ;;  %1825 = vmax.xlane.f32.xlu0 %v8593_v8 }
 0x37e   : > { %v6663_v47 = vpop.eup %6662  ;;  %v1377_v18 = vmul.f32 0.044715, %v1303_v56  ;;  %v1504_v1 = vmul.f32 0.7978846, %v1472_v62  ;;  %v1864_v62 = vsub.f32 %v8434_v39, %v1806_v58  ;;  %v1344_v39 = vmul.f32 0.5, %v8579_v21  ;;  %v1808_v21 = vpop.xlane.xlu1 %1807 }
 0x37f   : > { %v1567_v16 = vadd.f32 1.0, %v6663_v47 }
 0x380   : > { %v1409_v59 = vmul.f32 %v1377_v18, %v1303_v56  ;;  %6664 = vtanh.f32 %v1504_v1 }
 0x381   : > { %v1599_v44 = vmul.f32 %v1567_v16, %v1343_v23  ;;  %6666 = vpow2.f32 %v1899_v27 }
 0x382   : > { %v1441_v3 = vmul.f32 %v1409_v59, %v1303_v56  ;;  %v1755_v28 = vpop.f32.mrf.mxu1 }
 0x383   : > { %v1305_v51 = vpop.f32.mrf.mxu2  ;;  %v1619_v43 = vpack.c.bf16 %v1599_v44, %v1598_v11  ;;  %v8600_v10 = vadd.f32 %v1755_v28, %v8324_v0  ;;  %v1345_v11 = vmul.f32 0.5, %v1303_v56 }
 0x384   : > { %v1306_v5 = vadd.f32 %v8354_v14, %v1305_v51  ;;  %v1473_v40 = vadd.f32 %v1441_v3, %v1303_v56  ;;  %v1901_v3 = vmul.f32 1.442695, %v1864_v62 }
 0x385   : > { %6100 = vmatmul.msk.bf16.gmra.mxu3 %vm1657_vm11, %v1619_v43  ;;  %1827 = vmax.xlane.f32.xlu2 %v8600_v10 }
 0x386   : > { %v1378_v41 = vmul.f32 0.044715, %v1306_v5  ;;  %v1505_v57 = vmul.f32 0.7978846, %v1473_v40  ;;  %v6665_v47 = vpop.eup %6664 }
 0x387   : > { %v8606_v59 = vpop.eup %6666  ;;  %v1568_v40 = vadd.f32 1.0, %v6665_v47 }
 0x388   : > { %v1410_v63 = vmul.f32 %v1378_v41, %v1306_v5  ;;  %6668 = vtanh.f32 %v1505_v57 }
 0x389   : > { %6670 = vpow2.f32 %v1901_v3  ;;  %v1600_v58 = vmul.f32 %v1568_v40, %v1344_v39  ;;  %v1346_v39 = vmul.f32 0.5, %v1306_v5 }
 0x38a   : > { %v1442_v18 = vmul.f32 %v1410_v63, %v1306_v5  ;;  %v1757_v32 = vpop.f32.mrf.mxu1 }
 0x38b   : > { %v1307_v25 = vpop.f32.mrf.mxu2  ;;  %v8609_v43 = vadd.f32 %v1757_v32, %v8324_v0  ;;  %v1865_v32 = vsub.f32 %v8445_v30, %v1808_v21 }
 0x38c   : > { %v1308_v23 = vadd.f32 %v8354_v14, %v1307_v25  ;;  %v1474_v16 = vadd.f32 %v1442_v18, %v1306_v5 }
 0x38d   : > { %1963 = vadd.xlane.f32.xlu2 %v8606_v59  ;;  %1829 = vmax.xlane.f32.xlu0 %v8609_v43 }
 0x38e   : > { %v6669_v27 = vpop.eup %6668  ;;  %v1379_v1 = vmul.f32 0.044715, %v1308_v23  ;;  %v1506_v28 = vmul.f32 0.7978846, %v1474_v16 }
 0x38f   : > { %v1569_v44 = vadd.f32 1.0, %v6669_v27  ;;  %v8615_v47 = vpop.eup %6670  ;;  %v1903_v27 = vmul.f32 1.442695, %v1865_v32 }
 0x390   : > { %v1411_v51 = vmul.f32 %v1379_v1, %v1308_v23  ;;  %6672 = vtanh.f32 %v1506_v28 }
 0x391   : > { %v1601_v41 = vmul.f32 %v1569_v44, %v1345_v11  ;;  %v1347_v11 = vmul.f32 0.5, %v1308_v23 }
 0x392   : > { %v1443_v57 = vmul.f32 %v1411_v51, %v1308_v23 }
 0x393   : > { %v1620_v62 = vpack.c.bf16 %v1601_v41, %v1600_v58 }
 0x394   : > { %v1475_v63 = vadd.f32 %v1443_v57, %v1308_v23 }
 0x395   : > { %6101 = vmatmul.msk.bf16.gmra.mxu3 %vm1657_vm11, %v1620_v62  ;;  %1965 = vadd.xlane.f32.xlu0 %v8615_v47 }
 0x396   : > { %v1507_v18 = vmul.f32 0.7978846, %v1475_v63  ;;  %v6673_v3 = vpop.eup %6672  ;;  %v8639_v63 = vpop.xlane.xlu0 %1813 }
 0x397   : > { %v1760_v25 = vpop.f32.mrf.mxu3  ;;  %v1570_v16 = vadd.f32 1.0, %v6673_v3 }
 0x398   : > { %v8619_v56 = vadd.f32 %v1760_v25, %v8324_v0  ;;  %6674 = vtanh.f32 %v1507_v18  ;;  %v8641_v18 = vpop.xlane.xlu1 %1817 }
 0x399   : > { %v1602_v28 = vmul.f32 %v1570_v16, %v1346_v39  ;;  %6676 = vpow2.f32 %v1903_v27  ;;  %v8643_v27 = vpop.xlane.xlu2 %1809 }
 0x39a   : > { %12949 = vst [vmem:[#allocation39_spill] sm:$0xff] %v8619_v56  ;;  %1831 = vmax.xlane.f32.xlu2 %v8619_v56 }
 0x39e   : > { %v6675_v40 = vpop.eup %6674 }
 0x39f   : > { %v1762_v1 = vpop.f32.mrf.mxu3  ;;  %v1571_v44 = vadd.f32 1.0, %v6675_v40  ;;  %v8631_v62 = vpop.eup %6676 }
 0x3a0   : > { %v8624_v51 = vadd.f32 %v1762_v1, %v8324_v0 }
 0x3a1   : > { %v1603_v58 = vmul.f32 %v1571_v44, %v1347_v11 }
 0x3a2   : > { %12950 = vst [vmem:[#allocation40_spill] sm:$0xff] %v8624_v51  ;;  %1833 = vmax.xlane.f32.xlu0 %v8624_v51 }
 0x3a3   : > { %v1621_v41 = vpack.c.bf16 %v1603_v58, %v1602_v28 }
 0x3a5   : > { %6102 = vmatmul.msk.bf16.gmra.mxu3 %vm1657_vm11, %v1621_v41 }
 0x3a7   : > { %v1765_v57 = vpop.f32.mrf.mxu3 }
 0x3a8   : > { %v8629_v30 = vadd.f32 %v1765_v57, %v8324_v0 }
 0x3aa   : > { %12951 = vst [vmem:[#allocation41_spill] sm:$0xff] %v8629_v30  ;;  %1835 = vmax.xlane.f32.xlu2 %v8629_v30  ;;  %1967 = vadd.xlane.f32.xlu0 %v8631_v62 }
 0x3af   : > { %v1767_v5 = vpop.f32.mrf.mxu3 }
 0x3b0   : > { %v8636_v23 = vadd.f32 %v1767_v5, %v8324_v0 }
 0x3b2   : > { %12952 = vst [vmem:[#allocation42_spill] sm:$0xff] %v8636_v23  ;;  %1837 = vmax.xlane.f32.xlu0 %v8636_v23 }
 0x3c2   : > { %v1956_v25 = vpop.xlane.xlu0 %1955 }
 0x3c3   : > { %6678 = vrcp.f32 %v1956_v25  ;;  %v2030_v40 = vand.u32 2147483648, %v1956_v25  ;;  %v2028_v39 = vand.u32 2147483647, %v1956_v25  ;;  %vm2024_vm6 = vweird.f32 %v1956_v25 }
 0x3c5   : > { %v2031_v28 = vor.u32 1.1754944e-38, %v2030_v40  ;;  %vm2029_vm8 = vcmp.eq.f32.partialorder %v2028_v39, 8.507059e+37  ;;  %v8652_v40 = vpop.xlane.xlu2 %1811 }
 0x3c9   : > { %v6679_v21 = vpop.eup %6678 }
 0x3ca   : > { %v2020_v32 = vmul.f32 %v6679_v21, %v1956_v25  ;;  %vm2025_vm5 = vweird.f32 %v6679_v21 }
 0x3cb   : > { %v1958_v3 = vpop.xlane.xlu1 %1957  ;;  %vm2026_vm7 = vmor %vm2024_vm6, %vm2025_vm5 }
 0x3cc   : > { %6680 = vrcp.f32 %v1958_v3  ;;  %v2021_v16 = vsub.f32 1.0, %v2020_v32  ;;  %v2043_v54 = vand.u32 2147483647, %v1958_v3  ;;  %vm2039_vm10 = vweird.f32 %v1958_v3 }
 0x3ce   : > { %v2022_v1 = vmul.f32 %v6679_v21, %v2021_v16  ;;  %v2045_v16 = vand.u32 2147483648, %v1958_v3  ;;  %vm2044_vm13 = vcmp.eq.f32.partialorder %v2043_v54, 8.507059e+37 }
 0x3d0   : > { %v2023_v44 = vadd.f32 %v6679_v21, %v2022_v1  ;;  %v2046_v1 = vor.u32 1.1754944e-38, %v2045_v16 }
 0x3d2   : > { %v6681_v11 = vpop.eup %6680  ;;  %v2027_v57 = vsel %vm2026_vm7, %v6679_v21, %v2023_v44 }
 0x3d3   : > { %v2035_v58 = vmul.f32 %v6681_v11, %v1958_v3  ;;  %v8645_v41 = vpop.xlane.xlu1 %1819  ;;  %v2032_v17 = vsel %vm2029_vm8, %v2031_v28, %v2027_v57  ;;  %vm2040_vm9 = vweird.f32 %v6681_v11  ;;  %v8660_v3 = vpop.xlane.xlu2 %1821 }
 0x3d4   : > { %v2033_v32 = vmul.f32 %v8532_v24, %v2032_v17  ;;  %vm2041_vm12 = vmor %vm2039_vm10, %vm2040_vm9 }
 0x3d5   : > { %v2036_v5 = vsub.f32 1.0, %v2035_v58 }
 0x3d6   : > { %5832 = vst [vmem:[%s8649_s29] sm:$0xff] %v2033_v32 }
 0x3d7   : > { %v2037_v60 = vmul.f32 %v6681_v11, %v2036_v5 }
 0x3d9   : > { %v2038_v25 = vadd.f32 %v6681_v11, %v2037_v60 }
 0x3db   : > { %v2042_v21 = vsel %vm2041_vm12, %v6681_v11, %v2038_v25  ;;  %v1960_v39 = vpop.xlane.xlu1 %1959 }
 0x3dc   : > { %6682 = vrcp.f32 %v1960_v39  ;;  %v2047_v17 = vsel %vm2044_vm13, %v2046_v1, %v2042_v21  ;;  %v1310_v24 = vpop.f32.mrf.mxu2  ;;  %v2060_v25 = vand.u32 2147483648, %v1960_v39  ;;  %v2058_v21 = vand.u32 2147483647, %v1960_v39 }
 0x3dd   : > { %v8655_v44 = vmul.f32 %v8541_v55, %v2047_v17  ;;  %v1311_v28 = vadd.f32 %v8354_v14, %v1310_v24  ;;  %vm2054_vm15 = vweird.f32 %v1960_v39 }
 0x3de   : > { %v2061_v12 = vor.u32 1.1754944e-38, %v2060_v25  ;;  %vm2059_vm1 = vcmp.eq.f32.partialorder %v2058_v21, 8.507059e+37 }
 0x3df   : > { %5833 = vst [vmem:[%s8649_s29 + $0x8] sm:$0xff] %v8655_v44  ;;  %v1380_v58 = vmul.f32 0.044715, %v1311_v28 }
 0x3e1   : > { %v1412_v5 = vmul.f32 %v1380_v58, %v1311_v28 }
 0x3e2   : > { %v6683_v60 = vpop.eup %6682 }
 0x3e3   : > { %v2050_v57 = vmul.f32 %v6683_v60, %v1960_v39  ;;  %v1444_v16 = vmul.f32 %v1412_v5, %v1311_v28  ;;  %vm2055_vm14 = vweird.f32 %v6683_v60 }
 0x3e4   : > { %v1312_v54 = vpop.f32.mrf.mxu2  ;;  %vm2056_vm0 = vmor %vm2054_vm15, %vm2055_vm14 }
 0x3e5   : > { %v2051_v11 = vsub.f32 1.0, %v2050_v57  ;;  %v1313_v55 = vadd.f32 %v8354_v14, %v1312_v54  ;;  %v1476_v1 = vadd.f32 %v1444_v16, %v1311_v28 }
 0x3e7   : > { %v2052_v37 = vmul.f32 %v6683_v60, %v2051_v11  ;;  %v1381_v24 = vmul.f32 0.044715, %v1313_v55  ;;  %v1508_v5 = vmul.f32 0.7978846, %v1476_v1 }
 0x3e8   : > { %v1824_v50 = vpop.xlane.xlu2 %1823 }
 0x3e9   : > { %v2053_v17 = vadd.f32 %v6683_v60, %v2052_v37  ;;  %v1413_v58 = vmul.f32 %v1381_v24, %v1313_v55  ;;  %v1873_v57 = vsub.f32 %v8582_v48, %v1824_v50  ;;  %v8673_v50 = vpop.xlane.xlu0 %1815 }
 0x3eb   : > { %v2057_v49 = vsel %vm2056_vm0, %v6683_v60, %v2053_v17  ;;  %v1919_v11 = vmul.f32 1.442695, %v1873_v57  ;;  %v1445_v46 = vmul.f32 %v1413_v58, %v1313_v55 }
 0x3ec   : > { %v2062_v15 = vsel %vm2059_vm1, %v2061_v12, %v2057_v49 }
 0x3ed   : > { %v8665_v23 = vmul.f32 %v8571_v20, %v2062_v15  ;;  %v1315_v16 = vpop.f32.mrf.mxu2  ;;  %6684 = vpow2.f32 %v1919_v11  ;;  %v1477_v39 = vadd.f32 %v1445_v46, %v1313_v55  ;;  %v2499_v15 = vmul.f32 %v2033_v32, %v7708_v19 }
 0x3ee   : > { %v8668_v37 = vadd.f32 %v8354_v14, %v1315_v16  ;;  %6686 = vtanh.f32 %v1508_v5 }
 0x3ef   : > { %5834 = vst [vmem:[%s8649_s29 + $0x10] sm:$0xff] %v8665_v23  ;;  %v1509_v25 = vmul.f32 0.7978846, %v1477_v39  ;;  %v2531_v1 = vadd.f32 %v2499_v15, %v7708_v19 }
 0x3f0   : > { %v1382_v60 = vmul.f32 0.044715, %v8668_v37  ;;  %v1962_v49 = vpop.xlane.xlu2 %1961 }
 0x3f1   : > { %6688 = vrcp.f32 %v1962_v49  ;;  %v8687_v11 = vpop.xlane.xlu0 %1825  ;;  %v2075_v56 = vand.u32 2147483648, %v1962_v49  ;;  %v2073_v51 = vand.u32 2147483647, %v1962_v49  ;;  %vm2069_vm3 = vweird.f32 %v1962_v49 }
 0x3f2   : > { %v1414_v12 = vmul.f32 %v1382_v60, %v8668_v37  ;;  %6690 = vtanh.f32 %v1509_v25  ;;  %v1348_v60 = vmul.f32 0.5, %v1311_v28  ;;  %v1349_v25 = vmul.f32 0.5, %v1313_v55 }
 0x3f3   : > { %v8677_v20 = vpop.eup %6684  ;;  %vm2074_vm5 = vcmp.eq.f32.partialorder %v2073_v51, 8.507059e+37 }
 0x3f4   : > { %v1446_v48 = vmul.f32 %v1414_v12, %v8668_v37  ;;  %v6687_v46 = vpop.eup %6686  ;;  %1983 = vadd.xlane.f32.xlu0 %v8677_v20 }
 0x3f5   : > { %v1317_v54 = vpop.f32.mrf.mxu2  ;;  %v1572_v58 = vadd.f32 1.0, %v6687_v46 }
 0x3f6   : > { %v8682_v21 = vadd.f32 %v8354_v14, %v1317_v54  ;;  %v1478_v32 = vadd.f32 %v1446_v48, %v8668_v37  ;;  %v7122_v54 = vld [vmem:[%s7514_s24] sm:$0xff] }
 0x3f7   : > { %v6689_v17 = vpop.eup %6688  ;;  %v8693_v19 = vadd.f32 %v7122_v54, %v2531_v1  ;;  %v1604_v15 = vmul.f32 %v1572_v58, %v1348_v60  ;;  %v1350_v54 = vmul.f32 0.5, %v8668_v37 }
 0x3f8   : > { %v1383_v24 = vmul.f32 0.044715, %v8682_v21  ;;  %v6691_v57 = vpop.eup %6690  ;;  %v2065_v5 = vmul.f32 %v6689_v17, %v1962_v49  ;;  %v8689_v16 = vpop.xlane.xlu2 %1827  ;;  %v1510_v48 = vmul.f32 0.7978846, %v1478_v32  ;;  %vm2070_vm2 = vweird.f32 %v6689_v17 }
 0x3f9   : > { %v1573_v14 = vadd.f32 1.0, %v6691_v57  ;;  %12953 = vst [vmem:[#allocation43_spill] sm:$0xff] %v8693_v19  ;;  %vm2071_vm4 = vmor %vm2069_vm3, %vm2070_vm2  ;;  %v2076_v32 = vor.u32 1.1754944e-38, %v2075_v56 }
 0x3fa   : > { %v1415_v39 = vmul.f32 %v1383_v24, %v8682_v21  ;;  %v2066_v12 = vsub.f32 1.0, %v2065_v5  ;;  %6692 = vtanh.f32 %v1510_v48  ;;  %v1866_v24 = vsub.f32 %v8480_v61, %v8643_v27 }
 0x3fb   : > { %v1605_v22 = vmul.f32 %v1573_v14, %v1349_v25  ;;  %v1868_v14 = vsub.f32 %v8506_v2, %v8639_v63 }
 0x3fc   : > { %v1447_v46 = vmul.f32 %v1415_v39, %v8682_v21  ;;  %v2067_v30 = vmul.f32 %v6689_v17, %v2066_v12  ;;  %2595 = vadd.xlane.f32.xlu0 %v8693_v19 }
 0x3fd   : > { %v1622_v38 = vpack.c.bf16 %v1605_v22, %v1604_v15  ;;  %v1351_v15 = vmul.f32 0.5, %v8682_v21  ;;  %v1909_v37 = vmul.f32 1.442695, %v1868_v14 }
 0x3fe   : > { %v1479_v28 = vadd.f32 %v1447_v46, %v8682_v21  ;;  %v2068_v55 = vadd.f32 %v6689_v17, %v2067_v30 }
 0x3ff   : > { %6103 = vmatmul.msk.bf16.gmra.mxu3 %vm1657_vm11, %v1622_v38  ;;  %v1905_v38 = vmul.f32 1.442695, %v1866_v24 }
 0x400   : > { %v1511_v1 = vmul.f32 0.7978846, %v1479_v28  ;;  %v2072_v58 = vsel %vm2071_vm4, %v6689_v17, %v2068_v55  ;;  %v1964_v57 = vpop.xlane.xlu2 %1963  ;;  %v1830_v5 = vpop.xlane.xlu0 %1829  ;;  %v2501_v55 = vmul.f32 %v8665_v23, %v7764_v4 }
 0x401   : > { %6694 = vrcp.f32 %v1964_v57  ;;  %v1876_v22 = vsub.f32 %v8609_v43, %v1830_v5  ;;  %v2077_v30 = vsel %vm2074_vm5, %v2076_v32, %v2072_v58  ;;  %v6693_v60 = vpop.eup %6692  ;;  %v2088_v48 = vand.u32 2147483647, %v1964_v57 }
 0x402   : > { %6696 = vtanh.f32 %v1511_v1  ;;  %v8703_v49 = vmul.f32 %v8590_v42, %v2077_v30  ;;  %v1574_v25 = vadd.f32 1.0, %v6693_v60  ;;  %v1867_v42 = vsub.f32 %v8495_v26, %v8652_v40 }
 0x403   : > { %v1925_v39 = vmul.f32 1.442695, %v1876_v22  ;;  %v2090_v28 = vand.u32 2147483648, %v1964_v57  ;;  %vm2084_vm7 = vweird.f32 %v1964_v57  ;;  %v2533_v30 = vadd.f32 %v2501_v55, %v7764_v4 }
 0x404   : > { %5835 = vst [vmem:[%s8649_s29 + $0x18] sm:$0xff] %v8703_v49  ;;  %v1606_v2 = vmul.f32 %v1574_v25, %v1350_v54  ;;  %v1907_v40 = vmul.f32 1.442695, %v1867_v42  ;;  %vm2089_vm9 = vcmp.eq.f32.partialorder %v2088_v48, 8.507059e+37  ;;  %v1869_v4 = vsub.f32 %v8545_v35, %v8673_v50 }
 0x405   : > { %6698 = vpow2.f32 %v1925_v39  ;;  %v2091_v22 = vor.u32 1.1754944e-38, %v2090_v28  ;;  %v1872_v28 = vsub.f32 %v8521_v7, %v8660_v3  ;;  %v1871_v55 = vsub.f32 %v8557_v29, %v8645_v41 }
 0x406   : > { %6700 = vpow2.f32 %v1905_v38  ;;  %v1911_v35 = vmul.f32 1.442695, %v1869_v4  ;;  %v1874_v29 = vsub.f32 %v8593_v8, %v8687_v11  ;;  %v1875_v41 = vsub.f32 %v8600_v10, %v8689_v16 }
 0x407   : > { %v6695_v27 = vpop.eup %6694  ;;  %v1915_v7 = vmul.f32 1.442695, %v1871_v55 }
 0x408   : > { %v1770_v61 = vpop.f32.mrf.mxu3  ;;  %v6697_v51 = vpop.eup %6696  ;;  %v2080_v17 = vmul.f32 %v6695_v27, %v1964_v57  ;;  %vm2085_vm6 = vweird.f32 %v6695_v27  ;;  %v1870_v57 = vsub.f32 %v8515_v31, %v8641_v18 }
 0x409   : > { %v8708_v56 = vadd.f32 %v1770_v61, %v8324_v0  ;;  %v8710_v43 = vpop.xlane.xlu0 %1965  ;;  %v1575_v46 = vadd.f32 1.0, %v6697_v51  ;;  %vm2086_vm8 = vmor %vm2084_vm7, %vm2085_vm6 }
 0x40a   : > { %6702 = vrcp.f32 %v8710_v43  ;;  %v2081_v12 = vsub.f32 1.0, %v2080_v17  ;;  %v2105_v51 = vand.u32 2147483648, %v8710_v43  ;;  %v7123_v17 = vld [vmem:[%s7514_s24 + $0x10] sm:$0xff]  ;;  %v2103_v18 = vand.u32 2147483647, %v8710_v43 }
 0x40b   : > { %1839 = vmax.xlane.f32.xlu1 %v8708_v56  ;;  %v8722_v1 = vpop.eup %6698  ;;  %v1607_v63 = vmul.f32 %v1575_v46, %v1351_v15  ;;  %6704 = vpow2.f32 %v1907_v40  ;;  %v8742_v25 = vadd.f32 %v7123_v17, %v2533_v30  ;;  %vm2099_vm10 = vweird.f32 %v8710_v43 }
 0x40c   : > { %v2082_v26 = vmul.f32 %v6695_v27, %v2081_v12  ;;  %1989 = vadd.xlane.f32.xlu0 %v8722_v1  ;;  %v8725_v24 = vpop.eup %6700  ;;  %6706 = vpow2.f32 %v1909_v37  ;;  %v1913_v12 = vmul.f32 1.442695, %v1870_v57  ;;  %v2106_v54 = vor.u32 1.1754944e-38, %v2105_v51 }
 0x40d   : > { %v1623_v21 = vpack.c.bf16 %v1607_v63, %v1606_v2  ;;  %12954 = vst [vmem:[#allocation44_spill] sm:$0xff] %v8742_v25  ;;  %vm2104_vm13 = vcmp.eq.f32.partialorder %v2103_v18, 8.507059e+37  ;;  %v1917_v40 = vmul.f32 1.442695, %v1872_v28 }
 0x40e   : > { %v2083_v58 = vadd.f32 %v6695_v27, %v2082_v26  ;;  %6708 = vpow2.f32 %v1913_v12  ;;  %v7124_v26 = vld [vmem:[%s7514_s24 + $0x20] sm:$0xff]  ;;  %v2502_v12 = vmul.f32 %v8703_v49, %v7779_v9 }
 0x40f   : > { %6104 = vmatmul.msk.bf16.gmra.mxu3 %vm1657_vm11, %v1623_v21  ;;  %6710 = vpow2.f32 %v1911_v35  ;;  %v1921_v21 = vmul.f32 1.442695, %v1874_v29 }
 0x410   : > { %v1772_v32 = vpop.f32.mrf.mxu3  ;;  %v6703_v5 = vpop.eup %6702  ;;  %v2087_v38 = vsel %vm2086_vm8, %v6695_v27, %v2083_v58  ;;  %v2534_v35 = vadd.f32 %v2502_v12, %v7779_v9 }
 0x411   : > { %v8728_v23 = vadd.f32 %v1772_v32, %v8324_v0  ;;  %v2095_v39 = vmul.f32 %v6703_v5, %v8710_v43  ;;  %v2092_v60 = vsel %vm2089_vm9, %v2091_v22, %v2087_v38  ;;  %vm2100_vm11 = vweird.f32 %v6703_v5 }
 0x412   : > { %v2093_v27 = vmul.f32 %v8606_v59, %v2092_v60  ;;  %v8751_v59 = vpop.eup %6704  ;;  %vm2101_vm12 = vmor %vm2099_vm10, %vm2100_vm11 }
 0x413   : > { %1841 = vmax.xlane.f32.xlu2 %v8728_v23  ;;  %1969 = vadd.xlane.f32.xlu1 %v8725_v24  ;;  %v2096_v61 = vsub.f32 1.0, %v2095_v39  ;;  %v8754_v46 = vpop.eup %6706 }
 0x414   : > { %v2503_v14 = vmul.f32 %v2093_v27, %v7816_v34  ;;  %5836 = vst [vmem:[%s8649_s29 + $0x20] sm:$0xff] %v2093_v27  ;;  %2599 = vadd.xlane.f32.xlu0 %v8742_v25  ;;  %v8768_v3 = vpop.eup %6708 }
 0x415   : > { %v8744_v42 = vpop.xlane.xlu0 %1833  ;;  %v2097_v31 = vmul.f32 %v6703_v5, %v2096_v61  ;;  %v8770_v37 = vpop.eup %6710  ;;  %v2500_v61 = vmul.f32 %v8655_v44, %v7711_v6 }
 0x416   : > { %v2535_v15 = vadd.f32 %v2503_v14, %v7816_v34  ;;  %v7126_v14 = vld [vmem:[%s7514_s24 + $0x30] sm:$0xff] }
 0x417   : > { %v2098_v50 = vadd.f32 %v6703_v5, %v2097_v31  ;;  %v2532_v17 = vadd.f32 %v2500_v61, %v7711_v6  ;;  %v7125_v31 = vld [vmem:[%s7514_s24 + $0x8] sm:$0xff] }
 0x418   : > { %v8764_v2 = vadd.f32 %v7124_v26, %v2535_v15  ;;  %v7128_v15 = vld [vmem:[%s7514_s24 + $0x28] sm:$0xff] }
 0x419   : > { %v2102_v48 = vsel %vm2101_vm12, %v6703_v5, %v2098_v50  ;;  %v1923_v5 = vmul.f32 1.442695, %v1875_v41  ;;  %v8798_v18 = vadd.f32 %v7125_v31, %v2532_v17  ;;  %v7127_v50 = vld [vmem:[%s7514_s24 + $0x18] sm:$0xff] }
 0x41a   : > { %v2107_v43 = vsel %vm2104_vm13, %v2106_v54, %v2102_v48  ;;  %12955 = vst [vmem:[#allocation45_spill] sm:$0xff] %v8764_v2  ;;  %v8809_v54 = vadd.f32 %v7127_v50, %v2534_v35 }
 0x41b   : > { %1971 = vadd.xlane.f32.xlu1 %v8751_v59  ;;  %1973 = vadd.xlane.f32.xlu2 %v8754_v46  ;;  %v2108_v34 = vmul.f32 %v8615_v47, %v2107_v43  ;;  %12956 = vst [vmem:[#allocation46_spill] sm:$0xff] %v8798_v18 }
 0x41c   : > { %2603 = vadd.xlane.f32.xlu0 %v8764_v2  ;;  %12958 = vst [vmem:[#allocation48_spill] sm:$0xff] %v8809_v54 }
 0x41d   : > { %v1968_v63 = vpop.xlane.xlu0 %1967  ;;  %5837 = vst [vmem:[%s8649_s29 + $0x28] sm:$0xff] %v2108_v34  ;;  %v2504_v6 = vmul.f32 %v2108_v34, %v7810_v33 }
 0x41e   : > { %6712 = vrcp.f32 %v1968_v63  ;;  %v2120_v22 = vand.u32 2147483648, %v1968_v63  ;;  %v2118_v39 = vand.u32 2147483647, %v1968_v63  ;;  %vm2114_vm15 = vweird.f32 %v1968_v63 }
 0x41f   : > { %6714 = vpow2.f32 %v1917_v40  ;;  %v8820_v40 = vpop.xlane.xlu2 %1831 }
 0x420   : > { %6716 = vpow2.f32 %v1915_v7  ;;  %v2121_v10 = vor.u32 1.1754944e-38, %v2120_v22  ;;  %vm2119_vm1 = vcmp.eq.f32.partialorder %v2118_v39, 8.507059e+37 }
 0x421   : > { %6718 = vpow2.f32 %v1921_v21 }
 0x422   : > { %6720 = vpow2.f32 %v1923_v5 }
 0x423   : > { %1977 = vadd.xlane.f32.xlu2 %v8768_v3  ;;  %1975 = vadd.xlane.f32.xlu1 %v8770_v37 }
 0x424   : > { %v6713_v47 = vpop.eup %6712 }
 0x425   : > { %v2110_v58 = vmul.f32 %v6713_v47, %v1968_v63  ;;  %v8778_v30 = vpop.eup %6714  ;;  %vm2115_vm14 = vweird.f32 %v6713_v47  ;;  %v8818_v49 = vpop.xlane.xlu0 %1837 }
 0x426   : > { %v8780_v8 = vpop.eup %6716  ;;  %vm2116_vm0 = vmor %vm2114_vm15, %vm2115_vm14 }
 0x427   : > { %v2111_v32 = vsub.f32 1.0, %v2110_v58  ;;  %v8785_v4 = vpop.eup %6718  ;;  %v8827_v21 = vpop.xlane.xlu2 %1835 }
 0x428   : > { %v8791_v51 = vpop.eup %6720 }
 0x429   : > { %v2112_v38 = vmul.f32 %v6713_v47, %v2111_v32 }
 0x42b   : > { %v2113_v11 = vadd.f32 %v6713_v47, %v2112_v38  ;;  %1981 = vadd.xlane.f32.xlu2 %v8778_v30  ;;  %1979 = vadd.xlane.f32.xlu1 %v8780_v8 }
 0x42d   : > { %v2117_v16 = vsel %vm2116_vm0, %v6713_v47, %v2113_v11 }
 0x42e   : > { %v2122_v57 = vsel %vm2119_vm1, %v2121_v10, %v2117_v16 }
 0x42f   : > { %v2123_v60 = vmul.f32 %v8631_v62, %v2122_v57 }
 0x431   : > { %v2505_v27 = vmul.f32 %v2123_v60, %v7858_v45  ;;  %5838 = vst [vmem:[%s8649_s29 + $0x30] sm:$0xff] %v2123_v60 }
 0x433   : > { %1987 = vadd.xlane.f32.xlu2 %v8791_v51  ;;  %1985 = vadd.xlane.f32.xlu1 %v8785_v4  ;;  %v2537_v62 = vadd.f32 %v2505_v27, %v7858_v45  ;;  %v2536_v45 = vadd.f32 %v2504_v6, %v7810_v33 }
 0x435   : > { %v8801_v44 = vadd.f32 %v7126_v14, %v2537_v62  ;;  %v8815_v48 = vadd.f32 %v7128_v15, %v2536_v45 }
 0x437   : > { %12957 = vst [vmem:[#allocation47_spill] sm:$0xff] %v8801_v44 }
 0x438   : > { %12959 = vst [vmem:[#allocation49_spill] sm:$0xff] %v8815_v48 }
 0x43b   : > { %2597 = vadd.xlane.f32.xlu1 %v8798_v18  ;;  %2607 = vadd.xlane.f32.xlu2 %v8801_v44 }
 0x443   : > { %2601 = vadd.xlane.f32.xlu1 %v8809_v54 }
 0x44b   : > { %2605 = vadd.xlane.f32.xlu1 %v8815_v48 }
 0x467   : > { %v1984_v28 = vpop.xlane.xlu0 %1983 }
 0x468   : > { %6722 = vrcp.f32 %v1984_v28  ;;  %v2240_v26 = vand.u32 2147483648, %v1984_v28  ;;  %v2238_v34 = vand.u32 2147483647, %v1984_v28  ;;  %vm2234_vm3 = vweird.f32 %v1984_v28 }
 0x46a   : > { %v2241_v7 = vor.u32 1.1754944e-38, %v2240_v26  ;;  %vm2239_vm5 = vcmp.eq.f32.partialorder %v2238_v34, 8.507059e+37 }
 0x46e   : > { %v6723_v43 = vpop.eup %6722 }
 0x46f   : > { %v2230_v9 = vmul.f32 %v6723_v43, %v1984_v28  ;;  %vm2235_vm2 = vweird.f32 %v6723_v43  ;;  %v2596_v47 = vpop.xlane.xlu0 %2595 }
 0x470   : > { %vm2236_vm4 = vmor %vm2234_vm3, %vm2235_vm2 }
 0x471   : > { %v2231_v55 = vsub.f32 1.0, %v2230_v9 }
 0x473   : > { %v2232_v63 = vmul.f32 %v6723_v43, %v2231_v55 }
 0x475   : > { %v2233_v33 = vadd.f32 %v6723_v43, %v2232_v63 }
 0x477   : > { %v2237_v29 = vsel %vm2236_vm4, %v6723_v43, %v2233_v33 }
 0x478   : > { %v2242_v41 = vsel %vm2239_vm5, %v2241_v7, %v2237_v29  ;;  %v1775_v7 = vpop.f32.mrf.mxu3  ;;  %v2659_v29 = vmul.f32 %v2596_v47, %v7531_v13 }
 0x479   : > { %v8823_v58 = vmul.f32 %v8677_v20, %v2242_v41 }
 0x47b   : > { %5846 = vst [vmem:[%s8649_s29 + $0x70] sm:$0xff] %v8823_v58 }
 0x47e   : > { %v8829_v32 = vpop.xlane.xlu1 %1839 }
 0x47f   : > { %v1990_v5 = vpop.xlane.xlu0 %1989 }
 0x480   : > { %6724 = vrcp.f32 %v1990_v5  ;;  %v2285_v57 = vand.u32 2147483648, %v1990_v5  ;;  %v2283_v17 = vand.u32 2147483647, %v1990_v5  ;;  %vm2279_vm7 = vweird.f32 %v1990_v5 }
 0x482   : > { %v2286_v14 = vor.u32 1.1754944e-38, %v2285_v57  ;;  %vm2284_vm9 = vcmp.eq.f32.partialorder %v2283_v17, 8.507059e+37  ;;  %v8869_v57 = vadd.f32 %v1775_v7, %v8324_v0  ;;  %v8875_v17 = vsub.f32 %v8693_v19, %v2659_v29 }
 0x486   : > { %v8831_v22 = vpop.xlane.xlu2 %1841  ;;  %v1970_v38 = vpop.xlane.xlu1 %1969 }
 0x487   : > { %6726 = vrcp.f32 %v1970_v38  ;;  %v6725_v39 = vpop.eup %6724  ;;  %v2135_v6 = vand.u32 2147483648, %v1970_v38  ;;  %vm2129_vm10 = vweird.f32 %v1970_v38  ;;  %v2133_v28 = vand.u32 2147483647, %v1970_v38 }
 0x488   : > { %v2275_v11 = vmul.f32 %v6725_v39, %v1990_v5  ;;  %vm2280_vm6 = vweird.f32 %v6725_v39 }
 0x489   : > { %vm2281_vm8 = vmor %vm2279_vm7, %vm2280_vm6  ;;  %v2136_v41 = vor.u32 1.1754944e-38, %v2135_v6  ;;  %vm2134_vm13 = vcmp.eq.f32.partialorder %v2133_v28, 8.507059e+37 }
 0x48a   : > { %v2276_v16 = vsub.f32 1.0, %v2275_v11 }
 0x48c   : > { %v2277_v27 = vmul.f32 %v6725_v39, %v2276_v16 }
 0x48d   : > { %v6727_v10 = vpop.eup %6726 }
 0x48e   : > { %v2125_v60 = vmul.f32 %v6727_v10, %v1970_v38  ;;  %v8833_v20 = vpop.xlane.xlu1 %1971  ;;  %v8835_v61 = vpop.xlane.xlu2 %1973  ;;  %v2278_v31 = vadd.f32 %v6725_v39, %v2277_v27  ;;  %vm2130_vm11 = vweird.f32 %v6727_v10 }
 0x48f   : > { %6728 = vrcp.f32 %v8833_v20  ;;  %vm8846_vm12 = vmor %vm2129_vm10, %vm2130_vm11  ;;  %v2148_v11 = vand.u32 2147483647, %v8833_v20  ;;  %v2163_v47 = vand.u32 2147483647, %v8835_v61  ;;  %vm2144_vm15 = vweird.f32 %v8833_v20 }
 0x490   : > { %v2126_v62 = vsub.f32 1.0, %v2125_v60  ;;  %6730 = vrcp.f32 %v8835_v61  ;;  %v2282_v35 = vsel %vm2281_vm8, %v6725_v39, %v2278_v31  ;;  %v2165_v31 = vand.u32 2147483648, %v8835_v61 }
 0x491   : > { %v2287_v45 = vsel %vm2284_vm9, %v2286_v14, %v2282_v35  ;;  %vm2159_vm0 = vweird.f32 %v8835_v61  ;;  %vm8889_vm2 = vcmp.eq.f32.partialorder %v2148_v11, 8.507059e+37  ;;  %vm8906_vm4 = vcmp.eq.f32.partialorder %v2163_v47, 8.507059e+37 }
 0x492   : > { %v2127_v12 = vmul.f32 %v6727_v10, %v2126_v62  ;;  %v8842_v43 = vmul.f32 %v8722_v1, %v2287_v45 }
 0x494   : > { %v2128_v50 = vadd.f32 %v6727_v10, %v2127_v12  ;;  %5849 = vst [vmem:[%s8649_s29 + $0x88] sm:$0xff] %v8842_v43 }
 0x495   : > { %v8839_v15 = vpop.eup %6728 }
 0x496   : > { %v8844_v9 = vpop.eup %6730  ;;  %v2140_v26 = vmul.f32 %v8839_v15, %v8833_v20  ;;  %v8852_v63 = vpop.xlane.xlu2 %1977  ;;  %v2132_v33 = vsel %vm8846_vm12, %v6727_v10, %v2128_v50  ;;  %v2150_v10 = vand.u32 2147483648, %v8833_v20  ;;  %vm2145_vm14 = vweird.f32 %v8839_v15 }
 0x497   : > { %v8854_v34 = vpop.xlane.xlu1 %1975  ;;  %v2155_v1 = vmul.f32 %v8844_v9, %v8835_v61  ;;  %6732 = vrcp.f32 %v8852_v63  ;;  %v2137_v16 = vsel %vm2134_vm13, %v2136_v41, %v2132_v33  ;;  %vm2160_vm1 = vweird.f32 %v8844_v9  ;;  %vm8902_vm3 = vmor %vm2144_vm15, %vm2145_vm14 }
 0x498   : > { %v2141_v5 = vsub.f32 1.0, %v2140_v26  ;;  %6734 = vrcp.f32 %v8854_v34  ;;  %v2138_v27 = vmul.f32 %v8725_v24, %v2137_v16  ;;  %v2151_v50 = vor.u32 1.1754944e-38, %v2150_v10  ;;  %vm8921_vm5 = vmor %vm2159_vm0, %vm2160_vm1 }
 0x499   : > { %v2156_v38 = vsub.f32 1.0, %v2155_v1  ;;  %v2195_v45 = vand.u32 2147483648, %v8852_v63  ;;  %v2166_v41 = vor.u32 1.1754944e-38, %v2165_v31  ;;  %v2193_v11 = vand.u32 2147483647, %v8852_v63 }
 0x49a   : > { %v2142_v39 = vmul.f32 %v8839_v15, %v2141_v5  ;;  %5839 = vst [vmem:[%s8649_s29 + $0x38] sm:$0xff] %v2138_v27  ;;  %v2506_v1 = vmul.f32 %v2138_v27, %v7861_v52  ;;  %vm2189_vm6 = vweird.f32 %v8852_v63  ;;  %vm2174_vm7 = vweird.f32 %v8854_v34  ;;  %v9031_v27 = vpop.f32.mrf.mxu3 }
 0x49b   : > { %v2157_v60 = vmul.f32 %v8844_v9, %v2156_v38  ;;  %v2178_v38 = vand.u32 2147483647, %v8854_v34  ;;  %v8932_v61 = vor.u32 1.1754944e-38, %v2195_v45  ;;  %vm8951_vm11 = vcmp.eq.f32.partialorder %v2193_v11, 8.507059e+37 }
 0x49c   : > { %v2143_v62 = vadd.f32 %v8839_v15, %v2142_v39 }
 0x49d   : > { %v8880_v14 = vpop.eup %6732  ;;  %v2158_v12 = vadd.f32 %v8844_v9, %v2157_v60  ;;  %vm8942_vm9 = vcmp.eq.f32.partialorder %v2178_v38, 8.507059e+37 }
 0x49e   : > { %v8887_v24 = vpop.eup %6734  ;;  %v2185_v6 = vmul.f32 %v8880_v14, %v8852_v63  ;;  %v8896_v20 = vpop.xlane.xlu2 %1981  ;;  %v2147_v7 = vsel %vm8902_vm3, %v8839_v15, %v2143_v62  ;;  %v2180_v15 = vand.u32 2147483648, %v8854_v34  ;;  %vm2190_vm10 = vweird.f32 %v8880_v14 }
 0x49f   : > { %v8898_v28 = vpop.xlane.xlu1 %1979  ;;  %v2170_v33 = vmul.f32 %v8887_v24, %v8854_v34  ;;  %6736 = vrcp.f32 %v8896_v20  ;;  %v2162_v39 = vsel %vm8921_vm5, %v8844_v9, %v2158_v12  ;;  %v2538_v9 = vadd.f32 %v2506_v1, %v7861_v52  ;;  %vm9004_vm0 = vmor %vm2189_vm6, %vm2190_vm10 }
 0x4a0   : > { %v2186_v5 = vsub.f32 1.0, %v2185_v6  ;;  %6738 = vrcp.f32 %v8898_v28  ;;  %v2152_v47 = vsel %vm8889_vm2, %v2151_v50, %v2147_v7  ;;  %vm2175_vm8 = vweird.f32 %v8887_v24  ;;  %v7129_v50 = vld [vmem:[%s7514_s24 + $0x38] sm:$0xff] }
 0x4a1   : > { %v2171_v10 = vsub.f32 1.0, %v2170_v33  ;;  %v2153_v62 = vmul.f32 %v8751_v59, %v2152_v47  ;;  %v2167_v31 = vsel %vm8906_vm4, %v2166_v41, %v2162_v39  ;;  %v2223_v35 = vand.u32 2147483647, %v8896_v20  ;;  %vm8980_vm12 = vmor %vm2174_vm7, %vm2175_vm8 }
 0x4a2   : > { %v2187_v16 = vmul.f32 %v8880_v14, %v2186_v5  ;;  %v8958_v45 = vadd.f32 %v7129_v50, %v2538_v9  ;;  %v8961_v55 = vmul.f32 %v8754_v46, %v2167_v31  ;;  %v2181_v59 = vor.u32 1.1754944e-38, %v2180_v15 }
 0x4a3   : > { %v2172_v60 = vmul.f32 %v8887_v24, %v2171_v10  ;;  %v2225_v33 = vand.u32 2147483648, %v8896_v20  ;;  %v2208_v1 = vand.u32 2147483647, %v8898_v28  ;;  %5840 = vst [vmem:[%s8649_s29 + $0x40] sm:$0xff] %v2153_v62  ;;  %v2507_v38 = vmul.f32 %v2153_v62, %v7954_v36 }
 0x4a4   : > { %12974 = vst [vmem:[#allocation50_spill] sm:$0xff] %v8958_v45  ;;  %v2188_v5 = vadd.f32 %v8880_v14, %v2187_v16  ;;  %2609 = vadd.xlane.f32.xlu0 %v8958_v45  ;;  %vm2219_vm13 = vweird.f32 %v8896_v20  ;;  %vm8995_vm14 = vcmp.eq.f32.partialorder %v2223_v35, 8.507059e+37  ;;  %vm2204_vm15 = vweird.f32 %v8898_v28 }
 0x4a5   : > { %v8949_v12 = vpop.eup %6736  ;;  %v2173_v52 = vadd.f32 %v8887_v24, %v2172_v60  ;;  %5841 = vst [vmem:[%s8649_s29 + $0x48] sm:$0xff] %v8961_v55  ;;  %v2210_v15 = vand.u32 2147483648, %v8898_v28  ;;  %v2226_v60 = vor.u32 1.1754944e-38, %v2225_v33  ;;  %vm9009_vm1 = vcmp.eq.f32.partialorder %v2208_v1, 8.507059e+37 }
 0x4a6   : > { %v2215_v26 = vmul.f32 %v8949_v12, %v8896_v20  ;;  %v8967_v7 = vpop.xlane.xlu2 %1987  ;;  %v8972_v41 = vpop.eup %6738  ;;  %v2192_v62 = vsel %vm9004_vm0, %v8880_v14, %v2188_v5  ;;  %vm2220_vm2 = vweird.f32 %v8949_v12  ;;  %v2539_v63 = vadd.f32 %v2507_v38, %v7954_v36  ;;  %v7130_v36 = vld [vmem:[%s7514_s24 + $0x40] sm:$0xff] }
 0x4a7   : > { %v8969_v29 = vpop.xlane.xlu1 %1985  ;;  %6740 = vrcp.f32 %v8967_v7  ;;  %v2177_v39 = vsel %vm8980_vm12, %v8887_v24, %v2173_v52  ;;  %v2200_v34 = vmul.f32 %v8972_v41, %v8898_v28  ;;  %vm2205_vm3 = vweird.f32 %v8972_v41  ;;  %vm9035_vm5 = vmor %vm2219_vm13, %vm2220_vm2 }
 0x4a8   : > { %v2216_v11 = vsub.f32 1.0, %v2215_v26  ;;  %6742 = vrcp.f32 %v8969_v29  ;;  %v2182_v31 = vsel %vm8942_vm9, %v2181_v59, %v2177_v39  ;;  %v2211_v33 = vor.u32 1.1754944e-38, %v2210_v15  ;;  %vm9054_vm6 = vmor %vm2204_vm15, %vm2205_vm3  ;;  %v7131_v59 = vld [vmem:[%s7514_s24 + $0x50] sm:$0xff] }
 0x4a9   : > { %v2201_v9 = vsub.f32 1.0, %v2200_v34  ;;  %v2183_v50 = vmul.f32 %v8770_v37, %v2182_v31  ;;  %vm2264_vm4 = vweird.f32 %v8967_v7  ;;  %v2268_v14 = vand.u32 2147483647, %v8967_v7 }
 0x4aa   : > { %v2217_v16 = vmul.f32 %v8949_v12, %v2216_v11  ;;  %v9029_v1 = vadd.f32 %v7130_v36, %v2539_v63  ;;  %v2270_v46 = vand.u32 2147483648, %v8967_v7  ;;  %v2197_v39 = vsel %vm8951_vm11, %v8932_v61, %v2192_v62  ;;  %v12988_v63 = vld [vmem:[#allocation17_spill] sm:$0xff] }
 0x4ab   : > { %v2202_v35 = vmul.f32 %v8972_v41, %v2201_v9  ;;  %5842 = vst [vmem:[%s8649_s29 + $0x50] sm:$0xff] %v2183_v50  ;;  %v2253_v15 = vand.u32 2147483647, %v8969_v29  ;;  %v2509_v6 = vmul.f32 %v2183_v50, %v8024_v53  ;;  %v2508_v31 = vmul.f32 %v8961_v55, %v12988_v63 }
 0x4ac   : > { %v2218_v52 = vadd.f32 %v8949_v12, %v2217_v16  ;;  %12983 = vst [vmem:[#allocation51_spill] sm:$0xff] %v9029_v1  ;;  %1843 = vmax.xlane.f32.xlu0 %v8869_v57  ;;  %2611 = vadd.xlane.f32.xlu1 %v9029_v1  ;;  %v2255_v16 = vand.u32 2147483648, %v8969_v29  ;;  %v9077_v50 = vmul.f32 %v8768_v3, %v2197_v39  ;;  %v2271_v47 = vor.u32 1.1754944e-38, %v2270_v46 }
 0x4ad   : > { %v9024_v26 = vpop.eup %6740  ;;  %v2203_v37 = vadd.f32 %v8972_v41, %v2202_v35  ;;  %v2541_v62 = vadd.f32 %v2509_v6, %v8024_v53  ;;  %vm2269_vm11 = vcmp.eq.f32.partialorder %v2268_v14, 8.507059e+37  ;;  %vm2249_vm10 = vweird.f32 %v8969_v29 }
 0x4ae   : > { %v2260_v5 = vmul.f32 %v9024_v26, %v8967_v7  ;;  %v6743_v11 = vpop.eup %6742  ;;  %v2222_v20 = vsel %vm9035_vm5, %v8949_v12, %v2218_v52  ;;  %vm2265_vm7 = vweird.f32 %v9024_v26  ;;  %v2600_v52 = vpop.xlane.xlu0 %2599  ;;  %5843 = vst [vmem:[%s8649_s29 + $0x58] sm:$0xff] %v9077_v50  ;;  %v2256_v7 = vor.u32 1.1754944e-38, %v2255_v16 }
 0x4af   : > { %v2598_v38 = vpop.xlane.xlu1 %2597  ;;  %v2207_v12 = vsel %vm9054_vm6, %v8972_v41, %v2203_v37  ;;  %v2245_v24 = vmul.f32 %v6743_v11, %v8969_v29  ;;  %v2227_v36 = vsel %vm8995_vm14, %v2226_v60, %v2222_v20  ;;  %v9082_v37 = vadd.f32 %v7131_v59, %v2541_v62  ;;  %v12990_v60 = vld [vmem:[#allocation40_spill] sm:$0xff]  ;;  %vm9104_vm9 = vmor %vm2264_vm4, %vm2265_vm7  ;;  %v12995_v59 = vld [vmem:[#allocation41_spill] sm:$0xff] }
 0x4b0   : > { %v2660_v61 = vmul.f32 %v2598_v38, %v7531_v13  ;;  %v2261_v28 = vsub.f32 1.0, %v2260_v5  ;;  %v9087_v5 = vmul.f32 %v8778_v30, %v2227_v36  ;;  %v2212_v55 = vsel %vm9009_vm1, %v2211_v33, %v2207_v12 }
 0x4b1   : > { %v2246_v41 = vsub.f32 1.0, %v2245_v24  ;;  %12989 = vst [vmem:[#allocation17_spill] sm:$0xff] %v9082_v37  ;;  %vm2250_vm8 = vweird.f32 %v6743_v11  ;;  %v9095_v10 = vmul.f32 %v8780_v8, %v2212_v55  ;;  %v1878_v39 = vsub.f32 %v12990_v60, %v8744_v42 }
 0x4b2   : > { %v9070_v9 = vsub.f32 %v8798_v18, %v2660_v61  ;;  %v2262_v35 = vmul.f32 %v9024_v26, %v2261_v28  ;;  %v2661_v20 = vmul.f32 %v2600_v52, %v7531_v13  ;;  %v2723_v33 = vmul.f32 %v8875_v17, %v8875_v17  ;;  %5845 = vst [vmem:[%s8649_s29 + $0x68] sm:$0xff] %v9087_v5  ;;  %vm2251_vm12 = vmor %vm2249_vm10, %vm2250_vm8  ;;  %v1780_v61 = vpop.f32.mrf.mxu3 }
 0x4b3   : > { %v2247_v3 = vmul.f32 %v6743_v11, %v2246_v41  ;;  %5844 = vst [vmem:[%s8649_s29 + $0x60] sm:$0xff] %v9095_v10  ;;  %v2540_v46 = vadd.f32 %v2508_v31, %v12988_v63  ;;  %vm2254_vm13 = vcmp.eq.f32.partialorder %v2253_v15, 8.507059e+37  ;;  %v1929_v16 = vmul.f32 1.442695, %v1878_v39  ;;  %v7132_v63 = vld [vmem:[%s7514_s24 + $0x48] sm:$0xff] }
 0x4b4   : > { %v2724_v53 = vmul.f32 %v9070_v9, %v9070_v9  ;;  %v2263_v38 = vadd.f32 %v9024_v26, %v2262_v35  ;;  %2615 = vadd.xlane.f32.xlu0 %v9082_v37  ;;  %2755 = vadd.xlane.f32.xlu1 %v2723_v33  ;;  %v9127_v28 = vsub.f32 %v8742_v25, %v2661_v20  ;;  %v6425_v25 = vld [vmem:[#allocation7 + $0x58] sm:$0xff] }
 0x4b5   : > { %v2248_v8 = vadd.f32 %v6743_v11, %v2247_v3  ;;  %v9135_v31 = vadd.f32 %v7132_v63, %v2540_v46  ;;  %6744 = vpow2.f32 %v1929_v16  ;;  %v9168_v60 = vadd.f32 %v1780_v61, %v8324_v0  ;;  %v7133_v61 = vld [vmem:[%s7514_s24 + $0x58] sm:$0xff] }
 0x4b6   : > { %2757 = vadd.xlane.f32.xlu2 %v2724_v53  ;;  %v2267_v42 = vsel %vm9104_vm9, %v9024_v26, %v2263_v38  ;;  %v12993_v26 = vld [vmem:[#allocation39_spill] sm:$0xff]  ;;  %v1879_v53 = vsub.f32 %v12995_v59, %v8827_v21  ;;  %v2604_v55 = vpop.xlane.xlu0 %2603 }
 0x4b7   : > { %v2272_v34 = vsel %vm2269_vm11, %v2271_v47, %v2267_v42  ;;  %v1877_v14 = vsub.f32 %v12993_v26, %v8820_v40  ;;  %v2252_v6 = vsel %vm2251_vm12, %v6743_v11, %v2248_v8  ;;  %v2602_v29 = vpop.xlane.xlu1 %2601  ;;  %12994 = vst [vmem:[#allocation40_spill] sm:$0xff] %v9135_v31  ;;  %v2725_v11 = vmul.f32 %v9127_v28, %v9127_v28  ;;  %v12996_v47 = vld [vmem:[#allocation18_spill] sm:$0xff]  ;;  %v12998_v26 = vld [vmem:[#allocation19_spill] sm:$0xff] }
 0x4b8   : > { %v9124_v12 = vmul.f32 %v8791_v51, %v2272_v34  ;;  %v2257_v24 = vsel %vm2254_vm13, %v2256_v7, %v2252_v6  ;;  %v9141_v51 = vadd.f32 %v9031_v27, %v8324_v0  ;;  %v2662_v35 = vmul.f32 %v2602_v29, %v7531_v13  ;;  %v12997_v8 = vld [vmem:[#allocation42_spill] sm:$0xff]  ;;  %v13000_v29 = vld [vmem:[#allocation20_spill] sm:$0xff] }
 0x4b9   : > { %v9130_v62 = vmul.f32 %v8785_v4, %v2257_v24  ;;  %v1927_v40 = vmul.f32 1.442695, %v1877_v14  ;;  %v2663_v39 = vmul.f32 %v2604_v55, %v7531_v13  ;;  %v1931_v20 = vmul.f32 1.442695, %v1879_v53 }
 0x4ba   : > { %5848 = vst [vmem:[%s8649_s29 + $0x80] sm:$0xff] %v9124_v12  ;;  %v1782_v4 = vpop.f32.mrf.mxu3  ;;  %v9162_v38 = vsub.f32 %v8809_v54, %v2662_v35  ;;  %v2510_v33 = vmul.f32 %v9077_v50, %v12996_v47  ;;  %v1880_v7 = vsub.f32 %v12997_v8, %v8818_v49  ;;  %v2511_v14 = vmul.f32 %v9095_v10, %v12998_v26  ;;  %v6219_v8 = vld [vmem:[#allocation5 + $0xe0] sm:$0xf] }
 0x4bb   : > { %5847 = vst [vmem:[%s8649_s29 + $0x78] sm:$0xff] %v9130_v62  ;;  %6746 = vpow2.f32 %v1927_v40  ;;  %v9147_v52 = vpop.eup %6744  ;;  %v9152_v27 = vadd.f32 %v1782_v4, %v8324_v0  ;;  %v9179_v42 = vsub.f32 %v8764_v2, %v2663_v39  ;;  %v2512_v24 = vmul.f32 %v9087_v5, %v13000_v29  ;;  %v7134_v40 = vld [vmem:[%s7514_s24 + $0x60] sm:$0xff] }
 0x4bc   : > { %1845 = vmax.xlane.f32.xlu1 %v9141_v51  ;;  %2759 = vadd.xlane.f32.xlu0 %v2725_v11  ;;  %v2726_v30 = vmul.f32 %v9162_v38, %v9162_v38  ;;  %6748 = vpow2.f32 %v1931_v20  ;;  %v2542_v46 = vadd.f32 %v2510_v33, %v12996_v47  ;;  %v1933_v50 = vmul.f32 1.442695, %v1880_v7  ;;  %v13003_v20 = vld [vmem:[#allocation22_spill] sm:$0xff] }
 0x4bd   : > { %v2727_v34 = vmul.f32 %v9179_v42, %v9179_v42  ;;  %v2543_v49 = vadd.f32 %v2511_v14, %v12998_v26  ;;  %v1882_v10 = vsub.f32 %v8728_v23, %v8831_v22  ;;  %v2544_v63 = vadd.f32 %v2512_v24, %v13000_v29  ;;  %v2608_v22 = vpop.xlane.xlu2 %2607  ;;  %v7136_v47 = vld [vmem:[%s7514_s24 + $0x70] sm:$0xff]  ;;  %v6227_v14 = vld [vmem:[#allocation5 + $0xe8] sm:$0xf]  ;;  %v6411_v24 = vld [vmem:[#allocation5 + $0xec] sm:$0xf] }
 0x4be   : > { %2613 = vadd.xlane.f32.xlu2 %v9135_v31  ;;  %v9189_v6 = vadd.f32 %v7133_v61, %v2542_v46  ;;  %6750 = vpow2.f32 %v1933_v50  ;;  %v2665_v59 = vmul.f32 %v2608_v22, %v7531_v13  ;;  %v6412_v7 = vld [vmem:[#allocation5 + $0xec] sm:$0xf0]  ;;  %v6410_v46 = vld [vmem:[#allocation5 + $0xe4] sm:$0xf]  ;;  %v6221_v26 = vld [vmem:[#allocation5 + $0xf0] sm:$0xf0] }
 0x4bf   : > { %v2606_v15 = vpop.xlane.xlu1 %2605  ;;  %v9202_v11 = vadd.f32 %v7134_v40, %v2543_v49  ;;  %v1937_v4 = vmul.f32 1.442695, %v1882_v10  ;;  %v6413_v50 = vld [vmem:[#allocation5 + $0xf4] sm:$0xf0]  ;;  %v6224_v61 = vor.u32 %v6410_v46, %v6221_v26  ;;  %v6229_v49 = vld [vmem:[#allocation5 + $0xf8] sm:$0xf0] }
 0x4c0   : > { %v2664_v41 = vmul.f32 %v2606_v15, %v7531_v13  ;;  %12999 = vst [vmem:[#allocation39_spill] sm:$0xff] %v9189_v6  ;;  %v7135_v15 = vld [vmem:[%s7514_s24 + $0x68] sm:$0xff]  ;;  %v9221_v55 = vsub.f32 %v8801_v44, %v2665_v59  ;;  %v6228_v29 = vor.u32 %v6413_v50, %v6227_v14  ;;  %v6203_v10 = vld [vmem:[#allocation5 + $0xc0] sm:$0xf]  ;;  %v6406_v40 = vld [vmem:[#allocation5 + $0xc4] sm:$0xf] }
 0x4c1   : > { %v9155_v36 = vpop.eup %6746  ;;  %13001 = vst [vmem:[#allocation41_spill] sm:$0xff] %v9202_v11  ;;  %v9205_v5 = vadd.f32 %v7135_v15, %v2544_v63  ;;  %6752 = vpow2.f32 %v1937_v4  ;;  %3608 = vmatpush.bf16.msrb.mxu3 %v6224_v61  ;;  %v6408_v63 = vld [vmem:[#allocation5 + $0xcc] sm:$0xf0]  ;;  %v6205_v15 = vld [vmem:[#allocation5 + $0xd0] sm:$0xf0] }
 0x4c2   : > { %v9165_v3 = vsub.f32 %v8815_v48, %v2664_v41  ;;  %v9193_v16 = vpop.eup %6748  ;;  %v1785_v23 = vpop.f32.mrf.mxu3  ;;  %v2729_v39 = vmul.f32 %v9221_v55, %v9221_v55  ;;  %3697 = vmatpush.bf16.msrb.mxu1 %v6228_v29  ;;  %v6204_v4 = vor.u32 %v6408_v63, %v6203_v10  ;;  %v6409_v22 = vld [vmem:[#allocation5 + $0xd4] sm:$0xf0]  ;;  %v6208_v59 = vor.u32 %v6406_v40, %v6205_v15  ;;  %v6195_v26 = vld [vmem:[#allocation5 + $0xa8] sm:$0xf]  ;;  %v6171_v63 = vld [vmem:[#allocation5 + $0x80] sm:$0xf] }
 0x4c3   : > { %13002 = vst [vmem:[#allocation18_spill] sm:$0xff] %v9205_v5  ;;  %v9213_v41 = vadd.f32 %v1785_v23, %v8324_v0  ;;  %v6211_v23 = vld [vmem:[#allocation5 + $0xc8] sm:$0xf]  ;;  %v6405_v14 = vld [vmem:[#allocation5 + $0xb4] sm:$0xf0] }
 0x4c4   : > { %1991 = vadd.xlane.f32.xlu1 %v9155_v36  ;;  %1849 = vmax.xlane.f32.xlu0 %v9152_v27  ;;  %v2728_v21 = vmul.f32 %v9165_v3, %v9165_v3  ;;  %v9208_v35 = vpop.eup %6750  ;;  %v6196_v29 = vor.u32 %v6405_v14, %v6195_v26  ;;  %v6400_v40 = vld [vmem:[#allocation5 + $0x8c] sm:$0xf0]  ;;  %v6394_v26 = vld [vmem:[#allocation5 + $0x64] sm:$0xf]  ;;  %v1881_v14 = vsub.f32 %v8708_v56, %v8829_v32  ;;  %v6139_v56 = vld [vmem:[#allocation5 + $0x40] sm:$0xf] }
 0x4c5   : > { %3609 = vmatpush.bf16.msrb.mxu3 %v6208_v59  ;;  %v6179_v59 = vld [vmem:[#allocation5 + $0x88] sm:$0xf]  ;;  %v6392_v32 = vld [vmem:[#allocation5 + $0x4c] sm:$0xf0] }
 0x4c6   : > { %1993 = vadd.xlane.f32.xlu2 %v9147_v52 }
 0x4c7   : > { %v9216_v53 = vpop.eup %6752 }
 0x4cc   : > { %2761 = vadd.xlane.f32.xlu1 %v2726_v30  ;;  %2765 = vadd.xlane.f32.xlu0 %v2728_v21  ;;  %v2513_v30 = vmul.f32 %v8823_v58, %v13003_v20  ;;  %v6232_v58 = vor.u32 %v6411_v24, %v6229_v49  ;;  %v6403_v24 = vld [vmem:[#allocation5 + $0xac] sm:$0xf]  ;;  %v6197_v49 = vld [vmem:[#allocation5 + $0xb8] sm:$0xf0] }
 0x4cd   : > { %v6200_v10 = vor.u32 %v6403_v24, %v6197_v49  ;;  %v6163_v24 = vld [vmem:[#allocation5 + $0x68] sm:$0xf]  ;;  %v6397_v49 = vld [vmem:[#allocation5 + $0x74] sm:$0xf0] }
 0x4ce   : > { %1847 = vmax.xlane.f32.xlu2 %v9168_v60  ;;  %v2545_v21 = vadd.f32 %v2513_v30, %v13003_v20  ;;  %3786 = vmatpush.bf16.msrb.mxu0 %v6232_v58  ;;  %v6407_v20 = vld [vmem:[#allocation5 + $0xcc] sm:$0xf]  ;;  %v6213_v30 = vld [vmem:[#allocation5 + $0xd8] sm:$0xf0] }
 0x4d0   : > { %v9229_v33 = vadd.f32 %v7136_v47, %v2545_v21  ;;  %v6216_v21 = vor.u32 %v6407_v20, %v6213_v30  ;;  %v6187_v47 = vld [vmem:[#allocation5 + $0xa0] sm:$0xf] }
 0x4d2   : > { %13004 = vst [vmem:[#allocation42_spill] sm:$0xff] %v9229_v33  ;;  %3787 = vmatpush.bf16.msrb.mxu0 %v6216_v21  ;;  %v6399_v21 = vld [vmem:[#allocation5 + $0x8c] sm:$0xf] }
 0x4d4   : > { %2617 = vadd.xlane.f32.xlu1 %v9189_v6  ;;  %1995 = vadd.xlane.f32.xlu0 %v9193_v16 }
 0x4d6   : > { %2763 = vadd.xlane.f32.xlu2 %v2727_v34  ;;  %v6220_v34 = vor.u32 %v6412_v7, %v6219_v8  ;;  %v6404_v8 = vld [vmem:[#allocation5 + $0xac] sm:$0xf0]  ;;  %v6402_v7 = vld [vmem:[#allocation5 + $0xa4] sm:$0xf]  ;;  %3788 = vmatpush.bf16.msrb.mxu0 %v6200_v10 }
 0x4d7   : > { %v6188_v46 = vor.u32 %v6404_v8, %v6187_v47  ;;  %v6181_v47 = vld [vmem:[#allocation5 + $0x98] sm:$0xf0] }
 0x4d8   : > { %3519 = vmatpush.bf16.msrb.mxu2 %v6220_v34  ;;  %v6189_v34 = vld [vmem:[#allocation5 + $0xb0] sm:$0xf0] }
 0x4d9   : > { %v6192_v61 = vor.u32 %v6402_v7, %v6189_v34  ;;  %v6184_v7 = vor.u32 %v6399_v21, %v6181_v47  ;;  %v6396_v34 = vld [vmem:[#allocation5 + $0x6c] sm:$0xf0]  ;;  %v6140_v21 = vor.u32 %v6392_v32, %v6139_v56  ;;  %v6141_v47 = vld [vmem:[#allocation5 + $0x50] sm:$0xf0]  ;;  %v6389_v56 = vld [vmem:[#allocation5 + $0x34] sm:$0xf0] }
 0x4db   : > { %3610 = vmatpush.bf16.msrb.mxu3 %v6192_v61  ;;  %3789 = vmatpush.bf16.msrb.mxu0 %v6184_v7 }
 0x4dc   : > { %1997 = vadd.xlane.f32.xlu1 %v9208_v35  ;;  %2621 = vadd.xlane.f32.xlu0 %v9205_v5 }
 0x4dd   : > { %3520 = vmatpush.bf16.msrb.mxu2 %v6204_v4  ;;  %v6398_v4 = vld [vmem:[#allocation5 + $0x84] sm:$0xf] }
 0x4de   : > { %2619 = vadd.xlane.f32.xlu2 %v9202_v11 }
 0x4e1   : > { %3521 = vmatpush.bf16.msrb.mxu2 %v6188_v46  ;;  %v6155_v46 = vld [vmem:[#allocation5 + $0x60] sm:$0xf] }
 0x4e2   : > { %v6156_v61 = vor.u32 %v6396_v34, %v6155_v46  ;;  %v6393_v46 = vld [vmem:[#allocation5 + $0x54] sm:$0xf0]  ;;  %v6391_v34 = vld [vmem:[#allocation5 + $0x4c] sm:$0xf] }
 0x4e4   : > { %1851 = vmax.xlane.f32.xlu1 %v9213_v41  ;;  %2001 = vadd.xlane.f32.xlu0 %v9216_v53 }
 0x4ec   : > { %2767 = vadd.xlane.f32.xlu1 %v2729_v39  ;;  %v6212_v39 = vor.u32 %v6409_v22, %v6211_v23  ;;  %v6172_v23 = vor.u32 %v6400_v40, %v6171_v63  ;;  %v6173_v22 = vld [vmem:[#allocation5 + $0x90] sm:$0xf0]  ;;  %v6164_v40 = vor.u32 %v6397_v49, %v6163_v24 }
 0x4ed   : > { %v6176_v20 = vor.u32 %v6398_v4, %v6173_v22  ;;  %v6395_v4 = vld [vmem:[#allocation5 + $0x6c] sm:$0xf] }
 0x4ee   : > { %3698 = vmatpush.bf16.msrb.mxu1 %v6212_v39  ;;  %v6401_v39 = vld [vmem:[#allocation5 + $0x94] sm:$0xf0]  ;;  %3522 = vmatpush.bf16.msrb.mxu2 %v6172_v23  ;;  %v6165_v23 = vld [vmem:[#allocation5 + $0x78] sm:$0xf0] }
 0x4ef   : > { %v6180_v30 = vor.u32 %v6401_v39, %v6179_v59  ;;  %3611 = vmatpush.bf16.msrb.mxu3 %v6176_v20  ;;  %v6168_v59 = vor.u32 %v6395_v4, %v6165_v23  ;;  %v6390_v39 = vld [vmem:[#allocation5 + $0x44] sm:$0xf]  ;;  %v1935_v20 = vmul.f32 1.442695, %v1881_v14 }
 0x4f0   : > { %v6144_v7 = vor.u32 %v6390_v39, %v6141_v47  ;;  %v6387_v47 = vld [vmem:[#allocation5 + $0x2c] sm:$0xf] }
 0x4f1   : > { %3790 = vmatpush.bf16.msrb.mxu0 %v6168_v59  ;;  %v6131_v59 = vld [vmem:[#allocation5 + $0x28] sm:$0xf]  ;;  %6754 = vpow2.f32 %v1935_v20 }
 0x4f2   : > { %3699 = vmatpush.bf16.msrb.mxu1 %v6196_v29  ;;  %v6157_v29 = vld [vmem:[#allocation5 + $0x70] sm:$0xf0]  ;;  %3523 = vmatpush.bf16.msrb.mxu2 %v6156_v61 }
 0x4f3   : > { %v6160_v63 = vor.u32 %v6394_v26, %v6157_v29  ;;  %v6149_v26 = vld [vmem:[#allocation5 + $0x58] sm:$0xf0] }
 0x4f4   : > { %2623 = vadd.xlane.f32.xlu1 %v9229_v33  ;;  %v6152_v14 = vor.u32 %v6391_v34, %v6149_v26 }
 0x4f5   : > { %3612 = vmatpush.bf16.msrb.mxu3 %v6160_v63  ;;  %v6388_v63 = vld [vmem:[#allocation5 + $0x2c] sm:$0xf0] }
 0x4f6   : > { %3700 = vmatpush.bf16.msrb.mxu1 %v6180_v30  ;;  %3524 = vmatpush.bf16.msrb.mxu2 %v6140_v21  ;;  %v6132_v21 = vor.u32 %v6389_v56, %v6131_v59  ;;  %v6117_v59 = vld [vmem:[#allocation5 + $0x18] sm:$0xf0]  ;;  %v13005_v56 = vld [vmem:[#allocation21_spill] sm:$0xff] }
 0x4f7   : > { %3791 = vmatpush.bf16.msrb.mxu0 %v6152_v14  ;;  %v6115_v14 = vld [vmem:[#allocation5 + $0x8] sm:$0xf] }
 0x4f9   : > { %3613 = vmatpush.bf16.msrb.mxu3 %v6144_v7 }
 0x4fa   : > { %3701 = vmatpush.bf16.msrb.mxu1 %v6164_v40  ;;  %v6386_v40 = vld [vmem:[#allocation5 + $0x24] sm:$0xf] }
 0x517   : > { %v2610_v50 = vpop.xlane.xlu0 %2609 }
 0x518   : > { %v2666_v58 = vmul.f32 %v2610_v50, %v7531_v13  ;;  %v1787_v50 = vpop.f32.mrf.mxu3 }
 0x519   : > { %v9249_v29 = vadd.f32 %v1787_v50, %v8324_v0 }
 0x51a   : > { %v9234_v15 = vsub.f32 %v8958_v45, %v2666_v58 }
 0x51c   : > { %v2730_v8 = vmul.f32 %v9234_v15, %v9234_v15 }
 0x51e   : > { %2769 = vadd.xlane.f32.xlu2 %v2730_v8  ;;  %v6147_v8 = vld [vmem:[#allocation5 + $0x48] sm:$0xf] }
 0x51f   : > { %v2612_v58 = vpop.xlane.xlu1 %2611  ;;  %v9240_v10 = vpop.xlane.xlu0 %1843  ;;  %v6148_v24 = vor.u32 %v6393_v46, %v6147_v8  ;;  %v6133_v8 = vld [vmem:[#allocation5 + $0x38] sm:$0xf0] }
 0x520   : > { %v2667_v22 = vmul.f32 %v2612_v58, %v7531_v13  ;;  %v6123_v58 = vld [vmem:[#allocation5 + $0x20] sm:$0xf]  ;;  %v6136_v34 = vor.u32 %v6387_v47, %v6133_v8  ;;  %v1790_v26 = vpop.f32.mrf.mxu3  ;;  %v9265_v47 = vpop.eup %6754 }
 0x521   : > { %v6124_v23 = vor.u32 %v6388_v63, %v6123_v58  ;;  %3702 = vmatpush.bf16.msrb.mxu1 %v6148_v24  ;;  %v6382_v58 = vld [vmem:[#allocation5 + $0x4] sm:$0xf]  ;;  %v6109_v24 = vld [vmem:[#allocation5 + $0x10] sm:$0xf0] }
 0x522   : > { %v9244_v30 = vsub.f32 %v9029_v1, %v2667_v22  ;;  %v6125_v22 = vld [vmem:[#allocation5 + $0x30] sm:$0xf0]  ;;  %3792 = vmatpush.bf16.msrb.mxu0 %v6136_v34 }
 0x523   : > { %v6128_v39 = vor.u32 %v6386_v40, %v6125_v22  ;;  %3525 = vmatpush.bf16.msrb.mxu2 %v6124_v23  ;;  %v6112_v40 = vor.u32 %v6382_v58, %v6109_v24  ;;  %v6385_v22 = vld [vmem:[#allocation5 + $0x14] sm:$0xf0]  ;;  %v9260_v23 = vadd.f32 %v1790_v26, %v8324_v0 }
 0x524   : > { %v2731_v61 = vmul.f32 %v9244_v30, %v9244_v30 }
 0x525   : > { %3614 = vmatpush.bf16.msrb.mxu3 %v6128_v39  ;;  %3703 = vmatpush.bf16.msrb.mxu1 %v6132_v21  ;;  %v6116_v39 = vor.u32 %v6385_v22, %v6115_v14 }
 0x526   : > { %2771 = vadd.xlane.f32.xlu0 %v2731_v61  ;;  %1853 = vmax.xlane.f32.xlu2 %v9249_v29  ;;  %v6107_v61 = vld [vmem:[#allocation5] sm:$0xf] }
 0x527   : > { %v2756_v50 = vpop.xlane.xlu1 %2755  ;;  %v2616_v32 = vpop.xlane.xlu0 %2615 }
 0x528   : > { %v2819_v7 = vmul.f32 %v2756_v50, %v7531_v13  ;;  %v2514_v50 = vmul.f32 %v9130_v62, %v13005_v56 }
 0x529   : > { %v2758_v49 = vpop.xlane.xlu2 %2757  ;;  %3615 = vmatpush.bf16.msrb.mxu3 %v6112_v40  ;;  %3704 = vmatpush.bf16.msrb.mxu1 %v6116_v39  ;;  %v2669_v39 = vmul.f32 %v2616_v32, %v7531_v13 }
 0x52a   : > { %v2820_v4 = vmul.f32 %v2758_v49, %v7531_v13  ;;  %v6384_v49 = vld [vmem:[#allocation5 + $0xc] sm:$0xf0]  ;;  %v9256_v20 = vadd.f32 1e-05, %v2819_v7  ;;  %v2546_v58 = vadd.f32 %v2514_v50, %v13005_v56 }
 0x52b   : > { %v6108_v63 = vor.u32 %v6384_v49, %v6107_v61 }
 0x52c   : > { %v9254_v46 = vadd.f32 1e-05, %v2820_v4  ;;  %v6383_v4 = vld [vmem:[#allocation5 + $0xc] sm:$0xf]  ;;  %vm2889_vm2 = vweird.f32 %v9256_v20 }
 0x52d   : > { %3526 = vmatpush.bf16.msrb.mxu2 %v6108_v63  ;;  %v6120_v21 = vor.u32 %v6383_v4, %v6117_v59  ;;  %v1883_v63 = vsub.f32 %v8869_v57, %v9240_v10  ;;  %v1792_v10 = vpop.f32.mrf.mxu3 }
 0x52e   : > { %6756 = vrsqrt.f32 %v9254_v46  ;;  %1855 = vmax.xlane.f32.xlu0 %v9260_v23  ;;  %1999 = vadd.xlane.f32.xlu2 %v9265_v47  ;;  %vm2899_vm0 = vweird.f32 %v9254_v46 }
 0x52f   : > { %6758 = vrsqrt.f32 %v9256_v20  ;;  %v1846_v34 = vpop.xlane.xlu1 %1845  ;;  %v2760_v26 = vpop.xlane.xlu0 %2759  ;;  %3793 = vmatpush.bf16.msrb.mxu0 %v6120_v21  ;;  %v7137_v21 = vld [vmem:[%s7514_s24 + $0x78] sm:$0xff] }
 0x530   : > { %v2821_v62 = vmul.f32 %v2760_v26, %v7531_v13  ;;  %v9286_v56 = vadd.f32 %v7137_v21, %v2546_v58  ;;  %v1939_v26 = vmul.f32 1.442695, %v1883_v63  ;;  %v9298_v58 = vsub.f32 %v9082_v37, %v2669_v39  ;;  %v13007_v39 = vld [vmem:[#allocation24_spill] sm:$0xff] }
 0x531   : > { %v2614_v8 = vpop.xlane.xlu2 %2613  ;;  %v9308_v21 = vadd.f32 %v1792_v10, %v8324_v0 }
 0x532   : > { %v2668_v7 = vmul.f32 %v2614_v8, %v7531_v13  ;;  %v9278_v40 = vadd.f32 1e-05, %v2821_v62  ;;  %v1884_v8 = vsub.f32 %v9141_v51, %v1846_v34  ;;  %13006 = vst [vmem:[#allocation19_spill] sm:$0xff] %v9286_v56 }
 0x534   : > { %v6757_v61 = vpop.eup %6756  ;;  %v9272_v49 = vsub.f32 %v9135_v31, %v2668_v7  ;;  %6760 = vrsqrt.f32 %v9278_v40  ;;  %vm2909_vm12 = vweird.f32 %v9278_v40 }
 0x535   : > { %v2894_v24 = vmul.f32 %v6757_v61, %v9254_v46  ;;  %v6759_v14 = vpop.eup %6758  ;;  %vm2900_vm14 = vweird.f32 %v6757_v61 }
 0x536   : > { %v2732_v22 = vmul.f32 %v9272_v49, %v9272_v49  ;;  %v2884_v4 = vmul.f32 %v6759_v14, %v9256_v20  ;;  %2625 = vadd.xlane.f32.xlu2 %v9286_v56  ;;  %vm2890_vm15 = vweird.f32 %v6759_v14  ;;  %vm2901_vm1 = vmor %vm2899_vm0, %vm2900_vm14 }
 0x537   : > { %v2895_v59 = vmul.f32 %v6757_v61, %v2894_v24  ;;  %v9293_v51 = vpop.xlane.xlu1 %1991  ;;  %v9295_v34 = vpop.xlane.xlu0 %1849  ;;  %v1941_v24 = vmul.f32 1.442695, %v1884_v8  ;;  %v9312_v8 = vmul.f32 %v8842_v43, %v13007_v39  ;;  %vm2891_vm3 = vmor %vm2889_vm2, %vm2890_vm15  ;;  %v2733_v43 = vmul.f32 %v9298_v58, %v9298_v58 }
 0x538   : > { %2773 = vadd.xlane.f32.xlu1 %v2732_v22  ;;  %v2885_v50 = vmul.f32 %v6759_v14, %v2884_v4  ;;  %v7138_v4 = vld [vmem:[%s12628_s7] sm:$0x3f]  ;;  %vm2294_vm5 = vweird.f32 %v9293_v51 }
 0x539   : > { %v2896_v7 = vmul.f32 0.5, %v2895_v59  ;;  %v9289_v57 = vpop.xlane.xlu2 %1993  ;;  %v9305_v59 = vperm.slane %v7138_v4, 2 }
 0x53a   : > { %6762 = vrcp.f32 %v9289_v57  ;;  %v2886_v62 = vmul.f32 0.5, %v2885_v50  ;;  %v9314_v50 = vpop.eup %6760  ;;  %vm2309_vm4 = vweird.f32 %v9289_v57 }
 0x53b   : > { %v2897_v32 = vsub.f32 1.5, %v2896_v7  ;;  %6764 = vrcp.f32 %v9293_v51  ;;  %v2904_v0 = vmul.f32 %v9314_v50, %v9278_v40  ;;  %vm2910_vm10 = vweird.f32 %v9314_v50 }
 0x53c   : > { %v2887_v22 = vsub.f32 1.5, %v2886_v62  ;;  %6766 = vpow2.f32 %v1939_v26  ;;  %v9317_v26 = vperm.slane %v7138_v4, 3  ;;  %vm9409_vm14 = vmor %vm2909_vm12, %vm2910_vm10 }
 0x53d   : > { %v2898_v63 = vmul.f32 %v6757_v61, %v2897_v32  ;;  %6768 = vpow2.f32 %v1941_v24  ;;  %v2905_v4 = vmul.f32 %v9314_v50, %v2904_v0 }
 0x53e   : > { %v2888_v7 = vmul.f32 %v6759_v14, %v2887_v22  ;;  %13008 = vst [vmem:[#allocation20_spill] sm:$0xff] %v9317_v26  ;;  %2775 = vadd.xlane.f32.xlu2 %v2733_v43 }
 0x53f   : > { %v2902_v46 = vsel %vm2901_vm1, %v6757_v61, %v2898_v63  ;;  %v2313_v61 = vand.u32 2147483647, %v9289_v57  ;;  %v2762_v31 = vpop.xlane.xlu1 %2761  ;;  %v2766_v1 = vpop.xlane.xlu0 %2765 }
 0x540   : > { %v6763_v62 = vpop.eup %6762  ;;  %v3204_v32 = vmul.f32 %v2902_v46, %v9070_v9  ;;  %1857 = vmax.xlane.f32.xlu1 %v9308_v21  ;;  %v2892_v10 = vsel %vm2891_vm3, %v6759_v14, %v2888_v7  ;;  %v2315_v46 = vand.u32 2147483648, %v9289_v57  ;;  %v2298_v7 = vand.u32 2147483647, %v9293_v51 }
 0x541   : > { %v2305_v20 = vmul.f32 %v6763_v62, %v9289_v57  ;;  %v9329_v22 = vpop.xlane.xlu2 %1847  ;;  %v9331_v63 = vpop.eup %6764  ;;  %v3203_v9 = vmul.f32 %v2892_v10, %v8875_v17  ;;  %v2822_v0 = vmul.f32 %v2762_v31, %v7531_v13  ;;  %v2824_v10 = vmul.f32 %v2766_v1, %v7531_v13 }
 0x542   : > { %v3237_v24 = vmul.f32 %v9305_v59, %v3204_v32  ;;  %v2290_v14 = vmul.f32 %v9331_v63, %v9293_v51  ;;  %v9341_v45 = vpop.eup %6766  ;;  %v2906_v32 = vmul.f32 0.5, %v2905_v4  ;;  %vm2310_vm6 = vweird.f32 %v6763_v62 }
 0x543   : > { %v2306_v37 = vsub.f32 1.0, %v2305_v20  ;;  %v3236_v17 = vmul.f32 %v9305_v59, %v3203_v9  ;;  %v9349_v2 = vpop.eup %6768  ;;  %vm2295_vm7 = vweird.f32 %v9331_v63  ;;  %v2300_v20 = vand.u32 2147483648, %v9293_v51  ;;  %vm9363_vm8 = vmor %vm2309_vm4, %vm2310_vm6 }
 0x544   : > { %v2291_v43 = vsub.f32 1.0, %v2290_v14  ;;  %v9347_v48 = vadd.f32 %v9317_v26, %v3237_v24  ;;  %v9353_v54 = vadd.f32 1e-05, %v2822_v0  ;;  %v9355_v9 = vadd.f32 1e-05, %v2824_v10  ;;  %vm9381_vm11 = vmor %vm2294_vm5, %vm2295_vm7 }
 0x545   : > { %v2307_v44 = vmul.f32 %v6763_v62, %v2306_v37  ;;  %v2907_v4 = vsub.f32 1.5, %v2906_v32  ;;  %v9359_v37 = vadd.f32 %v9317_v26, %v3236_v17  ;;  %vm2314_vm9 = vcmp.eq.f32.partialorder %v2313_v61, 8.507059e+37 }
 0x546   : > { %13009 = vst [vmem:[#allocation22_spill] sm:$0xff] %v9347_v48  ;;  %v2292_v31 = vmul.f32 %v9331_v63, %v2291_v43  ;;  %v2316_v14 = vor.u32 1.1754944e-38, %v2315_v46  ;;  %6770 = vrsqrt.f32 %v9353_v54  ;;  %v1885_v0 = vsub.f32 %v9168_v60, %v9329_v22  ;;  %2005 = vadd.xlane.f32.xlu2 %v9349_v2 }
 0x547   : > { %v2308_v1 = vadd.f32 %v6763_v62, %v2307_v44  ;;  %13010 = vst [vmem:[#allocation21_spill] sm:$0xff] %v9359_v37  ;;  %6772 = vrsqrt.f32 %v9355_v9  ;;  %v3301_v57 = vpack.c.bf16 %v9347_v48, %v9359_v37  ;;  %v1886_v60 = vsub.f32 %v9152_v27, %v9295_v34  ;;  %v2618_v43 = vpop.xlane.xlu1 %2617  ;;  %v6441_v37 = vld [vmem:[#allocation7 + $0xd8] sm:$0xff] }
 0x548   : > { %2003 = vadd.xlane.f32.xlu1 %v9341_v45  ;;  %v2293_v44 = vadd.f32 %v9331_v63, %v2292_v31  ;;  %v2548_v22 = vadd.f32 %v9312_v8, %v13007_v39  ;;  %v2908_v10 = vmul.f32 %v9314_v50, %v2907_v4  ;;  %v9396_v31 = vpop.xlane.xlu0 %1995  ;;  %v2301_v34 = vor.u32 1.1754944e-38, %v2300_v20  ;;  %v13015_v8 = vld [vmem:[#allocation23_spill] sm:$0xff] }
 0x549   : > { %v2312_v17 = vsel %vm9363_vm8, %v6763_v62, %v2308_v1  ;;  %v2764_v32 = vpop.xlane.xlu2 %2763  ;;  %3527 = vmatmul.bf16.vlgmr.msrb.gmra.mxu2 %v3301_v57  ;;  %3616 = vmatmul.bf16.vlgmr.msrb.gmra.mxu3 %v3301_v57  ;;  %v2670_v39 = vmul.f32 %v2618_v43, %v7531_v13  ;;  %6774 = vrcp.f32 %v9396_v31  ;;  %v2515_v4 = vmul.f32 %v9124_v12, %v13015_v8 }
 0x54a   : > { %v2823_v62 = vmul.f32 %v2764_v32, %v7531_v13  ;;  %v2317_v46 = vsel %vm2314_vm9, %v2316_v14, %v2312_v17  ;;  %v2297_v51 = vsel %vm9381_vm11, %v9331_v63, %v2293_v44  ;;  %3705 = vmatmul.bf16.vlgmr.msrb.gmra.mxu1 %v3301_v57  ;;  %3794 = vmatmul.bf16.vlgmr.msrb.gmra.mxu0 %v3301_v57  ;;  %vm2299_vm13 = vcmp.eq.f32.partialorder %v2298_v7, 8.507059e+37  ;;  %v7139_v44 = vld [vmem:[%s7514_s24 + $0x88] sm:$0xff] }
 0x54b   : > { %v2318_v27 = vmul.f32 %v9147_v52, %v2317_v46  ;;  %v1943_v63 = vmul.f32 1.442695, %v1885_v0  ;;  %v1945_v20 = vmul.f32 1.442695, %v1886_v60  ;;  %v9414_v14 = vsub.f32 %v9189_v6, %v2670_v39 }
 0x54c   : > { %v9404_v1 = vadd.f32 1e-05, %v2823_v62  ;;  %v6771_v24 = vpop.eup %6770  ;;  %v9417_v12 = vadd.f32 %v7139_v44, %v2548_v22  ;;  %v2302_v40 = vsel %vm2299_vm13, %v2301_v34, %v2297_v51  ;;  %v2912_v0 = vsel %vm9409_vm14, %v9314_v50, %v2908_v10 }
 0x54d   : > { %5851 = vst [vmem:[%s8649_s29 + $0x98] sm:$0xff] %v2318_v27  ;;  %v9419_v7 = vpop.eup %6772  ;;  %v2914_v17 = vmul.f32 %v6771_v24, %v9353_v54  ;;  %v2734_v32 = vmul.f32 %v9414_v14, %v9414_v14  ;;  %v2547_v61 = vadd.f32 %v2515_v4, %v13015_v8  ;;  %v9433_v50 = vmul.f32 %v9155_v36, %v2302_v40  ;;  %v13019_v8 = vld [vmem:[#allocation25_spill] sm:$0xff] }
 0x54e   : > { %13018 = vst [vmem:[#allocation24_spill] sm:$0xff] %v9417_v12  ;;  %6776 = vrsqrt.f32 %v9404_v1  ;;  %v2934_v57 = vmul.f32 %v9419_v7, %v9355_v9  ;;  %v3205_v46 = vmul.f32 %v2912_v0, %v9127_v28  ;;  %v2518_v4 = vmul.f32 %v2318_v27, %v13019_v8 }
 0x54f   : > { %v2915_v60 = vmul.f32 %v6771_v24, %v2914_v17  ;;  %6778 = vpow2.f32 %v1943_v63  ;;  %v9435_v22 = vpop.eup %6774  ;;  %2777 = vadd.xlane.f32.xlu0 %v2734_v32  ;;  %v9441_v34 = vpop.xlane.xlu1 %1997  ;;  %5850 = vst [vmem:[%s8649_s29 + $0x90] sm:$0xff] %v9433_v50  ;;  %v2330_v36 = vand.u32 2147483648, %v9396_v31  ;;  %v7140_v63 = vld [vmem:[%s7514_s24 + $0x80] sm:$0xff]  ;;  %vm2919_vm15 = vweird.f32 %v9353_v54 }
 0x550   : > { %2629 = vadd.xlane.f32.xlu1 %v9417_v12  ;;  %6780 = vpow2.f32 %v1945_v20  ;;  %v2935_v51 = vmul.f32 %v9419_v7, %v2934_v57  ;;  %v2320_v43 = vmul.f32 %v9435_v22, %v9396_v31  ;;  %v2622_v39 = vpop.xlane.xlu0 %2621  ;;  %v9450_v52 = vadd.f32 %v7140_v63, %v2547_v61 }
 0x551   : > { %v2620_v62 = vpop.xlane.xlu2 %2619  ;;  %v2916_v10 = vmul.f32 0.5, %v2915_v60  ;;  %6782 = vrcp.f32 %v9441_v34  ;;  %vm2920_vm0 = vweird.f32 %v6771_v24  ;;  %v3238_v27 = vmul.f32 %v9305_v59, %v3205_v46 }
 0x552   : > { %v2671_v28 = vmul.f32 %v2620_v62, %v7531_v13  ;;  %13020 = vst [vmem:[#allocation23_spill] sm:$0xff] %v9450_v52  ;;  %v2321_v40 = vsub.f32 1.0, %v2320_v43  ;;  %vm2324_vm1 = vweird.f32 %v9396_v31  ;;  %v2328_v0 = vand.u32 2147483647, %v9396_v31  ;;  %vm2921_vm2 = vmor %vm2919_vm15, %vm2920_vm0 }
 0x553   : > { %v2917_v44 = vsub.f32 1.5, %v2916_v10  ;;  %v2936_v61 = vmul.f32 0.5, %v2935_v51  ;;  %v2550_v62 = vadd.f32 %v2518_v4, %v13019_v8  ;;  %vm2940_vm3 = vweird.f32 %v9419_v7 }
 0x554   : > { %v9452_v20 = vpop.eup %6776  ;;  %v2322_v60 = vmul.f32 %v9435_v22, %v2321_v40  ;;  %v2331_v46 = vor.u32 1.1754944e-38, %v2330_v36  ;;  %v9469_v43 = vsub.f32 %v9202_v11, %v2671_v28  ;;  %vm2325_vm4 = vweird.f32 %v9435_v22 }
 0x555   : > { %v2924_v17 = vmul.f32 %v9452_v20, %v9404_v1  ;;  %v9460_v57 = vpop.eup %6778  ;;  %v2918_v32 = vmul.f32 %v6771_v24, %v2917_v44  ;;  %vm2929_vm5 = vweird.f32 %v9404_v1  ;;  %v2672_v51 = vmul.f32 %v2622_v39, %v7531_v13  ;;  %v7141_v39 = vld [vmem:[%s7514_s24 + $0x98] sm:$0xff]  ;;  %vm9496_vm6 = vmor %vm2324_vm1, %vm2325_vm4 }
 0x556   : > { %v9464_v54 = vpop.eup %6780  ;;  %v2323_v36 = vadd.f32 %v9435_v22, %v2322_v60  ;;  %v2735_v28 = vmul.f32 %v9469_v43, %v9469_v43  ;;  %v2937_v40 = vsub.f32 1.5, %v2936_v61  ;;  %v9484_v11 = vadd.f32 %v9317_v26, %v3238_v27 }
 0x557   : > { %v2925_v10 = vmul.f32 %v9452_v20, %v2924_v17  ;;  %v2922_v63 = vsel %vm2921_vm2, %v6771_v24, %v2918_v32  ;;  %v6783_v8 = vpop.eup %6782  ;;  %2627 = vadd.xlane.f32.xlu0 %v9450_v52  ;;  %v1852_v17 = vpop.xlane.xlu1 %1851  ;;  %v9487_v6 = vadd.f32 %v7141_v39, %v2550_v62  ;;  %vm2930_vm7 = vweird.f32 %v9452_v20 }
 0x558   : > { %2007 = vadd.xlane.f32.xlu1 %v9460_v57  ;;  %v3206_v4 = vmul.f32 %v2922_v63, %v9162_v38  ;;  %v2335_v24 = vmul.f32 %v6783_v8, %v9441_v34  ;;  %v9481_v32 = vpop.xlane.xlu0 %2001  ;;  %13021 = vst [vmem:[#allocation25_spill] sm:$0xff] %v9484_v11  ;;  %2779 = vadd.xlane.f32.xlu2 %v2735_v28  ;;  %v2345_v62 = vand.u32 2147483648, %v9441_v34  ;;  %vm2340_vm8 = vweird.f32 %v6783_v8  ;;  %vm9517_vm10 = vmor %vm2929_vm5, %vm2930_vm7 }
 0x559   : > { %v2926_v44 = vmul.f32 0.5, %v2925_v10  ;;  %13022 = vst [vmem:[#allocation52_spill] sm:$0xff] %v9487_v6  ;;  %v1887_v10 = vsub.f32 %v9213_v41, %v1852_v17  ;;  %6784 = vrcp.f32 %v9481_v32  ;;  %v9503_v63 = vsub.f32 %v9205_v5, %v2672_v51 }
 0x55a   : > { %v3239_v38 = vmul.f32 %v9305_v59, %v3206_v4  ;;  %v2336_v27 = vsub.f32 1.0, %v2335_v24  ;;  %v2327_v41 = vsel %vm9496_vm6, %v9435_v22, %v2323_v36  ;;  %v2938_v28 = vmul.f32 %v9419_v7, %v2937_v40 }
 0x55b   : > { %v2927_v60 = vsub.f32 1.5, %v2926_v44  ;;  %v1947_v44 = vmul.f32 1.442695, %v1887_v10  ;;  %v2343_v24 = vand.u32 2147483647, %v9441_v34  ;;  %vm2939_vm9 = vweird.f32 %v9355_v9 }
 0x55c   : > { %v9510_v31 = vadd.f32 %v9317_v26, %v3239_v38  ;;  %v2337_v17 = vmul.f32 %v6783_v8, %v2336_v27  ;;  %vm2329_vm11 = vcmp.eq.f32.partialorder %v2328_v0, 8.507059e+37  ;;  %vm2339_vm12 = vweird.f32 %v9441_v34  ;;  %vm9527_vm13 = vmor %vm2939_vm9, %vm2940_vm3 }
 0x55d   : > { %v2928_v4 = vmul.f32 %v9452_v20, %v2927_v60  ;;  %6786 = vpow2.f32 %v1947_v44  ;;  %v2332_v0 = vsel %vm2329_vm11, %v2331_v46, %v2327_v41  ;;  %vm9534_vm14 = vmor %vm2339_vm12, %vm2340_vm8  ;;  %v2346_v39 = vor.u32 1.1754944e-38, %v2345_v62  ;;  %v13032_v60 = vld [vmem:[#allocation26_spill] sm:$0xff] }
 0x55e   : > { %13025 = vst [vmem:[#allocation53_spill] sm:$0xff] %v9510_v31  ;;  %v3302_v22 = vpack.c.bf16 %v9510_v31, %v9484_v11  ;;  %v2338_v1 = vadd.f32 %v6783_v8, %v2337_v17  ;;  %v2736_v38 = vmul.f32 %v9503_v63, %v9503_v63  ;;  %v2517_v10 = vmul.f32 %v9433_v50, %v13032_v60  ;;  %v6417_v31 = vld [vmem:[#allocation7 + $0x18] sm:$0xff] }
 0x55f   : > { %v2932_v9 = vsel %vm9517_vm10, %v9452_v20, %v2928_v4  ;;  %v6785_v40 = vpop.eup %6784  ;;  %v9543_v20 = vmul.f32 %v9193_v16, %v2332_v0  ;;  %v2942_v46 = vsel %vm9527_vm13, %v9419_v7, %v2938_v28  ;;  %vm2344_vm15 = vcmp.eq.f32.partialorder %v2343_v24, 8.507059e+37  ;;  %v2768_v62 = vpop.xlane.xlu1 %2767  ;;  %v13033_v24 = vld [vmem:[#allocation27_spill] sm:$0xff] }
 0x560   : > { %2633 = vadd.xlane.f32.xlu1 %v9487_v6  ;;  %3532 = vmatmul.bf16.gmra.mxu2 %v3302_v22  ;;  %v2342_v61 = vsel %vm9534_vm14, %v6783_v8, %v2338_v1  ;;  %v2365_v27 = vmul.f32 %v6785_v40, %v9481_v32  ;;  %v3207_v41 = vmul.f32 %v2932_v9, %v9179_v42  ;;  %v2375_v4 = vand.u32 2147483648, %v9481_v32  ;;  %v7142_v9 = vld [vmem:[%s7514_s24 + $0x90] sm:$0xff]  ;;  %v6433_v11 = vld [vmem:[#allocation7 + $0x98] sm:$0xff] }
 0x561   : > { %3621 = vmatmul.bf16.gmra.mxu3 %v3302_v22  ;;  %3710 = vmatmul.bf16.gmra.mxu1 %v3302_v22  ;;  %v2347_v16 = vsel %vm2344_vm15, %v2346_v39, %v2342_v61  ;;  %5852 = vst [vmem:[%s8649_s29 + $0xa0] sm:$0xff] %v9543_v20  ;;  %v3208_v8 = vmul.f32 %v2942_v46, %v9165_v3  ;;  %vm2370_vm0 = vweird.f32 %v6785_v40  ;;  %v2373_v42 = vand.u32 2147483647, %v9481_v32 }
 0x562   : > { %3799 = vmatmul.bf16.gmra.mxu0 %v3302_v22  ;;  %2781 = vadd.xlane.f32.xlu0 %v2736_v38  ;;  %v2366_v50 = vsub.f32 1.0, %v2365_v27  ;;  %v2348_v7 = vmul.f32 %v9208_v35, %v2347_v16  ;;  %v2549_v44 = vadd.f32 %v2517_v10, %v13032_v60  ;;  %v3240_v22 = vmul.f32 %v9305_v59, %v3207_v41 }
 0x563   : > { %2009 = vadd.xlane.f32.xlu2 %v9464_v54  ;;  %v9559_v28 = vpop.eup %6786  ;;  %vm2369_vm1 = vweird.f32 %v9481_v32  ;;  %v3241_v3 = vmul.f32 %v9305_v59, %v3208_v8  ;;  %v2376_v36 = vor.u32 1.1754944e-38, %v2375_v4  ;;  %vm2374_vm3 = vcmp.eq.f32.partialorder %v2373_v42, 8.507059e+37 }
 0x564   : > { %v2367_v17 = vmul.f32 %v6785_v40, %v2366_v50  ;;  %v2520_v51 = vmul.f32 %v2348_v7, %v13033_v24  ;;  %5853 = vst [vmem:[%s8649_s29 + $0xa8] sm:$0xff] %v2348_v7  ;;  %vm2371_vm2 = vmor %vm2369_vm1, %vm2370_vm0  ;;  %v9569_v1 = vadd.f32 %v7142_v9, %v2549_v44  ;;  %v9575_v32 = vadd.f32 %v9317_v26, %v3240_v22 }
 0x565   : > { %v9584_v61 = vadd.f32 %v9317_v26, %v3241_v3 }
 0x566   : > { %v2368_v35 = vadd.f32 %v6785_v40, %v2367_v17  ;;  %13034 = vst [vmem:[#allocation26_spill] sm:$0xff] %v9569_v1  ;;  %v2552_v0 = vadd.f32 %v2520_v51, %v13033_v24 }
 0x567   : > { %v2624_v39 = vpop.xlane.xlu1 %2623  ;;  %13035 = vst [vmem:[#allocation27_spill] sm:$0xff] %v9575_v32  ;;  %v3303_v16 = vpack.c.bf16 %v9584_v61, %v9575_v32 }
 0x568   : > { %2011 = vadd.xlane.f32.xlu1 %v9559_v28  ;;  %v2372_v34 = vsel %vm2371_vm2, %v6785_v40, %v2368_v35  ;;  %v2673_v38 = vmul.f32 %v2624_v39, %v7531_v13  ;;  %13036 = vst [vmem:[#allocation54_spill] sm:$0xff] %v9584_v61  ;;  %v7143_v40 = vld [vmem:[%s7514_s24 + $0xa8] sm:$0xff] }
 0x569   : > { %v2377_v60 = vsel %vm2374_vm3, %v2376_v36, %v2372_v34  ;;  %v9587_v27 = vadd.f32 %v7143_v40, %v2552_v0 }
 0x56a   : > { %2631 = vadd.xlane.f32.xlu0 %v9569_v1  ;;  %v9578_v10 = vmul.f32 %v9216_v53, %v2377_v60  ;;  %v9581_v46 = vsub.f32 %v9229_v33, %v2673_v38  ;;  %v2825_v53 = vmul.f32 %v2768_v62, %v7531_v13 }
 0x56b   : > { %13037 = vst [vmem:[#allocation55_spill] sm:$0xff] %v9587_v27 }
 0x56c   : > { %5855 = vst [vmem:[%s8649_s29 + $0xb8] sm:$0xff] %v9578_v10  ;;  %v2737_v41 = vmul.f32 %v9581_v46, %v9581_v46  ;;  %v2857_v50 = vadd.f32 1e-05, %v2825_v53 }
 0x56e   : > { %2783 = vadd.xlane.f32.xlu2 %v2737_v41  ;;  %6788 = vrsqrt.f32 %v2857_v50  ;;  %vm2949_vm5 = vweird.f32 %v2857_v50 }
 0x570   : > { %2637 = vadd.xlane.f32.xlu1 %v9587_v27  ;;  %3537 = vmatmul.bf16.gmra.mxu2 %v3303_v16 }
 0x571   : > { %3626 = vmatmul.bf16.gmra.mxu3 %v3303_v16  ;;  %3715 = vmatmul.bf16.gmra.mxu1 %v3303_v16 }
 0x572   : > { %3804 = vmatmul.bf16.gmra.mxu0 %v3303_v16 }
 0x574   : > { %v6789_v7 = vpop.eup %6788 }
 0x575   : > { %v2944_v8 = vmul.f32 %v6789_v7, %v2857_v50  ;;  %vm2950_vm4 = vweird.f32 %v6789_v7 }
 0x576   : > { %vm2951_vm6 = vmor %vm2949_vm5, %vm2950_vm4 }
 0x577   : > { %v2945_v4 = vmul.f32 %v6789_v7, %v2944_v8 }
 0x579   : > { %v2946_v24 = vmul.f32 0.5, %v2945_v4 }
 0x57b   : > { %v2947_v51 = vsub.f32 1.5, %v2946_v24 }
 0x57d   : > { %v2948_v34 = vmul.f32 %v6789_v7, %v2947_v51 }
 0x57f   : > { %v2952_v60 = vsel %vm2951_vm6, %v6789_v7, %v2948_v34 }
 0x580   : > { %v3209_v4 = vmul.f32 %v2952_v60, %v9221_v55  ;;  %v13038_v60 = vld [vmem:[#allocation30_spill] sm:$0xff] }
 0x591   : > { %v2770_v44 = vpop.xlane.xlu2 %2769 }
 0x592   : > { %v2826_v17 = vmul.f32 %v2770_v44, %v7531_v13 }
 0x594   : > { %v2858_v42 = vadd.f32 1e-05, %v2826_v17 }
 0x596   : > { %6790 = vrsqrt.f32 %v2858_v42  ;;  %vm2959_vm8 = vweird.f32 %v2858_v42 }
 0x599   : > { %v1854_v22 = vpop.xlane.xlu2 %1853  ;;  %v2772_v35 = vpop.xlane.xlu0 %2771 }
 0x59a   : > { %v1888_v3 = vsub.f32 %v9249_v29, %v1854_v22  ;;  %v2827_v36 = vmul.f32 %v2772_v35, %v7531_v13 }
 0x59c   : > { %v6791_v9 = vpop.eup %6790  ;;  %v1949_v62 = vmul.f32 1.442695, %v1888_v3  ;;  %v9600_v0 = vadd.f32 1e-05, %v2827_v36 }
 0x59d   : > { %v2954_v39 = vmul.f32 %v6791_v9, %v2858_v42  ;;  %vm2960_vm7 = vweird.f32 %v6791_v9 }
 0x59e   : > { %6792 = vpow2.f32 %v1949_v62  ;;  %vm2961_vm9 = vmor %vm2959_vm8, %vm2960_vm7  ;;  %vm2969_vm15 = vweird.f32 %v9600_v0 }
 0x59f   : > { %v2955_v38 = vmul.f32 %v6791_v9, %v2954_v39  ;;  %6794 = vrsqrt.f32 %v9600_v0 }
 0x5a1   : > { %v2956_v40 = vmul.f32 0.5, %v2955_v38  ;;  %v2000_v41 = vpop.xlane.xlu2 %1999  ;;  %v1856_v16 = vpop.xlane.xlu0 %1855 }
 0x5a2   : > { %6796 = vrcp.f32 %v2000_v41  ;;  %v1889_v53 = vsub.f32 %v9260_v23, %v1856_v16  ;;  %v3242_v23 = vmul.f32 %v9305_v59, %v3209_v4  ;;  %v2360_v16 = vand.u32 2147483648, %v2000_v41 }
 0x5a3   : > { %v2957_v29 = vsub.f32 1.5, %v2956_v40  ;;  %v2522_v40 = vmul.f32 %v9578_v10, %v13038_v60  ;;  %vm2354_vm10 = vweird.f32 %v2000_v41 }
 0x5a4   : > { %v9604_v8 = vpop.eup %6792  ;;  %v1951_v17 = vmul.f32 1.442695, %v1889_v53 }
 0x5a5   : > { %v9607_v44 = vpop.eup %6794  ;;  %v2958_v50 = vmul.f32 %v6791_v9, %v2957_v29  ;;  %2013 = vadd.xlane.f32.xlu2 %v9604_v8 }
 0x5a6   : > { %v2964_v7 = vmul.f32 %v9607_v44, %v9600_v0  ;;  %6798 = vpow2.f32 %v1951_v17  ;;  %vm2970_vm14 = vweird.f32 %v9607_v44 }
 0x5a7   : > { %v2962_v24 = vsel %vm2961_vm9, %v6791_v9, %v2958_v50  ;;  %v2358_v50 = vand.u32 2147483647, %v2000_v41  ;;  %vm2971_vm0 = vmor %vm2969_vm15, %vm2970_vm14 }
 0x5a8   : > { %v6797_v22 = vpop.eup %6796  ;;  %v3210_v35 = vmul.f32 %v2962_v24, %v9234_v15  ;;  %v2965_v55 = vmul.f32 %v9607_v44, %v2964_v7  ;;  %v9624_v15 = vadd.f32 %v9317_v26, %v3242_v23  ;;  %v13041_v7 = vld [vmem:[#allocation28_spill] sm:$0xff] }
 0x5a9   : > { %v2350_v42 = vmul.f32 %v6797_v22, %v2000_v41  ;;  %v2626_v36 = vpop.xlane.xlu2 %2625  ;;  %vm2355_vm11 = vweird.f32 %v6797_v22  ;;  %v2519_v24 = vmul.f32 %v9543_v20, %v13041_v7  ;;  %vm2359_vm13 = vcmp.eq.f32.partialorder %v2358_v50, 8.507059e+37 }
 0x5aa   : > { %v3243_v62 = vmul.f32 %v9305_v59, %v3210_v35  ;;  %v2674_v34 = vmul.f32 %v2626_v36, %v7531_v13  ;;  %v2966_v38 = vmul.f32 0.5, %v2965_v55  ;;  %13039 = vst [vmem:[#allocation30_spill] sm:$0xff] %v9624_v15  ;;  %vm2356_vm12 = vmor %vm2354_vm10, %vm2355_vm11 }
 0x5ab   : > { %v2774_v51 = vpop.xlane.xlu1 %2773  ;;  %v2351_v9 = vsub.f32 1.0, %v2350_v42  ;;  %v2554_v42 = vadd.f32 %v2522_v40, %v13038_v60  ;;  %v2551_v41 = vadd.f32 %v2519_v24, %v13041_v7  ;;  %v7144_v60 = vld [vmem:[%s7514_s24 + $0xb8] sm:$0xff] }
 0x5ac   : > { %v2828_v3 = vmul.f32 %v2774_v51, %v7531_v13  ;;  %v9621_v29 = vsub.f32 %v9286_v56, %v2674_v34  ;;  %v9626_v53 = vpop.eup %6798  ;;  %v9629_v17 = vadd.f32 %v9317_v26, %v3243_v62  ;;  %v2967_v51 = vsub.f32 1.5, %v2966_v38 }
 0x5ad   : > { %v2352_v4 = vmul.f32 %v6797_v22, %v2351_v9  ;;  %2015 = vadd.xlane.f32.xlu1 %v9626_v53 }
 0x5ae   : > { %v2860_v39 = vadd.f32 1e-05, %v2828_v3  ;;  %13040 = vst [vmem:[#allocation56_spill] sm:$0xff] %v9629_v17  ;;  %v2738_v10 = vmul.f32 %v9621_v29, %v9621_v29  ;;  %v3304_v23 = vpack.c.bf16 %v9629_v17, %v9624_v15  ;;  %v2361_v3 = vor.u32 1.1754944e-38, %v2360_v16  ;;  %v7145_v16 = vld [vmem:[%s7514_s24 + $0xa0] sm:$0xff] }
 0x5af   : > { %v2353_v35 = vadd.f32 %v6797_v22, %v2352_v4  ;;  %v2968_v34 = vmul.f32 %v9607_v44, %v2967_v51  ;;  %v9652_v4 = vadd.f32 %v7145_v16, %v2551_v41 }
 0x5b0   : > { %6800 = vrsqrt.f32 %v2860_v39  ;;  %2785 = vadd.xlane.f32.xlu0 %v2738_v10  ;;  %3542 = vmatmul.bf16.gmra.mxu2 %v3304_v23  ;;  %vm2979_vm2 = vweird.f32 %v2860_v39 }
 0x5b1   : > { %v2357_v36 = vsel %vm2356_vm12, %v6797_v22, %v2353_v35  ;;  %3631 = vmatmul.bf16.gmra.mxu3 %v3304_v23  ;;  %3720 = vmatmul.bf16.gmra.mxu1 %v3304_v23  ;;  %v9646_v22 = vadd.f32 %v7144_v60, %v2554_v42  ;;  %13043 = vst [vmem:[#allocation57_spill] sm:$0xff] %v9652_v4  ;;  %v2776_v24 = vpop.xlane.xlu2 %2775 }
 0x5b2   : > { %3809 = vmatmul.bf16.gmra.mxu0 %v3304_v23  ;;  %v2362_v62 = vsel %vm2359_vm13, %v2361_v3, %v2357_v36  ;;  %v2972_v50 = vsel %vm2971_vm0, %v9607_v44, %v2968_v34  ;;  %v2829_v23 = vmul.f32 %v2776_v24, %v7531_v13 }
 0x5b3   : > { %v9638_v55 = vpop.xlane.xlu1 %1857  ;;  %v2363_v9 = vmul.f32 %v9265_v47, %v2362_v62  ;;  %13042 = vst [vmem:[#allocation28_spill] sm:$0xff] %v9646_v22  ;;  %v3211_v0 = vmul.f32 %v2972_v50, %v9244_v30  ;;  %v13046_v50 = vld [vmem:[#allocation29_spill] sm:$0xff] }
 0x5b4   : > { %v9664_v62 = vadd.f32 1e-05, %v2829_v23  ;;  %v7146_v23 = vld [vmem:[%s7514_s24 + $0xb0] sm:$0xff] }
 0x5b5   : > { %5854 = vst [vmem:[%s8649_s29 + $0xb0] sm:$0xff] %v2363_v9  ;;  %2641 = vadd.xlane.f32.xlu1 %v9646_v22  ;;  %v3244_v3 = vmul.f32 %v9305_v59, %v3211_v0 }
 0x5b6   : > { %v6801_v20 = vpop.eup %6800  ;;  %6802 = vrsqrt.f32 %v9664_v62  ;;  %vm2989_vm8 = vweird.f32 %v9664_v62 }
 0x5b7   : > { %v2974_v38 = vmul.f32 %v6801_v20, %v2860_v39  ;;  %vm2980_vm1 = vweird.f32 %v6801_v20 }
 0x5b8   : > { %2635 = vadd.xlane.f32.xlu0 %v9652_v4  ;;  %vm2981_vm3 = vmor %vm2979_vm2, %vm2980_vm1 }
 0x5b9   : > { %v2975_v40 = vmul.f32 %v6801_v20, %v2974_v38 }
 0x5bb   : > { %v2976_v10 = vmul.f32 0.5, %v2975_v40  ;;  %v9655_v7 = vpop.xlane.xlu1 %2003 }
 0x5bc   : > { %v9689_v0 = vpop.eup %6802  ;;  %vm2384_vm6 = vweird.f32 %v9655_v7 }
 0x5bd   : > { %v2977_v47 = vsub.f32 1.5, %v2976_v10  ;;  %v2521_v10 = vmul.f32 %v2363_v9, %v13046_v50  ;;  %vm2990_vm5 = vweird.f32 %v9689_v0 }
 0x5be   : > { %vm9755_vm11 = vmor %vm2989_vm8, %vm2990_vm5 }
 0x5bf   : > { %v2978_v51 = vmul.f32 %v6801_v20, %v2977_v47  ;;  %v2553_v47 = vadd.f32 %v2521_v10, %v13046_v50 }
 0x5c1   : > { %v2982_v35 = vsel %vm2981_vm3, %v6801_v20, %v2978_v51  ;;  %v9671_v20 = vadd.f32 %v9317_v26, %v3244_v3  ;;  %v9695_v3 = vadd.f32 %v7146_v23, %v2553_v47 }
 0x5c2   : > { %v3212_v44 = vmul.f32 %v2982_v35, %v9272_v49  ;;  %v2778_v34 = vpop.xlane.xlu0 %2777  ;;  %v9676_v49 = vpop.xlane.xlu2 %2005 }
 0x5c3   : > { %v2630_v42 = vpop.xlane.xlu1 %2629  ;;  %v2830_v30 = vmul.f32 %v2778_v34, %v7531_v13  ;;  %13044 = vst [vmem:[#allocation58_spill] sm:$0xff] %v9671_v20  ;;  %vm2399_vm14 = vweird.f32 %v9676_v49 }
 0x5c4   : > { %v3245_v36 = vmul.f32 %v9305_v59, %v3212_v44  ;;  %v2676_v41 = vmul.f32 %v2630_v42, %v7531_v13  ;;  %13047 = vst [vmem:[#allocation29_spill] sm:$0xff] %v9695_v3 }
 0x5c5   : > { %v9678_v60 = vadd.f32 1e-05, %v2830_v30 }
 0x5c6   : > { %v9668_v39 = vsub.f32 %v9417_v12, %v2676_v41  ;;  %v9674_v38 = vadd.f32 %v9317_v26, %v3245_v36  ;;  %v2984_v36 = vmul.f32 %v9689_v0, %v9664_v62 }
 0x5c7   : > { %6804 = vrsqrt.f32 %v9678_v60  ;;  %vm2999_vm10 = vweird.f32 %v9678_v60 }
 0x5c8   : > { %13045 = vst [vmem:[#allocation59_spill] sm:$0xff] %v9674_v38  ;;  %v2740_v40 = vmul.f32 %v9668_v39, %v9668_v39  ;;  %v3305_v16 = vpack.c.bf16 %v9674_v38, %v9671_v20  ;;  %6806 = vrcp.f32 %v9655_v7  ;;  %v2985_v10 = vmul.f32 %v9689_v0, %v2984_v36 }
 0x5ca   : > { %2789 = vadd.xlane.f32.xlu0 %v2740_v40  ;;  %3547 = vmatmul.bf16.gmra.mxu2 %v3305_v16  ;;  %v2628_v24 = vpop.xlane.xlu0 %2627  ;;  %v1890_v40 = vsub.f32 %v9308_v21, %v9638_v55  ;;  %v2986_v12 = vmul.f32 0.5, %v2985_v10 }
 0x5cb   : > { %3636 = vmatmul.bf16.gmra.mxu3 %v3305_v16  ;;  %3725 = vmatmul.bf16.gmra.mxu1 %v3305_v16  ;;  %v2780_v51 = vpop.xlane.xlu2 %2779  ;;  %v2675_v42 = vmul.f32 %v2628_v24, %v7531_v13  ;;  %v9705_v34 = vpop.xlane.xlu1 %2007 }
 0x5cc   : > { %3814 = vmatmul.bf16.gmra.mxu0 %v3305_v16  ;;  %v2831_v9 = vmul.f32 %v2780_v51, %v7531_v13  ;;  %v1953_v24 = vmul.f32 1.442695, %v1890_v40 }
 0x5cd   : > { %v9691_v35 = vpop.eup %6804  ;;  %v9714_v50 = vsub.f32 %v9450_v52, %v2675_v42  ;;  %v2987_v52 = vsub.f32 1.5, %v2986_v12  ;;  %v2390_v12 = vand.u32 2147483648, %v9655_v7 }
 0x5ce   : > { %v9697_v44 = vpop.eup %6806  ;;  %v2994_v41 = vmul.f32 %v9691_v35, %v9678_v60  ;;  %v9707_v30 = vadd.f32 1e-05, %v2831_v9  ;;  %vm3000_vm7 = vweird.f32 %v9691_v35 }
 0x5cf   : > { %v2380_v16 = vmul.f32 %v9697_v44, %v9655_v7  ;;  %v2739_v9 = vmul.f32 %v9714_v50, %v9714_v50  ;;  %vm2385_vm4 = vweird.f32 %v9697_v44  ;;  %vm9764_vm12 = vmor %vm2999_vm10, %vm3000_vm7 }
 0x5d0   : > { %v2995_v47 = vmul.f32 %v9691_v35, %v2994_v41  ;;  %6808 = vrsqrt.f32 %v9707_v30  ;;  %vm9748_vm9 = vmor %vm2384_vm6, %vm2385_vm4  ;;  %vm3009_vm5 = vweird.f32 %v9707_v30 }
 0x5d1   : > { %v2381_v51 = vsub.f32 1.0, %v2380_v16  ;;  %6810 = vrcp.f32 %v9676_v49  ;;  %2787 = vadd.xlane.f32.xlu2 %v2739_v9 }
 0x5d2   : > { %2639 = vadd.xlane.f32.xlu0 %v9695_v3  ;;  %v2996_v21 = vmul.f32 0.5, %v2995_v47  ;;  %6812 = vpow2.f32 %v1953_v24 }
 0x5d3   : > { %v2382_v42 = vmul.f32 %v9697_v44, %v2381_v51  ;;  %v2634_v41 = vpop.xlane.xlu1 %2633  ;;  %6814 = vrcp.f32 %v9705_v34  ;;  %v2988_v51 = vmul.f32 %v9689_v0, %v2987_v52 }
 0x5d4   : > { %v2997_v40 = vsub.f32 1.5, %v2996_v21  ;;  %v2678_v60 = vmul.f32 %v2634_v41, %v7531_v13 }
 0x5d5   : > { %v2782_v23 = vpop.xlane.xlu0 %2781  ;;  %v2383_v10 = vadd.f32 %v9697_v44, %v2382_v42  ;;  %v2992_v38 = vsel %vm9755_vm11, %v9689_v0, %v2988_v51 }
 0x5d6   : > { %v2832_v55 = vmul.f32 %v2782_v23, %v7531_v13  ;;  %v9724_v36 = vpop.eup %6808  ;;  %v2388_v23 = vand.u32 2147483647, %v9655_v7  ;;  %v2998_v9 = vmul.f32 %v9691_v35, %v2997_v40  ;;  %v2391_v40 = vor.u32 1.1754944e-38, %v2390_v12  ;;  %v9768_v5 = vpop.xlane.xlu2 %2009 }
 0x5d7   : > { %v9729_v56 = vpop.eup %6810  ;;  %v3004_v47 = vmul.f32 %v9724_v36, %v9707_v30  ;;  %v2387_v7 = vsel %vm9748_vm9, %v9697_v44, %v2383_v10  ;;  %v3213_v33 = vmul.f32 %v2992_v38, %v9298_v58  ;;  %v9790_v51 = vsub.f32 %v9487_v6, %v2678_v60  ;;  %v13054_v38 = vld [vmem:[#allocation31_spill] sm:$0xff] }
 0x5d8   : > { %v9727_v16 = vadd.f32 1e-05, %v2832_v55  ;;  %v9739_v24 = vpop.eup %6812  ;;  %v2395_v21 = vmul.f32 %v9729_v56, %v9676_v49  ;;  %vm2389_vm13 = vcmp.eq.f32.partialorder %v2388_v23, 8.507059e+37  ;;  %v3002_v44 = vsel %vm9764_vm12, %v9691_v35, %v2998_v9 }
 0x5d9   : > { %2017 = vadd.xlane.f32.xlu2 %v9739_v24  ;;  %v9753_v42 = vpop.eup %6814  ;;  %v3005_v62 = vmul.f32 %v9724_v36, %v3004_v47  ;;  %v2392_v55 = vsel %vm2389_vm13, %v2391_v40, %v2387_v7  ;;  %v3214_v35 = vmul.f32 %v3002_v44, %v9414_v14  ;;  %v2405_v7 = vand.u32 2147483648, %v9676_v49 }
 0x5da   : > { %6816 = vrsqrt.f32 %v9727_v16  ;;  %v2396_v47 = vsub.f32 1.0, %v2395_v21  ;;  %v2410_v12 = vmul.f32 %v9753_v42, %v9705_v34  ;;  %v2393_v23 = vmul.f32 %v9341_v45, %v2392_v55 }
 0x5db   : > { %v9781_v17 = vpop.xlane.xlu1 %2011  ;;  %v3006_v15 = vmul.f32 0.5, %v3005_v62  ;;  %6818 = vrcp.f32 %v9768_v5  ;;  %v3246_v40 = vmul.f32 %v9305_v59, %v3213_v33  ;;  %v3247_v44 = vmul.f32 %v9305_v59, %v3214_v35  ;;  %v7147_v35 = vld [vmem:[%s7514_s24 + $0xc0] sm:$0xff] }
 0x5dc   : > { %v2397_v21 = vmul.f32 %v9729_v56, %v2396_v47  ;;  %v2411_v52 = vsub.f32 1.0, %v2410_v12  ;;  %v2523_v14 = vmul.f32 %v2393_v23, %v13054_v38  ;;  %5856 = vst [vmem:[%s8649_s29 + $0xc0] sm:$0xff] %v2393_v23  ;;  %6820 = vrcp.f32 %v9781_v17 }
 0x5dd   : > { %v2632_v20 = vpop.xlane.xlu0 %2631  ;;  %v3007_v62 = vsub.f32 1.5, %v3006_v15  ;;  %v2742_v15 = vmul.f32 %v9790_v51, %v9790_v51  ;;  %vm2400_vm0 = vweird.f32 %v9729_v56  ;;  %vm3010_vm1 = vweird.f32 %v9724_v36 }
 0x5de   : > { %v2677_v9 = vmul.f32 %v2632_v20, %v7531_v13  ;;  %v2555_v47 = vadd.f32 %v2523_v14, %v13054_v38  ;;  %v2398_v12 = vadd.f32 %v9729_v56, %v2397_v21  ;;  %v2412_v55 = vmul.f32 %v9753_v42, %v2411_v52  ;;  %vm9841_vm4 = vmor %vm2399_vm14, %vm2400_vm0 }
 0x5df   : > { %vm3019_vm2 = vweird.f32 %v9727_v16  ;;  %2793 = vadd.xlane.f32.xlu0 %v2742_v15  ;;  %v9830_v21 = vadd.f32 %v9317_v26, %v3246_v40  ;;  %v9833_v52 = vadd.f32 %v9317_v26, %v3247_v44  ;;  %v2403_v38 = vand.u32 2147483647, %v9676_v49  ;;  %vm9853_vm6 = vmor %vm3009_vm5, %vm3010_vm1 }
 0x5e0   : > { %v9777_v10 = vpop.eup %6816  ;;  %v9803_v45 = vsub.f32 %v9569_v1, %v2677_v9  ;;  %v2406_v40 = vor.u32 1.1754944e-38, %v2405_v7  ;;  %v2402_v30 = vsel %vm9841_vm4, %v9729_v56, %v2398_v12  ;;  %vm2415_vm7 = vweird.f32 %v9753_v42 }
 0x5e1   : > { %v3014_v0 = vmul.f32 %v9777_v10, %v9727_v16  ;;  %vm3020_vm15 = vweird.f32 %v9777_v10  ;;  %v9805_v20 = vpop.eup %6818  ;;  %13058 = vst [vmem:[#allocation60_spill] sm:$0xff] %v9830_v21  ;;  %vm2404_vm8 = vcmp.eq.f32.partialorder %v2403_v38, 8.507059e+37  ;;  %vm2414_vm9 = vweird.f32 %v9705_v34 }
 0x5e2   : > { %vm9823_vm3 = vmor %vm3019_vm2, %vm3020_vm15  ;;  %v2425_v9 = vmul.f32 %v9805_v20, %v9768_v5  ;;  %13059 = vst [vmem:[#allocation61_spill] sm:$0xff] %v9833_v52  ;;  %v2741_v16 = vmul.f32 %v9803_v45, %v9803_v45  ;;  %v9859_v49 = vpop.eup %6820  ;;  %v2418_v56 = vand.u32 2147483647, %v9705_v34  ;;  %v2420_v12 = vand.u32 2147483648, %v9705_v34 }
 0x5e3   : > { %v3015_v41 = vmul.f32 %v9777_v10, %v3014_v0  ;;  %v3008_v0 = vmul.f32 %v9724_v36, %v3007_v62  ;;  %v2638_v62 = vpop.xlane.xlu1 %2637  ;;  %vm2416_vm11 = vmor %vm2414_vm9, %vm2415_vm7  ;;  %vm2430_vm12 = vweird.f32 %v9805_v20  ;;  %vm2429_vm13 = vweird.f32 %v9768_v5 }
 0x5e4   : > { %2791 = vadd.xlane.f32.xlu2 %v2741_v16  ;;  %v2680_v7 = vmul.f32 %v2638_v62, %v7531_v13  ;;  %v2421_v62 = vor.u32 1.1754944e-38, %v2420_v12  ;;  %vm2419_vm10 = vcmp.eq.f32.partialorder %v2418_v56, 8.507059e+37  ;;  %vm2445_vm14 = vweird.f32 %v9859_v49  ;;  %v13068_v56 = vld [vmem:[#allocation34_spill] sm:$0xff]  ;;  %vm2431_vm15 = vmor %vm2429_vm13, %vm2430_vm12 }
 0x5e5   : > { %v3016_v58 = vmul.f32 0.5, %v3015_v41  ;;  %v9819_v41 = vadd.f32 %v7147_v35, %v2555_v47  ;;  %v2413_v47 = vadd.f32 %v9753_v42, %v2412_v55  ;;  %v2440_v35 = vmul.f32 %v9859_v49, %v9781_v17 }
 0x5e6   : > { %vm2444_vm0 = vweird.f32 %v9781_v17 }
 0x5e7   : > { %v3017_v60 = vsub.f32 1.5, %v3016_v58  ;;  %13055 = vst [vmem:[#allocation31_spill] sm:$0xff] %v9819_v41  ;;  %2643 = vadd.xlane.f32.xlu1 %v9819_v41  ;;  %v2441_v55 = vsub.f32 1.0, %v2440_v35  ;;  %v2417_v23 = vsel %vm2416_vm11, %v9753_v42, %v2413_v47  ;;  %vm2446_vm1 = vmor %vm2444_vm0, %vm2445_vm14 }
 0x5e8   : > { %v2422_v42 = vsel %vm2419_vm10, %v2421_v62, %v2417_v23  ;;  %v7149_v62 = vld [vmem:[%s7514_s24 + $0xd0] sm:$0xff] }
 0x5e9   : > { %v3018_v33 = vmul.f32 %v9777_v10, %v3017_v60  ;;  %v3306_v60 = vpack.c.bf16 %v9833_v52, %v9830_v21  ;;  %v2442_v38 = vmul.f32 %v9859_v49, %v2441_v55 }
 0x5eb   : > { %v3022_v14 = vsel %vm9823_vm3, %v9777_v10, %v3018_v33  ;;  %v3012_v10 = vsel %vm9853_vm6, %v9724_v36, %v3008_v0  ;;  %v2426_v33 = vsub.f32 1.0, %v2425_v9  ;;  %3552 = vmatmul.bf16.gmra.mxu2 %v3306_v60  ;;  %3641 = vmatmul.bf16.gmra.mxu3 %v3306_v60  ;;  %v2407_v0 = vsel %vm2404_vm8, %v2406_v40, %v2402_v30 }
 0x5ec   : > { %v3216_v15 = vmul.f32 %v3022_v14, %v9503_v63  ;;  %3730 = vmatmul.bf16.gmra.mxu1 %v3306_v60  ;;  %3819 = vmatmul.bf16.gmra.mxu0 %v3306_v60  ;;  %v3215_v36 = vmul.f32 %v3012_v10, %v9469_v43  ;;  %v9878_v63 = vsub.f32 %v9587_v27, %v2680_v7  ;;  %v13064_v14 = vld [vmem:[#allocation32_spill] sm:$0xff]  ;;  %v2433_v10 = vand.u32 2147483647, %v9768_v5 }
 0x5ed   : > { %v2427_v16 = vmul.f32 %v9805_v20, %v2426_v33  ;;  %v2408_v34 = vmul.f32 %v9349_v2, %v2407_v0  ;;  %v2423_v30 = vmul.f32 %v9460_v57, %v2422_v42  ;;  %v2435_v7 = vand.u32 2147483648, %v9768_v5 }
 0x5ee   : > { %v3249_v9 = vmul.f32 %v9305_v59, %v3216_v15  ;;  %v2744_v43 = vmul.f32 %v9878_v63, %v9878_v63  ;;  %v3248_v58 = vmul.f32 %v9305_v59, %v3215_v36  ;;  %v2443_v47 = vadd.f32 %v9859_v49, %v2442_v38  ;;  %v7148_v15 = vld [vmem:[%s7514_s24 + $0xc8] sm:$0xff] }
 0x5ef   : > { %v2524_v40 = vmul.f32 %v2408_v34, %v13064_v14  ;;  %5857 = vst [vmem:[%s8649_s29 + $0xc8] sm:$0xff] %v2408_v34  ;;  %v2428_v2 = vadd.f32 %v9805_v20, %v2427_v16  ;;  %v2525_v12 = vmul.f32 %v2423_v30, %v13068_v56  ;;  %v2450_v57 = vand.u32 2147483648, %v9781_v17 }
 0x5f0   : > { %2797 = vadd.xlane.f32.xlu1 %v2744_v43  ;;  %v9896_v60 = vadd.f32 %v9317_v26, %v3249_v9  ;;  %v9908_v35 = vadd.f32 %v9317_v26, %v3248_v58  ;;  %5858 = vst [vmem:[%s8649_s29 + $0xd0] sm:$0xff] %v2423_v30  ;;  %v2448_v36 = vand.u32 2147483647, %v9781_v17  ;;  %v2436_v0 = vor.u32 1.1754944e-38, %v2435_v7 }
 0x5f1   : > { %v2556_v44 = vadd.f32 %v2524_v40, %v13064_v14  ;;  %v2432_v5 = vsel %vm2431_vm15, %v9805_v20, %v2428_v2  ;;  %vm2434_vm2 = vcmp.eq.f32.partialorder %v2433_v10, 8.507059e+37  ;;  %v2447_v23 = vsel %vm2446_vm1, %v9859_v49, %v2443_v47  ;;  %v2784_v49 = vpop.xlane.xlu2 %2783 }
 0x5f2   : > { %13065 = vst [vmem:[#allocation32_spill] sm:$0xff] %v9896_v60  ;;  %v3307_v55 = vpack.c.bf16 %v9896_v60, %v9908_v35  ;;  %v2557_v20 = vadd.f32 %v2525_v12, %v13068_v56  ;;  %v2451_v9 = vor.u32 1.1754944e-38, %v2450_v57  ;;  %v2437_v16 = vsel %vm2434_vm2, %v2436_v0, %v2432_v5 }
 0x5f3   : > { %v9905_v33 = vadd.f32 %v7148_v15, %v2556_v44  ;;  %13067 = vst [vmem:[#allocation63_spill] sm:$0xff] %v9908_v35  ;;  %vm2449_vm3 = vcmp.eq.f32.partialorder %v2448_v36, 8.507059e+37  ;;  %v2438_v17 = vmul.f32 %v9464_v54, %v2437_v16  ;;  %v2833_v38 = vmul.f32 %v2784_v49, %v7531_v13 }
 0x5f4   : > { %v2452_v34 = vsel %vm2449_vm3, %v2451_v9, %v2447_v23  ;;  %v9927_v43 = vadd.f32 %v7149_v62, %v2557_v20 }
 0x5f5   : > { %13066 = vst [vmem:[#allocation62_spill] sm:$0xff] %v9905_v33  ;;  %2645 = vadd.xlane.f32.xlu2 %v9905_v33  ;;  %v9931_v58 = vmul.f32 %v9559_v28, %v2452_v34  ;;  %v2865_v14 = vadd.f32 1e-05, %v2833_v38 }
 0x5f6   : > { %13069 = vst [vmem:[#allocation34_spill] sm:$0xff] %v9927_v43 }
 0x5f7   : > { %5859 = vst [vmem:[%s8649_s29 + $0xd8] sm:$0xff] %v2438_v17  ;;  %6822 = vrsqrt.f32 %v2865_v14  ;;  %vm3029_vm8 = vweird.f32 %v2865_v14 }
 0x5f8   : > { %5860 = vst [vmem:[%s8649_s29 + $0xe0] sm:$0xff] %v9931_v58 }
 0x5fb   : > { %3557 = vmatmul.bf16.gmra.mxu2 %v3307_v55  ;;  %3646 = vmatmul.bf16.gmra.mxu3 %v3307_v55 }
 0x5fc   : > { %3735 = vmatmul.bf16.gmra.mxu1 %v3307_v55  ;;  %3824 = vmatmul.bf16.gmra.mxu0 %v3307_v55 }
 0x5fd   : > { %2647 = vadd.xlane.f32.xlu2 %v9927_v43  ;;  %v6823_v40 = vpop.eup %6822 }
 0x5fe   : > { %v3024_v2 = vmul.f32 %v6823_v40, %v2865_v14  ;;  %vm3030_vm6 = vweird.f32 %v6823_v40 }
 0x5ff   : > { %vm3031_vm9 = vmor %vm3029_vm8, %vm3030_vm6 }
 0x600   : > { %v3025_v28 = vmul.f32 %v6823_v40, %v3024_v2 }
 0x602   : > { %v3026_v56 = vmul.f32 0.5, %v3025_v28 }
 0x604   : > { %v3027_v0 = vsub.f32 1.5, %v3026_v56 }
 0x606   : > { %v3028_v28 = vmul.f32 %v6823_v40, %v3027_v0 }
 0x608   : > { %v3032_v0 = vsel %vm3031_vm9, %v6823_v40, %v3028_v28  ;;  %v7150_v28 = vld [vmem:[%s7514_s24 + $0xd8] sm:$0xff] }
 0x618   : > { %v2014_v54 = vpop.xlane.xlu2 %2013 }
 0x619   : > { %6824 = vrcp.f32 %v2014_v54  ;;  %v2465_v62 = vand.u32 2147483648, %v2014_v54  ;;  %vm2459_vm5 = vweird.f32 %v2014_v54  ;;  %v2463_v38 = vand.u32 2147483647, %v2014_v54 }
 0x61b   : > { %vm2464_vm11 = vcmp.eq.f32.partialorder %v2463_v38, 8.507059e+37 }
 0x61f   : > { %v6825_v42 = vpop.eup %6824 }
 0x620   : > { %v2455_v44 = vmul.f32 %v6825_v42, %v2014_v54  ;;  %v9937_v30 = vpop.xlane.xlu1 %2015  ;;  %vm2460_vm4 = vweird.f32 %v6825_v42 }
 0x621   : > { %6826 = vrcp.f32 %v9937_v30  ;;  %vm9955_vm7 = vmor %vm2459_vm5, %vm2460_vm4  ;;  %vm2474_vm13 = vweird.f32 %v9937_v30  ;;  %v2478_v40 = vand.u32 2147483647, %v9937_v30 }
 0x622   : > { %v2456_v7 = vsub.f32 1.0, %v2455_v44 }
 0x623   : > { %v2786_v10 = vpop.xlane.xlu0 %2785  ;;  %vm2479_vm1 = vcmp.eq.f32.partialorder %v2478_v40, 8.507059e+37  ;;  %v13080_v40 = vld [vmem:[#allocation36_spill] sm:$0xff] }
 0x624   : > { %v2834_v47 = vmul.f32 %v2786_v10, %v7531_v13  ;;  %v2457_v57 = vmul.f32 %v6825_v42, %v2456_v7 }
 0x626   : > { %v2866_v15 = vadd.f32 1e-05, %v2834_v47  ;;  %v2458_v20 = vadd.f32 %v6825_v42, %v2457_v57  ;;  %v13072_v57 = vld [vmem:[#allocation33_spill] sm:$0xff] }
 0x627   : > { %v9941_v12 = vpop.eup %6826 }
 0x628   : > { %6828 = vrsqrt.f32 %v2866_v15  ;;  %v2470_v5 = vmul.f32 %v9941_v12, %v9937_v30  ;;  %v2642_v36 = vpop.xlane.xlu1 %2641  ;;  %v2462_v47 = vsel %vm9955_vm7, %v6825_v42, %v2458_v20  ;;  %vm2475_vm10 = vweird.f32 %v9941_v12 }
 0x629   : > { %v2682_v55 = vmul.f32 %v2642_v36, %v7531_v13  ;;  %v2466_v36 = vor.u32 1.1754944e-38, %v2465_v62  ;;  %v3217_v62 = vmul.f32 %v3032_v0, %v9581_v46  ;;  %vm9974_vm14 = vmor %vm2474_vm13, %vm2475_vm10  ;;  %vm3039_vm15 = vweird.f32 %v2866_v15 }
 0x62a   : > { %v2471_v9 = vsub.f32 1.0, %v2470_v5  ;;  %v2526_v5 = vmul.f32 %v2438_v17, %v13072_v57  ;;  %v2480_v17 = vand.u32 2147483648, %v9937_v30  ;;  %v13076_v30 = vld [vmem:[#allocation35_spill] sm:$0xff] }
 0x62b   : > { %v2636_v23 = vpop.xlane.xlu0 %2635  ;;  %v9947_v16 = vsub.f32 %v9646_v22, %v2682_v55 }
 0x62c   : > { %v2679_v34 = vmul.f32 %v2636_v23, %v7531_v13  ;;  %v2472_v56 = vmul.f32 %v9941_v12, %v2471_v9  ;;  %v2558_v20 = vadd.f32 %v2526_v5, %v13072_v57  ;;  %v2481_v46 = vor.u32 1.1754944e-38, %v2480_v17 }
 0x62d   : > { %v2746_v44 = vmul.f32 %v9947_v16, %v9947_v16 }
 0x62e   : > { %v6829_v49 = vpop.eup %6828  ;;  %v9951_v2 = vsub.f32 %v9652_v4, %v2679_v34  ;;  %v2467_v34 = vsel %vm2464_vm11, %v2466_v36, %v2462_v47  ;;  %v2473_v42 = vadd.f32 %v9941_v12, %v2472_v56  ;;  %v9982_v10 = vadd.f32 %v7150_v28, %v2558_v20 }
 0x62f   : > { %v3034_v7 = vmul.f32 %v6829_v49, %v2866_v15  ;;  %2801 = vadd.xlane.f32.xlu2 %v2746_v44  ;;  %v2468_v9 = vmul.f32 %v9604_v8, %v2467_v34  ;;  %vm3040_vm12 = vweird.f32 %v6829_v49  ;;  %v2527_v56 = vmul.f32 %v9931_v58, %v13076_v30 }
 0x630   : > { %v2743_v54 = vmul.f32 %v9951_v2, %v9951_v2  ;;  %v2477_v8 = vsel %vm9974_vm14, %v9941_v12, %v2473_v42  ;;  %vm3041_vm0 = vmor %vm3039_vm15, %vm3040_vm12  ;;  %13075 = vst [vmem:[#allocation33_spill] sm:$0xff] %v9982_v10 }
 0x631   : > { %v3035_v55 = vmul.f32 %v6829_v49, %v3034_v7  ;;  %5861 = vst [vmem:[%s8649_s29 + $0xe8] sm:$0xff] %v2468_v9  ;;  %v2482_v57 = vsel %vm2479_vm1, %v2481_v46, %v2477_v8  ;;  %v2559_v0 = vadd.f32 %v2527_v56, %v13076_v30  ;;  %v2528_v38 = vmul.f32 %v2468_v9, %v13080_v40  ;;  %v7152_v30 = vld [vmem:[%s7514_s24 + $0xe8] sm:$0xff] }
 0x632   : > { %2795 = vadd.xlane.f32.xlu0 %v2743_v54  ;;  %v3250_v54 = vmul.f32 %v9305_v59, %v3217_v62 }
 0x633   : > { %v3036_v23 = vmul.f32 0.5, %v3035_v55  ;;  %v2560_v46 = vadd.f32 %v2528_v38, %v13080_v40 }
 0x634   : > { %v9993_v55 = vadd.f32 %v9317_v26, %v3250_v54  ;;  %v13082_v54 = vld [vmem:[#allocation37_spill] sm:$0xff] }
 0x635   : > { %v3037_v14 = vsub.f32 1.5, %v3036_v23  ;;  %v7151_v23 = vld [vmem:[%s7514_s24 + $0xe0] sm:$0xff]  ;;  %v10016_v56 = vadd.f32 %v7152_v30, %v2560_v46 }
 0x636   : > { %13077 = vst [vmem:[#allocation35_spill] sm:$0xff] %v9993_v55  ;;  %v10003_v34 = vadd.f32 %v7151_v23, %v2559_v0 }
 0x637   : > { %v3038_v44 = vmul.f32 %v6829_v49, %v3037_v14  ;;  %13081 = vst [vmem:[#allocation36_spill] sm:$0xff] %v10016_v56 }
 0x638   : > { %13079 = vst [vmem:[#allocation65_spill] sm:$0xff] %v10003_v34 }
 0x639   : > { %v3042_v7 = vsel %vm3041_vm0, %v6829_v49, %v3038_v44  ;;  %v2483_v49 = vmul.f32 %v9626_v53, %v2482_v57 }
 0x63a   : > { %v3218_v15 = vmul.f32 %v3042_v7, %v9621_v29  ;;  %2649 = vadd.xlane.f32.xlu0 %v9982_v10 }
 0x63b   : > { %5862 = vst [vmem:[%s8649_s29 + $0xf0] sm:$0xff] %v2483_v49 }
 0x63c   : > { %v3251_v5 = vmul.f32 %v9305_v59, %v3218_v15  ;;  %v2529_v15 = vmul.f32 %v2483_v49, %v13082_v54 }
 0x63d   : > { %v2790_v47 = vpop.xlane.xlu0 %2789 }
 0x63e   : > { %v2836_v12 = vmul.f32 %v2790_v47, %v7531_v13  ;;  %v9996_v58 = vadd.f32 %v9317_v26, %v3251_v5  ;;  %v2561_v9 = vadd.f32 %v2529_v15, %v13082_v54 }
 0x640   : > { %v2868_v36 = vadd.f32 1e-05, %v2836_v12  ;;  %13078 = vst [vmem:[#allocation64_spill] sm:$0xff] %v9996_v58  ;;  %v3308_v29 = vpack.c.bf16 %v9996_v58, %v9993_v55 }
 0x642   : > { %6830 = vrsqrt.f32 %v2868_v36  ;;  %3562 = vmatmul.bf16.gmra.mxu2 %v3308_v29  ;;  %3651 = vmatmul.bf16.gmra.mxu3 %v3308_v29  ;;  %vm3059_vm3 = vweird.f32 %v2868_v36 }
 0x643   : > { %3740 = vmatmul.bf16.gmra.mxu1 %v3308_v29  ;;  %3829 = vmatmul.bf16.gmra.mxu0 %v3308_v29 }
 0x644   : > { %2651 = vadd.xlane.f32.xlu0 %v10003_v34  ;;  %v2788_v8 = vpop.xlane.xlu2 %2787 }
 0x645   : > { %v2640_v53 = vpop.xlane.xlu0 %2639  ;;  %v2835_v28 = vmul.f32 %v2788_v8, %v7531_v13 }
 0x646   : > { %v2681_v20 = vmul.f32 %v2640_v53, %v7531_v13  ;;  %v7153_v53 = vld [vmem:[%s7514_s24 + $0xf0] sm:$0xff] }
 0x647   : > { %v2867_v7 = vadd.f32 1e-05, %v2835_v28 }
 0x648   : > { %v6831_v42 = vpop.eup %6830  ;;  %v10008_v14 = vsub.f32 %v9695_v3, %v2681_v20  ;;  %v10022_v20 = vadd.f32 %v7153_v53, %v2561_v9 }
 0x649   : > { %v3054_v17 = vmul.f32 %v6831_v42, %v2868_v36  ;;  %6832 = vrsqrt.f32 %v2867_v7  ;;  %vm3060_vm2 = vweird.f32 %v6831_v42  ;;  %vm3049_vm6 = vweird.f32 %v2867_v7 }
 0x64a   : > { %v2745_v62 = vmul.f32 %v10008_v14, %v10008_v14  ;;  %13083 = vst [vmem:[#allocation37_spill] sm:$0xff] %v10022_v20  ;;  %vm3061_vm4 = vmor %vm3059_vm3, %vm3060_vm2 }
 0x64b   : > { %v3055_v44 = vmul.f32 %v6831_v42, %v3054_v17 }
 0x64c   : > { %2799 = vadd.xlane.f32.xlu1 %v2745_v62  ;;  %v2018_v57 = vpop.xlane.xlu2 %2017 }
 0x64d   : > { %v3056_v47 = vmul.f32 0.5, %v3055_v44  ;;  %6834 = vrcp.f32 %v2018_v57  ;;  %vm2489_vm9 = vweird.f32 %v2018_v57  ;;  %v2495_v36 = vand.u32 2147483648, %v2018_v57 }
 0x64f   : > { %v3057_v12 = vsub.f32 1.5, %v3056_v47  ;;  %v6833_v5 = vpop.eup %6832 }
 0x650   : > { %v3044_v29 = vmul.f32 %v6833_v5, %v2867_v7  ;;  %vm3050_vm5 = vweird.f32 %v6833_v5 }
 0x651   : > { %v3058_v0 = vmul.f32 %v6831_v42, %v3057_v12  ;;  %vm3051_vm8 = vmor %vm3049_vm6, %vm3050_vm5 }
 0x652   : > { %v3045_v23 = vmul.f32 %v6833_v5, %v3044_v29  ;;  %v2794_v47 = vpop.xlane.xlu0 %2793 }
 0x653   : > { %v6835_v17 = vpop.eup %6834  ;;  %v3062_v62 = vsel %vm3061_vm4, %v6831_v42, %v3058_v0  ;;  %v2493_v42 = vand.u32 2147483647, %v2018_v57  ;;  %v2838_v15 = vmul.f32 %v2794_v47, %v7531_v13 }
 0x654   : > { %2653 = vadd.xlane.f32.xlu1 %v10016_v56  ;;  %v3046_v49 = vmul.f32 0.5, %v3045_v23  ;;  %v2485_v40 = vmul.f32 %v6835_v17, %v2018_v57  ;;  %v3220_v8 = vmul.f32 %v3062_v62, %v9668_v39  ;;  %vm2490_vm7 = vweird.f32 %v6835_v17 }
 0x655   : > { %vm2491_vm11 = vmor %vm2489_vm9, %vm2490_vm7  ;;  %v2870_v29 = vadd.f32 1e-05, %v2838_v15  ;;  %v2496_v62 = vor.u32 1.1754944e-38, %v2495_v36  ;;  %vm2494_vm10 = vcmp.eq.f32.partialorder %v2493_v42, 8.507059e+37 }
 0x656   : > { %v3047_v38 = vsub.f32 1.5, %v3046_v49  ;;  %v2486_v44 = vsub.f32 1.0, %v2485_v40  ;;  %v3253_v12 = vmul.f32 %v9305_v59, %v3220_v8 }
 0x657   : > { %v2792_v23 = vpop.xlane.xlu2 %2791  ;;  %6836 = vrsqrt.f32 %v2870_v29  ;;  %vm3079_vm13 = vweird.f32 %v2870_v29 }
 0x658   : > { %v3048_v28 = vmul.f32 %v6833_v5, %v3047_v38  ;;  %v2487_v46 = vmul.f32 %v6835_v17, %v2486_v44  ;;  %v10039_v40 = vadd.f32 %v9317_v26, %v3253_v12 }
 0x65a   : > { %v3052_v30 = vsel %vm3051_vm8, %v6833_v5, %v3048_v28  ;;  %v2488_v54 = vadd.f32 %v6835_v17, %v2487_v46  ;;  %v2644_v0 = vpop.xlane.xlu1 %2643  ;;  %v2837_v5 = vmul.f32 %v2792_v23, %v7531_v13  ;;  %13085 = vst [vmem:[#allocation67_spill] sm:$0xff] %v10039_v40  ;;  %v13086_v28 = vld [vmem:[#allocation38_spill] sm:$0xff] }
 0x65b   : > { %v3219_v9 = vmul.f32 %v3052_v30, %v9714_v50  ;;  %v2683_v39 = vmul.f32 %v2644_v0, %v7531_v13 }
 0x65c   : > { %2655 = vadd.xlane.f32.xlu1 %v10022_v20  ;;  %v2492_v7 = vsel %vm2491_vm11, %v6835_v17, %v2488_v54  ;;  %v2869_v49 = vadd.f32 1e-05, %v2837_v5  ;;  %v7154_v54 = vld [vmem:[%s7514_s24 + $0xf8] sm:$0xff]  ;;  %s7262_s24 = scalar_lea.hbm %s7261_s14, 256 }
 0x65d   : > { %v3252_v53 = vmul.f32 %v9305_v59, %v3219_v9  ;;  %v10033_v57 = vsub.f32 %v9819_v41, %v2683_v39  ;;  %v2497_v17 = vsel %vm2494_vm10, %v2496_v62, %v2492_v7  ;;  %v6837_v36 = vpop.eup %6836  ;;  %v6429_v62 = vld [vmem:[#allocation7 + $0x78] sm:$0xff]  ;;  %p7263_p1 = scmp.ne.s32.totalorder %s7261_s14, %s7262_s24  ;;  %p7268_p9 = scmp.lt.s32.totalorder %s7266_s4, %s7262_s24 }
 0x65e   : > { %v2498_v44 = vmul.f32 %v9739_v24, %v2497_v17  ;;  %6838 = vrsqrt.f32 %v2869_v49  ;;  %v3074_v30 = vmul.f32 %v6837_v36, %v2870_v29  ;;  %vm3080_vm12 = vweird.f32 %v6837_v36  ;;  %v6437_v5 = vld [vmem:[#allocation7 + $0xb8] sm:$0xff]  ;;  %5437 = vmatpush.bf16.msra.mxu3 %v6429_v62  ;;  %v6420_v62 = vld [vmem:[#allocation7 + $0x30] sm:$0xff] }
 0x65f   : > { %v10036_v50 = vadd.f32 %v9317_v26, %v3252_v53  ;;  %v2747_v38 = vmul.f32 %v10033_v57, %v10033_v57  ;;  %v6421_v53 = vld [vmem:[#allocation7 + $0x38] sm:$0xff]  ;;  %vm3081_vm14 = vmor %vm3079_vm13, %vm3080_vm12  ;;  %5526 = vmatpush.bf16.msra.mxu1 %v6437_v5  ;;  %vm3069_vm0 = vweird.f32 %v2869_v49  ;;  %v6428_v5 = vld [vmem:[#allocation7 + $0x70] sm:$0xff]  ;;  %p7264_p4 = pnand %p7263_p1, %p7480_p5  ;;  %p7269_p2 = por %p7268_p9, %p7267_p11 }
 0x660   : > { %v2530_v46 = vmul.f32 %v2498_v44, %v13086_v28  ;;  %5863 = vst [vmem:[%s8649_s29 + $0xf8] sm:$0xff] %v2498_v44  ;;  %v3075_v15 = vmul.f32 %v6837_v36, %v3074_v30  ;;  %5348 = vmatpush.bf16.msra.mxu2 %v6421_v53 }
 0x661   : > { %13084 = vst [vmem:[#allocation66_spill] sm:$0xff] %v10036_v50  ;;  %v3309_v8 = vpack.c.bf16 %v10039_v40, %v10036_v50  ;;  %2803 = vadd.xlane.f32.xlu2 %v2747_v38  ;;  %v6445_v38 = vld [vmem:[#allocation7 + $0xf8] sm:$0xff]  ;;  %v6443_v40 = vld [vmem:[#allocation7 + $0xe8] sm:$0xff]  ;;  %p7265_p8 = pneg %p7264_p4 }
 0x662   : > { %v2562_v47 = vadd.f32 %v2530_v46, %v13086_v28  ;;  %v3076_v9 = vmul.f32 0.5, %v3075_v15  ;;  %5615 = vmatpush.bf16.msra.mxu0 %v6445_v38  ;;  %5438 = vmatpush.bf16.msra.mxu3 %v6428_v5  ;;  %v6436_v38 = vld [vmem:[#allocation7 + $0xb0] sm:$0xff] }
 0x663   : > { %3567 = vmatmul.bf16.gmra.mxu2 %v3309_v8  ;;  %3656 = vmatmul.bf16.gmra.mxu3 %v3309_v8  ;;  %p7270_p10 = pnand %p7269_p2, %p7265_p8 }
 0x664   : > { %3745 = vmatmul.bf16.gmra.mxu1 %v3309_v8  ;;  %3834 = vmatmul.bf16.gmra.mxu0 %v3309_v8  ;;  %v10050_v42 = vadd.f32 %v7154_v54, %v2562_v47  ;;  %v6839_v24 = vpop.eup %6838  ;;  %v3077_v7 = vsub.f32 1.5, %v3076_v9 }
 0x665   : > { %v3064_v12 = vmul.f32 %v6839_v24, %v2869_v49  ;;  %vm3070_vm15 = vweird.f32 %v6839_v24  ;;  %5349 = vmatpush.bf16.msra.mxu2 %v6420_v62  ;;  %5527 = vmatpush.bf16.msra.mxu1 %v6436_v38 }
 0x666   : > { %13087 = vst [vmem:[#allocation38_spill] sm:$0xff] %v10050_v42  ;;  %v3078_v44 = vmul.f32 %v6837_v36, %v3077_v7  ;;  %vm3071_vm1 = vmor %vm3069_vm0, %vm3070_vm15 }
 0x667   : > { %v3065_v0 = vmul.f32 %v6839_v24, %v3064_v12 }
 0x668   : > { %v2646_v39 = vpop.xlane.xlu2 %2645  ;;  %v3082_v46 = vsel %vm3081_vm14, %v6837_v36, %v3078_v44  ;;  %v6444_v44 = vld [vmem:[#allocation7 + $0xf0] sm:$0xff] }
 0x669   : > { %2657 = vadd.xlane.f32.xlu2 %v10050_v42  ;;  %v2684_v23 = vmul.f32 %v2646_v39, %v7531_v13  ;;  %v3066_v17 = vmul.f32 0.5, %v3065_v0  ;;  %v3222_v30 = vmul.f32 %v3082_v46, %v9790_v51  ;;  %5616 = vmatpush.bf16.msra.mxu0 %v6444_v44  ;;  %v6419_v44 = vld [vmem:[#allocation7 + $0x28] sm:$0xff] }
 0x66a   : > { %5350 = vmatpush.bf16.msra.mxu2 %v6419_v44 }
 0x66b   : > { %v10055_v8 = vsub.f32 %v9905_v33, %v2684_v23  ;;  %v3067_v28 = vsub.f32 1.5, %v3066_v17  ;;  %v3255_v12 = vmul.f32 %v9305_v59, %v3222_v30 }
 0x66d   : > { %v2748_v47 = vmul.f32 %v10055_v8, %v10055_v8  ;;  %v3068_v54 = vmul.f32 %v6839_v24, %v3067_v28  ;;  %v10071_v51 = vadd.f32 %v9317_v26, %v3255_v12  ;;  %5617 = vmatpush.bf16.msra.mxu0 %v6443_v40 }
 0x66f   : > { %2805 = vadd.xlane.f32.xlu0 %v2748_v47  ;;  %v3072_v29 = vsel %vm3071_vm1, %v6839_v24, %v3068_v54  ;;  %13090 = vst [vmem:[#allocation70_spill] sm:$0xff] %v10071_v51 }
 0x670   : > { %v2648_v15 = vpop.xlane.xlu2 %2647  ;;  %v3221_v9 = vmul.f32 %v3072_v29, %v9803_v45  ;;  %v2798_v45 = vpop.xlane.xlu1 %2797 }
 0x671   : > { %v2685_v0 = vmul.f32 %v2648_v15, %v7531_v13  ;;  %v2840_v23 = vmul.f32 %v2798_v45, %v7531_v13 }
 0x672   : > { %v3254_v39 = vmul.f32 %v9305_v59, %v3221_v9 }
 0x673   : > { %v10065_v36 = vsub.f32 %v9927_v43, %v2685_v0  ;;  %v2872_v53 = vadd.f32 1e-05, %v2840_v23 }
 0x674   : > { %v10068_v7 = vadd.f32 %v9317_v26, %v3254_v39 }
 0x675   : > { %13088 = vst [vmem:[#allocation68_spill] sm:$0xff] %v10065_v36  ;;  %v2749_v49 = vmul.f32 %v10065_v36, %v10065_v36  ;;  %6840 = vrsqrt.f32 %v2872_v53  ;;  %vm3099_vm3 = vweird.f32 %v2872_v53 }
 0x676   : > { %13089 = vst [vmem:[#allocation69_spill] sm:$0xff] %v10068_v7  ;;  %v3310_v24 = vpack.c.bf16 %v10071_v51, %v10068_v7  ;;  %v6435_v7 = vld [vmem:[#allocation7 + $0xa8] sm:$0xff] }
 0x677   : > { %2807 = vadd.xlane.f32.xlu0 %v2749_v49  ;;  %5528 = vmatpush.bf16.msra.mxu1 %v6435_v7 }
 0x678   : > { %3572 = vmatmul.bf16.gmra.mxu2 %v3310_v24  ;;  %3661 = vmatmul.bf16.gmra.mxu3 %v3310_v24 }
 0x679   : > { %3750 = vmatmul.bf16.gmra.mxu1 %v3310_v24  ;;  %3839 = vmatmul.bf16.gmra.mxu0 %v3310_v24 }
 0x67b   : > { %v6841_v17 = vpop.eup %6840 }
 0x67c   : > { %v3094_v28 = vmul.f32 %v6841_v17, %v2872_v53  ;;  %vm3100_vm2 = vweird.f32 %v6841_v17 }
 0x67d   : > { %vm3101_vm4 = vmor %vm3099_vm3, %vm3100_vm2 }
 0x67e   : > { %v3095_v46 = vmul.f32 %v6841_v17, %v3094_v28  ;;  %v6427_v28 = vld [vmem:[#allocation7 + $0x68] sm:$0xff] }
 0x67f   : > { %5439 = vmatpush.bf16.msra.mxu3 %v6427_v28 }
 0x680   : > { %v3096_v29 = vmul.f32 0.5, %v3095_v46 }
 0x682   : > { %v3097_v15 = vsub.f32 1.5, %v3096_v29 }
 0x684   : > { %v3098_v49 = vmul.f32 %v6841_v17, %v3097_v15 }
 0x686   : > { %v3102_v5 = vsel %vm3101_vm4, %v6841_v17, %v3098_v49 }
 0x687   : > { %v3224_v29 = vmul.f32 %v3102_v5, %v9878_v63  ;;  %v3349_v5 = vld [vmem:[%s12626_s5] sm:$0xf] }
 0x689   : > { %v3257_v49 = vmul.f32 %v9305_v59, %v3224_v29  ;;  %v10116_v29 = vperm.slane %v3349_v5, 3 }
 0x68b   : > { %v10109_v28 = vadd.f32 %v9317_v26, %v3257_v49  ;;  %13096 = vst [vmem:[#allocation76_spill] sm:$0xff] %v10116_v29 }
 0x68d   : > { %13094 = vst [vmem:[#allocation74_spill] sm:$0xff] %v10109_v28 }
 0x6a2   : > { %v2802_v62 = vpop.xlane.xlu2 %2801 }
 0x6a3   : > { %v2842_v46 = vmul.f32 %v2802_v62, %v7531_v13 }
 0x6a5   : > { %v2796_v47 = vpop.xlane.xlu0 %2795  ;;  %v10091_v17 = vadd.f32 1e-05, %v2842_v46  ;;  %v3617_v46 = vpop.f32.mrf.mxu3 }
 0x6a6   : > { %v2839_v30 = vmul.f32 %v2796_v47, %v7531_v13 }
 0x6a7   : > { %vm3119_vm11 = vweird.f32 %v10091_v17 }
 0x6a8   : > { %v2871_v54 = vadd.f32 1e-05, %v2839_v30 }
 0x6aa   : > { %6842 = vrsqrt.f32 %v2871_v54  ;;  %vm3089_vm6 = vweird.f32 %v2871_v54 }
 0x6ab   : > { %6844 = vrsqrt.f32 %v10091_v17 }
 0x6ad   : > { %v2650_v12 = vpop.xlane.xlu0 %2649 }
 0x6ae   : > { %v2686_v9 = vmul.f32 %v2650_v12, %v7531_v13 }
 0x6b0   : > { %v6843_v0 = vpop.eup %6842  ;;  %v10081_v39 = vsub.f32 %v9982_v10, %v2686_v9  ;;  %v3619_v10 = vpop.f32.mrf.mxu3 }
 0x6b1   : > { %v3084_v24 = vmul.f32 %v6843_v0, %v2871_v54  ;;  %vm3090_vm5 = vweird.f32 %v6843_v0 }
 0x6b2   : > { %13091 = vst [vmem:[#allocation71_spill] sm:$0xff] %v10081_v39  ;;  %v2750_v45 = vmul.f32 %v10081_v39, %v10081_v39  ;;  %vm3091_vm7 = vmor %vm3089_vm6, %vm3090_vm5 }
 0x6b3   : > { %v3085_v23 = vmul.f32 %v6843_v0, %v3084_v24 }
 0x6b4   : > { %2809 = vadd.xlane.f32.xlu1 %v2750_v45 }
 0x6b5   : > { %v3086_v38 = vmul.f32 0.5, %v3085_v23  ;;  %v3706_v23 = vpop.f32.mrf.mxu1 }
 0x6b7   : > { %v3087_v47 = vsub.f32 1.5, %v3086_v38  ;;  %v2652_v30 = vpop.xlane.xlu0 %2651  ;;  %v3795_v38 = vpop.f32.mrf.mxu0 }
 0x6b8   : > { %v2687_v15 = vmul.f32 %v2652_v30, %v7531_v13 }
 0x6b9   : > { %v3088_v53 = vmul.f32 %v6843_v0, %v3087_v47  ;;  %v10111_v47 = vperm.slane %v3349_v5, 2 }
 0x6ba   : > { %v10089_v12 = vsub.f32 %v10003_v34, %v2687_v15  ;;  %v10118_v15 = vpop.eup %6844  ;;  %v10135_v34 = vperm.slane %v3349_v5, 1 }
 0x6bb   : > { %v3092_v9 = vsel %vm3091_vm7, %v6843_v0, %v3088_v53  ;;  %v3528_v0 = vpop.f32.mrf.mxu2  ;;  %13095 = vst [vmem:[#allocation75_spill] sm:$0xff] %v10111_v47  ;;  %v10121_v53 = vadd.f32 %v3706_v23, %v10111_v47  ;;  %vm3120_vm8 = vweird.f32 %v10118_v15 }
 0x6bc   : > { %13092 = vst [vmem:[#allocation72_spill] sm:$0xff] %v10089_v12  ;;  %v3223_v24 = vmul.f32 %v3092_v9, %v9951_v2  ;;  %v2751_v63 = vmul.f32 %v10089_v12, %v10089_v12  ;;  %v10124_v9 = vadd.f32 %v3795_v38, %v10116_v29  ;;  %v10145_v3 = vadd.f32 %v3617_v46, %v10135_v34  ;;  %vm10195_vm10 = vmor %vm3119_vm11, %vm3120_vm8  ;;  %v6424_v12 = vld [vmem:[#allocation7 + $0x50] sm:$0xff] }
 0x6bd   : > { %13098 = vst [vmem:[#allocation78_spill] sm:$0xff] %v10135_v34  ;;  %v10174_v55 = vadd.f32 %v3619_v10, %v10135_v34 }
 0x6be   : > { %v3256_v62 = vmul.f32 %v9305_v59, %v3223_v24  ;;  %2811 = vadd.xlane.f32.xlu2 %v2751_v63  ;;  %v3708_v24 = vpop.f32.mrf.mxu1  ;;  %v3114_v63 = vmul.f32 %v10118_v15, %v10091_v17  ;;  %v4006_v38 = vmul.f32 0.044715, %v10124_v9 }
 0x6bf   : > { %v2800_v45 = vpop.xlane.xlu1 %2799  ;;  %v10159_v46 = vadd.f32 %v3708_v24, %v10111_v47 }
 0x6c0   : > { %v2841_v54 = vmul.f32 %v2800_v45, %v7531_v13  ;;  %v10106_v2 = vadd.f32 %v9317_v26, %v3256_v62  ;;  %v10130_v45 = vperm.slane %v3349_v5, 0  ;;  %v3797_v62 = vpop.f32.mrf.mxu0  ;;  %v3115_v43 = vmul.f32 %v10118_v15, %v3114_v63 }
 0x6c1   : > { %v4134_v27 = vmul.f32 %v4006_v38, %v10124_v9  ;;  %v10161_v38 = vpop.f32.mrf.mxu3 }
 0x6c2   : > { %v10103_v44 = vadd.f32 1e-05, %v2841_v54  ;;  %13093 = vst [vmem:[#allocation73_spill] sm:$0xff] %v10106_v2  ;;  %v3311_v30 = vpack.c.bf16 %v10109_v28, %v10106_v2  ;;  %v10141_v41 = vadd.f32 %v3528_v0, %v10130_v45  ;;  %v3116_v28 = vmul.f32 0.5, %v3115_v43 }
 0x6c3   : > { %13097 = vst [vmem:[#allocation77_spill] sm:$0xff] %v10130_v45  ;;  %v3530_v23 = vpop.f32.mrf.mxu2  ;;  %v4004_v0 = vmul.f32 0.044715, %v10145_v3  ;;  %v10164_v43 = vadd.f32 %v3797_v62, %v10116_v29 }
 0x6c4   : > { %6846 = vrsqrt.f32 %v10103_v44  ;;  %3577 = vmatmul.bf16.gmra.mxu2 %v3311_v30  ;;  %3666 = vmatmul.bf16.gmra.mxu3 %v3311_v30  ;;  %v4003_v2 = vmul.f32 0.044715, %v10141_v41  ;;  %v10168_v50 = vadd.f32 %v3530_v23, %v10130_v45  ;;  %vm3109_vm12 = vweird.f32 %v10103_v44 }
 0x6c5   : > { %3755 = vmatmul.bf16.gmra.mxu1 %v3311_v30  ;;  %3844 = vmatmul.bf16.gmra.mxu0 %v3311_v30  ;;  %v4005_v30 = vmul.f32 0.044715, %v10121_v53  ;;  %v4132_v58 = vmul.f32 %v4004_v0, %v10145_v3 }
 0x6c6   : > { %v10148_v5 = vpop.f32.mrf.mxu1  ;;  %v4007_v40 = vmul.f32 0.044715, %v10168_v50 }
 0x6c7   : > { %v4133_v22 = vmul.f32 %v4005_v30, %v10121_v53  ;;  %v4262_v30 = vmul.f32 %v4134_v27, %v10124_v9  ;;  %v2654_v1 = vpop.xlane.xlu1 %2653  ;;  %v4260_v0 = vmul.f32 %v4132_v58, %v10145_v3 }
 0x6c8   : > { %v10151_v6 = vpop.f32.mrf.mxu0  ;;  %v2688_v27 = vmul.f32 %v2654_v1, %v7531_v13  ;;  %v4010_v1 = vmul.f32 0.044715, %v10164_v43 }
 0x6c9   : > { %v4261_v63 = vmul.f32 %v4133_v22, %v10121_v53  ;;  %v4131_v22 = vmul.f32 %v4003_v2, %v10141_v41  ;;  %v10219_v61 = vpop.f32.mrf.mxu3 }
 0x6ca   : > { %v10126_v49 = vpop.eup %6846  ;;  %v10180_v2 = vsub.f32 %v10016_v56, %v2688_v27  ;;  %v4138_v58 = vmul.f32 %v4010_v1, %v10164_v43 }
 0x6cb   : > { %v3104_v54 = vmul.f32 %v10126_v49, %v10103_v44  ;;  %v4389_v24 = vadd.f32 %v4261_v63, %v10121_v53  ;;  %vm3110_vm9 = vweird.f32 %v10126_v49  ;;  %v4259_v10 = vmul.f32 %v4131_v22, %v10141_v41 }
 0x6cc   : > { %13099 = vst [vmem:[#allocation79_spill] sm:$0xff] %v10180_v2  ;;  %v2752_v7 = vmul.f32 %v10180_v2, %v10180_v2  ;;  %vm10203_vm13 = vmor %vm3109_vm12, %vm3110_vm9 }
 0x6cd   : > { %v3105_v33 = vmul.f32 %v10126_v49, %v3104_v54  ;;  %v10155_v54 = vpop.f32.mrf.mxu2  ;;  %v4517_v63 = vmul.f32 0.7978846, %v4389_v24  ;;  %v4387_v21 = vadd.f32 %v4259_v10, %v10141_v41 }
 0x6ce   : > { %v10193_v27 = vpop.f32.mrf.mxu1  ;;  %2813 = vadd.xlane.f32.xlu0 %v2752_v7  ;;  %v4135_v7 = vmul.f32 %v4007_v40, %v10168_v50  ;;  %v4266_v40 = vmul.f32 %v4138_v58, %v10164_v43 }
 0x6cf   : > { %v3106_v4 = vmul.f32 0.5, %v3105_v33  ;;  %v3117_v33 = vsub.f32 1.5, %v3116_v28  ;;  %v4009_v28 = vmul.f32 0.044715, %v10159_v46  ;;  %v2656_v35 = vpop.xlane.xlu1 %2655  ;;  %6848 = vtanh.f32 %v4517_v63 }
 0x6d0   : > { %v10201_v22 = vpop.f32.mrf.mxu0  ;;  %v2689_v1 = vmul.f32 %v2656_v35, %v7531_v13  ;;  %v4515_v35 = vmul.f32 0.7978846, %v4387_v21  ;;  %v4263_v63 = vmul.f32 %v4135_v7, %v10168_v50  ;;  %v10242_v21 = vmul.f32 0.5, %v10121_v53 }
 0x6d1   : > { %v3107_v51 = vsub.f32 1.5, %v3106_v4  ;;  %v4390_v4 = vadd.f32 %v4262_v30, %v10124_v9  ;;  %v3118_v62 = vmul.f32 %v10118_v15, %v3117_v33  ;;  %v4008_v30 = vmul.f32 0.044715, %v10174_v55 }
 0x6d2   : > { %v4137_v33 = vmul.f32 %v4009_v28, %v10159_v46  ;;  %v10230_v10 = vsub.f32 %v10022_v20, %v2689_v1  ;;  %v4394_v58 = vadd.f32 %v4266_v40, %v10164_v43  ;;  %v4391_v7 = vadd.f32 %v4263_v63, %v10168_v50 }
 0x6d3   : > { %v3108_v23 = vmul.f32 %v10126_v49, %v3107_v51  ;;  %v3122_v60 = vsel %vm10195_vm10, %v10118_v15, %v3118_v62  ;;  %v4518_v52 = vmul.f32 0.7978846, %v4390_v4  ;;  %v4388_v51 = vadd.f32 %v4260_v0, %v10145_v3 }
 0x6d4   : > { %v2804_v24 = vpop.xlane.xlu2 %2803  ;;  %v4136_v15 = vmul.f32 %v4008_v30, %v10174_v55  ;;  %13104 = vst [vmem:[#allocation80_spill] sm:$0xff] %v10230_v10  ;;  %v2753_v0 = vmul.f32 %v10230_v10, %v10230_v10  ;;  %v10258_v53 = vmul.f32 0.5, %v10145_v3 }
 0x6d5   : > { %v10208_v56 = vpop.f32.mrf.mxu2  ;;  %v3112_v44 = vsel %vm10203_vm13, %v10126_v49, %v3108_v23  ;;  %v2843_v28 = vmul.f32 %v2804_v24, %v7531_v13  ;;  %v4265_v49 = vmul.f32 %v4137_v33, %v10159_v46  ;;  %v3226_v23 = vmul.f32 %v3122_v60, %v9947_v16  ;;  %v6849_v24 = vpop.eup %6848 }
 0x6d6   : > { %v3225_v4 = vmul.f32 %v3112_v44, %v10008_v14  ;;  %v4516_v30 = vmul.f32 0.7978846, %v4388_v51  ;;  %v4264_v33 = vmul.f32 %v4136_v15, %v10174_v55  ;;  %2815 = vadd.xlane.f32.xlu1 %v2753_v0  ;;  %v10253_v1 = vpop.f32.mrf.mxu1  ;;  %v10279_v0 = vmul.f32 0.5, %v10159_v46 }
 0x6d7   : > { %v10224_v62 = vadd.f32 1e-05, %v2843_v28  ;;  %v4393_v60 = vadd.f32 %v4265_v49, %v10159_v46  ;;  %v3259_v16 = vmul.f32 %v9305_v59, %v3226_v23  ;;  %v10250_v28 = vmul.f32 0.5, %v10141_v41 }
 0x6d8   : > { %v3258_v14 = vmul.f32 %v9305_v59, %v3225_v4  ;;  %v4392_v15 = vadd.f32 %v4264_v33, %v10174_v55  ;;  %v10261_v49 = vpop.f32.mrf.mxu0  ;;  %v10268_v4 = vpop.f32.mrf.mxu3  ;;  %v10283_v33 = vadd.f32 %v10148_v5, %v10111_v47  ;;  %v10296_v46 = vadd.f32 %v10151_v6, %v10116_v29 }
 0x6d9   : > { %6850 = vrsqrt.f32 %v10224_v62  ;;  %v4521_v23 = vmul.f32 0.7978846, %v4393_v60  ;;  %v10276_v3 = vadd.f32 %v9317_v26, %v3259_v16  ;;  %v10300_v5 = vadd.f32 %v10155_v54, %v10130_v45 }
 0x6da   : > { %6852 = vtanh.f32 %v4518_v52  ;;  %v10247_v52 = vmul.f32 0.5, %v10124_v9  ;;  %v4013_v54 = vmul.f32 0.044715, %v10283_v33  ;;  %v10370_v19 = vadd.f32 %v10268_v4, %v10135_v34 }
 0x6db   : > { %6854 = vtanh.f32 %v4515_v35  ;;  %v10273_v35 = vadd.f32 %v9317_v26, %v3258_v14  ;;  %13107 = vst [vmem:[#allocation83_spill] sm:$0xff] %v10276_v3  ;;  %v10290_v14 = vmul.f32 0.5, %v10164_v43  ;;  %vm3129_vm15 = vweird.f32 %v10224_v62 }
 0x6dc   : > { %v2658_v17 = vpop.xlane.xlu2 %2657  ;;  %6856 = vtanh.f32 %v4516_v30  ;;  %v4522_v30 = vmul.f32 0.7978846, %v4394_v58 }
 0x6dd   : > { %v2690_v44 = vmul.f32 %v2658_v17, %v7531_v13  ;;  %v10263_v9 = vpop.f32.mrf.mxu2  ;;  %13106 = vst [vmem:[#allocation82_spill] sm:$0xff] %v10273_v35  ;;  %v10287_v17 = vadd.f32 1.0, %v6849_v24  ;;  %v3312_v16 = vpack.c.bf16 %v10276_v3, %v10273_v35  ;;  %6858 = vtanh.f32 %v4521_v23  ;;  %v6426_v23 = vld [vmem:[#allocation7 + $0x60] sm:$0xff] }
 0x6de   : > { %13108 = vst [vmem:[#allocation84_spill] sm:$0xff] %v10290_v14  ;;  %6860 = vtanh.f32 %v4522_v30  ;;  %v10323_v30 = vadd.f32 %v10201_v22, %v10116_v29  ;;  %v6442_v3 = vld [vmem:[#allocation7 + $0xe0] sm:$0xff]  ;;  %v4011_v35 = vmul.f32 0.044715, %v10300_v5  ;;  %5440 = vmatpush.bf16.msra.mxu3 %v6426_v23  ;;  %v10335_v22 = vadd.f32 %v10208_v56, %v10130_v45 }
 0x6df   : > { %v10255_v51 = vpop.eup %6850  ;;  %v10266_v41 = vsub.f32 %v10050_v42, %v2690_v44  ;;  %v4519_v44 = vmul.f32 0.7978846, %v4391_v7  ;;  %v4520_v42 = vmul.f32 0.7978846, %v4392_v15  ;;  %v10306_v7 = vmul.f32 0.5, %v10168_v50  ;;  %3582 = vmatmul.bf16.gmra.mxu2 %v3312_v16  ;;  %3671 = vmatmul.bf16.gmra.mxu3 %v3312_v16  ;;  %v6418_v50 = vld [vmem:[#allocation7 + $0x20] sm:$0xff] }
 0x6e0   : > { %v3124_v40 = vmul.f32 %v10255_v51, %v10224_v62  ;;  %v6853_v63 = vpop.eup %6852  ;;  %3760 = vmatmul.bf16.gmra.mxu1 %v3312_v16  ;;  %3849 = vmatmul.bf16.gmra.mxu0 %v3312_v16  ;;  %v4018_v32 = vmul.f32 0.044715, %v10323_v30  ;;  %vm3130_vm14 = vweird.f32 %v10255_v51 }
 0x6e1   : > { %13105 = vst [vmem:[#allocation81_spill] sm:$0xff] %v10266_v41  ;;  %v2754_v60 = vmul.f32 %v10266_v41, %v10266_v41  ;;  %v6855_v20 = vpop.eup %6854  ;;  %v10303_v43 = vadd.f32 1.0, %v6853_v63  ;;  %v10316_v63 = vadd.f32 %v10193_v27, %v10111_v47  ;;  %6862 = vtanh.f32 %v4519_v44  ;;  %5351 = vmatpush.bf16.msra.mxu2 %v6418_v50  ;;  %5618 = vmatpush.bf16.msra.mxu0 %v6442_v3  ;;  %vm3131_vm0 = vmor %vm3129_vm15, %vm3130_vm14 }
 0x6e2   : > { %v3125_v58 = vmul.f32 %v10255_v51, %v3124_v40  ;;  %v2806_v24 = vpop.xlane.xlu0 %2805  ;;  %v6857_v6 = vpop.eup %6856  ;;  %v10312_v40 = vadd.f32 %v10161_v38, %v10135_v34  ;;  %v6434_v38 = vld [vmem:[#allocation7 + $0xa0] sm:$0xff]  ;;  %6864 = vtanh.f32 %v4520_v42  ;;  %v4014_v27 = vmul.f32 0.044715, %v10296_v46  ;;  %5441 = vmatpush.bf16.msra.mxu3 %v6425_v25 }
 0x6e3   : > { %2817 = vadd.xlane.f32.xlu2 %v2754_v60  ;;  %v2844_v15 = vmul.f32 %v2806_v24, %v7531_v13  ;;  %v10319_v60 = vmul.f32 0.5, %v10174_v55  ;;  %v10329_v44 = vadd.f32 1.0, %v6855_v20  ;;  %v10331_v55 = vadd.f32 1.0, %v6857_v6  ;;  %5529 = vmatpush.bf16.msra.mxu1 %v6434_v38  ;;  %v3807_v6 = vpop.f32.mrf.mxu0  ;;  %v10347_v56 = vpop.eup %6858 }
 0x6e4   : > { %v3126_v16 = vmul.f32 0.5, %v3125_v58  ;;  %v10339_v42 = vmul.f32 %v4013_v54, %v10283_v33  ;;  %v4012_v58 = vmul.f32 0.044715, %v10312_v40  ;;  %v4017_v50 = vmul.f32 0.044715, %v10316_v63  ;;  %v10362_v18 = vpop.eup %6860 }
 0x6e5   : > { %v10325_v24 = vadd.f32 1e-05, %v2844_v15  ;;  %v3718_v15 = vpop.f32.mrf.mxu1  ;;  %v10345_v20 = vadd.f32 %v10219_v61, %v10135_v34  ;;  %v3540_v23 = vpop.f32.mrf.mxu2  ;;  %v10352_v3 = vadd.f32 %v10253_v1, %v10111_v47  ;;  %v10356_v54 = vadd.f32 %v10261_v49, %v10116_v29  ;;  %5352 = vmatpush.bf16.msra.mxu2 %v6417_v31  ;;  %5619 = vmatpush.bf16.msra.mxu0 %v6441_v37 }
 0x6e6   : > { %v10360_v38 = vadd.f32 %v10263_v9, %v10130_v45  ;;  %v3629_v61 = vpop.f32.mrf.mxu3  ;;  %v10365_v48 = vmul.f32 %v4014_v27, %v10296_v46  ;;  %v4139_v1 = vmul.f32 %v4011_v35, %v10300_v5  ;;  %v3127_v49 = vsub.f32 1.5, %v3126_v16  ;;  %v6416_v35 = vld [vmem:[#allocation7 + $0x10] sm:$0xff]  ;;  %5442 = vmatpush.bf16.msra.mxu3 %v6424_v12 }
 0x6e7   : > { %6866 = vrsqrt.f32 %v10325_v24  ;;  %v6863_v41 = vpop.eup %6862  ;;  %v4015_v9 = vmul.f32 0.044715, %v10335_v22  ;;  %v10374_v10 = vadd.f32 %v3718_v15, %v10111_v47  ;;  %v10377_v2 = vadd.f32 %v3807_v6, %v10116_v29  ;;  %5530 = vmatpush.bf16.msra.mxu1 %v6433_v11 }
 0x6e8   : > { %v10380_v27 = vadd.f32 %v3540_v23, %v10130_v45  ;;  %v6865_v4 = vpop.eup %6864  ;;  %v4140_v16 = vmul.f32 %v4012_v58, %v10312_v40  ;;  %v4145_v39 = vmul.f32 %v4017_v50, %v10316_v63  ;;  %v4016_v36 = vmul.f32 0.044715, %v10345_v20 }
 0x6e9   : > { %v10386_v15 = vadd.f32 %v3629_v61, %v10135_v34  ;;  %v4146_v23 = vmul.f32 %v4018_v32, %v10323_v30  ;;  %v4021_v31 = vmul.f32 0.044715, %v10352_v3  ;;  %v4022_v25 = vmul.f32 0.044715, %v10356_v54  ;;  %5353 = vmatpush.bf16.msra.mxu2 %v6416_v35 }
 0x6ea   : > { %v4019_v45 = vmul.f32 0.044715, %v10360_v38  ;;  %v4020_v58 = vmul.f32 0.044715, %v10370_v19  ;;  %v3128_v50 = vmul.f32 %v10255_v51, %v3127_v49  ;;  %v4143_v11 = vmul.f32 %v4015_v9, %v10335_v22 }
 0x6eb   : > { %v4025_v37 = vmul.f32 0.044715, %v10374_v10  ;;  %v4026_v32 = vmul.f32 0.044715, %v10377_v2  ;;  %v4023_v34 = vmul.f32 0.044715, %v10380_v27  ;;  %v4144_v29 = vmul.f32 %v4016_v36, %v10345_v20 }
 0x6ec   : > { %v4024_v13 = vmul.f32 0.044715, %v10386_v15  ;;  %v10404_v47 = vmul.f32 %v4021_v31, %v10352_v3  ;;  %v10407_v9 = vmul.f32 %v4022_v25, %v10356_v54  ;;  %v4147_v26 = vmul.f32 %v4019_v45, %v10360_v38 }
 0x6ed   : > { %v6867_v6 = vpop.eup %6866  ;;  %v4775_v35 = vadd.f32 1.0, %v6863_v41  ;;  %v10413_v12 = vmul.f32 %v4020_v58, %v10370_v19  ;;  %v3132_v36 = vsel %vm3131_vm0, %v10255_v51, %v3128_v50  ;;  %v4267_v62 = vmul.f32 %v4139_v1, %v10300_v5 }
 0x6ee   : > { %v3134_v61 = vmul.f32 %v6867_v6, %v10325_v24  ;;  %13109 = vst [vmem:[#allocation85_spill] sm:$0xff] %v10407_v9  ;;  %v10418_v31 = vmul.f32 %v4025_v37, %v10374_v10  ;;  %v10421_v25 = vmul.f32 %v4026_v32, %v10377_v2  ;;  %v4151_v45 = vmul.f32 %v4023_v34, %v10380_v27 }
 0x6ef   : > { %v10425_v9 = vmul.f32 %v4024_v13, %v10386_v15  ;;  %vm3140_vm1 = vweird.f32 %v6867_v6  ;;  %v4777_v58 = vadd.f32 1.0, %v10347_v56  ;;  %v3227_v51 = vmul.f32 %v3132_v36, %v10033_v57  ;;  %v13117_v36 = vld [vmem:[#allocation20_spill] sm:$0xff] }
 0x6f0   : > { %v3135_v49 = vmul.f32 %v6867_v6, %v3134_v61  ;;  %v4776_v61 = vadd.f32 1.0, %v6865_v4  ;;  %v10431_v1 = vmul.f32 %v10329_v44, %v10250_v28  ;;  %v10434_v50 = vmul.f32 %v4775_v35, %v10306_v7 }
 0x6f1   : > { %v4271_v37 = vmul.f32 %v4143_v11, %v10335_v22  ;;  %vm3139_vm2 = vweird.f32 %v10325_v24  ;;  %v4395_v13 = vadd.f32 %v4267_v62, %v10300_v5  ;;  %v10442_v57 = vmul.f32 %v10331_v55, %v10258_v53 }
 0x6f2   : > { %v3136_v14 = vmul.f32 0.5, %v3135_v49  ;;  %vm3141_vm3 = vmor %vm3139_vm2, %vm3140_vm1  ;;  %v10445_v28 = vmul.f32 %v4776_v61, %v10319_v60  ;;  %v10449_v7 = vmul.f32 %v10287_v17, %v10242_v21  ;;  %v4272_v44 = vmul.f32 %v4144_v29, %v10345_v20  ;;  %v13115_v49 = vld [vmem:[#allocation84_spill] sm:$0xff] }
 0x6f3   : > { %13110 = vst [vmem:[#allocation86_spill] sm:$0xff] %v10442_v57  ;;  %v10453_v24 = vmul.f32 %v4777_v58, %v10279_v0  ;;  %v4778_v4 = vadd.f32 1.0, %v10362_v18  ;;  %v3260_v53 = vmul.f32 %v9305_v59, %v3227_v51  ;;  %v4399_v60 = vadd.f32 %v4271_v37, %v10335_v22 }
 0x6f4   : > { %v3137_v41 = vsub.f32 1.5, %v3136_v14  ;;  %v4268_v14 = vmul.f32 %v4140_v16, %v10312_v40  ;;  %13111 = vst [vmem:[#allocation87_spill] sm:$0xff] %v10445_v28  ;;  %v4273_v16 = vmul.f32 %v4145_v39, %v10316_v63  ;;  %v4274_v11 = vmul.f32 %v4146_v23, %v10323_v30  ;;  %v6440_v23 = vld [vmem:[#allocation7 + $0xd0] sm:$0xff] }
 0x6f5   : > { %13112 = vst [vmem:[#allocation88_spill] sm:$0xff] %v10449_v7  ;;  %v4523_v29 = vmul.f32 0.7978846, %v4395_v13  ;;  %v4269_v0 = vmul.f32 %v10339_v42, %v10283_v33  ;;  %v10476_v32 = vmul.f32 %v10303_v43, %v10247_v52  ;;  %v10479_v35 = vmul.f32 %v4778_v4, %v13115_v49  ;;  %5620 = vmatpush.bf16.msra.mxu0 %v6440_v23 }
 0x6f6   : > { %v3138_v34 = vmul.f32 %v6867_v6, %v3137_v41  ;;  %13113 = vst [vmem:[#allocation89_spill] sm:$0xff] %v10453_v24  ;;  %v4396_v17 = vadd.f32 %v4268_v14, %v10312_v40  ;;  %v4401_v42 = vadd.f32 %v4273_v16, %v10316_v63  ;;  %v10483_v62 = vadd.f32 %v13117_v36, %v3260_v53 }
 0x6f7   : > { %13114 = vst [vmem:[#allocation90_spill] sm:$0xff] %v10476_v32  ;;  %v4527_v41 = vmul.f32 0.7978846, %v4399_v60  ;;  %6868 = vtanh.f32 %v4523_v29  ;;  %v4397_v51 = vadd.f32 %v4269_v0, %v10283_v33  ;;  %v4275_v52 = vmul.f32 %v4147_v26, %v10360_v38  ;;  %v3721_v0 = vpop.f32.mrf.mxu1 }
 0x6f8   : > { %v3142_v56 = vsel %vm3141_vm3, %v6867_v6, %v3138_v34  ;;  %v4270_v6 = vmul.f32 %v10365_v48, %v10296_v46  ;;  %13116 = vst [vmem:[#allocation84_spill] sm:$0xff] %v10479_v35  ;;  %v4402_v48 = vadd.f32 %v4274_v11, %v10323_v30  ;;  %v4524_v58 = vmul.f32 0.7978846, %v4396_v17 }
 0x6f9   : > { %v3228_v55 = vmul.f32 %v3142_v56, %v10055_v8  ;;  %v4400_v8 = vadd.f32 %v4272_v44, %v10345_v20  ;;  %13118 = vst [vmem:[#allocation20_spill] sm:$0xff] %v10483_v62  ;;  %v4279_v13 = vmul.f32 %v4151_v45, %v10380_v27  ;;  %v10498_v44 = vmul.f32 0.5, %v10300_v5 }
 0x6fa   : > { %v4398_v34 = vadd.f32 %v4270_v6, %v10296_v46  ;;  %v10501_v56 = vmul.f32 0.5, %v10335_v22  ;;  %v4529_v4 = vmul.f32 0.7978846, %v4401_v42  ;;  %6870 = vtanh.f32 %v4527_v41  ;;  %v3543_v6 = vpop.f32.mrf.mxu2 }
 0x6fb   : > { %v3261_v18 = vmul.f32 %v9305_v59, %v3228_v55  ;;  %v4528_v37 = vmul.f32 0.7978846, %v4400_v8  ;;  %v10504_v26 = vmul.f32 0.5, %v10312_v40  ;;  %v4530_v16 = vmul.f32 0.7978846, %v4402_v48 }
 0x6fc   : > { %v4276_v45 = vmul.f32 %v10413_v12, %v10370_v19  ;;  %6872 = vtanh.f32 %v4524_v58  ;;  %v4525_v53 = vmul.f32 0.7978846, %v4397_v51  ;;  %v4403_v5 = vadd.f32 %v4275_v52, %v10360_v38 }
 0x6fd   : > { %v10486_v61 = vadd.f32 %v13117_v36, %v3261_v18  ;;  %v4280_v22 = vmul.f32 %v10425_v9, %v10386_v15  ;;  %6874 = vtanh.f32 %v4528_v37  ;;  %v4526_v55 = vmul.f32 0.7978846, %v4398_v34  ;;  %v6869_v11 = vpop.eup %6868 }
 0x6fe   : > { %v4407_v60 = vadd.f32 %v4279_v13, %v10380_v27  ;;  %v4277_v40 = vmul.f32 %v10404_v47, %v10352_v3  ;;  %v10515_v29 = vmul.f32 0.5, %v10345_v20  ;;  %v10518_v12 = vmul.f32 0.5, %v10283_v33  ;;  %v13120_v47 = vld [vmem:[#allocation85_spill] sm:$0xff] }
 0x6ff   : > { %13119 = vst [vmem:[#allocation91_spill] sm:$0xff] %v10486_v61  ;;  %v3313_v43 = vpack.c.bf16 %v10486_v61, %v10483_v62  ;;  %6876 = vtanh.f32 %v4529_v4  ;;  %v4281_v17 = vmul.f32 %v10418_v31, %v10374_v10  ;;  %v10523_v9 = vmul.f32 0.5, %v10316_v63  ;;  %v3810_v31 = vpop.f32.mrf.mxu0 }
 0x700   : > { %6878 = vtanh.f32 %v4530_v16  ;;  %v4404_v18 = vadd.f32 %v4276_v45, %v10370_v19  ;;  %v4278_v8 = vmul.f32 %v13120_v47, %v10356_v54  ;;  %v4531_v20 = vmul.f32 0.7978846, %v4403_v5  ;;  %v6871_v42 = vpop.eup %6870  ;;  %v3632_v45 = vpop.f32.mrf.mxu3  ;;  %v13122_v47 = vld [vmem:[#allocation75_spill] sm:$0xff] }
 0x701   : > { %3587 = vmatmul.bf16.gmra.mxu2 %v3313_v43  ;;  %3676 = vmatmul.bf16.gmra.mxu3 %v3313_v43  ;;  %6880 = vtanh.f32 %v4525_v53  ;;  %v4408_v33 = vadd.f32 %v4280_v22, %v10386_v15  ;;  %v4282_v49 = vmul.f32 %v10421_v25, %v10377_v2  ;;  %v10532_v41 = vmul.f32 0.5, %v10296_v46 }
 0x702   : > { %3765 = vmatmul.bf16.gmra.mxu1 %v3313_v43  ;;  %3854 = vmatmul.bf16.gmra.mxu0 %v3313_v43  ;;  %6882 = vtanh.f32 %v4526_v55  ;;  %v4535_v63 = vmul.f32 0.7978846, %v4407_v60  ;;  %v4405_v48 = vadd.f32 %v4277_v40, %v10352_v3  ;;  %v6873_v58 = vpop.eup %6872  ;;  %v4779_v51 = vadd.f32 1.0, %v6869_v11  ;;  %v2808_v60 = vpop.xlane.xlu0 %2807 }
 0x703   : > { %v3890_v52 = vmul.f32 0.5, %v10323_v30  ;;  %v10537_v43 = vmul.f32 0.5, %v10360_v38  ;;  %v4409_v37 = vadd.f32 %v4281_v17, %v10374_v10  ;;  %v6875_v34 = vpop.eup %6874  ;;  %v10541_v25 = vmul.f32 0.5, %v10380_v27 }
 0x704   : > { %v10544_v46 = vmul.f32 0.5, %v10370_v19  ;;  %v4532_v13 = vmul.f32 0.7978846, %v4404_v18  ;;  %v4406_v4 = vadd.f32 %v4278_v8, %v10356_v54  ;;  %6884 = vtanh.f32 %v4531_v20 }
 0x705   : > { %v6877_v16 = vpop.eup %6876  ;;  %v10548_v30 = vmul.f32 0.5, %v10386_v15  ;;  %v4536_v38 = vmul.f32 0.7978846, %v4408_v33  ;;  %v4410_v53 = vadd.f32 %v4282_v49, %v10377_v2  ;;  %v4783_v22 = vadd.f32 1.0, %v6871_v42 }
 0x706   : > { %v6879_v5 = vpop.eup %6878  ;;  %6886 = vtanh.f32 %v4535_v63  ;;  %v10552_v27 = vmul.f32 0.5, %v10352_v3  ;;  %v4533_v19 = vmul.f32 0.7978846, %v4405_v48  ;;  %v10555_v40 = vmul.f32 %v4779_v51, %v10498_v44  ;;  %v3723_v63 = vpop.f32.mrf.mxu1  ;;  %v13123_v48 = vld [vmem:[#allocation16_spill] sm:$0xff] }
 0x707   : > { %v6881_v55 = vpop.eup %6880  ;;  %v4780_v11 = vadd.f32 1.0, %v6873_v58  ;;  %v10558_v17 = vmul.f32 0.5, %v10374_v10  ;;  %v4537_v15 = vmul.f32 0.7978846, %v4409_v37  ;;  %v10561_v8 = vadd.f32 %v3721_v0, %v13122_v47  ;;  %v13125_v37 = vld [vmem:[#allocation76_spill] sm:$0xff]  ;;  %v3545_v0 = vpop.f32.mrf.mxu2 }
 0x708   : > { %13121 = vst [vmem:[#allocation85_spill] sm:$0xff] %v10555_v40  ;;  %v6883_v18 = vpop.eup %6882  ;;  %v4784_v20 = vadd.f32 1.0, %v6875_v34  ;;  %6888 = vtanh.f32 %v4532_v13  ;;  %v4534_v33 = vmul.f32 0.7978846, %v4406_v4  ;;  %v4785_v3 = vadd.f32 1.0, %v6877_v16 }
 0x709   : > { %v4786_v49 = vadd.f32 1.0, %v6879_v5  ;;  %6890 = vtanh.f32 %v4536_v38  ;;  %v4538_v42 = vmul.f32 0.7978846, %v4410_v53  ;;  %v2845_v44 = vmul.f32 %v2808_v60, %v13123_v48  ;;  %v13127_v38 = vld [vmem:[#allocation77_spill] sm:$0xff] }
 0x70a   : > { %v10565_v58 = vmul.f32 %v4783_v22, %v10501_v56  ;;  %v4781_v10 = vadd.f32 1.0, %v6881_v55  ;;  %6892 = vtanh.f32 %v4533_v19  ;;  %v6885_v51 = vpop.eup %6884  ;;  %v10568_v14 = vadd.f32 %v3810_v31, %v13125_v37  ;;  %v3812_v56 = vpop.f32.mrf.mxu0 }
 0x70b   : > { %v10571_v34 = vmul.f32 %v4780_v11, %v10504_v26  ;;  %v4782_v13 = vadd.f32 1.0, %v6883_v18  ;;  %6894 = vtanh.f32 %v4537_v15  ;;  %v4029_v16 = vmul.f32 0.044715, %v10561_v8 }
 0x70c   : > { %13124 = vst [vmem:[#allocation16_spill] sm:$0xff] %v10565_v58  ;;  %v6887_v4 = vpop.eup %6886  ;;  %v10575_v53 = vadd.f32 %v3543_v6, %v13127_v38  ;;  %v10578_v5 = vmul.f32 %v4784_v20, %v10515_v29  ;;  %6896 = vtanh.f32 %v4534_v33  ;;  %v10581_v31 = vadd.f32 %v3723_v63, %v13122_v47 }
 0x70d   : > { %13126 = vst [vmem:[#allocation92_spill] sm:$0xff] %v10571_v34  ;;  %v10584_v22 = vmul.f32 %v4785_v3, %v10523_v9  ;;  %v10586_v26 = vmul.f32 %v4786_v49, %v3890_v52  ;;  %6898 = vtanh.f32 %v4538_v42  ;;  %v10589_v55 = vadd.f32 %v3545_v0, %v13127_v38  ;;  %v3634_v9 = vpop.f32.mrf.mxu3  ;;  %v13133_v42 = vld [vmem:[#allocation78_spill] sm:$0xff] }
 0x70e   : > { %13128 = vst [vmem:[#allocation93_spill] sm:$0xff] %v10578_v5  ;;  %v6889_v19 = vpop.eup %6888  ;;  %v10591_v6 = vadd.f32 1e-05, %v2845_v44  ;;  %v10594_v60 = vmul.f32 %v4781_v10, %v10518_v12  ;;  %v4787_v29 = vadd.f32 1.0, %v6885_v51  ;;  %v4030_v15 = vmul.f32 0.044715, %v10568_v14 }
 0x70f   : > { %13129 = vst [vmem:[#allocation94_spill] sm:$0xff] %v10584_v22  ;;  %v6891_v11 = vpop.eup %6890  ;;  %v10598_v18 = vadd.f32 %v3812_v56, %v13125_v37  ;;  %v10601_v52 = vmul.f32 %v4782_v13, %v10532_v41  ;;  %v4791_v20 = vadd.f32 1.0, %v6887_v4  ;;  %v4157_v3 = vmul.f32 %v4029_v16, %v10561_v8  ;;  %v6432_v41 = vld [vmem:[#allocation7 + $0x90] sm:$0xff] }
 0x710   : > { %13130 = vst [vmem:[#allocation95_spill] sm:$0xff] %v10586_v26  ;;  %v6893_v33 = vpop.eup %6892  ;;  %v4027_v49 = vmul.f32 0.044715, %v10575_v53  ;;  %v10606_v12 = vadd.f32 %v3632_v45, %v13133_v42  ;;  %v4033_v10 = vmul.f32 0.044715, %v10581_v31  ;;  %v10619_v45 = vadd.f32 %v3634_v9, %v13133_v42  ;;  %5531 = vmatpush.bf16.msra.mxu1 %v6432_v41 }
 0x711   : > { %13131 = vst [vmem:[#allocation96_spill] sm:$0xff] %v10594_v60  ;;  %v6895_v44 = vpop.eup %6894  ;;  %v4031_v4 = vmul.f32 0.044715, %v10589_v55  ;;  %6900 = vrsqrt.f32 %v10591_v6  ;;  %v10623_v16 = vmul.f32 %v4787_v29, %v10537_v43  ;;  %v4158_v51 = vmul.f32 %v4030_v15, %v10568_v14 }
 0x712   : > { %13132 = vst [vmem:[#allocation97_spill] sm:$0xff] %v10601_v52  ;;  %v6897_v13 = vpop.eup %6896  ;;  %v4034_v63 = vmul.f32 0.044715, %v10598_v18  ;;  %v10628_v0 = vmul.f32 %v4791_v20, %v10541_v25  ;;  %v3894_v39 = vmul.f32 0.5, %v10356_v54  ;;  %v4155_v9 = vmul.f32 %v4027_v49, %v10575_v53  ;;  %v3548_v20 = vpop.f32.mrf.mxu2 }
 0x713   : > { %13134 = vst [vmem:[#allocation98_spill] sm:$0xff] %v10623_v16  ;;  %v6899_v56 = vpop.eup %6898  ;;  %v4028_v21 = vmul.f32 0.044715, %v10606_v12  ;;  %v4788_v61 = vadd.f32 1.0, %v6889_v19  ;;  %v4285_v43 = vmul.f32 %v4157_v3, %v10561_v8  ;;  %v4161_v29 = vmul.f32 %v4033_v10, %v10581_v31 }
 0x714   : > { %13135 = vst [vmem:[#allocation99_spill] sm:$0xff] %v10628_v0  ;;  %v4792_v15 = vadd.f32 1.0, %v6891_v11  ;;  %v4789_v62 = vadd.f32 1.0, %v6893_v33  ;;  %v4793_v52 = vadd.f32 1.0, %v6895_v44  ;;  %v4159_v26 = vmul.f32 %v4031_v4, %v10589_v55 }
 0x715   : > { %v4032_v25 = vmul.f32 0.044715, %v10619_v45  ;;  %v4790_v54 = vadd.f32 1.0, %v6897_v13  ;;  %v4794_v60 = vadd.f32 1.0, %v6899_v56  ;;  %v4162_v49 = vmul.f32 %v4034_v63, %v10598_v18  ;;  %v3726_v13 = vpop.f32.mrf.mxu1  ;;  %v3815_v63 = vpop.f32.mrf.mxu0 }
 0x716   : > { %v3898_v3 = vmul.f32 0.5, %v10377_v2  ;;  %v4286_v10 = vmul.f32 %v4158_v51, %v10568_v14  ;;  %v4156_v11 = vmul.f32 %v4028_v21, %v10606_v12  ;;  %v10646_v33 = vmul.f32 %v4788_v61, %v10544_v46  ;;  %v3637_v46 = vpop.f32.mrf.mxu3 }
 0x717   : > { %v10642_v23 = vpop.eup %6900  ;;  %v4283_v44 = vmul.f32 %v4155_v9, %v10575_v53  ;;  %v4413_v41 = vadd.f32 %v4285_v43, %v10561_v8  ;;  %v10651_v4 = vmul.f32 %v4792_v15, %v10548_v30  ;;  %v10654_v2 = vmul.f32 %v4789_v62, %v10552_v27 }
 0x718   : > { %13136 = vst [vmem:[#allocation100_spill] sm:$0xff] %v10646_v33  ;;  %v10657_v51 = vmul.f32 %v4793_v52, %v10558_v17  ;;  %v4289_v21 = vmul.f32 %v4161_v29, %v10581_v31  ;;  %v4160_v61 = vmul.f32 %v4032_v25, %v10619_v45  ;;  %v10661_v9 = vmul.f32 %v4790_v54, %v3894_v39 }
 0x719   : > { %13137 = vst [vmem:[#allocation101_spill] sm:$0xff] %v10651_v4  ;;  %v10663_v43 = vmul.f32 %v4794_v60, %v3898_v3  ;;  %v4287_v19 = vmul.f32 %v4159_v26, %v10589_v55  ;;  %v3144_v30 = vmul.f32 %v10642_v23, %v10591_v6  ;;  %v4290_v27 = vmul.f32 %v4162_v49, %v10598_v18  ;;  %v6415_v26 = vld [vmem:[#allocation7 + $0x8] sm:$0xff] }
 0x71a   : > { %13138 = vst [vmem:[#allocation102_spill] sm:$0xff] %v10654_v2  ;;  %v4414_v17 = vadd.f32 %v4286_v10, %v10568_v14  ;;  %v10672_v52 = vadd.f32 %v3726_v13, %v13122_v47  ;;  %v4411_v29 = vadd.f32 %v4283_v44, %v10575_v53  ;;  %v4284_v39 = vmul.f32 %v4156_v11, %v10606_v12 }
 0x71b   : > { %13139 = vst [vmem:[#allocation103_spill] sm:$0xff] %v10657_v51  ;;  %v4541_v60 = vmul.f32 0.7978846, %v4413_v41  ;;  %v4417_v49 = vadd.f32 %v4289_v21, %v10581_v31  ;;  %v10684_v3 = vadd.f32 %v3815_v63, %v13125_v37  ;;  %v4415_v11 = vadd.f32 %v4287_v19, %v10589_v55  ;;  %5354 = vmatpush.bf16.msra.mxu2 %v6415_v26 }
 0x71c   : > { %13140 = vst [vmem:[#allocation104_spill] sm:$0xff] %v10661_v9  ;;  %v4288_v44 = vmul.f32 %v4160_v61, %v10619_v45  ;;  %v3145_v41 = vmul.f32 %v10642_v23, %v3144_v30  ;;  %v4418_v13 = vadd.f32 %v4290_v27, %v10598_v18  ;;  %v4037_v21 = vmul.f32 0.044715, %v10672_v52 }
 0x71d   : > { %13141 = vst [vmem:[#allocation105_spill] sm:$0xff] %v10663_v43  ;;  %v4539_v63 = vmul.f32 0.7978846, %v4411_v29  ;;  %v4412_v54 = vadd.f32 %v4284_v39, %v10606_v12  ;;  %v10696_v10 = vadd.f32 %v3548_v20, %v13127_v38  ;;  %v10699_v19 = vadd.f32 %v3637_v46, %v13133_v42  ;;  %v3728_v29 = vpop.f32.mrf.mxu1 }
 0x71e   : > { %v3901_v61 = vmul.f32 0.5, %v10561_v8  ;;  %v4545_v30 = vmul.f32 0.7978846, %v4417_v49  ;;  %v4038_v26 = vmul.f32 0.044715, %v10684_v3  ;;  %v10705_v25 = vmul.f32 0.5, %v10568_v14  ;;  %v3817_v8 = vpop.f32.mrf.mxu0  ;;  %v3639_v49 = vpop.f32.mrf.mxu3 }
 0x71f   : > { %v4543_v27 = vmul.f32 0.7978846, %v4415_v11  ;;  %v3146_v20 = vmul.f32 0.5, %v3145_v41  ;;  %v10711_v46 = vmul.f32 %v4037_v21, %v10672_v52  ;;  %v10714_v9 = vmul.f32 0.5, %v10575_v53 }
 0x720   : > { %v4540_v11 = vmul.f32 0.7978846, %v4412_v54  ;;  %v4035_v14 = vmul.f32 0.044715, %v10696_v10  ;;  %v10721_v41 = vmul.f32 0.5, %v10606_v12  ;;  %vm3150_vm4 = vweird.f32 %v10642_v23 }
 0x721   : > { %v3147_v43 = vsub.f32 1.5, %v3146_v20  ;;  %vm3149_vm6 = vweird.f32 %v10591_v6 }
 0x722   : > { %v4163_v51 = vmul.f32 %v4035_v14, %v10696_v10  ;;  %vm10758_vm7 = vmor %vm3149_vm6, %vm3150_vm4 }
 0x727   : > { %v2810_v56 = vpop.xlane.xlu1 %2809 }
 0x728   : > { %v2846_v62 = vmul.f32 %v2810_v56, %v13123_v48  ;;  %v4542_v56 = vmul.f32 0.7978846, %v4414_v17  ;;  %v4416_v17 = vadd.f32 %v4288_v44, %v10619_v45 }
 0x72a   : > { %v10676_v15 = vadd.f32 1e-05, %v2846_v62  ;;  %v3550_v62 = vpop.f32.mrf.mxu2  ;;  %v4544_v21 = vmul.f32 0.7978846, %v4416_v17  ;;  %v10738_v17 = vadd.f32 %v3728_v29, %v13122_v47 }
 0x72b   : > { %v10708_v39 = vadd.f32 %v3550_v62, %v13127_v38  ;;  %v4036_v62 = vmul.f32 0.044715, %v10699_v19 }
 0x72c   : > { %6902 = vrsqrt.f32 %v10676_v15  ;;  %vm3159_vm8 = vweird.f32 %v10676_v15 }
 0x72d   : > { %6904 = vtanh.f32 %v4541_v60  ;;  %v4546_v60 = vmul.f32 0.7978846, %v4418_v13  ;;  %v4039_v54 = vmul.f32 0.044715, %v10708_v39 }
 0x72e   : > { %6906 = vtanh.f32 %v4542_v56  ;;  %v10724_v56 = vmul.f32 %v4038_v26, %v10684_v3  ;;  %v3906_v26 = vmul.f32 0.5, %v10598_v18 }
 0x72f   : > { %6908 = vtanh.f32 %v4539_v63  ;;  %v10730_v63 = vadd.f32 %v3639_v49, %v13133_v42  ;;  %v4167_v18 = vmul.f32 %v4039_v54, %v10708_v39  ;;  %v4041_v54 = vmul.f32 0.044715, %v10738_v17 }
 0x730   : > { %6910 = vtanh.f32 %v4545_v30  ;;  %v3905_v30 = vmul.f32 0.5, %v10581_v31 }
 0x731   : > { %6912 = vtanh.f32 %v4543_v27  ;;  %v4164_v27 = vmul.f32 %v4036_v62, %v10699_v19  ;;  %v2812_v33 = vpop.xlane.xlu2 %2811  ;;  %v4040_v14 = vmul.f32 0.044715, %v10730_v63  ;;  %v3148_v62 = vmul.f32 %v10642_v23, %v3147_v43 }
 0x732   : > { %v10716_v44 = vpop.eup %6902  ;;  %6914 = vtanh.f32 %v4546_v60  ;;  %v3903_v60 = vmul.f32 0.5, %v10589_v55  ;;  %v4291_v43 = vmul.f32 %v4163_v51, %v10696_v10  ;;  %v3553_v5 = vpop.f32.mrf.mxu2  ;;  %v4169_v24 = vmul.f32 %v4041_v54, %v10738_v17 }
 0x733   : > { %v6905_v13 = vpop.eup %6904  ;;  %v3154_v53 = vmul.f32 %v10716_v44, %v10676_v15  ;;  %6916 = vtanh.f32 %v4540_v11  ;;  %v10742_v11 = vmul.f32 0.5, %v10619_v45  ;;  %vm3160_vm5 = vweird.f32 %v10716_v44  ;;  %v3642_v15 = vpop.f32.mrf.mxu3 }
 0x734   : > { %v6907_v2 = vpop.eup %6906  ;;  %v4797_v49 = vadd.f32 1.0, %v6905_v13  ;;  %6918 = vtanh.f32 %v4544_v21  ;;  %v10749_v13 = vadd.f32 %v3817_v8, %v13125_v37  ;;  %v2847_v45 = vmul.f32 %v2812_v33, %v13123_v48  ;;  %vm3161_vm9 = vmor %vm3159_vm8, %vm3160_vm5 }
 0x735   : > { %v3155_v12 = vmul.f32 %v10716_v44, %v3154_v53  ;;  %v6909_v4 = vpop.eup %6908  ;;  %v3731_v53 = vpop.f32.mrf.mxu1  ;;  %v4292_v33 = vmul.f32 %v4164_v27, %v10699_v19  ;;  %v4168_v34 = vmul.f32 %v4040_v14, %v10730_v63  ;;  %v3152_v6 = vsel %vm10758_vm7, %v10642_v23, %v3148_v62  ;;  %v13145_v62 = vld [vmem:[#allocation68_spill] sm:$0xff] }
 0x736   : > { %v6911_v31 = vpop.eup %6910  ;;  %v10755_v16 = vmul.f32 %v4797_v49, %v3901_v61  ;;  %v4295_v61 = vmul.f32 %v4167_v18, %v10708_v39  ;;  %v10774_v27 = vadd.f32 1e-05, %v2847_v45  ;;  %v4795_v40 = vadd.f32 1.0, %v6909_v4 }
 0x737   : > { %v3156_v20 = vmul.f32 0.5, %v3155_v12  ;;  %v6913_v29 = vpop.eup %6912  ;;  %v3820_v12 = vpop.f32.mrf.mxu0  ;;  %v4798_v22 = vadd.f32 1.0, %v6907_v2  ;;  %v4419_v23 = vadd.f32 %v4291_v43, %v10696_v10  ;;  %v3229_v32 = vmul.f32 %v3152_v6, %v13145_v62 }
 0x738   : > { %v6915_v21 = vpop.eup %6914  ;;  %13142 = vst [vmem:[#allocation106_spill] sm:$0xff] %v10755_v16  ;;  %v4799_v51 = vadd.f32 1.0, %v6913_v29  ;;  %v13146_v29 = vld [vmem:[#allocation71_spill] sm:$0xff]  ;;  %v4420_v7 = vadd.f32 %v4292_v33, %v10699_v19  ;;  %v4296_v4 = vmul.f32 %v4168_v34, %v10730_v63  ;;  %6920 = vrsqrt.f32 %v10774_v27 }
 0x739   : > { %v3157_v55 = vsub.f32 1.5, %v3156_v20  ;;  %v6917_v0 = vpop.eup %6916  ;;  %v4801_v20 = vadd.f32 1.0, %v6911_v31  ;;  %v4802_v14 = vadd.f32 1.0, %v6915_v21  ;;  %v10794_v21 = vmul.f32 %v4795_v40, %v10714_v9 }
 0x73a   : > { %v6919_v49 = vpop.eup %6918  ;;  %v4796_v58 = vadd.f32 1.0, %v6917_v0  ;;  %v10783_v57 = vmul.f32 %v4799_v51, %v3903_v60  ;;  %v10800_v60 = vmul.f32 %v4798_v22, %v10705_v25  ;;  %v4547_v43 = vmul.f32 0.7978846, %v4419_v23 }
 0x73b   : > { %v3158_v8 = vmul.f32 %v10716_v44, %v3157_v55  ;;  %v4042_v55 = vmul.f32 0.044715, %v10749_v13  ;;  %v10779_v18 = vmul.f32 %v4801_v20, %v3905_v30  ;;  %v4800_v2 = vadd.f32 1.0, %v6919_v49  ;;  %13150 = vst [vmem:[#allocation108_spill] sm:$0xff] %v10794_v21  ;;  %v3644_v49 = vpop.f32.mrf.mxu3 }
 0x73c   : > { %13148 = vst [vmem:[#allocation71_spill] sm:$0xff] %v10783_v57  ;;  %v10791_v45 = vmul.f32 %v4802_v14, %v3906_v26  ;;  %v10797_v54 = vmul.f32 %v4796_v58, %v10721_v41  ;;  %v4548_v33 = vmul.f32 0.7978846, %v4420_v7  ;;  %v4424_v58 = vadd.f32 %v4296_v4, %v10730_v63  ;;  %v6414_v57 = vld [vmem:[#allocation7] sm:$0xff] }
 0x73d   : > { %v3162_v31 = vsel %vm3161_vm9, %v10716_v44, %v3158_v8  ;;  %13147 = vst [vmem:[#allocation68_spill] sm:$0xff] %v10779_v18  ;;  %v4423_v44 = vadd.f32 %v4295_v61, %v10708_v39  ;;  %v10788_v0 = vmul.f32 %v4042_v55, %v10749_v13  ;;  %v3733_v30 = vpop.f32.mrf.mxu1  ;;  %v3262_v8 = vmul.f32 %v9305_v59, %v3229_v32  ;;  %v3555_v61 = vpop.f32.mrf.mxu2  ;;  %v6423_v55 = vld [vmem:[#allocation7 + $0x48] sm:$0xff] }
 0x73e   : > { %v3230_v35 = vmul.f32 %v3162_v31, %v13146_v29  ;;  %13149 = vst [vmem:[#allocation107_spill] sm:$0xff] %v10791_v45  ;;  %v4293_v25 = vmul.f32 %v10711_v46, %v10672_v52  ;;  %v10812_v41 = vadd.f32 %v3731_v53, %v13122_v47  ;;  %v10815_v32 = vmul.f32 %v4800_v2, %v10742_v11  ;;  %v10831_v53 = vpop.eup %6920 }
 0x73f   : > { %13151 = vst [vmem:[#allocation109_spill] sm:$0xff] %v10797_v54  ;;  %v3822_v34 = vpop.f32.mrf.mxu0  ;;  %v4551_v9 = vmul.f32 0.7978846, %v4423_v44  ;;  %v10820_v7 = vmul.f32 0.5, %v10696_v10  ;;  %v10823_v6 = vadd.f32 %v3820_v12, %v13125_v37  ;;  %v10826_v51 = vadd.f32 %v3553_v5, %v13127_v38  ;;  %5443 = vmatpush.bf16.msra.mxu3 %v6423_v55  ;;  %5355 = vmatpush.bf16.msra.mxu2 %v6414_v57 }
 0x740   : > { %13152 = vst [vmem:[#allocation110_spill] sm:$0xff] %v10800_v60  ;;  %v3263_v20 = vmul.f32 %v9305_v59, %v3230_v35  ;;  %6922 = vtanh.f32 %v4547_v43  ;;  %v10829_v46 = vmul.f32 0.5, %v10699_v19  ;;  %v10834_v11 = vadd.f32 %v3642_v15, %v13133_v42 }
 0x741   : > { %13153 = vst [vmem:[#allocation111_spill] sm:$0xff] %v10815_v32  ;;  %v10837_v10 = vadd.f32 %v13117_v36, %v3262_v8  ;;  %6924 = vtanh.f32 %v4548_v33  ;;  %v10843_v5 = vadd.f32 %v3733_v30, %v13122_v47  ;;  %v4552_v19 = vmul.f32 0.7978846, %v4424_v58 }
 0x742   : > { %v10840_v12 = vadd.f32 %v13117_v36, %v3263_v20  ;;  %6926 = vtanh.f32 %v4551_v9  ;;  %v4421_v31 = vadd.f32 %v4293_v25, %v10672_v52  ;;  %v4045_v15 = vmul.f32 0.044715, %v10812_v41 }
 0x743   : > { %13154 = vst [vmem:[#allocation112_spill] sm:$0xff] %v10837_v10  ;;  %v10850_v22 = vmul.f32 0.5, %v10672_v52  ;;  %v10853_v23 = vmul.f32 0.5, %v10738_v17  ;;  %v4046_v62 = vmul.f32 0.044715, %v10823_v6  ;;  %v3164_v44 = vmul.f32 %v10831_v53, %v10774_v27  ;;  %v3647_v16 = vpop.f32.mrf.mxu3 }
 0x744   : > { %13155 = vst [vmem:[#allocation113_spill] sm:$0xff] %v10840_v12  ;;  %v3314_v14 = vpack.c.bf16 %v10840_v12, %v10837_v10  ;;  %v4043_v29 = vmul.f32 0.044715, %v10826_v51  ;;  %v4044_v2 = vmul.f32 0.044715, %v10834_v11  ;;  %v10863_v30 = vadd.f32 %v3822_v34, %v13125_v37  ;;  %v6431_v12 = vld [vmem:[#allocation7 + $0x88] sm:$0xff] }
 0x745   : > { %v4297_v52 = vmul.f32 %v4169_v24, %v10738_v17  ;;  %v10867_v43 = vmul.f32 0.5, %v10684_v3  ;;  %v4049_v20 = vmul.f32 0.044715, %v10843_v5  ;;  %v3736_v33 = vpop.f32.mrf.mxu1  ;;  %6928 = vtanh.f32 %v4552_v19  ;;  %v6439_v10 = vld [vmem:[#allocation7 + $0xc8] sm:$0xff]  ;;  %v3558_v45 = vpop.f32.mrf.mxu2  ;;  %5532 = vmatpush.bf16.msra.mxu1 %v6431_v12 }
 0x746   : > { %3592 = vmatmul.bf16.gmra.mxu2 %v3314_v14  ;;  %3681 = vmatmul.bf16.gmra.mxu3 %v3314_v14  ;;  %v6923_v8 = vpop.eup %6922  ;;  %v4549_v9 = vmul.f32 0.7978846, %v4421_v31  ;;  %v10871_v58 = vmul.f32 0.5, %v10749_v13  ;;  %v10874_v25 = vmul.f32 %v4045_v15, %v10812_v41  ;;  %v10877_v24 = vadd.f32 %v3555_v61, %v13127_v38  ;;  %v2814_v61 = vpop.xlane.xlu0 %2813 }
 0x747   : > { %3770 = vmatmul.bf16.gmra.mxu1 %v3314_v14  ;;  %3859 = vmatmul.bf16.gmra.mxu0 %v3314_v14  ;;  %v6925_v34 = vpop.eup %6924  ;;  %v3825_v55 = vpop.f32.mrf.mxu0  ;;  %v3911_v35 = vmul.f32 0.5, %v10708_v39  ;;  %v10881_v26 = vmul.f32 0.5, %v10730_v63  ;;  %v10884_v19 = vmul.f32 %v4046_v62, %v10823_v6  ;;  %v10887_v31 = vmul.f32 %v4043_v29, %v10826_v51 }
 0x748   : > { %v6927_v4 = vpop.eup %6926  ;;  %v10890_v14 = vadd.f32 %v3644_v49, %v13133_v42  ;;  %v3165_v15 = vmul.f32 %v10831_v53, %v3164_v44  ;;  %v10894_v40 = vmul.f32 %v4044_v2, %v10834_v11  ;;  %v4050_v39 = vmul.f32 0.044715, %v10863_v30  ;;  %5621 = vmatpush.bf16.msra.mxu0 %v6439_v10 }
 0x749   : > { %v2848_v63 = vmul.f32 %v2814_v61, %v13123_v48  ;;  %v4425_v62 = vadd.f32 %v4297_v52, %v10738_v17  ;;  %v10900_v29 = vmul.f32 %v4049_v20, %v10843_v5  ;;  %v10903_v49 = vadd.f32 %v3736_v33, %v13122_v47  ;;  %v2816_v21 = vpop.xlane.xlu1 %2815 }
 0x74a   : > { %v10906_v44 = vadd.f32 %v3825_v55, %v13125_v37  ;;  %v4803_v60 = vadd.f32 1.0, %v6923_v8  ;;  %v4047_v2 = vmul.f32 0.044715, %v10877_v24  ;;  %v4807_v61 = vadd.f32 1.0, %v6927_v4 }
 0x74b   : > { %v10909_v18 = vadd.f32 1e-05, %v2848_v63  ;;  %v4804_v17 = vadd.f32 1.0, %v6925_v34  ;;  %v6929_v52 = vpop.eup %6928  ;;  %v4048_v20 = vmul.f32 0.044715, %v10890_v14  ;;  %v3166_v54 = vmul.f32 0.5, %v3165_v15 }
 0x74c   : > { %6930 = vtanh.f32 %v4549_v9  ;;  %v4294_v33 = vmul.f32 %v10724_v56, %v10684_v3  ;;  %v10915_v8 = vmul.f32 %v4050_v39, %v10863_v30  ;;  %v4553_v55 = vmul.f32 0.7978846, %v4425_v62 }
 0x74d   : > { %6932 = vrsqrt.f32 %v10909_v18  ;;  %v4298_v12 = vmul.f32 %v10788_v0, %v10749_v13  ;;  %v4053_v10 = vmul.f32 0.044715, %v10903_v49  ;;  %v4054_v4 = vmul.f32 0.044715, %v10906_v44  ;;  %v3738_v32 = vpop.f32.mrf.mxu1 }
 0x74e   : > { %v10923_v34 = vadd.f32 %v3558_v45, %v13127_v38  ;;  %v10926_v9 = vadd.f32 %v3647_v16, %v13133_v42  ;;  %v10929_v56 = vmul.f32 %v4803_v60, %v10820_v7  ;;  %v10931_v15 = vmul.f32 %v4807_v61, %v3911_v35  ;;  %v6422_v16 = vld [vmem:[#allocation7 + $0x40] sm:$0xff] }
 0x74f   : > { %v4808_v39 = vadd.f32 1.0, %v6929_v52  ;;  %v10934_v63 = vmul.f32 %v4804_v17, %v10829_v46  ;;  %v4175_v0 = vmul.f32 %v4047_v2, %v10877_v24  ;;  %v10938_v62 = vmul.f32 %v4048_v20, %v10890_v14  ;;  %5444 = vmatpush.bf16.msra.mxu3 %v6422_v16 }
 0x750   : > { %13156 = vst [vmem:[#allocation114_spill] sm:$0xff] %v10929_v56  ;;  %v3167_v45 = vsub.f32 1.5, %v3166_v54  ;;  %v4422_v28 = vadd.f32 %v4294_v33, %v10684_v3  ;;  %v2849_v60 = vmul.f32 %v2816_v21, %v13123_v48  ;;  %6934 = vtanh.f32 %v4553_v55  ;;  %v3827_v3 = vpop.f32.mrf.mxu0 }
 0x751   : > { %13157 = vst [vmem:[#allocation115_spill] sm:$0xff] %v10931_v15  ;;  %v4426_v35 = vadd.f32 %v4298_v12, %v10749_v13  ;;  %v10944_v7 = vmul.f32 0.5, %v10826_v51  ;;  %v10947_v2 = vmul.f32 %v4053_v10, %v10903_v49  ;;  %v10950_v61 = vmul.f32 %v4054_v4, %v10906_v44  ;;  %v6438_v4 = vld [vmem:[#allocation7 + $0xc0] sm:$0xff] }
 0x752   : > { %13158 = vst [vmem:[#allocation116_spill] sm:$0xff] %v10934_v63  ;;  %v6931_v46 = vpop.eup %6930  ;;  %v4051_v54 = vmul.f32 0.044715, %v10923_v34  ;;  %v4052_v17 = vmul.f32 0.044715, %v10926_v9  ;;  %v10957_v13 = vadd.f32 %v3738_v32, %v13122_v47  ;;  %v10964_v33 = vmul.f32 %v4808_v39, %v10881_v26  ;;  %v6430_v32 = vld [vmem:[#allocation7 + $0x80] sm:$0xff]  ;;  %5622 = vmatpush.bf16.msra.mxu0 %v6438_v4 }
 0x753   : > { %v10954_v21 = vpop.eup %6932  ;;  %v10959_v52 = vadd.f32 1e-05, %v2849_v60  ;;  %v3168_v55 = vmul.f32 %v10831_v53, %v3167_v45  ;;  %vm3170_vm11 = vweird.f32 %v10831_v53  ;;  %v4550_v12 = vmul.f32 0.7978846, %v4422_v28  ;;  %5533 = vmatpush.bf16.msra.mxu1 %v6430_v32 }
 0x754   : > { %13159 = vst [vmem:[#allocation117_spill] sm:$0xff] %v10964_v33  ;;  %v3174_v57 = vmul.f32 %v10954_v21, %v10909_v18  ;;  %v10971_v10 = vadd.f32 %v3827_v3, %v13125_v37  ;;  %v4805_v16 = vadd.f32 1.0, %v6931_v46  ;;  %v4554_v60 = vmul.f32 0.7978846, %v4426_v35 }
 0x755   : > { %6936 = vrsqrt.f32 %v10959_v52  ;;  %v10975_v26 = vmul.f32 %v4051_v54, %v10923_v34  ;;  %v10978_v39 = vmul.f32 %v4052_v17, %v10926_v9  ;;  %vm3169_vm10 = vweird.f32 %v10774_v27  ;;  %v3560_v17 = vpop.f32.mrf.mxu2 }
 0x756   : > { %v3175_v45 = vmul.f32 %v10954_v21, %v3174_v57  ;;  %v6935_v28 = vpop.eup %6934  ;;  %vm10982_vm12 = vmor %vm3169_vm10, %vm3170_vm11  ;;  %v2818_v20 = vpop.xlane.xlu2 %2817  ;;  %v10989_v46 = vmul.f32 0.5, %v10877_v24  ;;  %v4299_v54 = vmul.f32 %v10887_v31, %v10826_v51  ;;  %v4303_v27 = vmul.f32 %v4175_v0, %v10877_v24 }
 0x757   : > { %v3172_v57 = vsel %vm10982_vm12, %v10831_v53, %v3168_v55  ;;  %v2850_v32 = vmul.f32 %v2818_v20, %v13123_v48  ;;  %6938 = vtanh.f32 %v4550_v12  ;;  %v4057_v4 = vmul.f32 0.044715, %v10957_v13  ;;  %v3649_v31 = vpop.f32.mrf.mxu3  ;;  %v13162_v20 = vld [vmem:[#allocation72_spill] sm:$0xff] }
 0x758   : > { %v3176_v56 = vmul.f32 0.5, %v3175_v45  ;;  %v4058_v35 = vmul.f32 0.044715, %v10971_v10  ;;  %v11001_v63 = vmul.f32 %v4805_v16, %v10850_v22  ;;  %6940 = vtanh.f32 %v4554_v60 }
 0x759   : > { %vm3180_vm13 = vweird.f32 %v10954_v21  ;;  %v11004_v0 = vadd.f32 1e-05, %v2850_v32  ;;  %v4809_v3 = vadd.f32 1.0, %v6935_v28  ;;  %v11009_v48 = vadd.f32 %v3560_v17, %v13127_v38 }
 0x75a   : > { %v3177_v33 = vsub.f32 1.5, %v3176_v56  ;;  %v3231_v55 = vmul.f32 %v3172_v57, %v13162_v20  ;;  %v4427_v12 = vadd.f32 %v4299_v54, %v10826_v51  ;;  %v4431_v22 = vadd.f32 %v4303_v27, %v10877_v24 }
 0x75b   : > { %v11006_v53 = vpop.eup %6936  ;;  %vm3179_vm14 = vweird.f32 %v10909_v18  ;;  %6942 = vrsqrt.f32 %v11004_v0  ;;  %v11020_v60 = vmul.f32 %v4057_v4, %v10957_v13  ;;  %v11023_v45 = vadd.f32 %v3649_v31, %v13133_v42  ;;  %v13163_v4 = vld [vmem:[#allocation79_spill] sm:$0xff] }
 0x75c   : > { %v3178_v16 = vmul.f32 %v10954_v21, %v3177_v33  ;;  %v3184_v56 = vmul.f32 %v11006_v53, %v10959_v52  ;;  %vm3181_vm15 = vmor %vm3179_vm14, %vm3180_vm13  ;;  %v11026_v51 = vmul.f32 0.5, %v10834_v11  ;;  %v4300_v24 = vmul.f32 %v10894_v40, %v10834_v11 }
 0x75d   : > { %v6939_v33 = vpop.eup %6938  ;;  %v11033_v54 = vmul.f32 %v4809_v3, %v10853_v23  ;;  %v4304_v27 = vmul.f32 %v10938_v62, %v10890_v14  ;;  %v11038_v57 = vmul.f32 %v4058_v35, %v10971_v10  ;;  %v3264_v32 = vmul.f32 %v9305_v59, %v3231_v55 }
 0x75e   : > { %v3182_v18 = vsel %vm3181_vm15, %v10954_v21, %v3178_v16  ;;  %v3185_v28 = vmul.f32 %v11006_v53, %v3184_v56  ;;  %v6941_v17 = vpop.eup %6940  ;;  %v4555_v40 = vmul.f32 0.7978846, %v4427_v12  ;;  %v4055_v20 = vmul.f32 0.044715, %v11009_v48 }
 0x75f   : > { %v3232_v31 = vmul.f32 %v3182_v18, %v13163_v4  ;;  %v4559_v16 = vmul.f32 0.7978846, %v4431_v22  ;;  %v11044_v56 = vmul.f32 0.5, %v10890_v14  ;;  %v4056_v23 = vmul.f32 0.044715, %v11023_v45 }
 0x760   : > { %v3186_v21 = vmul.f32 0.5, %v3185_v28  ;;  %v4428_v3 = vadd.f32 %v4300_v24, %v10834_v11  ;;  %v4301_v35 = vmul.f32 %v10874_v25, %v10812_v41  ;;  %v4806_v18 = vadd.f32 1.0, %v6939_v33  ;;  %v11063_v24 = vpop.f32.mrf.mxu1  ;;  %v11065_v33 = vpop.f32.mrf.mxu0 }
 0x761   : > { %v3265_v62 = vmul.f32 %v9305_v59, %v3232_v31  ;;  %v6943_v55 = vpop.eup %6942  ;;  %v4432_v22 = vadd.f32 %v4304_v27, %v10890_v14  ;;  %v11056_v4 = vadd.f32 %v13117_v36, %v3264_v32  ;;  %6944 = vtanh.f32 %v4555_v40 }
 0x762   : > { %v3187_v15 = vsub.f32 1.5, %v3186_v21  ;;  %v3194_v28 = vmul.f32 %v6943_v55, %v11004_v0  ;;  %vm3190_vm0 = vweird.f32 %v11006_v53  ;;  %v4810_v25 = vadd.f32 1.0, %v6941_v17 }
 0x763   : > { %13164 = vst [vmem:[#allocation72_spill] sm:$0xff] %v11056_v4  ;;  %v11059_v31 = vadd.f32 %v13117_v36, %v3265_v62  ;;  %6946 = vtanh.f32 %v4559_v16  ;;  %v4556_v32 = vmul.f32 0.7978846, %v4428_v3  ;;  %v4305_v21 = vmul.f32 %v10900_v29, %v10843_v5 }
 0x764   : > { %v3188_v11 = vmul.f32 %v11006_v53, %v3187_v15  ;;  %v3195_v14 = vmul.f32 %v6943_v55, %v3194_v28  ;;  %vm3189_vm1 = vweird.f32 %v10959_v52  ;;  %v4560_v40 = vmul.f32 0.7978846, %v4432_v22 }
 0x765   : > { %13165 = vst [vmem:[#allocation79_spill] sm:$0xff] %v11059_v31  ;;  %v3315_v27 = vpack.c.bf16 %v11059_v31, %v11056_v4  ;;  %v4429_v15 = vadd.f32 %v4301_v35, %v10812_v41  ;;  %v4302_v17 = vmul.f32 %v10884_v19, %v10823_v6  ;;  %v4183_v16 = vmul.f32 %v4055_v20, %v11009_v48  ;;  %vm11079_vm2 = vmor %vm3189_vm1, %vm3190_vm0 }
 0x766   : > { %v4184_v62 = vmul.f32 %v4056_v23, %v11023_v45  ;;  %v3196_v3 = vmul.f32 0.5, %v3195_v14  ;;  %v11084_v29 = vmul.f32 %v4806_v18, %v10867_v43  ;;  %v3192_v19 = vsel %vm11079_vm2, %v11006_v53, %v3188_v11  ;;  %v3563_v14 = vpop.f32.mrf.mxu2  ;;  %v3652_v53 = vpop.f32.mrf.mxu3 }
 0x767   : > { %3597 = vmatmul.bf16.gmra.mxu2 %v3315_v27  ;;  %3686 = vmatmul.bf16.gmra.mxu3 %v3315_v27  ;;  %v11090_v52 = vmul.f32 %v4810_v25, %v10871_v58  ;;  %v11093_v20 = vmul.f32 0.5, %v10812_v41  ;;  %v4306_v23 = vmul.f32 %v10915_v8, %v10863_v30  ;;  %v6945_v35 = vpop.eup %6944  ;;  %vm3200_vm3 = vweird.f32 %v6943_v55  ;;  %v13170_v25 = vld [vmem:[#allocation80_spill] sm:$0xff] }
 0x768   : > { %13168 = vst [vmem:[#allocation118_spill] sm:$0xff] %v11084_v29  ;;  %3775 = vmatmul.bf16.gmra.mxu1 %v3315_v27  ;;  %3864 = vmatmul.bf16.gmra.mxu0 %v3315_v27  ;;  %v3197_v22 = vsub.f32 1.5, %v3196_v3  ;;  %6948 = vtanh.f32 %v4556_v32  ;;  %v4433_v43 = vadd.f32 %v4305_v21, %v10843_v5  ;;  %v11099_v11 = vmul.f32 0.5, %v10843_v5  ;;  %v3743_v31 = vpop.f32.mrf.mxu1  ;;  %v13186_v29 = vld [vmem:[#allocation90_spill] sm:$0xff] }
 0x769   : > { %13169 = vst [vmem:[#allocation119_spill] sm:$0xff] %v11090_v52  ;;  %v6947_v18 = vpop.eup %6946  ;;  %6950 = vtanh.f32 %v4560_v40  ;;  %v4557_v58 = vmul.f32 0.7978846, %v4429_v15  ;;  %v4430_v41 = vadd.f32 %v4302_v17, %v10823_v6  ;;  %v3233_v27 = vmul.f32 %v3192_v19, %v13170_v25  ;;  %v13171_v19 = vld [vmem:[#allocation81_spill] sm:$0xff] }
 0x76a   : > { %v3198_v28 = vmul.f32 %v6943_v55, %v3197_v22  ;;  %vm3199_vm4 = vweird.f32 %v11004_v0  ;;  %v4307_v8 = vmul.f32 %v10975_v26, %v10923_v34  ;;  %v11107_v32 = vmul.f32 0.5, %v10823_v6 }
 0x76b   : > { %vm3201_vm5 = vmor %vm3199_vm4, %vm3200_vm3  ;;  %v11110_v21 = vmul.f32 0.5, %v10863_v30  ;;  %v4434_v5 = vadd.f32 %v4306_v23, %v10863_v30  ;;  %v4311_v40 = vmul.f32 %v4183_v16, %v11009_v48  ;;  %v4811_v3 = vadd.f32 1.0, %v6945_v35  ;;  %v3832_v30 = vpop.f32.mrf.mxu0 }
 0x76c   : > { %v3202_v15 = vsel %vm3201_vm5, %v6943_v55, %v3198_v28  ;;  %v4561_v0 = vmul.f32 0.7978846, %v4433_v43  ;;  %v4815_v26 = vadd.f32 1.0, %v6947_v18  ;;  %v11118_v25 = vmul.f32 0.5, %v10923_v34 }
 0x76d   : > { %v3234_v22 = vmul.f32 %v3202_v15, %v13171_v19  ;;  %v11121_v6 = vmul.f32 0.5, %v11009_v48  ;;  %v3266_v16 = vmul.f32 %v9305_v59, %v3233_v27  ;;  %6952 = vtanh.f32 %v4557_v58 }
 0x76e   : > { %v6949_v12 = vpop.eup %6948  ;;  %v4558_v55 = vmul.f32 0.7978846, %v4430_v41  ;;  %v4435_v23 = vadd.f32 %v4307_v8, %v10923_v34  ;;  %v4562_v28 = vmul.f32 0.7978846, %v4434_v5  ;;  %v4439_v18 = vadd.f32 %v4311_v40, %v11009_v48  ;;  %v3654_v40 = vpop.f32.mrf.mxu3 }
 0x76f   : > { %v6951_v35 = vpop.eup %6950  ;;  %v3267_v43 = vmul.f32 %v9305_v59, %v3234_v22  ;;  %v11128_v15 = vmul.f32 0.5, %v10926_v9  ;;  %v11131_v19 = vmul.f32 %v4811_v3, %v10944_v7  ;;  %6954 = vtanh.f32 %v4561_v0 }
 0x770   : > { %v11134_v17 = vmul.f32 0.5, %v11023_v45  ;;  %v4308_v58 = vmul.f32 %v10978_v39, %v10926_v9  ;;  %v11142_v59 = vmul.f32 %v4815_v26, %v10989_v46  ;;  %v4812_v48 = vadd.f32 1.0, %v6949_v12  ;;  %v3565_v39 = vpop.f32.mrf.mxu2 }
 0x771   : > { %13172 = vst [vmem:[#allocation80_spill] sm:$0xff] %v11131_v19  ;;  %v11139_v34 = vadd.f32 %v13117_v36, %v3267_v43  ;;  %v4312_v41 = vmul.f32 %v4184_v62, %v11023_v45  ;;  %v11146_v27 = vadd.f32 %v13117_v36, %v3266_v16  ;;  %v4816_v7 = vadd.f32 1.0, %v6951_v35 }
 0x772   : > { %13174 = vst [vmem:[#allocation120_spill] sm:$0xff] %v11142_v59  ;;  %6956 = vtanh.f32 %v4558_v55  ;;  %v4563_v8 = vmul.f32 0.7978846, %v4435_v23  ;;  %v11150_v5 = vadd.f32 %v11063_v24, %v13122_v47  ;;  %v4567_v3 = vmul.f32 0.7978846, %v4439_v18  ;;  %v11173_v23 = vpop.f32.mrf.mxu1 }
 0x773   : > { %13173 = vst [vmem:[#allocation81_spill] sm:$0xff] %v11139_v34  ;;  %6958 = vtanh.f32 %v4562_v28  ;;  %v4313_v46 = vmul.f32 %v11020_v60, %v10957_v13  ;;  %v6953_v12 = vpop.eup %6952  ;;  %v11155_v62 = vadd.f32 %v3563_v14, %v13127_v38  ;;  %v3316_v36 = vpack.c.bf16 %v11139_v34, %v11146_v27 }
 0x774   : > { %13175 = vst [vmem:[#allocation121_spill] sm:$0xff] %v11146_v27  ;;  %v4436_v0 = vadd.f32 %v4308_v58, %v10926_v9  ;;  %v4314_v24 = vmul.f32 %v11038_v57, %v10971_v10  ;;  %v11163_v22 = vadd.f32 %v3743_v31, %v13122_v47  ;;  %v4440_v60 = vadd.f32 %v4312_v41, %v11023_v45  ;;  %v11175_v9 = vpop.f32.mrf.mxu0 }
 0x775   : > { %v4309_v14 = vmul.f32 %v10947_v2, %v10903_v49  ;;  %v6955_v16 = vpop.eup %6954  ;;  %v11171_v55 = vadd.f32 %v3652_v53, %v13133_v42  ;;  %v11178_v57 = vmul.f32 %v4812_v48, %v11026_v51  ;;  %6960 = vtanh.f32 %v4563_v8 }
 0x776   : > { %v4310_v45 = vmul.f32 %v10950_v61, %v10906_v44  ;;  %v4061_v31 = vmul.f32 0.044715, %v11150_v5  ;;  %v11184_v2 = vadd.f32 %v3832_v30, %v13125_v37  ;;  %v11187_v53 = vmul.f32 %v4816_v7, %v11044_v56 }
 0x777   : > { %3602 = vmatmul.bf16.gmra.mxu2 %v3316_v36  ;;  %3691 = vmatmul.bf16.gmra.mxu3 %v3316_v36  ;;  %13176 = vst [vmem:[#allocation122_spill] sm:$0xff] %v11178_v57  ;;  %v4441_v35 = vadd.f32 %v4313_v46, %v10957_v13  ;;  %v11192_v51 = vadd.f32 %v11065_v33, %v13125_v37  ;;  %v4059_v28 = vmul.f32 0.044715, %v11155_v62  ;;  %v4564_v61 = vmul.f32 0.7978846, %v4436_v0 }
 0x778   : > { %3780 = vmatmul.bf16.gmra.mxu1 %v3316_v36  ;;  %3869 = vmatmul.bf16.gmra.mxu0 %v3316_v36  ;;  %13177 = vst [vmem:[#allocation123_spill] sm:$0xff] %v11187_v53  ;;  %v6957_v43 = vpop.eup %6956  ;;  %v4442_v18 = vadd.f32 %v4314_v24, %v10971_v10  ;;  %v4065_v30 = vmul.f32 0.044715, %v11163_v22  ;;  %v4813_v48 = vadd.f32 1.0, %v6953_v12  ;;  %v4568_v41 = vmul.f32 0.7978846, %v4440_v60  ;;  %v11205_v0 = vpop.f32.mrf.mxu2 }
 0x779   : > { %v6959_v58 = vpop.eup %6958  ;;  %v4437_v56 = vadd.f32 %v4309_v14, %v10903_v49  ;;  %v4060_v7 = vmul.f32 0.044715, %v11171_v55  ;;  %v11200_v8 = vadd.f32 %v3565_v39, %v13127_v38  ;;  %6962 = vtanh.f32 %v4567_v3  ;;  %v11207_v24 = vpop.f32.mrf.mxu3 }
 0x77a   : > { %v4438_v33 = vadd.f32 %v4310_v45, %v10906_v44  ;;  %v4189_v46 = vmul.f32 %v4061_v31, %v11150_v5  ;;  %v4066_v36 = vmul.f32 0.044715, %v11184_v2  ;;  %v11210_v12 = vmul.f32 0.5, %v10903_v49 }
 0x77b   : > { %v4569_v60 = vmul.f32 0.7978846, %v4441_v35  ;;  %v6961_v14 = vpop.eup %6960  ;;  %v4062_v26 = vmul.f32 0.044715, %v11192_v51  ;;  %v4187_v39 = vmul.f32 %v4059_v28, %v11155_v62  ;;  %6964 = vtanh.f32 %v4564_v61 }
 0x77c   : > { %v4570_v3 = vmul.f32 0.7978846, %v4442_v18  ;;  %v4193_v45 = vmul.f32 %v4065_v30, %v11163_v22  ;;  %6966 = vtanh.f32 %v4568_v41  ;;  %v11216_v31 = vmul.f32 0.5, %v10957_v13  ;;  %v11226_v13 = vpop.f32.mrf.mxu1  ;;  %v11228_v41 = vpop.f32.mrf.mxu0 }
 0x77d   : > { %v4565_v34 = vmul.f32 0.7978846, %v4437_v56  ;;  %v4188_v27 = vmul.f32 %v4060_v7, %v11171_v55  ;;  %v4063_v49 = vmul.f32 0.044715, %v11200_v8  ;;  %v11221_v35 = vadd.f32 %v3654_v40, %v13133_v42 }
 0x77e   : > { %v4566_v4 = vmul.f32 0.7978846, %v4438_v33  ;;  %v4194_v19 = vmul.f32 %v4066_v36, %v11184_v2  ;;  %v4817_v28 = vadd.f32 1.0, %v6955_v16  ;;  %6968 = vtanh.f32 %v4569_v60 }
 0x77f   : > { %v4317_v61 = vmul.f32 %v4189_v46, %v11150_v5  ;;  %v6963_v18 = vpop.eup %6962  ;;  %v4190_v30 = vmul.f32 %v4062_v26, %v11192_v51  ;;  %v4818_v56 = vadd.f32 1.0, %v6959_v58  ;;  %6970 = vtanh.f32 %v4570_v3 }
 0x780   : > { %v4315_v7 = vmul.f32 %v4187_v39, %v11155_v62  ;;  %v4814_v33 = vadd.f32 1.0, %v6957_v43  ;;  %6972 = vtanh.f32 %v4565_v34  ;;  %v4321_v16 = vmul.f32 %v4193_v45, %v11163_v22  ;;  %v3570_v40 = vpop.f32.mrf.mxu2 }
 0x781   : > { %v6965_v36 = vpop.eup %6964  ;;  %v4191_v46 = vmul.f32 %v4063_v49, %v11200_v8  ;;  %v4064_v26 = vmul.f32 0.044715, %v11221_v35  ;;  %6974 = vtanh.f32 %v4566_v4  ;;  %v4316_v60 = vmul.f32 %v4188_v27, %v11171_v55  ;;  %v11250_v57 = vpop.f32.mrf.mxu3 }
 0x782   : > { %v6967_v59 = vpop.eup %6966  ;;  %v11238_v58 = vmul.f32 %v4817_v28, %v11099_v11  ;;  %v4819_v39 = vadd.f32 1.0, %v6961_v14  ;;  %v4445_v3 = vadd.f32 %v4317_v61, %v11150_v5  ;;  %v4322_v43 = vmul.f32 %v4194_v19, %v11184_v2  ;;  %v13179_v61 = vld [vmem:[#allocation87_spill] sm:$0xff] }
 0x783   : > { %v11243_v34 = vmul.f32 %v4813_v48, %v11093_v20  ;;  %v11246_v45 = vmul.f32 %v4818_v56, %v11110_v21  ;;  %v4443_v49 = vadd.f32 %v4315_v7, %v11155_v62  ;;  %v4318_v4 = vmul.f32 %v4190_v30, %v11192_v51  ;;  %v13180_v30 = vld [vmem:[#allocation86_spill] sm:$0xff] }
 0x784   : > { %v6969_v27 = vpop.eup %6968  ;;  %v11253_v11 = vmul.f32 %v4814_v33, %v11107_v32  ;;  %v4823_v14 = vadd.f32 1.0, %v6963_v18  ;;  %v3926_v19 = vmul.f32 0.5, %v10906_v44  ;;  %v4449_v20 = vadd.f32 %v4321_v16, %v11163_v22  ;;  %v13182_v33 = vld [vmem:[#allocation89_spill] sm:$0xff]  ;;  %v13183_v16 = vld [vmem:[#allocation88_spill] sm:$0xff] }
 0x785   : > { %v6971_v48 = vpop.eup %6970  ;;  %v4192_v21 = vmul.f32 %v4064_v26, %v11221_v35  ;;  %v13178_v28 = vpack.c.bf16 %v10434_v50, %v10431_v1  ;;  %v13181_v56 = vpack.c.bf16 %v13179_v61, %v13180_v30  ;;  %v3930_v7 = vmul.f32 0.5, %v10971_v10  ;;  %v13185_v26 = vld [vmem:[#allocation84_spill] sm:$0xff] }
 0x786   : > { %v4319_v32 = vmul.f32 %v4191_v46, %v11200_v8  ;;  %v4444_v18 = vadd.f32 %v4316_v60, %v11171_v55  ;;  %v6973_v44 = vpop.eup %6972  ;;  %v13184_v53 = vpack.c.bf16 %v13182_v33, %v13183_v16  ;;  %v13187_v52 = vpack.c.bf16 %v13185_v26, %v13186_v29  ;;  %v11285_v16 = vpop.f32.mrf.mxu1  ;;  %v13201_v60 = vld [vmem:[#allocation94_spill] sm:$0xff] }
 0x787   : > { %5356 = vmatmul.bf16.vlgmr.msra.gmra.mxu2 %v13178_v28  ;;  %5445 = vmatmul.bf16.vlgmr.msra.gmra.mxu3 %v13181_v56  ;;  %v11276_v50 = vmul.f32 %v4819_v39, %v11118_v25  ;;  %v4573_v10 = vmul.f32 0.7978846, %v4445_v3  ;;  %v4450_v46 = vadd.f32 %v4322_v43, %v11184_v2  ;;  %v6975_v28 = vpop.eup %6974  ;;  %v4824_v61 = vadd.f32 1.0, %v6967_v59  ;;  %v11287_v25 = vpop.f32.mrf.mxu0 }
 0x788   : > { %5534 = vmatmul.bf16.vlgmr.msra.gmra.mxu1 %v13184_v53  ;;  %5623 = vmatmul.bf16.vlgmr.msra.gmra.mxu0 %v13187_v52  ;;  %v4571_v30 = vmul.f32 0.7978846, %v4443_v49  ;;  %v4446_v53 = vadd.f32 %v4318_v4, %v11192_v51  ;;  %v11283_v29 = vmul.f32 %v4823_v14, %v11121_v6  ;;  %v4825_v52 = vadd.f32 1.0, %v6969_v27 }
 0x789   : > { %13188 = vst [vmem:[#allocation87_spill] sm:$0xff] %v11276_v50  ;;  %v4826_v56 = vadd.f32 1.0, %v6971_v48  ;;  %v4577_v33 = vmul.f32 0.7978846, %v4449_v20  ;;  %v4820_v39 = vadd.f32 1.0, %v6965_v36  ;;  %v4447_v3 = vadd.f32 %v4319_v32, %v11200_v8  ;;  %v11312_v32 = vpop.f32.mrf.mxu2 }
 0x78a   : > { %v4320_v43 = vmul.f32 %v4192_v21, %v11221_v35  ;;  %v4572_v26 = vmul.f32 0.7978846, %v4444_v18  ;;  %v4821_v59 = vadd.f32 1.0, %v6973_v44  ;;  %v4822_v49 = vadd.f32 1.0, %v6975_v28  ;;  %v11314_v18 = vpop.f32.mrf.mxu3 }
 0x78b   : > { %6976 = vtanh.f32 %v4573_v10  ;;  %v4578_v4 = vmul.f32 0.7978846, %v4450_v46  ;;  %v11293_v6 = vadd.f32 %v11173_v23, %v13122_v47  ;;  %v11296_v27 = vmul.f32 %v4824_v61, %v11134_v17 }
 0x78c   : > { %6978 = vtanh.f32 %v4571_v30  ;;  %v4574_v14 = vmul.f32 0.7978846, %v4446_v53  ;;  %v11300_v36 = vadd.f32 %v11205_v0, %v13127_v38  ;;  %v11303_v20 = vmul.f32 %v4825_v52, %v11216_v31 }
 0x78d   : > { %13189 = vst [vmem:[#allocation86_spill] sm:$0xff] %v11296_v27  ;;  %v11305_v48 = vmul.f32 %v4826_v56, %v3930_v7  ;;  %6980 = vtanh.f32 %v4577_v33  ;;  %v11309_v21 = vadd.f32 %v11207_v24, %v13133_v42  ;;  %v4575_v23 = vmul.f32 0.7978846, %v4447_v3 }
 0x78e   : > { %13190 = vst [vmem:[#allocation89_spill] sm:$0xff] %v11303_v20  ;;  %v4448_v17 = vadd.f32 %v4320_v43, %v11221_v35  ;;  %6982 = vtanh.f32 %v4572_v26  ;;  %v11317_v0 = vmul.f32 %v4820_v39, %v11128_v15  ;;  %v11320_v31 = vmul.f32 %v4821_v59, %v11210_v12  ;;  %v13196_v12 = vld [vmem:[#allocation85_spill] sm:$0xff] }
 0x78f   : > { %13191 = vst [vmem:[#allocation88_spill] sm:$0xff] %v11305_v48  ;;  %v11322_v7 = vmul.f32 %v4822_v49, %v3926_v19  ;;  %6984 = vtanh.f32 %v4578_v4  ;;  %v4069_v24 = vmul.f32 0.044715, %v11293_v6  ;;  %v11326_v44 = vadd.f32 %v3570_v40, %v13127_v38  ;;  %v11351_v49 = vpop.f32.mrf.mxu1  ;;  %v13198_v15 = vld [vmem:[#allocation93_spill] sm:$0xff] }
 0x790   : > { %13192 = vst [vmem:[#allocation84_spill] sm:$0xff] %v11317_v0  ;;  %6986 = vtanh.f32 %v4574_v14  ;;  %v4067_v28 = vmul.f32 0.044715, %v11300_v36  ;;  %v4068_v40 = vmul.f32 0.044715, %v11309_v21  ;;  %v3933_v53 = vmul.f32 0.5, %v11150_v5  ;;  %v11353_v5 = vpop.f32.mrf.mxu0 }
 0x791   : > { %13193 = vst [vmem:[#allocation90_spill] sm:$0xff] %v11320_v31  ;;  %v6977_v46 = vpop.eup %6976  ;;  %6988 = vtanh.f32 %v4575_v23  ;;  %v4576_v30 = vmul.f32 0.7978846, %v4448_v17  ;;  %v11341_v56 = vadd.f32 %v11175_v9, %v13125_v37  ;;  %v11345_v33 = vadd.f32 %v11250_v57, %v13133_v42  ;;  %v3575_v31 = vpop.f32.mrf.mxu2 }
 0x792   : > { %13194 = vst [vmem:[#allocation124_spill] sm:$0xff] %v11322_v7  ;;  %v6979_v61 = vpop.eup %6978  ;;  %v3931_v39 = vmul.f32 0.5, %v11155_v62  ;;  %v3934_v3 = vmul.f32 0.5, %v11192_v51  ;;  %v4197_v26 = vmul.f32 %v4069_v24, %v11293_v6  ;;  %v4071_v59 = vmul.f32 0.044715, %v11326_v44  ;;  %v13205_v7 = vld [vmem:[#allocation97_spill] sm:$0xff]  ;;  %v3664_v20 = vpop.f32.mrf.mxu3 }
 0x793   : > { %v6981_v52 = vpop.eup %6980  ;;  %v3932_v9 = vmul.f32 0.5, %v11171_v55  ;;  %v3937_v4 = vmul.f32 0.5, %v11163_v22  ;;  %v4195_v57 = vmul.f32 %v4067_v28, %v11300_v36  ;;  %v11360_v62 = vadd.f32 %v11226_v13, %v13122_v47  ;;  %v13195_v55 = vld [vmem:[#allocation16_spill] sm:$0xff] }
 0x794   : > { %v6983_v43 = vpop.eup %6982  ;;  %v4829_v51 = vadd.f32 1.0, %v6977_v46  ;;  %v3938_v23 = vmul.f32 0.5, %v11184_v2  ;;  %v4196_v24 = vmul.f32 %v4068_v40, %v11309_v21  ;;  %v11366_v19 = vadd.f32 %v11228_v41, %v13125_v37  ;;  %v13199_v28 = vld [vmem:[#allocation92_spill] sm:$0xff]  ;;  %v13204_v41 = vld [vmem:[#allocation95_spill] sm:$0xff] }
 0x795   : > { %v6985_v14 = vpop.eup %6984  ;;  %v13197_v22 = vpack.c.bf16 %v13195_v55, %v13196_v12  ;;  %v13200_v10 = vpack.c.bf16 %v13198_v15, %v13199_v28  ;;  %6990 = vtanh.f32 %v4576_v30  ;;  %v4833_v13 = vadd.f32 1.0, %v6981_v52  ;;  %v13202_v40 = vld [vmem:[#allocation96_spill] sm:$0xff] }
 0x796   : > { %v6987_v17 = vpop.eup %6986  ;;  %v4070_v46 = vmul.f32 0.044715, %v11341_v56  ;;  %v4072_v2 = vmul.f32 0.044715, %v11345_v33  ;;  %v13203_v1 = vpack.c.bf16 %v13201_v60, %v13202_v40  ;;  %v13206_v48 = vpack.c.bf16 %v13204_v41, %v13205_v7 }
 0x797   : > { %5361 = vmatmul.bf16.gmra.mxu2 %v13197_v22  ;;  %5450 = vmatmul.bf16.gmra.mxu3 %v13200_v10  ;;  %v3935_v12 = vmul.f32 0.5, %v11200_v8  ;;  %v4827_v55 = vadd.f32 1.0, %v6979_v61  ;;  %v6989_v22 = vpop.eup %6988  ;;  %v4199_v10 = vmul.f32 %v4071_v59, %v11326_v44  ;;  %v4828_v15 = vadd.f32 1.0, %v6983_v43 }
 0x798   : > { %5539 = vmatmul.bf16.gmra.mxu1 %v13203_v1  ;;  %5628 = vmatmul.bf16.gmra.mxu0 %v13206_v48  ;;  %v4834_v30 = vadd.f32 1.0, %v6985_v14  ;;  %v4325_v52 = vmul.f32 %v4197_v26, %v11293_v6  ;;  %v4073_v28 = vmul.f32 0.044715, %v11360_v62  ;;  %v3936_v1 = vmul.f32 0.5, %v11221_v35  ;;  %v11398_v35 = vpop.f32.mrf.mxu1 }
 0x799   : > { %v4830_v60 = vadd.f32 1.0, %v6987_v17  ;;  %v4323_v7 = vmul.f32 %v4195_v57, %v11300_v36  ;;  %v4074_v48 = vmul.f32 0.044715, %v11366_v19  ;;  %v11389_v8 = vmul.f32 %v4829_v51, %v3933_v53  ;;  %v11400_v17 = vpop.f32.mrf.mxu0 }
 0x79a   : > { %v11391_v61 = vmul.f32 %v4833_v13, %v3937_v4  ;;  %v4324_v43 = vmul.f32 %v4196_v24, %v11309_v21  ;;  %v4198_v59 = vmul.f32 %v4070_v46, %v11341_v56  ;;  %v4200_v26 = vmul.f32 %v4072_v2, %v11345_v33 }
 0x79b   : > { %13207 = vst [vmem:[#allocation16_spill] sm:$0xff] %v11389_v8  ;;  %v4831_v14 = vadd.f32 1.0, %v6989_v22  ;;  %v11396_v40 = vmul.f32 %v4827_v55, %v3931_v39  ;;  %v6991_v41 = vpop.eup %6990  ;;  %v11402_v57 = vmul.f32 %v4828_v15, %v3932_v9  ;;  %v11404_v53 = vmul.f32 %v4834_v30, %v3938_v23  ;;  %v13225_v8 = vld [vmem:[#allocation104_spill] sm:$0xff] }
 0x79c   : > { %13208 = vst [vmem:[#allocation85_spill] sm:$0xff] %v11391_v61  ;;  %v4327_v4 = vmul.f32 %v4199_v10, %v11326_v44  ;;  %v4453_v51 = vadd.f32 %v4325_v52, %v11293_v6  ;;  %v4201_v24 = vmul.f32 %v4073_v28, %v11360_v62  ;;  %v11411_v13 = vadd.f32 %v11312_v32, %v13127_v38 }
 0x79d   : > { %13209 = vst [vmem:[#allocation93_spill] sm:$0xff] %v11396_v40  ;;  %v11413_v39 = vmul.f32 %v4830_v60, %v3934_v3  ;;  %v4451_v46 = vadd.f32 %v4323_v7, %v11300_v36  ;;  %v4202_v2 = vmul.f32 %v4074_v48, %v11366_v19  ;;  %v11419_v9 = vadd.f32 %v11314_v18, %v13133_v42  ;;  %v11442_v60 = vpop.f32.mrf.mxu2 }
 0x79e   : > { %13210 = vst [vmem:[#allocation92_spill] sm:$0xff] %v11402_v57  ;;  %v4452_v55 = vadd.f32 %v4324_v43, %v11309_v21  ;;  %v11424_v22 = vmul.f32 %v4831_v14, %v3935_v12  ;;  %v4832_v10 = vadd.f32 1.0, %v6991_v41  ;;  %v4328_v32 = vmul.f32 %v4200_v26, %v11345_v33 }
 0x79f   : > { %13211 = vst [vmem:[#allocation94_spill] sm:$0xff] %v11404_v53  ;;  %v11428_v3 = vmul.f32 0.5, %v11293_v6  ;;  %v11432_v15 = vadd.f32 %v11285_v16, %v13122_v47  ;;  %v4455_v30 = vadd.f32 %v4327_v4, %v11326_v44  ;;  %v4581_v52 = vmul.f32 0.7978846, %v4453_v51  ;;  %v11444_v6 = vpop.f32.mrf.mxu3 }
 0x7a0   : > { %13212 = vst [vmem:[#allocation96_spill] sm:$0xff] %v11413_v39  ;;  %v4075_v28 = vmul.f32 0.044715, %v11411_v13  ;;  %v11440_v12 = vadd.f32 %v11351_v49, %v13122_v47  ;;  %v4579_v7 = vmul.f32 0.7978846, %v4451_v46  ;;  %v4329_v16 = vmul.f32 %v4201_v24, %v11360_v62  ;;  %v13219_v49 = vld [vmem:[#allocation100_spill] sm:$0xff] }
 0x7a1   : > { %13213 = vst [vmem:[#allocation95_spill] sm:$0xff] %v11424_v22  ;;  %v4076_v48 = vmul.f32 0.044715, %v11419_v9  ;;  %v4580_v43 = vmul.f32 0.7978846, %v4452_v55  ;;  %v11449_v26 = vmul.f32 0.5, %v11341_v56  ;;  %v4326_v14 = vmul.f32 %v4198_v59, %v11341_v56 }
 0x7a2   : > { %v11453_v41 = vadd.f32 %v3575_v31, %v13127_v38  ;;  %v4456_v4 = vadd.f32 %v4328_v32, %v11345_v33  ;;  %v4330_v51 = vmul.f32 %v4202_v2, %v11366_v19  ;;  %v4077_v24 = vmul.f32 0.044715, %v11432_v15  ;;  %v13221_v39 = vld [vmem:[#allocation103_spill] sm:$0xff] }
 0x7a3   : > { %v11460_v46 = vmul.f32 %v4832_v10, %v3936_v1  ;;  %v4583_v55 = vmul.f32 0.7978846, %v4455_v30  ;;  %6992 = vtanh.f32 %v4581_v52  ;;  %v4203_v18 = vmul.f32 %v4075_v28, %v11411_v13  ;;  %v11473_v1 = vpop.f32.mrf.mxu1  ;;  %v11475_v10 = vpop.f32.mrf.mxu0  ;;  %v13215_v30 = vld [vmem:[#allocation99_spill] sm:$0xff]  ;;  %v13216_v52 = vld [vmem:[#allocation98_spill] sm:$0xff] }
 0x7a4   : > { %v4081_v59 = vmul.f32 0.044715, %v11440_v12  ;;  %6994 = vtanh.f32 %v4579_v7  ;;  %v4457_v31 = vadd.f32 %v4329_v16, %v11360_v62  ;;  %v11467_v23 = vadd.f32 %v11287_v25, %v13125_v37  ;;  %v13218_v7 = vld [vmem:[#allocation101_spill] sm:$0xff] }
 0x7a5   : > { %13214 = vst [vmem:[#allocation97_spill] sm:$0xff] %v11460_v46  ;;  %v4204_v32 = vmul.f32 %v4076_v48, %v11419_v9  ;;  %v11471_v2 = vadd.f32 %v3664_v20, %v13133_v42  ;;  %v13217_v28 = vpack.c.bf16 %v13215_v30, %v13216_v52  ;;  %v13220_v16 = vpack.c.bf16 %v13218_v7, %v13219_v49  ;;  %v13222_v48 = vld [vmem:[#allocation102_spill] sm:$0xff]  ;;  %v13224_v20 = vld [vmem:[#allocation105_spill] sm:$0xff] }
 0x7a6   : > { %6996 = vtanh.f32 %v4580_v43  ;;  %v4079_v25 = vmul.f32 0.044715, %v11453_v41  ;;  %v13223_v53 = vpack.c.bf16 %v13221_v39, %v13222_v48  ;;  %v13226_v61 = vpack.c.bf16 %v13224_v20, %v13225_v8 }
 0x7a7   : > { %5366 = vmatmul.bf16.gmra.mxu2 %v13217_v28  ;;  %5455 = vmatmul.bf16.gmra.mxu3 %v13220_v16  ;;  %v3939_v40 = vmul.f32 0.5, %v11300_v36  ;;  %v4584_v22 = vmul.f32 0.7978846, %v4456_v4  ;;  %v4458_v30 = vadd.f32 %v4330_v51, %v11366_v19  ;;  %v4205_v52 = vmul.f32 %v4077_v24, %v11432_v15 }
 0x7a8   : > { %5544 = vmatmul.bf16.gmra.mxu1 %v13223_v53  ;;  %5633 = vmatmul.bf16.gmra.mxu0 %v13226_v61  ;;  %v11495_v43 = vadd.f32 %v11353_v5, %v13125_v37  ;;  %6998 = vtanh.f32 %v4583_v55  ;;  %v4454_v49 = vadd.f32 %v4326_v14, %v11341_v56  ;;  %v4209_v53 = vmul.f32 %v4081_v59, %v11440_v12  ;;  %v11507_v14 = vpop.f32.mrf.mxu2  ;;  %v11509_v59 = vpop.f32.mrf.mxu3 }
 0x7a9   : > { %v3940_v39 = vmul.f32 0.5, %v11309_v21  ;;  %v4585_v8 = vmul.f32 0.7978846, %v4457_v31  ;;  %v4331_v61 = vmul.f32 %v4203_v18, %v11411_v13  ;;  %v6993_v36 = vpop.eup %6992  ;;  %v4078_v4 = vmul.f32 0.044715, %v11467_v23 }
 0x7aa   : > { %v4080_v51 = vmul.f32 0.044715, %v11471_v2  ;;  %v4332_v5 = vmul.f32 %v4204_v32, %v11419_v9  ;;  %v6995_v55 = vpop.eup %6994  ;;  %v4207_v56 = vmul.f32 %v4079_v25, %v11453_v41  ;;  %7000 = vtanh.f32 %v4584_v22 }
 0x7ab   : > { %v11512_v21 = vmul.f32 0.5, %v11360_v62  ;;  %v4586_v18 = vmul.f32 0.7978846, %v4458_v30  ;;  %v4082_v28 = vmul.f32 0.044715, %v11495_v43  ;;  %v11516_v7 = vmul.f32 0.5, %v11366_v19  ;;  %v11523_v24 = vpop.f32.mrf.mxu1  ;;  %v11525_v57 = vpop.f32.mrf.mxu0 }
 0x7ac   : > { %v6997_v31 = vpop.eup %6996  ;;  %v4582_v16 = vmul.f32 0.7978846, %v4454_v49  ;;  %v4333_v32 = vmul.f32 %v4205_v52, %v11432_v15  ;;  %7002 = vtanh.f32 %v4585_v8  ;;  %v4837_v25 = vadd.f32 1.0, %v6993_v36 }
 0x7ad   : > { %v4459_v48 = vadd.f32 %v4331_v61, %v11411_v13  ;;  %v4337_v20 = vmul.f32 %v4209_v53, %v11440_v12  ;;  %v4206_v62 = vmul.f32 %v4078_v4, %v11467_v23  ;;  %v4208_v30 = vmul.f32 %v4080_v51, %v11471_v2 }
 0x7ae   : > { %v6999_v22 = vpop.eup %6998  ;;  %v4835_v19 = vadd.f32 1.0, %v6995_v55  ;;  %v4460_v49 = vadd.f32 %v4332_v5, %v11419_v9  ;;  %v3943_v52 = vmul.f32 0.5, %v11326_v44  ;;  %v4836_v8 = vadd.f32 1.0, %v6997_v31 }
 0x7af   : > { %7004 = vtanh.f32 %v4586_v18  ;;  %v4335_v61 = vmul.f32 %v4207_v56, %v11453_v41  ;;  %v4210_v53 = vmul.f32 %v4082_v28, %v11495_v43  ;;  %v3944_v36 = vmul.f32 0.5, %v11345_v33 }
 0x7b0   : > { %7006 = vtanh.f32 %v4582_v16  ;;  %v4461_v4 = vadd.f32 %v4333_v32, %v11432_v15  ;;  %v7001_v51 = vpop.eup %7000  ;;  %v4839_v46 = vadd.f32 1.0, %v6999_v22  ;;  %v11534_v0 = vmul.f32 %v4837_v25, %v11428_v3  ;;  %v11543_v28 = vpop.f32.mrf.mxu2 }
 0x7b1   : > { %v4587_v55 = vmul.f32 0.7978846, %v4459_v48  ;;  %v4465_v5 = vadd.f32 %v4337_v20, %v11440_v12  ;;  %v11537_v44 = vmul.f32 %v4835_v19, %v3939_v40  ;;  %v11540_v18 = vmul.f32 0.5, %v11411_v13  ;;  %v11545_v16 = vpop.f32.mrf.mxu3 }
 0x7b2   : > { %13227 = vst [vmem:[#allocation99_spill] sm:$0xff] %v11534_v0  ;;  %v4336_v56 = vmul.f32 %v4208_v30, %v11471_v2  ;;  %v4588_v31 = vmul.f32 0.7978846, %v4460_v49  ;;  %v7003_v33 = vpop.eup %7002  ;;  %v11547_v32 = vmul.f32 %v4836_v8, %v3940_v39  ;;  %v4463_v3 = vadd.f32 %v4335_v61, %v11453_v41  ;;  %v13231_v8 = vld [vmem:[#allocation71_spill] sm:$0xff] }
 0x7b3   : > { %13228 = vst [vmem:[#allocation98_spill] sm:$0xff] %v11537_v44  ;;  %v11551_v25 = vmul.f32 0.5, %v11419_v9  ;;  %v11554_v40 = vmul.f32 0.5, %v11432_v15  ;;  %v4840_v13 = vadd.f32 1.0, %v7001_v51  ;;  %v11557_v48 = vmul.f32 0.5, %v11453_v41  ;;  %v13232_v15 = vld [vmem:[#allocation108_spill] sm:$0xff] }
 0x7b4   : > { %13229 = vst [vmem:[#allocation101_spill] sm:$0xff] %v11547_v32  ;;  %v11560_v20 = vmul.f32 0.5, %v11440_v12  ;;  %v4589_v22 = vmul.f32 0.7978846, %v4461_v4  ;;  %v11562_v19 = vmul.f32 %v4839_v46, %v3943_v52  ;;  %7008 = vtanh.f32 %v4587_v55  ;;  %v13234_v51 = vld [vmem:[#allocation111_spill] sm:$0xff]  ;;  %v13235_v41 = vld [vmem:[#allocation109_spill] sm:$0xff] }
 0x7b5   : > { %v7005_v30 = vpop.eup %7004  ;;  %v11565_v39 = vmul.f32 0.5, %v11471_v2  ;;  %v4593_v9 = vmul.f32 0.7978846, %v4465_v5  ;;  %v13233_v61 = vpack.c.bf16 %v13231_v8, %v13232_v15  ;;  %v13236_v27 = vpack.c.bf16 %v13234_v51, %v13235_v41  ;;  %v13237_v55 = vld [vmem:[#allocation68_spill] sm:$0xff]  ;;  %v13238_v5 = vld [vmem:[#allocation106_spill] sm:$0xff]  ;;  %v13240_v8 = vld [vmem:[#allocation107_spill] sm:$0xff] }
 0x7b6   : > { %13230 = vst [vmem:[#allocation100_spill] sm:$0xff] %v11562_v19  ;;  %v7007_v49 = vpop.eup %7006  ;;  %v4841_v12 = vadd.f32 1.0, %v7003_v33  ;;  %v4464_v4 = vadd.f32 %v4336_v56, %v11471_v2  ;;  %7010 = vtanh.f32 %v4588_v31  ;;  %v11575_v46 = vmul.f32 0.5, %v11467_v23  ;;  %v13241_v15 = vld [vmem:[#allocation110_spill] sm:$0xff]  ;;  %v11597_v31 = vpop.f32.mrf.mxu0 }
 0x7b7   : > { %5371 = vmatmul.bf16.gmra.mxu2 %v13233_v61  ;;  %5460 = vmatmul.bf16.gmra.mxu3 %v13236_v27  ;;  %v11579_v52 = vadd.f32 %v11398_v35, %v13122_v47  ;;  %v13239_v50 = vpack.c.bf16 %v13237_v55, %v13238_v5  ;;  %v13242_v61 = vpack.c.bf16 %v13240_v8, %v13241_v15  ;;  %v4591_v27 = vmul.f32 0.7978846, %v4463_v3  ;;  %v11595_v35 = vpop.f32.mrf.mxu1 }
 0x7b8   : > { %v11588_v33 = vmul.f32 0.5, %v11495_v43  ;;  %v4334_v2 = vmul.f32 %v4206_v62, %v11467_v23  ;;  %v11593_v56 = vadd.f32 %v11473_v1, %v13122_v47  ;;  %v11599_v51 = vmul.f32 %v4840_v13, %v3944_v36  ;;  %v11640_v5 = vpop.f32.mrf.mxu2 }
 0x7b9   : > { %5549 = vmatmul.bf16.gmra.mxu1 %v13239_v50  ;;  %5638 = vmatmul.bf16.gmra.mxu0 %v13242_v61  ;;  %v4842_v50 = vadd.f32 1.0, %v7005_v30  ;;  %7012 = vtanh.f32 %v4589_v22  ;;  %v11603_v3 = vadd.f32 %v11442_v60, %v13127_v38  ;;  %v4838_v62 = vadd.f32 1.0, %v7007_v49 }
 0x7ba   : > { %13243 = vst [vmem:[#allocation103_spill] sm:$0xff] %v11599_v51  ;;  %7014 = vtanh.f32 %v4593_v9  ;;  %v11609_v1 = vadd.f32 %v11444_v6, %v13133_v42  ;;  %v11612_v55 = vmul.f32 %v4841_v12, %v11512_v21  ;;  %v4592_v36 = vmul.f32 0.7978846, %v4464_v4  ;;  %v7009_v22 = vpop.eup %7008 }
 0x7bb   : > { %v4338_v13 = vmul.f32 %v4210_v53, %v11495_v43  ;;  %v4085_v30 = vmul.f32 0.044715, %v11579_v52  ;;  %v11618_v60 = vadd.f32 %v11507_v14, %v13127_v38  ;;  %7016 = vtanh.f32 %v4591_v27 }
 0x7bc   : > { %13244 = vst [vmem:[#allocation102_spill] sm:$0xff] %v11612_v55  ;;  %v4462_v9 = vadd.f32 %v4334_v2, %v11467_v23  ;;  %v7011_v49 = vpop.eup %7010  ;;  %v4089_v6 = vmul.f32 0.044715, %v11593_v56  ;;  %v11624_v21 = vadd.f32 %v11509_v59, %v13133_v42  ;;  %v11629_v12 = vmul.f32 %v4842_v50, %v11516_v7  ;;  %v11642_v59 = vpop.f32.mrf.mxu3 }
 0x7bd   : > { %v11633_v14 = vadd.f32 %v11400_v17, %v13125_v37  ;;  %v4083_v4 = vmul.f32 0.044715, %v11603_v3  ;;  %v11638_v23 = vadd.f32 %v11475_v10, %v13125_v37  ;;  %v11645_v8 = vmul.f32 %v4838_v62, %v11449_v26 }
 0x7be   : > { %13245 = vst [vmem:[#allocation105_spill] sm:$0xff] %v11629_v12  ;;  %v4084_v7 = vmul.f32 0.044715, %v11609_v1  ;;  %v4843_v61 = vadd.f32 1.0, %v7009_v22  ;;  %7018 = vtanh.f32 %v4592_v36  ;;  %v4466_v17 = vadd.f32 %v4338_v13, %v11495_v43  ;;  %v11655_v62 = vpop.f32.mrf.mxu0 }
 0x7bf   : > { %13246 = vst [vmem:[#allocation104_spill] sm:$0xff] %v11645_v8  ;;  %v7013_v15 = vpop.eup %7012  ;;  %v4213_v2 = vmul.f32 %v4085_v30, %v11579_v52  ;;  %v4087_v10 = vmul.f32 0.044715, %v11618_v60  ;;  %v4844_v50 = vadd.f32 1.0, %v7011_v49  ;;  %v4590_v53 = vmul.f32 0.7978846, %v4462_v9  ;;  %v11653_v26 = vpop.f32.mrf.mxu1 }
 0x7c0   : > { %v7015_v27 = vpop.eup %7014  ;;  %v4217_v41 = vmul.f32 %v4089_v6, %v11593_v56  ;;  %v4088_v32 = vmul.f32 0.044715, %v11624_v21  ;;  %v4086_v22 = vmul.f32 0.044715, %v11633_v14  ;;  %v4211_v30 = vmul.f32 %v4083_v4, %v11603_v3 }
 0x7c1   : > { %v7017_v13 = vpop.eup %7016  ;;  %v4090_v9 = vmul.f32 0.044715, %v11638_v23  ;;  %v4845_v49 = vadd.f32 1.0, %v7013_v15  ;;  %v4212_v6 = vmul.f32 %v4084_v7, %v11609_v1  ;;  %v11666_v51 = vmul.f32 %v4843_v61, %v11540_v18 }
 0x7c2   : > { %v4849_v44 = vadd.f32 1.0, %v7015_v27  ;;  %v4594_v19 = vmul.f32 0.7978846, %v4466_v17  ;;  %v4215_v36 = vmul.f32 %v4087_v10, %v11618_v60  ;;  %v11670_v0 = vmul.f32 %v4844_v50, %v11551_v25  ;;  %v11681_v27 = vpop.f32.mrf.mxu2  ;;  %v13249_v10 = vld [vmem:[#allocation114_spill] sm:$0xff]  ;;  %v13251_v50 = vld [vmem:[#allocation117_spill] sm:$0xff] }
 0x7c3   : > { %7020 = vtanh.f32 %v4590_v53  ;;  %v4341_v43 = vmul.f32 %v4213_v2, %v11579_v52  ;;  %v4216_v4 = vmul.f32 %v4088_v32, %v11624_v21  ;;  %v11676_v15 = vadd.f32 %v11523_v24, %v13122_v47  ;;  %v13248_v2 = vld [vmem:[#allocation115_spill] sm:$0xff] }
 0x7c4   : > { %v7019_v8 = vpop.eup %7018  ;;  %v4847_v7 = vadd.f32 1.0, %v7017_v13  ;;  %v4345_v18 = vmul.f32 %v4217_v41, %v11593_v56  ;;  %v4214_v61 = vmul.f32 %v4086_v22, %v11633_v14  ;;  %v4218_v17 = vmul.f32 %v4090_v9, %v11638_v23  ;;  %v11683_v25 = vpop.f32.mrf.mxu3  ;;  %v13252_v13 = vld [vmem:[#allocation116_spill] sm:$0xff] }
 0x7c5   : > { %v11686_v53 = vmul.f32 %v4845_v49, %v11554_v40  ;;  %v4339_v32 = vmul.f32 %v4211_v30, %v11603_v3  ;;  %v11691_v24 = vadd.f32 %v11525_v57, %v13125_v37  ;;  %v13250_v41 = vpack.c.bf16 %v13248_v2, %v13249_v10  ;;  %v13256_v49 = vld [vmem:[#allocation119_spill] sm:$0xff]  ;;  %v13257_v2 = vld [vmem:[#allocation118_spill] sm:$0xff] }
 0x7c6   : > { %v13253_v22 = vpack.c.bf16 %v13251_v50, %v13252_v13  ;;  %v11700_v9 = vmul.f32 %v4849_v44, %v11560_v20  ;;  %7022 = vtanh.f32 %v4594_v19  ;;  %v4340_v40 = vmul.f32 %v4212_v6, %v11609_v1 }
 0x7c7   : > { %13247 = vst [vmem:[#allocation71_spill] sm:$0xff] %v11686_v53  ;;  %5376 = vmatmul.bf16.gmra.mxu2 %v13250_v41  ;;  %v11705_v30 = vadd.f32 %v11543_v28, %v13127_v38  ;;  %v13255_v57 = vpack.c.bf16 %v11033_v54, %v11001_v63  ;;  %v13258_v10 = vpack.c.bf16 %v13256_v49, %v13257_v2  ;;  %v4848_v41 = vadd.f32 1.0, %v7019_v8 }
 0x7c8   : > { %5465 = vmatmul.bf16.gmra.mxu3 %v13253_v22  ;;  %13254 = vst [vmem:[#allocation108_spill] sm:$0xff] %v11700_v9  ;;  %v4343_v50 = vmul.f32 %v4215_v36, %v11618_v60  ;;  %v4469_v44 = vadd.f32 %v4341_v43, %v11579_v52  ;;  %v4093_v20 = vmul.f32 0.044715, %v11676_v15  ;;  %v11717_v19 = vmul.f32 %v4847_v7, %v11557_v48  ;;  %v11735_v7 = vpop.f32.mrf.mxu0 }
 0x7c9   : > { %5554 = vmatmul.bf16.gmra.mxu1 %v13255_v57  ;;  %5643 = vmatmul.bf16.gmra.mxu0 %v13258_v10  ;;  %v4344_v28 = vmul.f32 %v4216_v4, %v11624_v21  ;;  %v4473_v6 = vadd.f32 %v4345_v18, %v11593_v56  ;;  %v7021_v63 = vpop.eup %7020  ;;  %v11723_v54 = vadd.f32 %v11595_v35, %v13122_v47  ;;  %v4094_v13 = vmul.f32 0.044715, %v11691_v24  ;;  %v11733_v4 = vpop.f32.mrf.mxu1 }
 0x7ca   : > { %v4467_v8 = vadd.f32 %v4339_v32, %v11603_v3  ;;  %v4342_v36 = vmul.f32 %v4214_v61, %v11633_v14  ;;  %v4346_v43 = vmul.f32 %v4218_v17, %v11638_v23  ;;  %v11731_v48 = vadd.f32 %v11545_v16, %v13133_v42 }
 0x7cb   : > { %v4468_v18 = vadd.f32 %v4340_v40, %v11609_v1  ;;  %v4091_v32 = vmul.f32 0.044715, %v11705_v30  ;;  %v11742_v61 = vmul.f32 %v4848_v41, %v11565_v39  ;;  %v4471_v17 = vadd.f32 %v4343_v50, %v11618_v60 }
 0x7cc   : > { %v4597_v22 = vmul.f32 0.7978846, %v4469_v44  ;;  %v7023_v57 = vpop.eup %7022  ;;  %v4221_v16 = vmul.f32 %v4093_v20, %v11676_v15  ;;  %v11748_v49 = vadd.f32 %v11597_v31, %v13125_v37  ;;  %v4472_v2 = vadd.f32 %v4344_v28, %v11624_v21  ;;  %v11757_v31 = vpop.f32.mrf.mxu2 }
 0x7cd   : > { %v4601_v10 = vmul.f32 0.7978846, %v4473_v6  ;;  %v4097_v40 = vmul.f32 0.044715, %v11723_v54  ;;  %v4595_v35 = vmul.f32 0.7978846, %v4467_v8  ;;  %v4470_v53 = vadd.f32 %v4342_v36, %v11633_v14  ;;  %v11759_v12 = vpop.f32.mrf.mxu3 }
 0x7ce   : > { %v4474_v39 = vadd.f32 %v4346_v43, %v11638_v23  ;;  %v4222_v41 = vmul.f32 %v4094_v13, %v11691_v24  ;;  %v4092_v50 = vmul.f32 0.044715, %v11731_v48  ;;  %v4846_v44 = vadd.f32 1.0, %v7021_v63 }
 0x7cf   : > { %v4596_v20 = vmul.f32 0.7978846, %v4468_v18  ;;  %v4219_v9 = vmul.f32 %v4091_v32, %v11705_v30  ;;  %v4850_v28 = vadd.f32 1.0, %v7023_v57  ;;  %v4599_v6 = vmul.f32 0.7978846, %v4471_v17 }
 0x7d0   : > { %7024 = vtanh.f32 %v4597_v22  ;;  %v4098_v8 = vmul.f32 0.044715, %v11748_v49  ;;  %v4600_v36 = vmul.f32 0.7978846, %v4472_v2  ;;  %v4349_v43 = vmul.f32 %v4221_v16, %v11676_v15  ;;  %v11771_v17 = vpop.f32.mrf.mxu0 }
 0x7d1   : > { %7026 = vtanh.f32 %v4601_v10  ;;  %v4225_v13 = vmul.f32 %v4097_v40, %v11723_v54  ;;  %v4598_v63 = vmul.f32 0.7978846, %v4470_v53  ;;  %v4602_v18 = vmul.f32 0.7978846, %v4474_v39  ;;  %v11769_v57 = vpop.f32.mrf.mxu1  ;;  %13260 = vst [vmem:[#allocation109_spill] sm:$0xff] %v11771_v17 }
 0x7d2   : > { %7028 = vtanh.f32 %v4595_v35  ;;  %v4220_v32 = vmul.f32 %v4092_v50, %v11731_v48  ;;  %v11767_v55 = vadd.f32 %v11640_v5, %v13127_v38  ;;  %13259 = vst [vmem:[#allocation111_spill] sm:$0xff] %v11769_v57  ;;  %v4350_v22 = vmul.f32 %v4222_v41, %v11691_v24 }
 0x7d3   : > { %7030 = vtanh.f32 %v4596_v20  ;;  %v11777_v35 = vmul.f32 %v4850_v28, %v11588_v33  ;;  %v4347_v53 = vmul.f32 %v4219_v9, %v11705_v30  ;;  %v4226_v2 = vmul.f32 %v4098_v8, %v11748_v49  ;;  %v13261_v20 = vld [vmem:[#allocation120_spill] sm:$0xff]  ;;  %v13264_v8 = vld [vmem:[#allocation123_spill] sm:$0xff] }
 0x7d4   : > { %7032 = vtanh.f32 %v4599_v6  ;;  %v4477_v10 = vadd.f32 %v4349_v43, %v11676_v15  ;;  %v11786_v39 = vadd.f32 %v11642_v59, %v13133_v42  ;;  %v11789_v41 = vmul.f32 %v4846_v44, %v11575_v46  ;;  %v13262_v28 = vld [vmem:[#allocation80_spill] sm:$0xff] }
 0x7d5   : > { %7034 = vtanh.f32 %v4600_v36  ;;  %v4353_v33 = vmul.f32 %v4225_v13, %v11723_v54  ;;  %v4095_v50 = vmul.f32 0.044715, %v11767_v55  ;;  %v13263_v6 = vpack.c.bf16 %v13261_v20, %v13262_v28  ;;  %v13265_v36 = vld [vmem:[#allocation122_spill] sm:$0xff]  ;;  %v11803_v13 = vpop.f32.mrf.mxu3 }
 0x7d6   : > { %v7025_v40 = vpop.eup %7024  ;;  %7036 = vtanh.f32 %v4602_v18  ;;  %v13266_v43 = vpack.c.bf16 %v13264_v8, %v13265_v36  ;;  %v4348_v59 = vmul.f32 %v4220_v32, %v11731_v48  ;;  %v4478_v46 = vadd.f32 %v4350_v22, %v11691_v24  ;;  %v11801_v18 = vpop.f32.mrf.mxu2  ;;  %13268 = vst [vmem:[#allocation106_spill] sm:$0xff] %v11803_v13 }
 0x7d7   : > { %v7027_v9 = vpop.eup %7026  ;;  %5381 = vmatmul.bf16.gmra.mxu2 %v13263_v6  ;;  %7038 = vtanh.f32 %v4598_v63  ;;  %13267 = vst [vmem:[#allocation68_spill] sm:$0xff] %v11801_v18  ;;  %v13269_v5 = vpack.c.bf16 %v11238_v58, %v11243_v34  ;;  %v13270_v20 = vpack.c.bf16 %v11246_v45, %v11253_v11  ;;  %v3957_v32 = vmul.f32 0.5, %v11579_v52 }
 0x7d8   : > { %5470 = vmatmul.bf16.gmra.mxu3 %v13266_v43  ;;  %v7029_v44 = vpop.eup %7028  ;;  %v3958_v22 = vmul.f32 0.5, %v11633_v14  ;;  %v4475_v28 = vadd.f32 %v4347_v53, %v11705_v30  ;;  %v3955_v8 = vmul.f32 0.5, %v11603_v3  ;;  %v3956_v36 = vmul.f32 0.5, %v11609_v1 }
 0x7d9   : > { %5559 = vmatmul.bf16.gmra.mxu1 %v13269_v5  ;;  %5648 = vmatmul.bf16.gmra.mxu0 %v13270_v20  ;;  %v7031_v6 = vpop.eup %7030  ;;  %v4605_v58 = vmul.f32 0.7978846, %v4477_v10  ;;  %v4354_v34 = vmul.f32 %v4226_v2, %v11748_v49  ;;  %v4096_v45 = vmul.f32 0.044715, %v11786_v39  ;;  %v3961_v11 = vmul.f32 0.5, %v11593_v56  ;;  %v11826_v18 = vpop.f32.mrf.mxu1 }
 0x7da   : > { %v7033_v5 = vpop.eup %7032  ;;  %v4857_v43 = vadd.f32 1.0, %v7027_v9  ;;  %v4481_v52 = vadd.f32 %v4353_v33, %v11723_v54  ;;  %v4223_v14 = vmul.f32 %v4095_v50, %v11767_v55  ;;  %v3962_v53 = vmul.f32 0.5, %v11638_v23  ;;  %13271 = vst [vmem:[#allocation107_spill] sm:$0xff] %v11826_v18  ;;  %v11828_v56 = vpop.f32.mrf.mxu0 }
 0x7db   : > { %v7035_v20 = vpop.eup %7034  ;;  %v4476_v3 = vadd.f32 %v4348_v59, %v11731_v48  ;;  %v4606_v63 = vmul.f32 0.7978846, %v4478_v46  ;;  %v3959_v10 = vmul.f32 0.5, %v11618_v60  ;;  %v4851_v2 = vadd.f32 1.0, %v7029_v44  ;;  %13272 = vst [vmem:[#allocation110_spill] sm:$0xff] %v11828_v56 }
 0x7dc   : > { %v7037_v1 = vpop.eup %7036  ;;  %v4853_v16 = vadd.f32 1.0, %v7025_v40  ;;  %v4603_v13 = vmul.f32 0.7978846, %v4475_v28  ;;  %v4855_v33 = vadd.f32 1.0, %v7033_v5  ;;  %v4852_v9 = vadd.f32 1.0, %v7031_v6 }
 0x7dd   : > { %v7039_v17 = vpop.eup %7038  ;;  %7040 = vtanh.f32 %v4605_v58  ;;  %v4482_v50 = vadd.f32 %v4354_v34, %v11748_v49  ;;  %v4224_v23 = vmul.f32 %v4096_v45, %v11786_v39  ;;  %v4856_v59 = vadd.f32 1.0, %v7035_v20 }
 0x7de   : > { %v11832_v46 = vmul.f32 %v4857_v43, %v3961_v11  ;;  %v4609_v57 = vmul.f32 0.7978846, %v4481_v52  ;;  %v4858_v60 = vadd.f32 1.0, %v7037_v1  ;;  %v4351_v40 = vmul.f32 %v4223_v14, %v11767_v55  ;;  %v11844_v11 = vpop.f32.mrf.mxu2  ;;  %v11846_v43 = vpop.f32.mrf.mxu3 }
 0x7df   : > { %v4604_v44 = vmul.f32 0.7978846, %v4476_v3  ;;  %7042 = vtanh.f32 %v4606_v63  ;;  %v3960_v28 = vmul.f32 0.5, %v11624_v21  ;;  %v11836_v18 = vmul.f32 %v4853_v16, %v3957_v32  ;;  %13278 = vst [vmem:[#allocation118_spill] sm:$0xff] %v11844_v11  ;;  %v13312_v11 = vld [vmem:[#allocation92_spill] sm:$0xff] }
 0x7e0   : > { %13273 = vst [vmem:[#allocation115_spill] sm:$0xff] %v11832_v46  ;;  %v4854_v5 = vadd.f32 1.0, %v7039_v17  ;;  %7044 = vtanh.f32 %v4603_v13  ;;  %v11838_v6 = vmul.f32 %v4851_v2, %v3955_v8  ;;  %v11840_v58 = vmul.f32 %v4855_v33, %v3959_v10 }
 0x7e1   : > { %13274 = vst [vmem:[#allocation114_spill] sm:$0xff] %v11836_v18  ;;  %v11842_v34 = vmul.f32 %v4852_v9, %v3956_v36  ;;  %v4610_v45 = vmul.f32 0.7978846, %v4482_v50  ;;  %v11848_v52 = vmul.f32 %v4856_v59, %v3960_v28  ;;  %v4352_v63 = vmul.f32 %v4224_v23, %v11786_v39  ;;  %v13284_v9 = vld [vmem:[#allocation87_spill] sm:$0xff] }
 0x7e2   : > { %13275 = vst [vmem:[#allocation117_spill] sm:$0xff] %v11838_v6  ;;  %v3965_v21 = vmul.f32 0.5, %v11676_v15  ;;  %7046 = vtanh.f32 %v4609_v57  ;;  %v11854_v13 = vmul.f32 %v4858_v60, %v3962_v53  ;;  %v4479_v32 = vadd.f32 %v4351_v40, %v11767_v55  ;;  %v13327_v6 = vld [vmem:[#allocation101_spill] sm:$0xff] }
 0x7e3   : > { %13276 = vst [vmem:[#allocation116_spill] sm:$0xff] %v11840_v58  ;;  %v7041_v17 = vpop.eup %7040  ;;  %7048 = vtanh.f32 %v4604_v44  ;;  %v11859_v8 = vadd.f32 %v11653_v26, %v13122_v47  ;;  %v11863_v36 = vadd.f32 %v11655_v62, %v13125_v37  ;;  %v11865_v20 = vmul.f32 %v4854_v5, %v3958_v22  ;;  %v13290_v5 = vld [vmem:[#allocation90_spill] sm:$0xff] }
 0x7e4   : > { %13277 = vst [vmem:[#allocation119_spill] sm:$0xff] %v11842_v34  ;;  %v3966_v15 = vmul.f32 0.5, %v11691_v24  ;;  %v3963_v1 = vmul.f32 0.5, %v11705_v30  ;;  %v3964_v10 = vmul.f32 0.5, %v11731_v48  ;;  %7050 = vtanh.f32 %v4610_v45  ;;  %v13286_v30 = vld [vmem:[#allocation86_spill] sm:$0xff]  ;;  %v13287_v48 = vld [vmem:[#allocation84_spill] sm:$0xff] }
 0x7e5   : > { %13279 = vst [vmem:[#allocation120_spill] sm:$0xff] %v11846_v43  ;;  %v7043_v57 = vpop.eup %7042  ;;  %v3776_v14 = vpop.f32.mrf.mxu1  ;;  %v4480_v22 = vadd.f32 %v4352_v63, %v11786_v39  ;;  %v3969_v2 = vmul.f32 0.5, %v11723_v54  ;;  %v4861_v24 = vadd.f32 1.0, %v7041_v17  ;;  %v11878_v33 = vadd.f32 %v11681_v27, %v13127_v38  ;;  %v13292_v63 = vld [vmem:[#allocation88_spill] sm:$0xff] }
 0x7e6   : > { %13280 = vst [vmem:[#allocation80_spill] sm:$0xff] %v11848_v52  ;;  %v3865_v3 = vpop.f32.mrf.mxu0  ;;  %v7045_v26 = vpop.eup %7044  ;;  %v13285_v50 = vpack.c.bf16 %v11283_v29, %v13284_v9  ;;  %v13288_v23 = vpack.c.bf16 %v13286_v30, %v13287_v48  ;;  %v4607_v60 = vmul.f32 0.7978846, %v4479_v32  ;;  %v3970_v40 = vmul.f32 0.5, %v11748_v49  ;;  %v13289_v29 = vld [vmem:[#allocation89_spill] sm:$0xff]  ;;  %v13293_v17 = vld [vmem:[#allocation124_spill] sm:$0xff] }
 0x7e7   : > { %13281 = vst [vmem:[#allocation123_spill] sm:$0xff] %v11854_v13  ;;  %v4101_v44 = vmul.f32 0.044715, %v11859_v8  ;;  %v4102_v27 = vmul.f32 0.044715, %v11863_v36  ;;  %v11893_v28 = vadd.f32 %v11683_v25, %v13133_v42  ;;  %v13291_v45 = vpack.c.bf16 %v13289_v29, %v13290_v5  ;;  %v13326_v52 = vld [vmem:[#allocation103_spill] sm:$0xff] }
 0x7e8   : > { %13282 = vst [vmem:[#allocation122_spill] sm:$0xff] %v11863_v36  ;;  %5386 = vmatmul.bf16.gmra.mxu2 %v13285_v50  ;;  %5475 = vmatmul.bf16.gmra.mxu3 %v13288_v23  ;;  %v7047_v54 = vpop.eup %7046  ;;  %v13294_v9 = vpack.c.bf16 %v13292_v63, %v13293_v17  ;;  %v11902_v32 = vmul.f32 0.5, %v11767_v55  ;;  %v11905_v50 = vadd.f32 %v3776_v14, %v13122_v47  ;;  %v4859_v30 = vadd.f32 1.0, %v7045_v26 }
 0x7e9   : > { %13283 = vst [vmem:[#allocation125_spill] sm:$0xff] %v11865_v20  ;;  %5564 = vmatmul.bf16.gmra.mxu1 %v13291_v45  ;;  %v7049_v49 = vpop.eup %7048  ;;  %v11908_v48 = vmul.f32 0.5, %v11786_v39  ;;  %v4862_v25 = vadd.f32 1.0, %v7043_v57  ;;  %v11911_v23 = vadd.f32 %v3865_v3, %v13125_v37  ;;  %v4608_v45 = vmul.f32 0.7978846, %v4480_v22 }
 0x7ea   : > { %5653 = vmatmul.bf16.gmra.mxu0 %v13294_v9  ;;  %v3598_v29 = vpop.f32.mrf.mxu2  ;;  %v3687_v5 = vpop.f32.mrf.mxu3  ;;  %v11913_v63 = vmul.f32 %v4861_v24, %v3965_v21  ;;  %v11916_v55 = vmul.f32 0.5, %v11859_v8  ;;  %v4099_v14 = vmul.f32 0.044715, %v11878_v33  ;;  %7052 = vtanh.f32 %v4607_v60 }
 0x7eb   : > { %v7051_v17 = vpop.eup %7050  ;;  %v4865_v26 = vadd.f32 1.0, %v7047_v54  ;;  %v11920_v39 = vmul.f32 0.5, %v11863_v36  ;;  %v4229_v57 = vmul.f32 %v4101_v44, %v11859_v8  ;;  %v4230_v3 = vmul.f32 %v4102_v27, %v11863_v36 }
 0x7ec   : > { %13295 = vst [vmem:[#allocation87_spill] sm:$0xff] %v11913_v63  ;;  %v4100_v9 = vmul.f32 0.044715, %v11893_v28  ;;  %v4860_v22 = vadd.f32 1.0, %v7049_v49  ;;  %v11927_v21 = vadd.f32 %v11733_v4, %v13122_v47  ;;  %v4117_v24 = vmul.f32 0.044715, %v11905_v50 }
 0x7ed   : > { %13296 = vst [vmem:[#allocation86_spill] sm:$0xff] %v11916_v55  ;;  %v3778_v59 = vpop.f32.mrf.mxu1  ;;  %v11930_v60 = vmul.f32 %v4859_v30, %v3963_v1  ;;  %v11932_v54 = vmul.f32 %v4862_v25, %v3966_v15  ;;  %v11936_v44 = vadd.f32 %v11735_v7, %v13125_v37  ;;  %v4118_v27 = vmul.f32 0.044715, %v11911_v23 }
 0x7ee   : > { %13297 = vst [vmem:[#allocation84_spill] sm:$0xff] %v11920_v39  ;;  %v3867_v16 = vpop.f32.mrf.mxu0  ;;  %7054 = vtanh.f32 %v4608_v45  ;;  %v4866_v49 = vadd.f32 1.0, %v7051_v17  ;;  %v4227_v62 = vmul.f32 %v4099_v14, %v11878_v33  ;;  %v11941_v4 = vadd.f32 %v3598_v29, %v13127_v38 }
 0x7ef   : > { %13298 = vst [vmem:[#allocation89_spill] sm:$0xff] %v11930_v60  ;;  %v11944_v53 = vadd.f32 %v3687_v5, %v13133_v42  ;;  %v11946_v1 = vmul.f32 %v4865_v26, %v3969_v2  ;;  %v4228_v15 = vmul.f32 %v4100_v9, %v11893_v28  ;;  %v11949_v30 = vmul.f32 %v4860_v22, %v3964_v10 }
 0x7f0   : > { %13299 = vst [vmem:[#allocation90_spill] sm:$0xff] %v11936_v44  ;;  %v4357_v7 = vmul.f32 %v4229_v57, %v11859_v8  ;;  %v11953_v25 = vmul.f32 %v4230_v3, %v11863_v36  ;;  %v7053_v45 = vpop.eup %7052  ;;  %v4105_v17 = vmul.f32 0.044715, %v11927_v21  ;;  %v4245_v29 = vmul.f32 %v4117_v24, %v11905_v50  ;;  %v13315_v36 = vld [vmem:[#allocation85_spill] sm:$0xff] }
 0x7f1   : > { %13300 = vst [vmem:[#allocation88_spill] sm:$0xff] %v11946_v1  ;;  %v11958_v14 = vmul.f32 0.5, %v11878_v33  ;;  %v11961_v2 = vmul.f32 0.5, %v11893_v28  ;;  %v4106_v5 = vmul.f32 0.044715, %v11936_v44  ;;  %v4246_v10 = vmul.f32 %v4118_v27, %v11911_v23 }
 0x7f2   : > { %13301 = vst [vmem:[#allocation124_spill] sm:$0xff] %v11949_v30  ;;  %v11966_v26 = vadd.f32 %v3778_v59, %v13122_v47  ;;  %v3600_v57 = vpop.f32.mrf.mxu2  ;;  %v3689_v3 = vpop.f32.mrf.mxu3  ;;  %v11968_v9 = vmul.f32 %v4866_v49, %v3970_v40  ;;  %v4115_v22 = vmul.f32 0.044715, %v11941_v4  ;;  %v4116_v24 = vmul.f32 0.044715, %v11944_v53 }
 0x7f3   : > { %13302 = vst [vmem:[#allocation126_spill] sm:$0xff] %v11953_v25  ;;  %v11975_v55 = vmul.f32 %v4227_v62, %v11878_v33  ;;  %v11978_v27 = vadd.f32 %v3867_v16, %v13125_v37  ;;  %v11981_v59 = vadd.f32 %v3600_v57, %v13127_v38  ;;  %v11984_v40 = vmul.f32 %v4228_v15, %v11893_v28 }
 0x7f4   : > { %13303 = vst [vmem:[#allocation127_spill] sm:$0xff] %v11958_v14  ;;  %v4863_v14 = vadd.f32 1.0, %v7053_v45  ;;  %v11988_v49 = vadd.f32 %v11757_v31, %v13127_v38  ;;  %v11991_v39 = vadd.f32 %v3689_v3, %v13133_v42  ;;  %v11994_v1 = vadd.f32 %v4357_v7, %v11859_v8  ;;  %v13308_v7 = vld [vmem:[#allocation95_spill] sm:$0xff] }
 0x7f5   : > { %13304 = vst [vmem:[#allocation128_spill] sm:$0xff] %v11961_v2  ;;  %v7055_v2 = vpop.eup %7054  ;;  %v3781_v62 = vpop.f32.mrf.mxu1  ;;  %v4373_v16 = vmul.f32 %v4245_v29, %v11905_v50  ;;  %v11998_v57 = vmul.f32 %v4105_v17, %v11927_v21  ;;  %v12001_v15 = vmul.f32 %v4106_v5, %v11936_v44  ;;  %v4121_v45 = vmul.f32 0.044715, %v11966_v26  ;;  %v13309_v29 = vld [vmem:[#allocation93_spill] sm:$0xff]  ;;  %v13319_v44 = vld [vmem:[#allocation96_spill] sm:$0xff] }
 0x7f6   : > { %13305 = vst [vmem:[#allocation129_spill] sm:$0xff] %v11988_v49  ;;  %v3870_v63 = vpop.f32.mrf.mxu0  ;;  %v4374_v31 = vmul.f32 %v4246_v10, %v11911_v23  ;;  %v12007_v3 = vadd.f32 %v11759_v12, %v13133_v42  ;;  %v4243_v56 = vmul.f32 %v4115_v22, %v11941_v4  ;;  %v4244_v8 = vmul.f32 %v4116_v24, %v11944_v53  ;;  %v13311_v17 = vld [vmem:[#allocation97_spill] sm:$0xff]  ;;  %v13318_v24 = vld [vmem:[#allocation94_spill] sm:$0xff] }
 0x7f7   : > { %13306 = vst [vmem:[#allocation130_spill] sm:$0xff] %v11994_v1  ;;  %v13310_v43 = vpack.c.bf16 %v13308_v7, %v13309_v29  ;;  %v13313_v5 = vpack.c.bf16 %v13311_v17, %v13312_v11  ;;  %v12018_v25 = vmul.f32 0.5, %v11927_v21  ;;  %v4122_v10 = vmul.f32 0.044715, %v11978_v27  ;;  %v7155_v17 = vld [vmem:[%s12628_s7] sm:$0x3f] }
 0x7f8   : > { %13307 = vst [vmem:[#allocation131_spill] sm:$0xff] %v12001_v15  ;;  %v4119_v12 = vmul.f32 0.044715, %v11981_v59  ;;  %v13316_v15 = vld [vmem:[#allocation16_spill] sm:$0xff]  ;;  %v13320_v30 = vpack.c.bf16 %v13318_v24, %v13319_v44  ;;  %v12031_v11 = vadd.f32 1.0, %v7055_v2  ;;  %v4249_v44 = vmul.f32 %v4121_v45, %v11966_v26 }
 0x7f9   : > { %5391 = vmatmul.bf16.gmra.mxu2 %v13310_v43  ;;  %5480 = vmatmul.bf16.gmra.mxu3 %v13313_v5  ;;  %13314 = vst [vmem:[#allocation95_spill] sm:$0xff] %v12018_v25  ;;  %v13317_v22 = vpack.c.bf16 %v13315_v36, %v13316_v15  ;;  %v12029_v43 = vmul.f32 %v4863_v14, %v11902_v32  ;;  %v12034_v7 = vmul.f32 0.044715, %v11988_v49  ;;  %v4120_v29 = vmul.f32 0.044715, %v11991_v39 }
 0x7fa   : > { %5658 = vmatmul.bf16.gmra.mxu0 %v13320_v30  ;;  %v12040_v36 = vperm.slane %v7155_v17, 5  ;;  %v4501_v15 = vadd.f32 %v4373_v16, %v11905_v50  ;;  %v12045_v32 = vadd.f32 %v3781_v62, %v13122_v47  ;;  %v12048_v30 = vadd.f32 %v3870_v63, %v13125_v37  ;;  %v3603_v14 = vpop.f32.mrf.mxu2  ;;  %v3692_v2 = vpop.f32.mrf.mxu3 }
 0x7fb   : > { %5569 = vmatmul.bf16.gmra.mxu1 %v13317_v22  ;;  %13321 = vst [vmem:[#allocation93_spill] sm:$0xff] %v12029_v43  ;;  %v4502_v5 = vadd.f32 %v4374_v31, %v11911_v23  ;;  %v4371_v22 = vmul.f32 %v4243_v56, %v11941_v4  ;;  %v4372_v24 = vmul.f32 %v4244_v8, %v11944_v53  ;;  %v12054_v17 = vmul.f32 0.5, %v11905_v50  ;;  %v13333_v43 = vld [vmem:[#allocation104_spill] sm:$0xff] }
 0x7fc   : > { %13322 = vst [vmem:[#allocation97_spill] sm:$0xff] %v12034_v7  ;;  %v12057_v16 = vmul.f32 0.5, %v11911_v23  ;;  %v4250_v62 = vmul.f32 %v4122_v10, %v11978_v27  ;;  %v4247_v45 = vmul.f32 %v4119_v12, %v11981_v59  ;;  %v12062_v63 = vadd.f32 %v3603_v14, %v13127_v38 }
 0x7fd   : > { %v4629_v25 = vmul.f32 0.7978846, %v4501_v15  ;;  %v4248_v31 = vmul.f32 %v4120_v29, %v11991_v39  ;;  %v3783_v20 = vpop.f32.mrf.mxu1  ;;  %v12066_v8 = vmul.f32 0.5, %v11941_v4  ;;  %v4499_v50 = vadd.f32 %v4371_v22, %v11941_v4 }
 0x7fe   : > { %v3872_v56 = vpop.f32.mrf.mxu0  ;;  %v4500_v23 = vadd.f32 %v4372_v24, %v11944_v53  ;;  %v4125_v13 = vmul.f32 0.044715, %v12045_v32  ;;  %v4126_v10 = vmul.f32 0.044715, %v12048_v30  ;;  %v4377_v12 = vmul.f32 %v4249_v44, %v11966_v26 }
 0x7ff   : > { %v4630_v14 = vmul.f32 0.7978846, %v4502_v5  ;;  %v12074_v15 = vadd.f32 %v3692_v2, %v13133_v42  ;;  %v4627_v29 = vmul.f32 0.7978846, %v4499_v50  ;;  %v12077_v18 = vmul.f32 0.5, %v11944_v53 }
 0x800   : > { %7056 = vtanh.f32 %v4629_v25  ;;  %v4123_v46 = vmul.f32 0.044715, %v12062_v63  ;;  %v12081_v4 = vmul.f32 0.5, %v11966_v26  ;;  %v4505_v22 = vadd.f32 %v4377_v12, %v11966_v26 }
 0x801   : > { %v12085_v24 = vmul.f32 0.5, %v11978_v27  ;;  %v12088_v44 = vadd.f32 %v3783_v20, %v13122_v47  ;;  %7058 = vtanh.f32 %v4627_v29  ;;  %v4628_v2 = vmul.f32 0.7978846, %v4500_v23 }
 0x802   : > { %v4378_v5 = vmul.f32 %v4250_v62, %v11978_v27  ;;  %v4253_v53 = vmul.f32 %v4125_v13, %v12045_v32  ;;  %v12093_v25 = vadd.f32 %v3872_v56, %v13125_v37  ;;  %v3605_v50 = vpop.f32.mrf.mxu2  ;;  %v3694_v1 = vpop.f32.mrf.mxu3  ;;  %v4633_v34 = vmul.f32 0.7978846, %v4505_v22 }
 0x803   : > { %7060 = vtanh.f32 %v4630_v14  ;;  %v4124_v26 = vmul.f32 0.044715, %v12074_v15  ;;  %v12097_v12 = vadd.f32 %v3605_v50, %v13127_v38  ;;  %v4375_v20 = vmul.f32 %v4247_v45, %v11981_v59 }
 0x804   : > { %v4376_v23 = vmul.f32 %v4248_v31, %v11991_v39  ;;  %v4254_v62 = vmul.f32 %v4126_v10, %v12048_v30  ;;  %v12103_v13 = vadd.f32 %v3694_v1, %v13133_v42  ;;  %7062 = vtanh.f32 %v4628_v2  ;;  %v13324_v42 = vld [vmem:[#allocation98_spill] sm:$0xff] }
 0x805   : > { %v4506_v56 = vadd.f32 %v4378_v5, %v11978_v27  ;;  %v4251_v14 = vmul.f32 %v4123_v46, %v12062_v63  ;;  %v4129_v22 = vmul.f32 0.044715, %v12088_v44  ;;  %v5535_v37 = vpop.f32.mrf.mxu1  ;;  %v4503_v38 = vadd.f32 %v4375_v20, %v11981_v59  ;;  %v13323_v46 = vld [vmem:[#allocation100_spill] sm:$0xff] }
 0x806   : > { %v7057_v29 = vpop.eup %7056  ;;  %v5624_v50 = vpop.f32.mrf.mxu0  ;;  %v4504_v45 = vadd.f32 %v4376_v23, %v11991_v39  ;;  %v4130_v31 = vmul.f32 0.044715, %v12093_v25  ;;  %7064 = vtanh.f32 %v4633_v34  ;;  %v4381_v1 = vmul.f32 %v4253_v53, %v12045_v32  ;;  %v13330_v53 = vld [vmem:[#allocation99_spill] sm:$0xff] }
 0x807   : > { %v4634_v10 = vmul.f32 0.7978846, %v4506_v56  ;;  %v7059_v2 = vpop.eup %7058  ;;  %v4252_v27 = vmul.f32 %v4124_v26, %v12074_v15  ;;  %v4127_v5 = vmul.f32 0.044715, %v12097_v12  ;;  %v13325_v47 = vpack.c.bf16 %v13323_v46, %v13324_v42  ;;  %v13329_v56 = vld [vmem:[#allocation102_spill] sm:$0xff]  ;;  %v13332_v26 = vld [vmem:[#allocation105_spill] sm:$0xff] }
 0x808   : > { %v13328_v20 = vpack.c.bf16 %v13326_v52, %v13327_v6  ;;  %v4631_v23 = vmul.f32 0.7978846, %v4503_v38  ;;  %v4632_v58 = vmul.f32 0.7978846, %v4504_v45  ;;  %v4128_v34 = vmul.f32 0.044715, %v12103_v13 }
 0x809   : > { %5396 = vmatmul.bf16.gmra.mxu2 %v13325_v47  ;;  %v7061_v7 = vpop.eup %7060  ;;  %v13331_v49 = vpack.c.bf16 %v13329_v56, %v13330_v53  ;;  %v13334_v60 = vpack.c.bf16 %v13332_v26, %v13333_v43  ;;  %v3991_v42 = vmul.f32 0.5, %v11981_v59  ;;  %v4885_v47 = vadd.f32 1.0, %v7057_v29 }
 0x80a   : > { %5485 = vmatmul.bf16.gmra.mxu3 %v13328_v20  ;;  %7066 = vtanh.f32 %v4634_v10  ;;  %v4257_v6 = vmul.f32 %v4129_v22, %v12088_v44  ;;  %v4883_v38 = vadd.f32 1.0, %v7059_v2  ;;  %v3992_v52 = vmul.f32 0.5, %v11991_v39  ;;  %v7063_v45 = vpop.eup %7062  ;;  %v5357_v20 = vpop.f32.mrf.mxu2 }
 0x80b   : > { %5574 = vmatmul.bf16.gmra.mxu1 %v13331_v49  ;;  %5663 = vmatmul.bf16.gmra.mxu0 %v13334_v60  ;;  %7068 = vtanh.f32 %v4631_v23  ;;  %v4258_v46 = vmul.f32 %v4130_v31, %v12093_v25  ;;  %v5446_v56 = vpop.f32.mrf.mxu3  ;;  %v4886_v49 = vadd.f32 1.0, %v7061_v7  ;;  %v4509_v43 = vadd.f32 %v4381_v1, %v12045_v32 }
 0x80c   : > { %7070 = vtanh.f32 %v4632_v58  ;;  %v4255_v60 = vmul.f32 %v4127_v5, %v12097_v12  ;;  %v5358_v59 = vadd.f32 %v5357_v20, %v12040_v36  ;;  %v4884_v29 = vadd.f32 1.0, %v7063_v45  ;;  %v7065_v10 = vpop.eup %7064 }
 0x80d   : > { %v4379_v22 = vmul.f32 %v4251_v14, %v12062_v63  ;;  %v4256_v2 = vmul.f32 %v4128_v34, %v12103_v13  ;;  %v12137_v39 = vmul.f32 %v4885_v47, %v12054_v17  ;;  %v4380_v31 = vmul.f32 %v4252_v27, %v12074_v15  ;;  %v5537_v7 = vpop.f32.mrf.mxu1 }
 0x80e   : > { %v4637_v23 = vmul.f32 0.7978846, %v4509_v43  ;;  %v5447_v58 = vadd.f32 %v5446_v56, %v5358_v59  ;;  %v12140_v53 = vpop.f32.mrf.mxu0  ;;  %v12143_v1 = vmul.f32 %v4883_v38, %v12066_v8  ;;  %v4889_v5 = vadd.f32 1.0, %v7065_v10 }
 0x80f   : > { %v4507_v26 = vadd.f32 %v4379_v22, %v12062_v63  ;;  %v12147_v45 = vmul.f32 %v4886_v49, %v12057_v16  ;;  %v4508_v17 = vadd.f32 %v4380_v31, %v12074_v15  ;;  %v4385_v34 = vmul.f32 %v4257_v6, %v12088_v44 }
 0x810   : > { %v7067_v14 = vpop.eup %7066  ;;  %v4382_v27 = vmul.f32 %v4254_v62, %v12048_v30  ;;  %v5536_v20 = vadd.f32 %v5535_v37, %v5447_v58  ;;  %v12153_v56 = vmul.f32 %v4884_v29, %v12077_v18  ;;  %v12156_v8 = vmul.f32 %v4889_v5, %v12081_v4 }
 0x811   : > { %v7069_v47 = vpop.eup %7068  ;;  %v4890_v38 = vadd.f32 1.0, %v7067_v14  ;;  %v4635_v22 = vmul.f32 0.7978846, %v4507_v26  ;;  %7072 = vtanh.f32 %v4637_v23  ;;  %v4386_v16 = vmul.f32 %v4258_v46, %v12093_v25  ;;  %v13335_v23 = vld [vmem:[#allocation21_spill] sm:$0xff] }
 0x812   : > { %v7071_v43 = vpop.eup %7070  ;;  %v4887_v59 = vadd.f32 1.0, %v7069_v47  ;;  %v5625_v49 = vadd.f32 %v5624_v50, %v5536_v20  ;;  %v5359_v18 = vpop.f32.mrf.mxu2  ;;  %v4636_v4 = vmul.f32 0.7978846, %v4508_v17  ;;  %v4513_v31 = vadd.f32 %v4385_v34, %v12088_v44 }
 0x813   : > { %v4888_v10 = vadd.f32 1.0, %v7071_v43  ;;  %v12162_v37 = vmul.f32 %v4890_v38, %v12085_v24  ;;  %v5448_v6 = vpop.f32.mrf.mxu3  ;;  %v4510_v58 = vadd.f32 %v4382_v27, %v12048_v30  ;;  %v5360_v50 = vadd.f32 %v5359_v18, %v12040_v36 }
 0x814   : > { %v12164_v29 = vmul.f32 %v4887_v59, %v3991_v42  ;;  %v5704_v5 = vmul.f32 %v5625_v49, %v13335_v23  ;;  %v4383_v42 = vmul.f32 %v4255_v60, %v12097_v12  ;;  %7074 = vtanh.f32 %v4635_v22 }
 0x815   : > { %v12170_v46 = vmul.f32 %v4888_v10, %v3992_v52  ;;  %v4384_v14 = vmul.f32 %v4256_v2, %v12103_v13  ;;  %v5449_v34 = vadd.f32 %v5448_v6, %v5360_v50  ;;  %v5540_v27 = vpop.f32.mrf.mxu1  ;;  %v4641_v20 = vmul.f32 0.7978846, %v4513_v31  ;;  %v13336_v2 = vld [vmem:[#allocation43_spill] sm:$0xff]  ;;  %v13339_v31 = vld [vmem:[#allocation108_spill] sm:$0xff] }
 0x816   : > { %v5736_v17 = vadd.f32 %v5704_v5, %v13335_v23  ;;  %v12179_v47 = vpop.f32.mrf.mxu0  ;;  %v4511_v43 = vadd.f32 %v4383_v42, %v12097_v12  ;;  %7076 = vtanh.f32 %v4636_v4  ;;  %v4514_v60 = vadd.f32 %v4386_v16, %v12093_v25  ;;  %v13340_v23 = vld [vmem:[#allocation71_spill] sm:$0xff]  ;;  %v13384_v52 = vld [vmem:[#allocation48_spill] sm:$0xff] }
 0x817   : > { %v7073_v38 = vpop.eup %7072  ;;  %v4512_v59 = vadd.f32 %v4384_v14, %v12103_v13  ;;  %v5538_v49 = vadd.f32 %v5537_v7, %v5449_v34  ;;  %v13337_v10 = vpack.c.bf16 %v11717_v19, %v11666_v51  ;;  %v13338_v18 = vpack.c.bf16 %v11742_v61, %v11670_v0  ;;  %v13343_v14 = vld [vmem:[#allocation22_spill] sm:$0xff]  ;;  %v13344_v34 = vld [vmem:[#allocation89_spill] sm:$0xff] }
 0x818   : > { %v5768_v22 = vadd.f32 %v5736_v17, %v13336_v2  ;;  %7078 = vtanh.f32 %v4641_v20  ;;  %v4638_v6 = vmul.f32 0.7978846, %v4510_v58  ;;  %v13341_v5 = vpack.c.bf16 %v13339_v31, %v13340_v23  ;;  %v13345_v20 = vld [vmem:[#allocation93_spill] sm:$0xff] }
 0x819   : > { %5401 = vmatmul.bf16.gmra.mxu2 %v13337_v10  ;;  %v13342_v16 = vpack.c.bf16 %v11777_v35, %v11789_v41  ;;  %v4483_v7 = vadd.f32 %v11975_v55, %v11878_v33  ;;  %v4639_v4 = vmul.f32 0.7978846, %v4511_v43  ;;  %v4640_v51 = vmul.f32 0.7978846, %v4512_v59  ;;  %v13347_v2 = vld [vmem:[#allocation97_spill] sm:$0xff] }
 0x81a   : > { %5490 = vmatmul.bf16.gmra.mxu3 %v13338_v18  ;;  %v4642_v19 = vmul.f32 0.7978846, %v4514_v60  ;;  %v4104_v50 = vmul.f32 0.044715, %v12007_v3  ;;  %5800 = vst [vmem:[%s12203_s20] sm:$0xff] %v5768_v22  ;;  %v5627_v0 = vadd.f32 %v12140_v53, %v5538_v49  ;;  %7080 = vtanh.f32 %v4638_v6  ;;  %v7075_v35 = vpop.eup %7074  ;;  %v5362_v41 = vpop.f32.mrf.mxu2  ;;  %v13346_v60 = vld [vmem:[#allocation129_spill] sm:$0xff] }
 0x81b   : > { %5579 = vmatmul.bf16.gmra.mxu1 %v13341_v5  ;;  %5668 = vmatmul.bf16.gmra.mxu0 %v13342_v16  ;;  %v5451_v58 = vpop.f32.mrf.mxu3  ;;  %v12211_v33 = vmul.f32 %v12031_v11, %v11908_v48  ;;  %v4484_v55 = vadd.f32 %v11984_v40, %v11893_v28  ;;  %v4361_v42 = vmul.f32 %v11998_v57, %v11927_v21  ;;  %7082 = vtanh.f32 %v4639_v4 }
 0x81c   : > { %v5705_v53 = vmul.f32 %v5627_v0, %v13343_v14  ;;  %v5363_v17 = vadd.f32 %v5362_v41, %v12040_v36  ;;  %7084 = vtanh.f32 %v4640_v51  ;;  %v7077_v59 = vpop.eup %7076  ;;  %v4231_v48 = vmul.f32 %v13347_v2, %v13346_v60 }
 0x81d   : > { %v12223_v11 = vmul.f32 0.7978846, %v4483_v7  ;;  %v4893_v22 = vadd.f32 1.0, %v7073_v38  ;;  %7086 = vtanh.f32 %v4642_v19  ;;  %v4232_v40 = vmul.f32 %v4104_v50, %v12007_v3  ;;  %v5542_v10 = vpop.f32.mrf.mxu1  ;;  %v13348_v38 = vld [vmem:[#allocation46_spill] sm:$0xff] }
 0x81e   : > { %v7079_v28 = vpop.eup %7078  ;;  %v5737_v57 = vadd.f32 %v5705_v53, %v13343_v14  ;;  %v5452_v49 = vadd.f32 %v5451_v58, %v5363_v17  ;;  %v5631_v18 = vpop.f32.mrf.mxu0  ;;  %v3997_v6 = vmul.f32 0.5, %v12045_v32  ;;  %v4891_v31 = vadd.f32 1.0, %v7075_v35 }
 0x81f   : > { %v4001_v23 = vmul.f32 0.5, %v12088_v44  ;;  %v4897_v5 = vadd.f32 1.0, %v7079_v28  ;;  %v3998_v16 = vmul.f32 0.5, %v12048_v30  ;;  %v3995_v19 = vmul.f32 0.5, %v12062_v63 }
 0x820   : > { %v7081_v7 = vpop.eup %7080  ;;  %v5769_v4 = vadd.f32 %v5737_v57, %v13348_v38  ;;  %v5541_v51 = vadd.f32 %v5540_v27, %v5452_v49  ;;  %v3996_v50 = vmul.f32 0.5, %v12074_v15  ;;  %v4892_v41 = vadd.f32 1.0, %v7077_v59  ;;  %v13349_v57 = vld [vmem:[#allocation25_spill] sm:$0xff] }
 0x821   : > { %v7083_v0 = vpop.eup %7082  ;;  %v12233_v58 = vmul.f32 %v4893_v22, %v3997_v6  ;;  %v12235_v32 = vmul.f32 %v4897_v5, %v4001_v23  ;;  %v4894_v35 = vadd.f32 1.0, %v7081_v7  ;;  %v3999_v30 = vmul.f32 0.5, %v12097_v12 }
 0x822   : > { %v7085_v14 = vpop.eup %7084  ;;  %5801 = vst [vmem:[%s12203_s20 + $0x8] sm:$0xff] %v5769_v4  ;;  %v5630_v44 = vadd.f32 %v12179_v47, %v5541_v51  ;;  %v4895_v53 = vadd.f32 1.0, %v7083_v0  ;;  %v4002_v27 = vmul.f32 0.5, %v12093_v25  ;;  %v5364_v63 = vpop.f32.mrf.mxu2  ;;  %v12241_v15 = vmul.f32 %v4891_v31, %v3995_v19 }
 0x823   : > { %v7087_v17 = vpop.eup %7086  ;;  %v5453_v2 = vpop.f32.mrf.mxu3  ;;  %v4000_v59 = vmul.f32 0.5, %v12103_v13  ;;  %v4896_v22 = vadd.f32 1.0, %v7085_v14  ;;  %v5365_v47 = vadd.f32 %v5364_v63, %v12040_v36  ;;  %v4612_v23 = vmul.f32 0.7978846, %v4484_v55 }
 0x824   : > { %v5706_v49 = vmul.f32 %v5630_v44, %v13349_v57  ;;  %v12248_v6 = vmul.f32 %v4895_v53, %v3999_v30  ;;  %v4898_v12 = vadd.f32 1.0, %v7087_v17  ;;  %v12250_v25 = vmul.f32 %v4892_v41, %v3996_v50  ;;  %v13352_v41 = vld [vmem:[#allocation44_spill] sm:$0xff]  ;;  %v13354_v30 = vld [vmem:[#allocation117_spill] sm:$0xff] }
 0x825   : > { %v12252_v5 = vmul.f32 %v4896_v22, %v4000_v59  ;;  %v12254_v31 = vmul.f32 %v4894_v35, %v3998_v16  ;;  %v5454_v7 = vadd.f32 %v5453_v2, %v5365_v47  ;;  %v5545_v38 = vpop.f32.mrf.mxu1  ;;  %v4359_v0 = vmul.f32 %v4231_v48, %v13346_v60  ;;  %v13353_v44 = vld [vmem:[#allocation116_spill] sm:$0xff]  ;;  %v13359_v48 = vld [vmem:[#allocation130_spill] sm:$0xff]  ;;  %v13362_v22 = vld [vmem:[#allocation115_spill] sm:$0xff] }
 0x826   : > { %v5738_v13 = vadd.f32 %v5706_v49, %v13349_v57  ;;  %v5634_v4 = vpop.f32.mrf.mxu0  ;;  %v12259_v19 = vmul.f32 %v4898_v12, %v4002_v27  ;;  %v4360_v55 = vmul.f32 %v4232_v40, %v12007_v3  ;;  %v4489_v50 = vadd.f32 %v4361_v42, %v11927_v21  ;;  %v13356_v17 = vld [vmem:[#allocation80_spill] sm:$0xff]  ;;  %v13357_v27 = vld [vmem:[#allocation119_spill] sm:$0xff]  ;;  %v13363_v57 = vld [vmem:[#allocation114_spill] sm:$0xff] }
 0x827   : > { %13350 = vst [vmem:[#allocation92_spill] sm:$0xff] %v12254_v31  ;;  %v5543_v14 = vadd.f32 %v5542_v10, %v5454_v7  ;;  %v13355_v53 = vpack.c.bf16 %v13353_v44, %v13354_v30  ;;  %v13358_v63 = vpack.c.bf16 %v13356_v17, %v13357_v27  ;;  %v4613_v2 = vmul.f32 0.7978846, %v13359_v48  ;;  %v13360_v21 = vld [vmem:[#allocation75_spill] sm:$0xff]  ;;  %v13366_v47 = vld [vmem:[#allocation125_spill] sm:$0xff]  ;;  %v13369_v44 = vld [vmem:[#allocation90_spill] sm:$0xff] }
 0x828   : > { %13351 = vst [vmem:[#allocation85_spill] sm:$0xff] %v12259_v19  ;;  %v5770_v35 = vadd.f32 %v5738_v13, %v13352_v41  ;;  %v13361_v42 = vld [vmem:[#allocation111_spill] sm:$0xff]  ;;  %v13364_v10 = vpack.c.bf16 %v13362_v22, %v13363_v57  ;;  %v13368_v13 = vld [vmem:[#allocation124_spill] sm:$0xff]  ;;  %v12289_v41 = vmul.f32 0.5, %v13346_v60  ;;  %v13371_v17 = vld [vmem:[#allocation77_spill] sm:$0xff]  ;;  %7088 = vtanh.f32 %v12223_v11 }
 0x829   : > { %5406 = vmatmul.bf16.gmra.mxu2 %v13355_v53  ;;  %v12278_v59 = vadd.f32 %v13361_v42, %v13360_v21  ;;  %v13365_v49 = vld [vmem:[#allocation123_spill] sm:$0xff]  ;;  %v13372_v27 = vld [vmem:[#allocation68_spill] sm:$0xff]  ;;  %v5632_v48 = vadd.f32 %v5631_v18, %v5543_v14  ;;  %v13373_v42 = vld [vmem:[#allocation122_spill] sm:$0xff]  ;;  %v4487_v40 = vadd.f32 %v4359_v0, %v13346_v60  ;;  %7090 = vtanh.f32 %v4612_v23 }
 0x82a   : > { %5495 = vmatmul.bf16.gmra.mxu3 %v13358_v63  ;;  %v13367_v12 = vpack.c.bf16 %v13365_v49, %v13366_v47  ;;  %v13370_v30 = vld [vmem:[#allocation131_spill] sm:$0xff]  ;;  %v12295_v63 = vadd.f32 %v13372_v27, %v13371_v17  ;;  %5802 = vst [vmem:[%s12203_s20 + $0x10] sm:$0xff] %v5770_v35  ;;  %v13374_v22 = vld [vmem:[#allocation126_spill] sm:$0xff]  ;;  %v5367_v47 = vpop.f32.mrf.mxu2  ;;  %v13377_v18 = vld [vmem:[#allocation53_spill] sm:$0xff]  ;;  %v4488_v14 = vadd.f32 %v4360_v55, %v12007_v3  ;;  %7092 = vtanh.f32 %v4613_v2 }
 0x82b   : > { %5584 = vmatmul.bf16.gmra.mxu1 %v13364_v10  ;;  %v4362_v53 = vmul.f32 %v13370_v30, %v13369_v44  ;;  %v4486_v57 = vadd.f32 %v13374_v22, %v13373_v42  ;;  %v13375_v10 = vld [vmem:[#allocation107_spill] sm:$0xff]  ;;  %v4617_v30 = vmul.f32 0.7978846, %v4489_v50  ;;  %v13376_v27 = vld [vmem:[#allocation118_spill] sm:$0xff]  ;;  %v5707_v35 = vmul.f32 %v5632_v48, %v13377_v18  ;;  %v13379_v22 = vld [vmem:[#allocation120_spill] sm:$0xff] }
 0x82c   : > { %5673 = vmatmul.bf16.gmra.mxu0 %v13367_v12  ;;  %v12303_v49 = vadd.f32 %v13375_v10, %v13360_v21  ;;  %v5456_v12 = vpop.f32.mrf.mxu3  ;;  %v12308_v28 = vadd.f32 %v13376_v27, %v13371_v17  ;;  %v5368_v11 = vadd.f32 %v5367_v47, %v12040_v36  ;;  %v4109_v42 = vmul.f32 0.044715, %v12278_v59  ;;  %v13378_v21 = vld [vmem:[#allocation78_spill] sm:$0xff]  ;;  %v13380_v0 = vld [vmem:[#allocation76_spill] sm:$0xff]  ;;  %v13382_v16 = vld [vmem:[#allocation109_spill] sm:$0xff] }
 0x82d   : > { %v12316_v10 = vadd.f32 %v13379_v22, %v13378_v21  ;;  %v4490_v60 = vadd.f32 %v4362_v53, %v13369_v44  ;;  %v4107_v23 = vmul.f32 0.044715, %v12295_v63  ;;  %v13381_v50 = vld [vmem:[#allocation110_spill] sm:$0xff]  ;;  %v5739_v48 = vadd.f32 %v5707_v35, %v13377_v18  ;;  %v5547_v27 = vpop.f32.mrf.mxu1 }
 0x82e   : > { %v12322_v17 = vadd.f32 %v13381_v50, %v13380_v0  ;;  %v5457_v47 = vadd.f32 %v5456_v12, %v5368_v11  ;;  %v5636_v55 = vpop.f32.mrf.mxu0  ;;  %v12327_v51 = vadd.f32 %v13382_v16, %v13380_v0  ;;  %v13383_v22 = vld [vmem:[#allocation106_spill] sm:$0xff]  ;;  %v4113_v53 = vmul.f32 0.044715, %v12303_v49  ;;  %v7089_v62 = vpop.eup %7088 }
 0x82f   : > { %v12331_v2 = vadd.f32 %v13383_v22, %v13378_v21  ;;  %v4615_v26 = vmul.f32 0.7978846, %v4487_v40  ;;  %v4111_v50 = vmul.f32 0.044715, %v12308_v28  ;;  %v5771_v18 = vadd.f32 %v5739_v48, %v13384_v52  ;;  %v7091_v11 = vpop.eup %7090 }
 0x830   : > { %v5546_v12 = vadd.f32 %v5545_v38, %v5457_v47  ;;  %v4616_v35 = vmul.f32 0.7978846, %v4488_v14  ;;  %v4237_v24 = vmul.f32 %v4109_v42, %v12278_v59  ;;  %v4112_v16 = vmul.f32 0.044715, %v12316_v10  ;;  %v7093_v7 = vpop.eup %7092 }
 0x831   : > { %v4614_v0 = vmul.f32 0.7978846, %v4486_v57  ;;  %v4618_v61 = vmul.f32 0.7978846, %v4490_v60  ;;  %v4235_v21 = vmul.f32 %v4107_v23, %v12295_v63  ;;  %v4114_v22 = vmul.f32 0.044715, %v12322_v17 }
 0x832   : > { %5803 = vst [vmem:[%s12203_s20 + $0x18] sm:$0xff] %v5771_v18  ;;  %v5635_v40 = vadd.f32 %v5634_v4, %v5546_v12  ;;  %7094 = vtanh.f32 %v4617_v30  ;;  %v4110_v43 = vmul.f32 0.044715, %v12327_v51  ;;  %v4108_v52 = vmul.f32 0.044715, %v12331_v2  ;;  %v5369_v14 = vpop.f32.mrf.mxu2  ;;  %v13385_v60 = vld [vmem:[#allocation27_spill] sm:$0xff] }
 0x833   : > { %v4241_v38 = vmul.f32 %v4113_v53, %v12303_v49  ;;  %7096 = vtanh.f32 %v4615_v26  ;;  %v4239_v57 = vmul.f32 %v4111_v50, %v12308_v28  ;;  %v5370_v23 = vadd.f32 %v5369_v14, %v12040_v36 }
 0x834   : > { %v5458_v42 = vpop.f32.mrf.mxu3  ;;  %v5708_v48 = vmul.f32 %v5635_v40, %v13385_v60  ;;  %7098 = vtanh.f32 %v4616_v35  ;;  %v4240_v4 = vmul.f32 %v4112_v16, %v12316_v10  ;;  %v4867_v30 = vadd.f32 1.0, %v7089_v62 }
 0x835   : > { %7100 = vtanh.f32 %v4618_v61  ;;  %v4365_v47 = vmul.f32 %v4237_v24, %v12278_v59  ;;  %v4242_v18 = vmul.f32 %v4114_v22, %v12322_v17  ;;  %v5459_v12 = vadd.f32 %v5458_v42, %v5370_v23  ;;  %v13386_v61 = vld [vmem:[#allocation45_spill] sm:$0xff] }
 0x836   : > { %v5740_v53 = vadd.f32 %v5708_v48, %v13385_v60  ;;  %v5550_v31 = vpop.f32.mrf.mxu1  ;;  %v5639_v26 = vpop.f32.mrf.mxu0  ;;  %v4363_v50 = vmul.f32 %v4235_v21, %v12295_v63  ;;  %v4238_v40 = vmul.f32 %v4110_v43, %v12327_v51  ;;  %v4236_v14 = vmul.f32 %v4108_v52, %v12331_v2  ;;  %v13390_v52 = vld [vmem:[#allocation87_spill] sm:$0xff] }
 0x837   : > { %v4868_v35 = vadd.f32 1.0, %v7091_v11  ;;  %v4369_v16 = vmul.f32 %v4241_v38, %v12303_v49  ;;  %v5548_v19 = vadd.f32 %v5547_v27, %v5459_v12  ;;  %v13387_v22 = vpack.c.bf16 %v13345_v20, %v13344_v34  ;;  %v13389_v11 = vld [vmem:[#allocation88_spill] sm:$0xff] }
 0x838   : > { %v7095_v62 = vpop.eup %7094  ;;  %v5772_v24 = vadd.f32 %v5740_v53, %v13386_v61  ;;  %v13388_v42 = vpack.c.bf16 %v12211_v33, %v13368_v13  ;;  %7102 = vtanh.f32 %v4614_v0  ;;  %v4367_v43 = vmul.f32 %v4239_v57, %v12308_v28  ;;  %v13393_v57 = vld [vmem:[#allocation127_spill] sm:$0xff] }
 0x839   : > { %5411 = vmatmul.bf16.gmra.mxu2 %v13387_v22  ;;  %v7097_v21 = vpop.eup %7096  ;;  %v13391_v38 = vpack.c.bf16 %v13389_v11, %v13390_v52  ;;  %v13392_v60 = vpack.c.bf16 %v11968_v9, %v11932_v54  ;;  %v3976_v27 = vmul.f32 0.5, %v12007_v3  ;;  %v3978_v34 = vmul.f32 0.5, %v13369_v44  ;;  %v13394_v3 = vld [vmem:[#allocation128_spill] sm:$0xff] }
 0x83a   : > { %5500 = vmatmul.bf16.gmra.mxu3 %v13388_v42  ;;  %v4368_v20 = vmul.f32 %v4240_v4, %v12316_v10  ;;  %v4493_v33 = vadd.f32 %v4365_v47, %v12278_v59  ;;  %v7099_v13 = vpop.eup %7098  ;;  %5804 = vst [vmem:[%s12203_s20 + $0x20] sm:$0xff] %v5772_v24  ;;  %v5637_v0 = vadd.f32 %v5636_v55, %v5548_v19  ;;  %v5372_v9 = vpop.f32.mrf.mxu2  ;;  %v4869_v44 = vadd.f32 1.0, %v7093_v7  ;;  %v13395_v24 = vld [vmem:[#allocation54_spill] sm:$0xff] }
 0x83b   : > { %5589 = vmatmul.bf16.gmra.mxu1 %v13391_v38  ;;  %v12375_v48 = vmul.f32 %v4867_v30, %v13393_v57  ;;  %v4491_v23 = vadd.f32 %v4363_v50, %v12295_v63  ;;  %v4370_v53 = vmul.f32 %v4242_v18, %v12322_v17  ;;  %v7101_v54 = vpop.eup %7100  ;;  %v12380_v61 = vmul.f32 %v4868_v35, %v13394_v3 }
 0x83c   : > { %5678 = vmatmul.bf16.gmra.mxu0 %v13392_v60  ;;  %v5461_v12 = vpop.f32.mrf.mxu3  ;;  %v4364_v4 = vmul.f32 %v4236_v14, %v12331_v2  ;;  %v4497_v47 = vadd.f32 %v4369_v16, %v12303_v49  ;;  %v5709_v19 = vmul.f32 %v5637_v0, %v13395_v24  ;;  %v5373_v55 = vadd.f32 %v5372_v9, %v12040_v36 }
 0x83d   : > { %v4495_v30 = vadd.f32 %v4367_v43, %v12308_v28  ;;  %v4366_v50 = vmul.f32 %v4238_v40, %v12327_v51  ;;  %v4871_v18 = vadd.f32 1.0, %v7097_v21  ;;  %v4872_v22 = vadd.f32 1.0, %v7099_v13  ;;  %v13396_v21 = vld [vmem:[#allocation49_spill] sm:$0xff] }
 0x83e   : > { %v4496_v42 = vadd.f32 %v4368_v20, %v12316_v10  ;;  %v4621_v11 = vmul.f32 0.7978846, %v4493_v33  ;;  %v7103_v35 = vpop.eup %7102  ;;  %v5741_v7 = vadd.f32 %v5709_v19, %v13395_v24  ;;  %v5462_v52 = vadd.f32 %v5461_v12, %v5373_v55  ;;  %v5552_v14 = vpop.f32.mrf.mxu1 }
 0x83f   : > { %v5641_v16 = vpop.f32.mrf.mxu0  ;;  %v4619_v38 = vmul.f32 0.7978846, %v4491_v23  ;;  %v4498_v60 = vadd.f32 %v4370_v53, %v12322_v17  ;;  %v4873_v0 = vadd.f32 1.0, %v7095_v62  ;;  %v4874_v57 = vadd.f32 1.0, %v7101_v54 }
 0x840   : > { %v4492_v43 = vadd.f32 %v4364_v4, %v12331_v2  ;;  %v4625_v40 = vmul.f32 0.7978846, %v4497_v47  ;;  %v5773_v13 = vadd.f32 %v5741_v7, %v13396_v21  ;;  %v5551_v9 = vadd.f32 %v5550_v31, %v5462_v52  ;;  %v13397_v4 = vld [vmem:[#allocation95_spill] sm:$0xff]  ;;  %v13398_v31 = vld [vmem:[#allocation30_spill] sm:$0xff] }
 0x841   : > { %v4623_v20 = vmul.f32 0.7978846, %v4495_v30  ;;  %v4494_v33 = vadd.f32 %v4366_v50, %v12327_v51  ;;  %v4999_v3 = vmul.f32 %v4871_v18, %v12289_v41  ;;  %v4870_v12 = vadd.f32 1.0, %v7103_v35 }
 0x842   : > { %v4624_v24 = vmul.f32 0.7978846, %v4496_v42  ;;  %7104 = vtanh.f32 %v4621_v11  ;;  %5805 = vst [vmem:[%s12203_s20 + $0x28] sm:$0xff] %v5773_v13  ;;  %v5640_v23 = vadd.f32 %v5639_v26, %v5551_v9  ;;  %v5000_v19 = vmul.f32 %v4872_v22, %v3976_v27  ;;  %v5374_v53 = vpop.f32.mrf.mxu2  ;;  %v13399_v42 = vld [vmem:[#allocation86_spill] sm:$0xff]  ;;  %v13400_v27 = vld [vmem:[#allocation84_spill] sm:$0xff] }
 0x843   : > { %7106 = vtanh.f32 %v4619_v38  ;;  %v4626_v62 = vmul.f32 0.7978846, %v4498_v60  ;;  %v5001_v47 = vmul.f32 %v4873_v0, %v13397_v4  ;;  %v5002_v55 = vmul.f32 %v4874_v57, %v3978_v34 }
 0x844   : > { %v5463_v54 = vpop.f32.mrf.mxu3  ;;  %v4620_v7 = vmul.f32 0.7978846, %v4492_v43  ;;  %7108 = vtanh.f32 %v4625_v40  ;;  %v5710_v30 = vmul.f32 %v5640_v23, %v13398_v31  ;;  %v5375_v50 = vadd.f32 %v5374_v53, %v12040_v36 }
 0x845   : > { %7110 = vtanh.f32 %v4623_v20  ;;  %v4622_v41 = vmul.f32 0.7978846, %v4494_v33  ;;  %v5075_v18 = vpack.c.bf16 %v4999_v3, %v12375_v48  ;;  %v4997_v26 = vmul.f32 %v4869_v44, %v13399_v42  ;;  %v13401_v48 = vld [vmem:[#allocation47_spill] sm:$0xff] }
 0x846   : > { %v4998_v22 = vmul.f32 %v4870_v12, %v13400_v27  ;;  %7112 = vtanh.f32 %v4624_v24  ;;  %v5742_v11 = vadd.f32 %v5710_v30, %v13398_v31  ;;  %v5464_v35 = vadd.f32 %v5463_v54, %v5375_v50  ;;  %v5555_v52 = vpop.f32.mrf.mxu1  ;;  %v13402_v12 = vld [vmem:[#allocation56_spill] sm:$0xff] }
 0x847   : > { %v5644_v34 = vpop.f32.mrf.mxu0  ;;  %v5076_v38 = vpack.c.bf16 %v5000_v19, %v12380_v61  ;;  %7114 = vtanh.f32 %v4626_v62  ;;  %v5077_v0 = vpack.c.bf16 %v5001_v47, %v4997_v26  ;;  %v3984_v31 = vmul.f32 0.5, %v12316_v10 }
 0x848   : > { %v7105_v60 = vpop.eup %7104  ;;  %v5078_v57 = vpack.c.bf16 %v5002_v55, %v4998_v22  ;;  %7116 = vtanh.f32 %v4620_v7  ;;  %v5774_v40 = vadd.f32 %v5742_v11, %v13401_v48  ;;  %v5553_v44 = vadd.f32 %v5552_v14, %v5464_v35 }
 0x849   : > { %v7107_v43 = vpop.eup %7106  ;;  %5416 = vmatmul.bf16.gmra.mxu2 %v5075_v18  ;;  %7118 = vtanh.f32 %v4622_v41  ;;  %v3979_v14 = vmul.f32 0.5, %v12295_v63  ;;  %v3983_v7 = vmul.f32 0.5, %v12308_v28  ;;  %v13403_v41 = vld [vmem:[#allocation50_spill] sm:$0xff]  ;;  %v3985_v27 = vmul.f32 0.5, %v12303_v49 }
 0x84a   : > { %5505 = vmatmul.bf16.gmra.mxu3 %v5076_v38  ;;  %v7109_v21 = vpop.eup %7108  ;;  %5806 = vst [vmem:[%s12203_s20 + $0x30] sm:$0xff] %v5774_v40  ;;  %v5642_v9 = vadd.f32 %v5641_v16, %v5553_v44  ;;  %v5377_v20 = vpop.f32.mrf.mxu2  ;;  %v4875_v26 = vadd.f32 1.0, %v7107_v43  ;;  %v4877_v22 = vadd.f32 1.0, %v7105_v60  ;;  %v3986_v11 = vmul.f32 0.5, %v12322_v17 }
 0x84b   : > { %5594 = vmatmul.bf16.gmra.mxu1 %v5077_v0  ;;  %v7111_v13 = vpop.eup %7110  ;;  %v5378_v23 = vadd.f32 %v5377_v20, %v12040_v36  ;;  %v4881_v30 = vadd.f32 1.0, %v7109_v21  ;;  %v3980_v28 = vmul.f32 0.5, %v12331_v2  ;;  %v3981_v40 = vmul.f32 0.5, %v12278_v59  ;;  %v13404_v21 = vld [vmem:[#allocation58_spill] sm:$0xff] }
 0x84c   : > { %5683 = vmatmul.bf16.gmra.mxu0 %v5078_v57  ;;  %v7113_v61 = vpop.eup %7112  ;;  %v5466_v33 = vpop.f32.mrf.mxu3  ;;  %v5711_v24 = vmul.f32 %v5642_v9, %v13402_v12  ;;  %v4879_v55 = vadd.f32 1.0, %v7111_v13  ;;  %v5003_v17 = vmul.f32 %v4875_v26, %v3979_v14 }
 0x84d   : > { %v7115_v3 = vpop.eup %7114  ;;  %v5467_v54 = vadd.f32 %v5466_v33, %v5378_v23  ;;  %v4880_v16 = vadd.f32 1.0, %v7113_v61  ;;  %v5009_v44 = vmul.f32 %v4881_v30, %v3985_v27  ;;  %v5005_v9 = vmul.f32 %v4877_v22, %v3981_v40 }
 0x84e   : > { %v7117_v19 = vpop.eup %7116  ;;  %v5743_v53 = vadd.f32 %v5711_v24, %v13402_v12  ;;  %v5557_v4 = vpop.f32.mrf.mxu1  ;;  %v4882_v50 = vadd.f32 1.0, %v7115_v3  ;;  %v5007_v0 = vmul.f32 %v4879_v55, %v3983_v7  ;;  %v13411_v40 = vpack.c.bf16 %v12170_v46, %v12153_v56 }
 0x84f   : > { %v7119_v62 = vpop.eup %7118  ;;  %v5646_v47 = vpop.f32.mrf.mxu0  ;;  %v5556_v42 = vadd.f32 %v5555_v52, %v5467_v54  ;;  %v4876_v63 = vadd.f32 1.0, %v7117_v19  ;;  %v5008_v57 = vmul.f32 %v4880_v16, %v3984_v31  ;;  %v3982_v52 = vmul.f32 0.5, %v12327_v51  ;;  %v13405_v51 = vld [vmem:[#allocation51_spill] sm:$0xff] }
 0x850   : > { %v5775_v18 = vadd.f32 %v5743_v53, %v13403_v41  ;;  %v4878_v35 = vadd.f32 1.0, %v7119_v62  ;;  %v5010_v43 = vmul.f32 %v4882_v50, %v3986_v11  ;;  %v5079_v3 = vpack.c.bf16 %v5007_v0, %v5003_v17  ;;  %v13406_v54 = vld [vmem:[#allocation59_spill] sm:$0xff]  ;;  %v13407_v41 = vld [vmem:[#allocation40_spill] sm:$0xff] }
 0x851   : > { %v5645_v38 = vadd.f32 %v5644_v34, %v5556_v42  ;;  %v5004_v13 = vmul.f32 %v4876_v63, %v3980_v28  ;;  %v5081_v12 = vpack.c.bf16 %v5009_v44, %v5005_v9  ;;  %v13409_v28 = vld [vmem:[#allocation17_spill] sm:$0xff]  ;;  %v13412_v44 = vpack.c.bf16 %v12156_v8, %v12137_v39  ;;  %v13415_v9 = vld [vmem:[#allocation39_spill] sm:$0xff] }
 0x852   : > { %5807 = vst [vmem:[%s12203_s20 + $0x38] sm:$0xff] %v5775_v18  ;;  %v5379_v10 = vpop.f32.mrf.mxu2  ;;  %v5006_v34 = vmul.f32 %v4878_v35, %v3982_v52  ;;  %v13413_v52 = vpack.c.bf16 %v12162_v37, %v12147_v45 }
 0x853   : > { %v5712_v49 = vmul.f32 %v5645_v38, %v13404_v21  ;;  %v5380_v60 = vadd.f32 %v5379_v10, %v12040_v36  ;;  %v5080_v59 = vpack.c.bf16 %v5008_v57, %v5004_v13 }
 0x854   : > { %v5468_v48 = vpop.f32.mrf.mxu3  ;;  %v5082_v24 = vpack.c.bf16 %v5010_v43, %v5006_v34 }
 0x855   : > { %v5744_v2 = vadd.f32 %v5712_v49, %v13404_v21  ;;  %v5469_v61 = vadd.f32 %v5468_v48, %v5380_v60  ;;  %v13410_v48 = vpack.c.bf16 %v12164_v29, %v12143_v1  ;;  %v13414_v60 = vld [vmem:[#allocation61_spill] sm:$0xff] }
 0x856   : > { %v5560_v20 = vpop.f32.mrf.mxu1 }
 0x857   : > { %v5649_v33 = vpop.f32.mrf.mxu0  ;;  %v5776_v23 = vadd.f32 %v5744_v2, %v13405_v51  ;;  %v5558_v19 = vadd.f32 %v5557_v4, %v5469_v61  ;;  %v13416_v2 = vld [vmem:[#allocation63_spill] sm:$0xff] }
 0x859   : > { %5421 = vmatmul.bf16.gmra.mxu2 %v5079_v3  ;;  %5808 = vst [vmem:[%s12203_s20 + $0x40] sm:$0xff] %v5776_v23  ;;  %v5647_v14 = vadd.f32 %v5646_v47, %v5558_v19  ;;  %v13408_v47 = vld [vmem:[#allocation60_spill] sm:$0xff]  ;;  %v13418_v19 = vpack.c.bf16 %v12248_v6, %v12241_v15 }
 0x85a   : > { %5510 = vmatmul.bf16.gmra.mxu3 %v5080_v59  ;;  %v5382_v62 = vpop.f32.mrf.mxu2 }
 0x85b   : > { %5599 = vmatmul.bf16.gmra.mxu1 %v5081_v12  ;;  %v5713_v55 = vmul.f32 %v5647_v14, %v13406_v54  ;;  %v5383_v16 = vadd.f32 %v5382_v62, %v12040_v36  ;;  %v13419_v14 = vpack.c.bf16 %v12252_v5, %v12250_v25  ;;  %v13420_v62 = vpack.c.bf16 %v12235_v32, %v12233_v58  ;;  %v13425_v58 = vld [vmem:[#allocation18_spill] sm:$0xff] }
 0x85c   : > { %5688 = vmatmul.bf16.gmra.mxu0 %v5082_v24  ;;  %v5471_v53 = vpop.f32.mrf.mxu3  ;;  %v13417_v24 = vld [vmem:[#allocation41_spill] sm:$0xff] }
 0x85d   : > { %v5745_v7 = vadd.f32 %v5713_v55, %v13406_v54  ;;  %v5472_v31 = vadd.f32 %v5471_v53, %v5383_v16  ;;  %v13421_v53 = vld [vmem:[#allocation85_spill] sm:$0xff]  ;;  %v13422_v54 = vld [vmem:[#allocation92_spill] sm:$0xff] }
 0x85e   : > { %v5562_v30 = vpop.f32.mrf.mxu1  ;;  %v13423_v55 = vpack.c.bf16 %v13421_v53, %v13422_v54 }
 0x85f   : > { %v5651_v50 = vpop.f32.mrf.mxu0  ;;  %v5777_v4 = vadd.f32 %v5745_v7, %v13407_v41  ;;  %v5561_v18 = vadd.f32 %v5560_v20, %v5472_v31 }
 0x861   : > { %5809 = vst [vmem:[%s12203_s20 + $0x48] sm:$0xff] %v5777_v4  ;;  %v5650_v42 = vadd.f32 %v5649_v33, %v5561_v18 }
 0x862   : > { %v5384_v26 = vpop.f32.mrf.mxu2 }
 0x863   : > { %v5714_v27 = vmul.f32 %v5650_v42, %v13408_v47  ;;  %v5385_v22 = vadd.f32 %v5384_v26, %v12040_v36 }
 0x864   : > { %v5473_v63 = vpop.f32.mrf.mxu3 }
 0x865   : > { %v5746_v11 = vadd.f32 %v5714_v27, %v13408_v47  ;;  %v5474_v35 = vadd.f32 %v5473_v63, %v5385_v22  ;;  %v13426_v63 = vld [vmem:[#allocation35_spill] sm:$0xff] }
 0x866   : > { %v5565_v38 = vpop.f32.mrf.mxu1 }
 0x867   : > { %v5654_v0 = vpop.f32.mrf.mxu0  ;;  %v5778_v57 = vadd.f32 %v5746_v11, %v13409_v28  ;;  %v5563_v10 = vadd.f32 %v5562_v30, %v5474_v35  ;;  %v13424_v30 = vld [vmem:[#allocation32_spill] sm:$0xff] }
 0x869   : > { %5426 = vmatmul.bf16.gmra.mxu2 %v13410_v48  ;;  %5810 = vst [vmem:[%s12203_s20 + $0x50] sm:$0xff] %v5778_v57  ;;  %v5652_v43 = vadd.f32 %v5651_v50, %v5563_v10 }
 0x86a   : > { %5515 = vmatmul.bf16.gmra.mxu3 %v13411_v40 }
 0x86b   : > { %5604 = vmatmul.bf16.gmra.mxu1 %v13412_v44  ;;  %v5387_v21 = vpop.f32.mrf.mxu2  ;;  %v5715_v1 = vmul.f32 %v5652_v43, %v13414_v60  ;;  %v13428_v44 = vld [vmem:[#allocation64_spill] sm:$0xff] }
 0x86c   : > { %5693 = vmatmul.bf16.gmra.mxu0 %v13413_v52  ;;  %v5476_v49 = vpop.f32.mrf.mxu3  ;;  %v5388_v29 = vadd.f32 %v5387_v21, %v12040_v36 }
 0x86d   : > { %v5747_v56 = vadd.f32 %v5715_v1, %v13414_v60 }
 0x86e   : > { %v5477_v46 = vadd.f32 %v5476_v49, %v5388_v29  ;;  %v5567_v17 = vpop.f32.mrf.mxu1  ;;  %v13429_v29 = vld [vmem:[#allocation19_spill] sm:$0xff] }
 0x86f   : > { %v5656_v13 = vpop.f32.mrf.mxu0  ;;  %v5779_v39 = vadd.f32 %v5747_v56, %v13415_v9 }
 0x870   : > { %v5566_v8 = vadd.f32 %v5565_v38, %v5477_v46 }
 0x871   : > { %5811 = vst [vmem:[%s12203_s20 + $0x58] sm:$0xff] %v5779_v39  ;;  %v13430_v39 = vld [vmem:[#allocation66_spill] sm:$0xff] }
 0x872   : > { %v5655_v45 = vadd.f32 %v5654_v0, %v5566_v8  ;;  %v13427_v0 = vld [vmem:[#allocation42_spill] sm:$0xff] }
 0x873   : > { %v5389_v37 = vpop.f32.mrf.mxu2 }
 0x874   : > { %v5478_v34 = vpop.f32.mrf.mxu3  ;;  %v5716_v61 = vmul.f32 %v5655_v45, %v13416_v2  ;;  %v5390_v20 = vadd.f32 %v5389_v37, %v12040_v36 }
 0x876   : > { %v5748_v33 = vadd.f32 %v5716_v61, %v13416_v2  ;;  %v5479_v3 = vadd.f32 %v5478_v34, %v5390_v20  ;;  %v13431_v20 = vld [vmem:[#allocation23_spill] sm:$0xff] }
 0x877   : > { %v5659_v12 = vpop.f32.mrf.mxu0 }
 0x878   : > { %v5570_v59 = vpop.f32.mrf.mxu1  ;;  %v5780_v51 = vadd.f32 %v5748_v33, %v13417_v24  ;;  %v5568_v23 = vadd.f32 %v5567_v17, %v5479_v3 }
 0x879   : > { %5431 = vmatmul.bf16.gmra.mxu2 %v13418_v19 }
 0x87a   : > { %5520 = vmatmul.bf16.gmra.mxu3 %v13419_v14  ;;  %5812 = vst [vmem:[%s12203_s20 + $0x60] sm:$0xff] %v5780_v51  ;;  %v5657_v16 = vadd.f32 %v5656_v13, %v5568_v23 }
 0x87b   : > { %5609 = vmatmul.bf16.gmra.mxu1 %v13420_v62 }
 0x87c   : > { %5698 = vmatmul.bf16.gmra.mxu0 %v13423_v55  ;;  %v5392_v7 = vpop.f32.mrf.mxu2  ;;  %v5481_v31 = vpop.f32.mrf.mxu3  ;;  %v5717_v15 = vmul.f32 %v5657_v16, %v13424_v30 }
 0x87d   : > { %v5393_v6 = vadd.f32 %v5392_v7, %v12040_v36 }
 0x87e   : > { %v5749_v25 = vadd.f32 %v5717_v15, %v13424_v30 }
 0x87f   : > { %v5482_v5 = vadd.f32 %v5481_v31, %v5393_v6  ;;  %v5661_v41 = vpop.f32.mrf.mxu0 }
 0x880   : > { %v5572_v50 = vpop.f32.mrf.mxu1  ;;  %v5781_v32 = vadd.f32 %v5749_v25, %v13425_v58 }
 0x881   : > { %v5571_v4 = vadd.f32 %v5570_v59, %v5482_v5 }
 0x882   : > { %5813 = vst [vmem:[%s12203_s20 + $0x68] sm:$0xff] %v5781_v32 }
 0x883   : > { %v5660_v18 = vadd.f32 %v5659_v12, %v5571_v4 }
 0x884   : > { %v5394_v42 = vpop.f32.mrf.mxu2  ;;  %v5483_v26 = vpop.f32.mrf.mxu3 }
 0x885   : > { %v5718_v47 = vmul.f32 %v5660_v18, %v13426_v63  ;;  %v5395_v27 = vadd.f32 %v5394_v42, %v12040_v36 }
 0x887   : > { %v5750_v22 = vadd.f32 %v5718_v47, %v13426_v63  ;;  %v5484_v11 = vadd.f32 %v5483_v26, %v5395_v27 }
 0x888   : > { %v5575_v35 = vpop.f32.mrf.mxu1  ;;  %v5664_v38 = vpop.f32.mrf.mxu0 }
 0x889   : > { %v5782_v28 = vadd.f32 %v5750_v22, %v13427_v0  ;;  %v5573_v57 = vadd.f32 %v5572_v50, %v5484_v11 }
 0x88b   : > { %5814 = vst [vmem:[%s12203_s20 + $0x70] sm:$0xff] %v5782_v28  ;;  %v5662_v10 = vadd.f32 %v5661_v41, %v5573_v57 }
 0x88c   : > { %v5397_v48 = vpop.f32.mrf.mxu2 }
 0x88d   : > { %v5486_v40 = vpop.f32.mrf.mxu3  ;;  %v5719_v52 = vmul.f32 %v5662_v10, %v13428_v44  ;;  %v5398_v43 = vadd.f32 %v5397_v48, %v12040_v36 }
 0x88f   : > { %v5751_v21 = vadd.f32 %v5719_v52, %v13428_v44  ;;  %v5487_v49 = vadd.f32 %v5486_v40, %v5398_v43 }
 0x890   : > { %v5577_v60 = vpop.f32.mrf.mxu1  ;;  %v5666_v1 = vpop.f32.mrf.mxu0 }
 0x891   : > { %v5783_v56 = vadd.f32 %v5751_v21, %v13429_v29  ;;  %v5576_v46 = vadd.f32 %v5575_v35, %v5487_v49 }
 0x893   : > { %5815 = vst [vmem:[%s12203_s20 + $0x78] sm:$0xff] %v5783_v56  ;;  %v5665_v17 = vadd.f32 %v5664_v38, %v5576_v46 }
 0x894   : > { %v5399_v13 = vpop.f32.mrf.mxu2 }
 0x895   : > { %v5488_v9 = vpop.f32.mrf.mxu3  ;;  %v5720_v8 = vmul.f32 %v5665_v17, %v13430_v39  ;;  %v5400_v45 = vadd.f32 %v5399_v13, %v12040_v36 }
 0x897   : > { %v5752_v37 = vadd.f32 %v5720_v8, %v13430_v39  ;;  %v5489_v34 = vadd.f32 %v5488_v9, %v5400_v45 }
 0x898   : > { %v5580_v2 = vpop.f32.mrf.mxu1  ;;  %v5669_v61 = vpop.f32.mrf.mxu0 }
 0x899   : > { %v5784_v33 = vadd.f32 %v5752_v37, %v13431_v20  ;;  %v5578_v3 = vadd.f32 %v5577_v60, %v5489_v34 }
 0x89b   : > { %5816 = vst [vmem:[%s12203_s20 + $0x80] sm:$0xff] %v5784_v33  ;;  %v5667_v59 = vadd.f32 %v5666_v1, %v5578_v3 }
 0x89c   : > { %v5402_v12 = vpop.f32.mrf.mxu2 }
 0x89d   : > { %v5491_v24 = vpop.f32.mrf.mxu3 }
 0x89e   : > { %7273 = shalt.err (!%p7270_p10)
}
 0x89f   : > { %s7359_s21 = smov 128   ;;  %s7360_s23 = smov 8   ;;  %v13432_v51 = vld [vmem:[#allocation67_spill] sm:$0xff]  ;;  %v5403_v19 = vadd.f32 %v5402_v12, %v12040_v36  ;;  %v13433_v55 = vld [vmem:[#allocation24_spill] sm:$0xff]  ;;  %v13434_v6 = vld [vmem:[#allocation69_spill] sm:$0xff] }
 0x8a0   : > { %6471 = dma.vmem_to_hbm [thread:$0]  (%p7480_p5), %s5900_s27, 4096, %s5902_s28, %s5870_s22, %s7359_s21, %s7359_s21, %s7360_s23   ;;  %v5721_v23 = vmul.f32 %v5667_v59, %v13432_v51  ;;  %v5582_v53 = vpop.f32.mrf.mxu1  ;;  %v5671_v54 = vpop.f32.mrf.mxu0  ;;  %v13435_v4 = vld [vmem:[#allocation26_spill] sm:$0xff]  ;;  %v13437_v57 = vld [vmem:[#allocation52_spill] sm:$0xff]  ;;  %v13438_v43 = vld [vmem:[#allocation73_spill] sm:$0xff] }
 0x8a1   : > { %v5492_v62 = vadd.f32 %v5491_v24, %v5403_v19  ;;  %v13436_v27 = vld [vmem:[#allocation70_spill] sm:$0xff]  ;;  %v13439_v46 = vld [vmem:[#allocation57_spill] sm:$0xff]  ;;  %v13441_v3 = vld [vmem:[#allocation55_spill] sm:$0xff]  ;;  %s5881_s22 = scalar_lea.hbm %s12629_s8, %s6446_s26  ;;  %s5882_s14 = sshll.u32 %s12203_s20, 4  ;;  %s5883_s14 = int_to_ptr.vmem [resolvable:$true] %s5882_s14 }
 0x8a2   : > { %v5753_v14 = vadd.f32 %v5721_v23, %v13432_v51  ;;  %v13440_v45 = vld [vmem:[#allocation74_spill] sm:$0xff]  ;;  %s5884_s24 = sshll.u32 %s5881_s22, 4  ;;  %s5865_s6 = scalar_lea.sflag [#allocation4], %s7507_s25  ;;  %s5885_s24 = int_to_ptr.hbm [resolvable:$true] %s5884_s24 }
 0x8a3   : > { %v5581_v7 = vadd.f32 %v5580_v2, %v5492_v62  ;;  %v13442_v19 = vld [vmem:[#allocation82_spill] sm:$0xff]  ;;  %s7288_s29 = sshra.s32 %s5885_s24, 4  ;;  %s7294_s15 = scalar_lea.hbm %s12629_s8, 512  ;;  %s7289_s29 = int_to_ptr.hbm [resolvable:$true] %s7288_s29 }
 0x8a4   : > { %v5785_v16 = vadd.f32 %v5753_v14, %v13433_v55  ;;  %v5404_v30 = vpop.f32.mrf.mxu2  ;;  %s7290_s4 = scalar_lea.hbm %s7289_s29, 256  ;;  %p7295_p3 = scmp.lt.s32.totalorder %s7289_s29, %s12629_s8 }
 0x8a5   : > { %v5670_v31 = vadd.f32 %v5669_v61, %v5581_v7  ;;  %v5493_v15 = vpop.f32.mrf.mxu3  ;;  %v5405_v5 = vadd.f32 %v5404_v30, %v12040_v36  ;;  %v13443_v7 = vld [vmem:[#allocation29_spill] sm:$0xff]  ;;  %p7291_p12 = scmp.ne.s32.totalorder %s7289_s29, %s7290_s4  ;;  %p7296_p7 = scmp.lt.s32.totalorder %s7294_s15, %s7290_s4 }
 0x8a6   : > { %5817 = vst [vmem:[%s12203_s20 + $0x88] sm:$0xff] %v5785_v16 }
 0x8a7   : > { %v5722_v25 = vmul.f32 %v5670_v31, %v13434_v6  ;;  %v5494_v41 = vadd.f32 %v5493_v15, %v5405_v5  ;;  %v13444_v5 = vld [vmem:[#allocation83_spill] sm:$0xff]  ;;  %p7292_p13 = pnand %p7291_p12, %p7480_p5  ;;  %p7297_p1 = por %p7296_p7, %p7295_p3 }
 0x8a8   : > { %v5585_v58 = vpop.f32.mrf.mxu1 }
 0x8a9   : > { %v5754_v50 = vadd.f32 %v5722_v25, %v13434_v6  ;;  %v5674_v32 = vpop.f32.mrf.mxu0  ;;  %v5583_v42 = vadd.f32 %v5582_v53, %v5494_v41  ;;  %p7293_p0 = pneg %p7292_p13 }
 0x8ab   : > { %v5786_v18 = vadd.f32 %v5754_v50, %v13435_v4  ;;  %v5672_v26 = vadd.f32 %v5671_v54, %v5583_v42  ;;  %v13445_v42 = vld [vmem:[#allocation28_spill] sm:$0xff]  ;;  %p7298_p4 = pnand %p7297_p1, %p7293_p0 }
 0x8ac   : > { %v5407_v63 = vpop.f32.mrf.mxu2 }
 0x8ad   : > { %5818 = vst [vmem:[%s12203_s20 + $0x90] sm:$0xff] %v5786_v18  ;;  %v5496_v47 = vpop.f32.mrf.mxu3  ;;  %v5723_v22 = vmul.f32 %v5672_v26, %v13436_v27  ;;  %v5408_v11 = vadd.f32 %v5407_v63, %v12040_v36 }
 0x8af   : > { %v5755_v35 = vadd.f32 %v5723_v22, %v13436_v27  ;;  %v5497_v38 = vadd.f32 %v5496_v47, %v5408_v11  ;;  %v13446_v11 = vld [vmem:[#allocation20_spill] sm:$0xff] }
 0x8b0   : > { %v5587_v0 = vpop.f32.mrf.mxu1 }
 0x8b1   : > { %v5676_v28 = vpop.f32.mrf.mxu0  ;;  %v5787_v10 = vadd.f32 %v5755_v35, %v13437_v57  ;;  %v5586_v48 = vadd.f32 %v5585_v58, %v5497_v38 }
 0x8b3   : > { %5819 = vst [vmem:[%s12203_s20 + $0x98] sm:$0xff] %v5787_v10  ;;  %v5675_v40 = vadd.f32 %v5674_v32, %v5586_v48  ;;  %v13447_v48 = vld [vmem:[#allocation31_spill] sm:$0xff] }
 0x8b4   : > { %v5409_v44 = vpop.f32.mrf.mxu2 }
 0x8b5   : > { %v5498_v52 = vpop.f32.mrf.mxu3  ;;  %v5724_v21 = vmul.f32 %v5675_v40, %v13438_v43  ;;  %v5410_v49 = vadd.f32 %v5409_v44, %v12040_v36 }
 0x8b7   : > { %v5756_v60 = vadd.f32 %v5724_v21, %v13438_v43  ;;  %v5499_v1 = vadd.f32 %v5498_v52, %v5410_v49  ;;  %v13448_v49 = vld [vmem:[#allocation91_spill] sm:$0xff] }
 0x8b8   : > { %v5590_v29 = vpop.f32.mrf.mxu1 }
 0x8b9   : > { %v5679_v56 = vpop.f32.mrf.mxu0  ;;  %v5788_v17 = vadd.f32 %v5756_v60, %v13439_v46  ;;  %v5588_v13 = vadd.f32 %v5587_v0, %v5499_v1 }
 0x8bb   : > { %5820 = vst [vmem:[%s12203_s20 + $0xa0] sm:$0xff] %v5788_v17  ;;  %v5677_v9 = vadd.f32 %v5676_v28, %v5588_v13  ;;  %v13449_v17 = vld [vmem:[#allocation62_spill] sm:$0xff] }
 0x8bc   : > { %v5412_v39 = vpop.f32.mrf.mxu2 }
 0x8bd   : > { %v5501_v8 = vpop.f32.mrf.mxu3  ;;  %v5725_v37 = vmul.f32 %v5677_v9, %v13440_v45  ;;  %v5413_v34 = vadd.f32 %v5412_v39, %v12040_v36 }
 0x8bf   : > { %v5757_v2 = vadd.f32 %v5725_v37, %v13440_v45  ;;  %v5502_v61 = vadd.f32 %v5501_v8, %v5413_v34  ;;  %v13450_v34 = vld [vmem:[#allocation112_spill] sm:$0xff] }
 0x8c0   : > { %v5592_v20 = vpop.f32.mrf.mxu1 }
 0x8c1   : > { %v5681_v33 = vpop.f32.mrf.mxu0  ;;  %v5789_v59 = vadd.f32 %v5757_v2, %v13441_v3  ;;  %v5591_v12 = vadd.f32 %v5590_v29, %v5502_v61  ;;  %v13451_v3 = vld [vmem:[#allocation34_spill] sm:$0xff] }
 0x8c3   : > { %5821 = vst [vmem:[%s12203_s20 + $0xa8] sm:$0xff] %v5789_v59  ;;  %v5680_v24 = vadd.f32 %v5679_v56, %v5591_v12 }
 0x8c4   : > { %v5414_v51 = vpop.f32.mrf.mxu2 }
 0x8c5   : > { %v5503_v23 = vpop.f32.mrf.mxu3  ;;  %v5726_v14 = vmul.f32 %v5680_v24, %v13442_v19  ;;  %v5415_v62 = vadd.f32 %v5414_v51, %v12040_v36 }
 0x8c7   : > { %v5758_v53 = vadd.f32 %v5726_v14, %v13442_v19  ;;  %v5504_v54 = vadd.f32 %v5503_v23, %v5415_v62  ;;  %v13452_v62 = vld [vmem:[#allocation113_spill] sm:$0xff] }
 0x8c8   : > { %v5595_v55 = vpop.f32.mrf.mxu1 }
 0x8c9   : > { %v5684_v16 = vpop.f32.mrf.mxu0  ;;  %v5790_v31 = vadd.f32 %v5758_v53, %v13443_v7  ;;  %v5593_v30 = vadd.f32 %v5592_v20, %v5504_v54  ;;  %v13453_v7 = vld [vmem:[#allocation33_spill] sm:$0xff] }
 0x8cb   : > { %5822 = vst [vmem:[%s12203_s20 + $0xb0] sm:$0xff] %v5790_v31  ;;  %v5682_v15 = vadd.f32 %v5681_v33, %v5593_v30 }
 0x8cc   : > { %v5417_v6 = vpop.f32.mrf.mxu2 }
 0x8cd   : > { %v5506_v25 = vpop.f32.mrf.mxu3  ;;  %v5727_v50 = vmul.f32 %v5682_v15, %v13444_v5  ;;  %v5418_v41 = vadd.f32 %v5417_v6, %v12040_v36 }
 0x8cf   : > { %v5759_v58 = vadd.f32 %v5727_v50, %v13444_v5  ;;  %v5507_v32 = vadd.f32 %v5506_v25, %v5418_v41  ;;  %v13454_v50 = vld [vmem:[#allocation72_spill] sm:$0xff] }
 0x8d0   : > { %v5597_v4 = vpop.f32.mrf.mxu1 }
 0x8d1   : > { %v5686_v18 = vpop.f32.mrf.mxu0  ;;  %v5791_v26 = vadd.f32 %v5759_v58, %v13445_v42  ;;  %v5596_v63 = vadd.f32 %v5595_v55, %v5507_v32  ;;  %v13455_v42 = vld [vmem:[#allocation65_spill] sm:$0xff] }
 0x8d3   : > { %5823 = vst [vmem:[%s12203_s20 + $0xb8] sm:$0xff] %v5791_v26  ;;  %v5685_v47 = vadd.f32 %v5684_v16, %v5596_v63 }
 0x8d4   : > { %v5419_v27 = vpop.f32.mrf.mxu2 }
 0x8d5   : > { %v5508_v22 = vpop.f32.mrf.mxu3  ;;  %v5728_v35 = vmul.f32 %v5685_v47, %v13446_v11  ;;  %v5420_v38 = vadd.f32 %v5419_v27, %v12040_v36 }
 0x8d7   : > { %v5760_v0 = vadd.f32 %v5728_v35, %v13446_v11  ;;  %v5509_v28 = vadd.f32 %v5508_v22, %v5420_v38  ;;  %v13456_v11 = vld [vmem:[#allocation79_spill] sm:$0xff] }
 0x8d8   : > { %v5600_v57 = vpop.f32.mrf.mxu1 }
 0x8d9   : > { %v5689_v10 = vpop.f32.mrf.mxu0  ;;  %v5792_v40 = vadd.f32 %v5760_v0, %v13447_v48  ;;  %v5598_v44 = vadd.f32 %v5597_v4, %v5509_v28  ;;  %v13457_v48 = vld [vmem:[#allocation36_spill] sm:$0xff] }
 0x8db   : > { %5824 = vst [vmem:[%s12203_s20 + $0xc0] sm:$0xff] %v5792_v40  ;;  %v5687_v52 = vadd.f32 %v5686_v18, %v5598_v44 }
 0x8dc   : > { %v5422_v43 = vpop.f32.mrf.mxu2 }
 0x8dd   : > { %v5511_v21 = vpop.f32.mrf.mxu3  ;;  %v5729_v60 = vmul.f32 %v5687_v52, %v13448_v49  ;;  %v5423_v1 = vadd.f32 %v5422_v43, %v12040_v36 }
 0x8df   : > { %v5761_v29 = vadd.f32 %v5729_v60, %v13448_v49  ;;  %v5512_v56 = vadd.f32 %v5511_v21, %v5423_v1  ;;  %v13458_v21 = vld [vmem:[#allocation121_spill] sm:$0xff] }
 0x8e0   : > { %v5602_v46 = vpop.f32.mrf.mxu1 }
 0x8e1   : > { %v5793_v13 = vadd.f32 %v5761_v29, %v13449_v17  ;;  %v5601_v9 = vadd.f32 %v5600_v57, %v5512_v56  ;;  %v5691_v39 = vpop.f32.mrf.mxu0  ;;  %v13459_v17 = vld [vmem:[#allocation37_spill] sm:$0xff] }
 0x8e3   : > { %5825 = vst [vmem:[%s12203_s20 + $0xc8] sm:$0xff] %v5793_v13  ;;  %v5690_v8 = vadd.f32 %v5689_v10, %v5601_v9 }
 0x8e4   : > { %v5424_v45 = vpop.f32.mrf.mxu2 }
 0x8e5   : > { %v5513_v37 = vpop.f32.mrf.mxu3  ;;  %v5730_v2 = vmul.f32 %v5690_v8, %v13450_v34  ;;  %v5425_v61 = vadd.f32 %v5424_v45, %v12040_v36 }
 0x8e7   : > { %v5762_v20 = vadd.f32 %v5730_v2, %v13450_v34  ;;  %v5514_v33 = vadd.f32 %v5513_v37, %v5425_v61  ;;  %v13461_v34 = vld [vmem:[#allocation38_spill] sm:$0xff] }
 0x8e8   : > { %v5605_v24 = vpop.f32.mrf.mxu1 }
 0x8e9   : > { %v5794_v59 = vadd.f32 %v5762_v20, %v13451_v3  ;;  %v5603_v12 = vadd.f32 %v5602_v46, %v5514_v33  ;;  %v5694_v23 = vpop.f32.mrf.mxu0 }
 0x8eb   : > { %5826 = vst [vmem:[%s12203_s20 + $0xd0] sm:$0xff] %v5794_v59  ;;  %v5692_v51 = vadd.f32 %v5691_v39, %v5603_v12 }
 0x8ec   : > { %v5427_v19 = vpop.f32.mrf.mxu2 }
 0x8ed   : > { %v5516_v14 = vpop.f32.mrf.mxu3  ;;  %v5731_v53 = vmul.f32 %v5692_v51, %v13452_v62  ;;  %v5428_v54 = vadd.f32 %v5427_v19, %v12040_v36 }
 0x8ef   : > { %v5763_v55 = vadd.f32 %v5731_v53, %v13452_v62  ;;  %v5517_v16 = vadd.f32 %v5516_v14, %v5428_v54 }
 0x8f0   : > { %v5607_v6 = vpop.f32.mrf.mxu1 }
 0x8f1   : > { %v5795_v31 = vadd.f32 %v5763_v55, %v13453_v7  ;;  %v5606_v30 = vadd.f32 %v5605_v24, %v5517_v16  ;;  %v5696_v32 = vpop.f32.mrf.mxu0 }
 0x8f3   : > { %5827 = vst [vmem:[%s12203_s20 + $0xd8] sm:$0xff] %v5795_v31  ;;  %v5695_v15 = vadd.f32 %v5694_v23, %v5606_v30 }
 0x8f4   : > { %v5429_v25 = vpop.f32.mrf.mxu2 }
 0x8f5   : > { %v5518_v5 = vpop.f32.mrf.mxu3  ;;  %v5732_v41 = vmul.f32 %v5695_v15, %v13454_v50  ;;  %v5430_v58 = vadd.f32 %v5429_v25, %v12040_v36 }
 0x8f7   : > { %v5764_v4 = vadd.f32 %v5732_v41, %v13454_v50  ;;  %v5519_v18 = vadd.f32 %v5518_v5, %v5430_v58 }
 0x8f8   : > { %v5610_v0 = vpop.f32.mrf.mxu1 }
 0x8f9   : > { %v5796_v26 = vadd.f32 %v5764_v4, %v13455_v42  ;;  %v5608_v63 = vadd.f32 %v5607_v6, %v5519_v18  ;;  %v5699_v10 = vpop.f32.mrf.mxu0 }
 0x8fb   : > { %5828 = vst [vmem:[%s12203_s20 + $0xe0] sm:$0xff] %v5796_v26  ;;  %v5697_v47 = vadd.f32 %v5696_v32, %v5608_v63 }
 0x8fc   : > { %v5432_v27 = vpop.f32.mrf.mxu2 }
 0x8fd   : > { %v5521_v22 = vpop.f32.mrf.mxu3  ;;  %v5733_v35 = vmul.f32 %v5697_v47, %v13456_v11  ;;  %v5433_v38 = vadd.f32 %v5432_v27, %v12040_v36 }
 0x8ff   : > { %v5765_v28 = vadd.f32 %v5733_v35, %v13456_v11  ;;  %v5522_v57 = vadd.f32 %v5521_v22, %v5433_v38 }
 0x900   : > { %v5612_v46 = vpop.f32.mrf.mxu1 }
 0x901   : > { %v5797_v40 = vadd.f32 %v5765_v28, %v13457_v48  ;;  %v5611_v44 = vadd.f32 %v5610_v0, %v5522_v57  ;;  %v5701_v39 = vpop.f32.mrf.mxu0 }
 0x903   : > { %5829 = vst [vmem:[%s12203_s20 + $0xe8] sm:$0xff] %v5797_v40  ;;  %v5700_v52 = vadd.f32 %v5699_v10, %v5611_v44 }
 0x904   : > { %v5434_v43 = vpop.f32.mrf.mxu2 }
 0x905   : > { %v5734_v49 = vmul.f32 %v5700_v52, %v13458_v21  ;;  %v5435_v60 = vadd.f32 %v5434_v43, %v12040_v36  ;;  %v5523_v1 = vpop.f32.mrf.mxu3  ;;  %v13460_v36 = vld [vmem:[#allocation81_spill] sm:$0xff] }
 0x907   : > { %v5766_v29 = vadd.f32 %v5734_v49, %v13458_v21  ;;  %v5524_v56 = vadd.f32 %v5523_v1, %v5435_v60 }
 0x909   : > { %v5798_v13 = vadd.f32 %v5766_v29, %v13459_v17  ;;  %v5613_v9 = vadd.f32 %v5612_v46, %v5524_v56 }
 0x90b   : > { %5830 = vst [vmem:[%s12203_s20 + $0xf0] sm:$0xff] %v5798_v13  ;;  %v5702_v8 = vadd.f32 %v5701_v39, %v5613_v9 }
 0x90d   : > { %v5735_v45 = vmul.f32 %v5702_v8, %v13460_v36 }
 0x90f   : > { %v5767_v37 = vadd.f32 %v5735_v45, %v13460_v36 }
 0x911   : > { %v5799_v2 = vadd.f32 %v5767_v37, %v13461_v34 }
 0x913   : > { %5831 = vst [vmem:[%s12203_s20 + $0xf8] sm:$0xff] %v5799_v2 }
 0x914   : > { %7301 = shalt.err (!%p7298_p4)
}
 0x915   : > { %6470 = dma.vmem_to_hbm [thread:$0]  (%p7480_p5), %s5883_s14, 4096, %s5885_s24, %s5865_s6, %s7359_s21, %s7359_s21, %s7360_s23  }
 0x916 PF: > { %s5916_s25 = sand.u32 1, %s7336_s30   ;;  %p13462_p8 = scmp.ge.s32.totalorder %s7348_s12, 2 }
 0x917   : > { %s5917_s20 = scalar_lea.sflag [#allocation4], %s5916_s25 }
 0x918   : > { %p6486_p11 = pnand %p13462_p8, %p7446_p6 }
 0x91a   : > { %p6487_p9 = pneg %p6486_p11 }
 0x91c   : > { %7327 = dma.done.wait (%p6487_p9), %s5917_s20, 4096  }
 0x91d   : > { %7329 = vsyncadd (%p6487_p9), %s5917_s20, 4294963200  ;;  %s5927_s28 = scalar_lea.sflag [#allocation10], %s5916_s25 }
 0x91e   : > { %7331 = dma.done.wait (%p6487_p9), %s5927_s28, 4096  }
 0x91f   : > { %7333 = vsyncadd (%p6487_p9), %s5927_s28, 4294963200  ;;  %s13463_s19 = sld [smem:[#allocation15_spill]]  ;;  %p27_p5 = scmp.ge.s32.totalorder %s7467_s18, 4  }
 0x920   : > { %s13464_s30 = smov %s7340_s10  ;;  %s13465_s10 = smov %s7344_s11 }
 0x921   : > { %s13467_s12 = smov %s7467_s18  ;;  %29 = sbr.rel (!%p27_p5) target bundleno = 11 (0xb), region = 122 }
 0x925   : > { %s13466_s11 = smov %s13463_s19 }
 0x926   :  { %5933 = vsyncpa [#allocation3], 1 }
 0x927   :  { %5935 = vsyncpa [#allocation3 + $0x1], 1 }
 0x928   :  { %5936 = vsyncpa [#allocation6], 1 }
 0x929   :  { %5937 = vsyncpa [#allocation4], 1 }
 0x92a   :  { %5939 = vsyncpa [#allocation4 + $0x1], 1 }
 0x92b   :  { %5940 = vsyncpa [#allocation10], 1 }
 0x92c   :  { %5942 = vsyncpa [#allocation10 + $0x1], 1 }

</bundles_post_ra>
